<compile_context>
chip_gen: v7x
topology: tpu7x:2x2x1
jax: 0.10.0
libtpu: 0.0.40
codegen_flags: <defaults>
</compile_context>

<pallas_src>
import functools

import jax
import jax.numpy as jnp
from jax import lax
from jax.experimental import pallas as pl
from jax.experimental.pallas import tpu as pltpu


def _round_up(x, m):
    return (x + m - 1) // m * m


_VMEM_LIMIT = 32 * 1024 * 1024   # explicit scoped-VMEM cap, safe on v5e/v6e/v7x


# --------------------------------------------------------------------------
# Pallas kernel: tiled matmul + bias + optional ReLU (stem conv im2col, FC head)
# --------------------------------------------------------------------------
def _matmul_bias_act_kernel(x_ref, w_ref, b_ref, o_ref, *, relu):
    acc = jnp.dot(x_ref[...], w_ref[...], preferred_element_type=jnp.float32)
    acc = acc + b_ref[...]                      # (1, N) broadcasts over rows
    if relu:
        acc = jnp.maximum(acc, 0.0)
    o_ref[...] = acc.astype(o_ref.dtype)


def matmul_bias_act(x, w, b, relu, block_m=256):
    """y = act(x @ w + b); x:(M,K) w:(K,N) b:(N,).

    M is tiled (parallel grid axis) so row blocks are pipelined/double-buffered
    and can shard across TensorCores. MXU operands are bf16, f32 accumulation.
    """
    M, K = x.shape
    K2, N = w.shape
    assert K == K2
    bm = min(block_m, M)                        # full-M if small, else 256-row tiles
    grid_m = pl.cdiv(M, bm)
    cost = pl.CostEstimate(
        flops=2 * M * K * N,
        transcendentals=0,
        bytes_accessed=M * K * 2 + K * N * 2 + M * N * 4 + N * 4)
    return pl.pallas_call(
        functools.partial(_matmul_bias_act_kernel, relu=relu),
        out_shape=jax.ShapeDtypeStruct((M, N), jnp.float32),
        grid=(grid_m,),
        in_specs=[pl.BlockSpec((bm, K), lambda i: (i, 0)),
                  pl.BlockSpec((K, N), lambda i: (0, 0)),
                  pl.BlockSpec((1, N), lambda i: (0, 0))],
        out_specs=pl.BlockSpec((bm, N), lambda i: (i, 0)),
        compiler_params=pltpu.CompilerParams(
            dimension_semantics=("parallel",),
            vmem_limit_bytes=_VMEM_LIMIT),
        cost_estimate=cost,
    )(x.astype(jnp.bfloat16), w.astype(jnp.bfloat16),
      b.reshape(1, N).astype(jnp.float32))


# --------------------------------------------------------------------------
# Pallas kernel: fused DepthWiseSeparable block
#   3x3 depthwise conv (pad=1) + folded BN + ReLU  ->  1x1 pointwise conv
#   + folded BN + ReLU, all in one kernel (dw result never touches HBM).
# --------------------------------------------------------------------------
def _dws_block_kernel(ph_ref, dww_ref, dwb_ref, pww_ref, pwb_ref, o_ref,
                      *, stride, out_h, out_w):
    cin = dww_ref.shape[1]
    # Load the padded image (stride 1) or its 4 spatial phases (stride 2) once.
    phases = [ph_ref[p, 0] for p in range(ph_ref.shape[0])]

    # 3x3 depthwise MAC: taps are formed here with static slices (f32 path).
    acc = jnp.zeros((out_h, out_w, cin), jnp.float32)
    for dy in range(3):
        for dx in range(3):
            if stride == 1:
                p, oy, ox = 0, dy, dx
            else:  # stride == 2: tap (dy,dx) lives in phase (dy%2, dx%2)
                p, oy, ox = (dy % 2) * 2 + (dx % 2), dy // 2, dx // 2
            tap = phases[p][oy:oy + out_h, ox:ox + out_w, :]
            acc = acc + tap * dww_ref[dy * 3 + dx:dy * 3 + dx + 1, :]
    dw_f32 = jnp.maximum(acc + dwb_ref[...], 0.0)        # (out_h, out_w, cin)

    # Fused 1x1 pointwise conv (+ folded BN + ReLU) straight from VMEM.
    pw_w = pww_ref[...]                                   # bf16 (cin, cout)
    pw_b = pwb_ref[...]                                   # f32  (1, cout)
    if out_w % 8 == 0:
        # Safe (no-op relayout) flatten of spatial into MXU rows.
        lhs = dw_f32.reshape(out_h * out_w, cin).astype(jnp.bfloat16)
        y = jnp.dot(lhs, pw_w, preferred_element_type=jnp.float32) + pw_b
        y = jnp.maximum(y, 0.0)
        o_ref[...] = y.reshape(1, out_h, out_w, -1).astype(o_ref.dtype)
    else:
        # Small late-stage spatial (out_w in {1, 2, 4}): per-row dots.
        for h in range(out_h):
            lhs = dw_f32[h].astype(jnp.bfloat16)          # (out_w, cin)
            y = jnp.dot(lhs, pw_w, preferred_element_type=jnp.float32) + pw_b
            o_ref[0, h] = jnp.maximum(y, 0.0).astype(o_ref.dtype)


def dws_block(x_nhwc, dw_w, dw_b, stride, pw_w, pw_b):
    """Fused depthwise-separable block on NHWC activations."""
    N, H, W, Cin = x_nhwc.shape
    Cout = pw_w.shape[1]
    out_h = (H + 2 - 3) // stride + 1
    out_w = (W + 2 - 3) // stride + 1
    xp = jnp.pad(x_nhwc, ((0, 0), (1, 1), (1, 1), (0, 0)))
    if stride == 1:
        phases = xp[None]                                  # (1, N, H+2, W+2, C)
    else:
        Hp, Wp = H + 2, W + 2
        Hq, Wq = _round_up(Hp, 2), _round_up(Wp, 2)
        xp = jnp.pad(xp, ((0, 0), (0, Hq - Hp), (0, Wq - Wp), (0, 0)))
        # 4 spatial phases: same total bytes as xp (no 9x taps blowup).
        phases = jnp.stack([xp[:, i::2, j::2, :]
                            for i in range(2) for j in range(2)], axis=0)
    P, _, Hq2, Wq2, _ = phases.shape

    kernel = functools.partial(_dws_block_kernel, stride=stride,
                               out_h=out_h, out_w=out_w)
    cost = pl.CostEstimate(
        flops=N * out_h * out_w * (18 * Cin + 2 * Cin * Cout),
        transcendentals=0,
        bytes_accessed=(phases.size * 4 + dw_w.size * 4 + pw_w.size * 2
                        + N * out_h * out_w * Cout * 4))
    # TODO(synk): for large spatial extents (e.g. alpha=1 @ 224x224) the per-image
    # block should additionally be row-strip tiled (manual halo DMA) to bound VMEM
    # on v7x; at these shapes a whole padded image is only a few KiB of VMEM.
    return pl.pallas_call(
        kernel,
        out_shape=jax.ShapeDtypeStruct((N, out_h, out_w, Cout), jnp.float32),
        grid=(N,),
        in_specs=[pl.BlockSpec((P, 1, Hq2, Wq2, Cin), lambda n: (0, n, 0, 0, 0)),
                  pl.BlockSpec((9, Cin), lambda n: (0, 0)),
                  pl.BlockSpec((1, Cin), lambda n: (0, 0)),
                  pl.BlockSpec((Cin, Cout), lambda n: (0, 0)),
                  pl.BlockSpec((1, Cout), lambda n: (0, 0))],
        out_specs=pl.BlockSpec((1, out_h, out_w, Cout), lambda n: (n, 0, 0, 0)),
        compiler_params=pltpu.CompilerParams(
            dimension_semantics=("parallel",),
            vmem_limit_bytes=_VMEM_LIMIT),
        cost_estimate=cost,
    )(phases, dw_w, dw_b.reshape(1, Cin),
      pw_w.astype(jnp.bfloat16), pw_b.reshape(1, Cout))


# --------------------------------------------------------------------------
# Stem conv and classifier head (both use the tiled Pallas matmul)
# --------------------------------------------------------------------------
def conv3x3_bn_relu(x_nhwc, w_hwio, b, stride):
    """Standard 3x3 conv (pad=1) + folded BN + ReLU via im2col + Pallas matmul."""
    N, H, W, Cin = x_nhwc.shape
    Cout = w_hwio.shape[-1]
    xp = jnp.pad(x_nhwc, ((0, 0), (1, 1), (1, 1), (0, 0)))
    out_h = (H + 2 - 3) // stride + 1
    out_w = (W + 2 - 3) // stride + 1
    cols = []
    for dy in range(3):
        for dx in range(3):
            cols.append(lax.slice(
                xp, (0, dy, dx, 0),
                (N, dy + (out_h - 1) * stride + 1, dx + (out_w - 1) * stride + 1, Cin),
                (1, stride, stride, 1)))
    patches = jnp.concatenate(cols, axis=-1)               # (N, Ho, Wo, 9*Cin)
    K = 9 * Cin
    Kp = _round_up(K, 8)                                    # aligned contraction dim
    x2d = patches.reshape(N * out_h * out_w, K)
    w2d = w_hwio.reshape(K, Cout)                           # (dy,dx,cin) matches concat
    if Kp > K:
        x2d = jnp.pad(x2d, ((0, 0), (0, Kp - K)))
        w2d = jnp.pad(w2d, ((0, Kp - K), (0, 0)))
    y2d = matmul_bias_act(x2d, w2d, b, relu=True)
    return y2d.reshape(N, out_h, out_w, Cout)


def linear(x, w, b):
    """Classifier head; output channels padded to 128 for lane-dense stores."""
    K, N = w.shape
    Np = _round_up(N, 128)
    if Np > N:
        w = jnp.pad(w, ((0, 0), (0, Np - N)))
        b = jnp.pad(b, (0, Np - N))
    y = matmul_bias_act(x, w, b, relu=False)
    return y[:, :N]


# --------------------------------------------------------------------------
# Parameter construction (deterministic, BN folded in inference mode)
# --------------------------------------------------------------------------
def make_params(image_channels=3, num_classes=10, alpha=0.25, seed=0):
    key = jax.random.PRNGKey(seed)

    def nxt():
        nonlocal key
        key, sub = jax.random.split(key)
        return sub

    def bn_fold(c, eps=1e-5):
        gamma = 1.0 + 0.1 * jax.random.normal(nxt(), (c,), jnp.float32)
        beta = 0.1 * jax.random.normal(nxt(), (c,), jnp.float32)
        mean = 0.1 * jax.random.normal(nxt(), (c,), jnp.float32)
        var = 1.0 + 0.1 * jnp.abs(jax.random.normal(nxt(), (c,), jnp.float32))
        s = gamma / jnp.sqrt(var + eps)
        return s, beta - mean * s

    ch = lambda c: int(alpha * c)

    params = {}
    c0 = ch(32)
    stem_w = 0.1 * jax.random.normal(nxt(), (3, 3, image_channels, c0), jnp.float32)
    s, b = bn_fold(c0)
    params["stem_w"] = stem_w * s
    params["stem_b"] = b

    # 13 depthwise-separable layers of MobileNetV1: (dw_stride, out_channels)
    pairs = [(1, ch(64)), (2, ch(128)),
             (1, ch(128)), (2, ch(256)),
             (1, ch(256)), (2, ch(512))] \
        + [(1, ch(512))] * 5 \
        + [(2, ch(1024)), (2, ch(1024))]

    blocks = []
    cin = c0
    for stride, cout in pairs:
        dw_w = 0.1 * jax.random.normal(nxt(), (9, cin), jnp.float32)   # (3*3, C)
        s, dw_b = bn_fold(cin)
        dw_w = dw_w * s
        pw_w = 0.1 * jax.random.normal(nxt(), (cin, cout), jnp.float32)
        s2, pw_b = bn_fold(cout)
        pw_w = pw_w * s2
        blocks.append((dw_w, dw_b, stride, pw_w, pw_b))
        cin = cout
    params["blocks"] = blocks

    fc_in = ch(1024)
    params["fc_w"] = 0.1 * jax.random.normal(nxt(), (fc_in, num_classes), jnp.float32)
    params["fc_b"] = 0.1 * jax.random.normal(nxt(), (num_classes,), jnp.float32)
    return params


# --------------------------------------------------------------------------
# Forward pass (mirrors MobileNetV1.forward)
# --------------------------------------------------------------------------
def mobilenet_v1_forward(params, x_nchw):
    x = jnp.transpose(x_nchw, (0, 2, 3, 1))                # NCHW -> NHWC
    # stem ConvBlock: conv3x3 s2 + BN + ReLU
    x = conv3x3_bn_relu(x, params["stem_w"], params["stem_b"], stride=2)
    # 13 fused DepthWiseSeparable blocks
    for dw_w, dw_b, stride, pw_w, pw_b in params["blocks"]:
        x = dws_block(x, dw_w, dw_b, stride, pw_w, pw_b)
    # AdaptiveAvgPool2d(1) + flatten (pure glue; spatial is 1x1 for 32x32 input)
    x = jnp.mean(x, axis=(1, 2))                           # (N, C)
    # Classifier: Dropout (inference-mode identity) + Linear
    # TODO(synk): dropout omitted — stochastic op, treated as eval-mode identity.
    return linear(x, params["fc_w"], params["fc_b"])


if __name__ == "__main__":
    key = jax.random.PRNGKey(0)
    # small shapes: batch=2, image_channels=3, 32x32 input, alpha=0.25, 10 classes
    x = jax.random.normal(key, (2, 3, 32, 32), jnp.float32)
    params = make_params(image_channels=3, num_classes=10, alpha=0.25, seed=0)
    fwd = jax.jit(functools.partial(mobilenet_v1_forward, params))
    logits = fwd(x)
    jax.block_until_ready(logits)
    assert logits.shape == (2, 10)
    print("KERNEL_OK")
</pallas_src>

<mosaic_0001>
module attributes {stable_mosaic.version = 11 : i64} {
  func.func @_matmul_bias_act_kernel(%arg0: i32, %arg1: memref<256x32xbf16, #tpu.memory_space<vmem>>, %arg2: memref<32x8xbf16, #tpu.memory_space<vmem>>, %arg3: memref<1x8xf32, #tpu.memory_space<vmem>>, %arg4: memref<256x8xf32, #tpu.memory_space<vmem>>) attributes {dimension_semantics = [#tpu.dimension_semantics<parallel>], iteration_bounds = array<i64: 2>, scalar_prefetch = 0 : i64, scratch_operands = 0 : i64, tpu.core_type = #tpu.core_type<tc>, window_params = [{transform_indices = @transform_0, window_bounds = array<i64: 256, 32>}, {pipeline_mode = #tpu.pipeline_mode<synchronous>, transform_indices = @transform_1, window_bounds = array<i64: 32, 8>}, {pipeline_mode = #tpu.pipeline_mode<synchronous>, transform_indices = @transform_2, window_bounds = array<i64: 1, 8>}, {transform_indices = @transform_3, window_bounds = array<i64: 256, 8>}]} {
    %c0 = arith.constant 0 : index
    %c0_0 = arith.constant 0 : index
    %0 = vector.load %arg1[%c0, %c0_0] : memref<256x32xbf16, #tpu.memory_space<vmem>>, vector<256x32xbf16>
    %c0_1 = arith.constant 0 : index
    %c0_2 = arith.constant 0 : index
    %1 = vector.load %arg2[%c0_1, %c0_2] : memref<32x8xbf16, #tpu.memory_space<vmem>>, vector<32x8xbf16>
    %cst = arith.constant dense<0.000000e+00> : vector<256x8xf32>
    %2 = tpu.matmul %0, %1, %cst {dimension_numbers = #tpu.dot_dimension_numbers<[1], [0], [0], [1], [0, 0, 1, 1], [], []>} : vector<256x32xbf16>, vector<32x8xbf16>, vector<256x8xf32> -> vector<256x8xf32>
    %c0_3 = arith.constant 0 : index
    %c0_4 = arith.constant 0 : index
    %3 = vector.load %arg3[%c0_3, %c0_4] : memref<1x8xf32, #tpu.memory_space<vmem>>, vector<1x8xf32>
    %4 = vector.broadcast %3 : vector<1x8xf32> to vector<256x8xf32>
    %5 = arith.addf %2, %4 : vector<256x8xf32>
    %cst_5 = arith.constant 0.000000e+00 : f32
    %6 = vector.broadcast %cst_5 : f32 to vector<256x8xf32>
    %7 = arith.maximumf %5, %6 : vector<256x8xf32>
    %c0_6 = arith.constant 0 : index
    %c0_7 = arith.constant 0 : index
    %8 = vector.load %arg4[%c0_6, %c0_7] : memref<256x8xf32, #tpu.memory_space<vmem>>, vector<256x8xf32>
    tpu.vector_store %arg4[%c0_6, %c0_7], %7 {strides = array<i32>} : memref<256x8xf32, #tpu.memory_space<vmem>>, vector<256x8xf32>,
    return
  }
  func.func @transform_0(%arg0: i32) -> (i32, i32) {
    %c0_i32 = arith.constant 0 : i32
    %c0_i32_0 = arith.constant 0 : i32
    return %arg0, %c0_i32 : i32, i32
  }
  func.func @transform_1(%arg0: i32) -> (i32, i32) {
    %c0_i32 = arith.constant 0 : i32
    %c0_i32_0 = arith.constant 0 : i32
    %c0_i32_1 = arith.constant 0 : i32
    return %c0_i32, %c0_i32_0 : i32, i32
  }
  func.func @transform_2(%arg0: i32) -> (i32, i32) {
    %c0_i32 = arith.constant 0 : i32
    %c0_i32_0 = arith.constant 0 : i32
    %c0_i32_1 = arith.constant 0 : i32
    return %c0_i32, %c0_i32_0 : i32, i32
  }
  func.func @transform_3(%arg0: i32) -> (i32, i32) {
    %c0_i32 = arith.constant 0 : i32
    %c0_i32_0 = arith.constant 0 : i32
    return %arg0, %c0_i32 : i32, i32
  }
}

module attributes {stable_mosaic.version = 11 : i64} {
  func.func @_dws_block_kernel(%arg0: i32, %arg1: memref<1x1x18x18x8xf32, #tpu.memory_space<vmem>>, %arg2: memref<9x8xf32, #tpu.memory_space<vmem>>, %arg3: memref<1x8xf32, #tpu.memory_space<vmem>>, %arg4: memref<8x16xbf16, #tpu.memory_space<vmem>>, %arg5: memref<1x16xf32, #tpu.memory_space<vmem>>, %arg6: memref<1x16x16x16xf32, #tpu.memory_space<vmem>>) attributes {dimension_semantics = [#tpu.dimension_semantics<parallel>], iteration_bounds = array<i64: 2>, scalar_prefetch = 0 : i64, scratch_operands = 0 : i64, tpu.core_type = #tpu.core_type<tc>, window_params = [{transform_indices = @transform_0, window_bounds = array<i64: 1, 1, 18, 18, 8>}, {pipeline_mode = #tpu.pipeline_mode<synchronous>, transform_indices = @transform_1, window_bounds = array<i64: 9, 8>}, {pipeline_mode = #tpu.pipeline_mode<synchronous>, transform_indices = @transform_2, window_bounds = array<i64: 1, 8>}, {pipeline_mode = #tpu.pipeline_mode<synchronous>, transform_indices = @transform_3, window_bounds = array<i64: 8, 16>}, {pipeline_mode = #tpu.pipeline_mode<synchronous>, transform_indices = @transform_4, window_bounds = array<i64: 1, 16>}, {transform_indices = @transform_5, window_bounds = array<i64: 1, 16, 16, 16>}]} {
    %c0 = arith.constant 0 : index
    %c0_0 = arith.constant 0 : index
    %c0_1 = arith.constant 0 : index
    %c0_2 = arith.constant 0 : index
    %c0_3 = arith.constant 0 : index
    %0 = vector.load %arg1[%c0, %c0_0, %c0_1, %c0_2, %c0_3] : memref<1x1x18x18x8xf32, #tpu.memory_space<vmem>>, vector<1x1x18x18x8xf32>
    %1 = vector.shape_cast %0 : vector<1x1x18x18x8xf32> to vector<18x18x8xf32>
    %cst = arith.constant 0.000000e+00 : f32
    %2 = vector.broadcast %cst : f32 to vector<16x16x8xf32>
    %3 = vector.extract_strided_slice %1 {offsets = [0, 0, 0], sizes = [16, 16, 8], strides = [1, 1, 1]} : vector<18x18x8xf32> to vector<16x16x8xf32>
    %c0_4 = arith.constant 0 : index
    %c0_5 = arith.constant 0 : index
    %4 = vector.load %arg2[%c0_4, %c0_5] : memref<9x8xf32, #tpu.memory_space<vmem>>, vector<1x8xf32>
    %5 = vector.shape_cast %4 : vector<1x8xf32> to vector<1x1x8xf32>
    %6 = vector.broadcast %5 : vector<1x1x8xf32> to vector<16x16x8xf32>
    %7 = arith.mulf %3, %6 : vector<16x16x8xf32>
    %8 = arith.addf %2, %7 : vector<16x16x8xf32>
    %9 = vector.extract_strided_slice %1 {offsets = [0, 1, 0], sizes = [16, 16, 8], strides = [1, 1, 1]} : vector<18x18x8xf32> to vector<16x16x8xf32>
    %c1 = arith.constant 1 : index
    %c0_6 = arith.constant 0 : index
    %10 = vector.load %arg2[%c1, %c0_6] : memref<9x8xf32, #tpu.memory_space<vmem>>, vector<1x8xf32>
    %11 = vector.shape_cast %10 : vector<1x8xf32> to vector<1x1x8xf32>
    %12 = vector.broadcast %11 : vector<1x1x8xf32> to vector<16x16x8xf32>
    %13 = arith.mulf %9, %12 : vector<16x16x8xf32>
    %14 = arith.addf %8, %13 : vector<16x16x8xf32>
    %15 = vector.extract_strided_slice %1 {offsets = [0, 2, 0], sizes = [16, 16, 8], strides = [1, 1, 1]} : vector<18x18x8xf32> to vector<16x16x8xf32>
    %c2 = arith.constant 2 : index
    %c0_7 = arith.constant 0 : index
    %16 = vector.load %arg2[%c2, %c0_7] : memref<9x8xf32, #tpu.memory_space<vmem>>, vector<1x8xf32>
    %17 = vector.shape_cast %16 : vector<1x8xf32> to vector<1x1x8xf32>
    %18 = vector.broadcast %17 : vector<1x1x8xf32> to vector<16x16x8xf32>
    %19 = arith.mulf %15, %18 : vector<16x16x8xf32>
    %20 = arith.addf %14, %19 : vector<16x16x8xf32>
    %21 = vector.extract_strided_slice %1 {offsets = [1, 0, 0], sizes = [16, 16, 8], strides = [1, 1, 1]} : vector<18x18x8xf32> to vector<16x16x8xf32>
    %c3 = arith.constant 3 : index
    %c0_8 = arith.constant 0 : index
    %22 = vector.load %arg2[%c3, %c0_8] : memref<9x8xf32, #tpu.memory_space<vmem>>, vector<1x8xf32>
    %23 = vector.shape_cast %22 : vector<1x8xf32> to vector<1x1x8xf32>
    %24 = vector.broadcast %23 : vector<1x1x8xf32> to vector<16x16x8xf32>
    %25 = arith.mulf %21, %24 : vector<16x16x8xf32>
    %26 = arith.addf %20, %25 : vector<16x16x8xf32>
    %27 = vector.extract_strided_slice %1 {offsets = [1, 1, 0], sizes = [16, 16, 8], strides = [1, 1, 1]} : vector<18x18x8xf32> to vector<16x16x8xf32>
    %c4 = arith.constant 4 : index
    %c0_9 = arith.constant 0 : index
    %28 = vector.load %arg2[%c4, %c0_9] : memref<9x8xf32, #tpu.memory_space<vmem>>, vector<1x8xf32>
    %29 = vector.shape_cast %28 : vector<1x8xf32> to vector<1x1x8xf32>
    %30 = vector.broadcast %29 : vector<1x1x8xf32> to vector<16x16x8xf32>
    %31 = arith.mulf %27, %30 : vector<16x16x8xf32>
    %32 = arith.addf %26, %31 : vector<16x16x8xf32>
    %33 = vector.extract_strided_slice %1 {offsets = [1, 2, 0], sizes = [16, 16, 8], strides = [1, 1, 1]} : vector<18x18x8xf32> to vector<16x16x8xf32>
    %c5 = arith.constant 5 : index
    %c0_10 = arith.constant 0 : index
    %34 = vector.load %arg2[%c5, %c0_10] : memref<9x8xf32, #tpu.memory_space<vmem>>, vector<1x8xf32>
    %35 = vector.shape_cast %34 : vector<1x8xf32> to vector<1x1x8xf32>
    %36 = vector.broadcast %35 : vector<1x1x8xf32> to vector<16x16x8xf32>
    %37 = arith.mulf %33, %36 : vector<16x16x8xf32>
    %38 = arith.addf %32, %37 : vector<16x16x8xf32>
    %39 = vector.extract_strided_slice %1 {offsets = [2, 0, 0], sizes = [16, 16, 8], strides = [1, 1, 1]} : vector<18x18x8xf32> to vector<16x16x8xf32>
    %c6 = arith.constant 6 : index
    %c0_11 = arith.constant 0 : index
    %40 = vector.load %arg2[%c6, %c0_11] : memref<9x8xf32, #tpu.memory_space<vmem>>, vector<1x8xf32>
    %41 = vector.shape_cast %40 : vector<1x8xf32> to vector<1x1x8xf32>
    %42 = vector.broadcast %41 : vector<1x1x8xf32> to vector<16x16x8xf32>
    %43 = arith.mulf %39, %42 : vector<16x16x8xf32>
    %44 = arith.addf %38, %43 : vector<16x16x8xf32>
    %45 = vector.extract_strided_slice %1 {offsets = [2, 1, 0], sizes = [16, 16, 8], strides = [1, 1, 1]} : vector<18x18x8xf32> to vector<16x16x8xf32>
    %c7 = arith.constant 7 : index
    %c0_12 = arith.constant 0 : index
    %46 = vector.load %arg2[%c7, %c0_12] : memref<9x8xf32, #tpu.memory_space<vmem>>, vector<1x8xf32>
    %47 = vector.shape_cast %46 : vector<1x8xf32> to vector<1x1x8xf32>
    %48 = vector.broadcast %47 : vector<1x1x8xf32> to vector<16x16x8xf32>
    %49 = arith.mulf %45, %48 : vector<16x16x8xf32>
    %50 = arith.addf %44, %49 : vector<16x16x8xf32>
    %51 = vector.extract_strided_slice %1 {offsets = [2, 2, 0], sizes = [16, 16, 8], strides = [1, 1, 1]} : vector<18x18x8xf32> to vector<16x16x8xf32>
    %c8 = arith.constant 8 : index
    %c0_13 = arith.constant 0 : index
    %52 = vector.load %arg2[%c8, %c0_13] : memref<9x8xf32, #tpu.memory_space<vmem>>, vector<1x8xf32>
    %53 = vector.shape_cast %52 : vector<1x8xf32> to vector<1x1x8xf32>
    %54 = vector.broadcast %53 : vector<1x1x8xf32> to vector<16x16x8xf32>
    %55 = arith.mulf %51, %54 : vector<16x16x8xf32>
    %56 = arith.addf %50, %55 : vector<16x16x8xf32>
    %c0_14 = arith.constant 0 : index
    %c0_15 = arith.constant 0 : index
    %57 = vector.load %arg3[%c0_14, %c0_15] : memref<1x8xf32, #tpu.memory_space<vmem>>, vector<1x8xf32>
    %58 = vector.shape_cast %57 : vector<1x8xf32> to vector<1x1x8xf32>
    %59 = vector.broadcast %58 : vector<1x1x8xf32> to vector<16x16x8xf32>
    %60 = arith.addf %56, %59 : vector<16x16x8xf32>
    %cst_16 = arith.constant 0.000000e+00 : f32
    %61 = vector.broadcast %cst_16 : f32 to vector<16x16x8xf32>
    %62 = arith.maximumf %60, %61 : vector<16x16x8xf32>
    %c0_17 = arith.constant 0 : index
    %c0_18 = arith.constant 0 : index
    %63 = vector.load %arg4[%c0_17, %c0_18] : memref<8x16xbf16, #tpu.memory_space<vmem>>, vector<8x16xbf16>
    %c0_19 = arith.constant 0 : index
    %c0_20 = arith.constant 0 : index
    %64 = vector.load %arg5[%c0_19, %c0_20] : memref<1x16xf32, #tpu.memory_space<vmem>>, vector<1x16xf32>
    %65 = vector.shape_cast %62 : vector<16x16x8xf32> to vector<256x8xf32>
    %66 = arith.truncf %65 : vector<256x8xf32> to vector<256x8xbf16>
    %cst_21 = arith.constant dense<0.000000e+00> : vector<256x16xf32>
    %67 = tpu.matmul %66, %63, %cst_21 {dimension_numbers = #tpu.dot_dimension_numbers<[1], [0], [0], [1], [0, 0, 1, 1], [], []>} : vector<256x8xbf16>, vector<8x16xbf16>, vector<256x16xf32> -> vector<256x16xf32>
    %68 = vector.broadcast %64 : vector<1x16xf32> to vector<256x16xf32>
    %69 = arith.addf %67, %68 : vector<256x16xf32>
    %cst_22 = arith.constant 0.000000e+00 : f32
    %70 = vector.broadcast %cst_22 : f32 to vector<256x16xf32>
    %71 = arith.maximumf %69, %70 : vector<256x16xf32>
    %72 = vector.shape_cast %71 : vector<256x16xf32> to vector<1x16x16x16xf32>
    %c0_23 = arith.constant 0 : index
    %c0_24 = arith.constant 0 : index
    %c0_25 = arith.constant 0 : index
    %c0_26 = arith.constant 0 : index
    %73 = vector.load %arg6[%c0_23, %c0_24, %c0_25, %c0_26] : memref<1x16x16x16xf32, #tpu.memory_space<vmem>>, vector<1x16x16x16xf32>
    tpu.vector_store %arg6[%c0_23, %c0_24, %c0_25, %c0_26], %72 {strides = array<i32>} : memref<1x16x16x16xf32, #tpu.memory_space<vmem>>, vector<1x16x16x16xf32>,
    return
  }
  func.func @transform_0(%arg0: i32) -> (i32, i32, i32, i32, i32) {
    %c0_i32 = arith.constant 0 : i32
    %c0_i32_0 = arith.constant 0 : i32
    %c0_i32_1 = arith.constant 0 : i32
    %c0_i32_2 = arith.constant 0 : i32
    %c0_i32_3 = arith.constant 0 : i32
    return %c0_i32, %arg0, %c0_i32_0, %c0_i32_1, %c0_i32_2 : i32, i32, i32, i32, i32
  }
  func.func @transform_1(%arg0: i32) -> (i32, i32) {
    %c0_i32 = arith.constant 0 : i32
    %c0_i32_0 = arith.constant 0 : i32
    %c0_i32_1 = arith.constant 0 : i32
    return %c0_i32, %c0_i32_0 : i32, i32
  }
  func.func @transform_2(%arg0: i32) -> (i32, i32) {
    %c0_i32 = arith.constant 0 : i32
    %c0_i32_0 = arith.constant 0 : i32
    %c0_i32_1 = arith.constant 0 : i32
    return %c0_i32, %c0_i32_0 : i32, i32
  }
  func.func @transform_3(%arg0: i32) -> (i32, i32) {
    %c0_i32 = arith.constant 0 : i32
    %c0_i32_0 = arith.constant 0 : i32
    %c0_i32_1 = arith.constant 0 : i32
    return %c0_i32, %c0_i32_0 : i32, i32
  }
  func.func @transform_4(%arg0: i32) -> (i32, i32) {
    %c0_i32 = arith.constant 0 : i32
    %c0_i32_0 = arith.constant 0 : i32
    %c0_i32_1 = arith.constant 0 : i32
    return %c0_i32, %c0_i32_0 : i32, i32
  }
  func.func @transform_5(%arg0: i32) -> (i32, i32, i32, i32) {
    %c0_i32 = arith.constant 0 : i32
    %c0_i32_0 = arith.constant 0 : i32
    %c0_i32_1 = arith.constant 0 : i32
    %c0_i32_2 = arith.constant 0 : i32
    return %arg0, %c0_i32, %c0_i32_0, %c0_i32_1 : i32, i32, i32, i32
  }
}

module attributes {stable_mosaic.version = 11 : i64} {
  func.func @_dws_block_kernel(%arg0: i32, %arg1: memref<4x1x9x9x16xf32, #tpu.memory_space<vmem>>, %arg2: memref<9x16xf32, #tpu.memory_space<vmem>>, %arg3: memref<1x16xf32, #tpu.memory_space<vmem>>, %arg4: memref<16x32xbf16, #tpu.memory_space<vmem>>, %arg5: memref<1x32xf32, #tpu.memory_space<vmem>>, %arg6: memref<1x8x8x32xf32, #tpu.memory_space<vmem>>) attributes {dimension_semantics = [#tpu.dimension_semantics<parallel>], iteration_bounds = array<i64: 2>, scalar_prefetch = 0 : i64, scratch_operands = 0 : i64, tpu.core_type = #tpu.core_type<tc>, window_params = [{transform_indices = @transform_0, window_bounds = array<i64: 4, 1, 9, 9, 16>}, {pipeline_mode = #tpu.pipeline_mode<synchronous>, transform_indices = @transform_1, window_bounds = array<i64: 9, 16>}, {pipeline_mode = #tpu.pipeline_mode<synchronous>, transform_indices = @transform_2, window_bounds = array<i64: 1, 16>}, {pipeline_mode = #tpu.pipeline_mode<synchronous>, transform_indices = @transform_3, window_bounds = array<i64: 16, 32>}, {pipeline_mode = #tpu.pipeline_mode<synchronous>, transform_indices = @transform_4, window_bounds = array<i64: 1, 32>}, {transform_indices = @transform_5, window_bounds = array<i64: 1, 8, 8, 32>}]} {
    %c0 = arith.constant 0 : index
    %c0_0 = arith.constant 0 : index
    %c0_1 = arith.constant 0 : index
    %c0_2 = arith.constant 0 : index
    %c0_3 = arith.constant 0 : index
    %0 = vector.load %arg1[%c0, %c0_0, %c0_1, %c0_2, %c0_3] : memref<4x1x9x9x16xf32, #tpu.memory_space<vmem>>, vector<1x1x9x9x16xf32>
    %1 = vector.shape_cast %0 : vector<1x1x9x9x16xf32> to vector<9x9x16xf32>
    %c1 = arith.constant 1 : index
    %c0_4 = arith.constant 0 : index
    %c0_5 = arith.constant 0 : index
    %c0_6 = arith.constant 0 : index
    %c0_7 = arith.constant 0 : index
    %2 = vector.load %arg1[%c1, %c0_4, %c0_5, %c0_6, %c0_7] : memref<4x1x9x9x16xf32, #tpu.memory_space<vmem>>, vector<1x1x9x9x16xf32>
    %3 = vector.shape_cast %2 : vector<1x1x9x9x16xf32> to vector<9x9x16xf32>
    %c2 = arith.constant 2 : index
    %c0_8 = arith.constant 0 : index
    %c0_9 = arith.constant 0 : index
    %c0_10 = arith.constant 0 : index
    %c0_11 = arith.constant 0 : index
    %4 = vector.load %arg1[%c2, %c0_8, %c0_9, %c0_10, %c0_11] : memref<4x1x9x9x16xf32, #tpu.memory_space<vmem>>, vector<1x1x9x9x16xf32>
    %5 = vector.shape_cast %4 : vector<1x1x9x9x16xf32> to vector<9x9x16xf32>
    %c3 = arith.constant 3 : index
    %c0_12 = arith.constant 0 : index
    %c0_13 = arith.constant 0 : index
    %c0_14 = arith.constant 0 : index
    %c0_15 = arith.constant 0 : index
    %6 = vector.load %arg1[%c3, %c0_12, %c0_13, %c0_14, %c0_15] : memref<4x1x9x9x16xf32, #tpu.memory_space<vmem>>, vector<1x1x9x9x16xf32>
    %7 = vector.shape_cast %6 : vector<1x1x9x9x16xf32> to vector<9x9x16xf32>
    %cst = arith.constant 0.000000e+00 : f32
    %8 = vector.broadcast %cst : f32 to vector<8x8x16xf32>
    %9 = vector.extract_strided_slice %1 {offsets = [0, 0, 0], sizes = [8, 8, 16], strides = [1, 1, 1]} : vector<9x9x16xf32> to vector<8x8x16xf32>
    %c0_16 = arith.constant 0 : index
    %c0_17 = arith.constant 0 : index
    %10 = vector.load %arg2[%c0_16, %c0_17] : memref<9x16xf32, #tpu.memory_space<vmem>>, vector<1x16xf32>
    %11 = vector.shape_cast %10 : vector<1x16xf32> to vector<1x1x16xf32>
    %12 = vector.broadcast %11 : vector<1x1x16xf32> to vector<8x8x16xf32>
    %13 = arith.mulf %9, %12 : vector<8x8x16xf32>
    %14 = arith.addf %8, %13 : vector<8x8x16xf32>
    %15 = vector.extract_strided_slice %3 {offsets = [0, 0, 0], sizes = [8, 8, 16], strides = [1, 1, 1]} : vector<9x9x16xf32> to vector<8x8x16xf32>
    %c1_18 = arith.constant 1 : index
    %c0_19 = arith.constant 0 : index
    %16 = vector.load %arg2[%c1_18, %c0_19] : memref<9x16xf32, #tpu.memory_space<vmem>>, vector<1x16xf32>
    %17 = vector.shape_cast %16 : vector<1x16xf32> to vector<1x1x16xf32>
    %18 = vector.broadcast %17 : vector<1x1x16xf32> to vector<8x8x16xf32>
    %19 = arith.mulf %15, %18 : vector<8x8x16xf32>
    %20 = arith.addf %14, %19 : vector<8x8x16xf32>
    %21 = vector.extract_strided_slice %1 {offsets = [0, 1, 0], sizes = [8, 8, 16], strides = [1, 1, 1]} : vector<9x9x16xf32> to vector<8x8x16xf32>
    %c2_20 = arith.constant 2 : index
    %c0_21 = arith.constant 0 : index
    %22 = vector.load %arg2[%c2_20, %c0_21] : memref<9x16xf32, #tpu.memory_space<vmem>>, vector<1x16xf32>
    %23 = vector.shape_cast %22 : vector<1x16xf32> to vector<1x1x16xf32>
    %24 = vector.broadcast %23 : vector<1x1x16xf32> to vector<8x8x16xf32>
    %25 = arith.mulf %21, %24 : vector<8x8x16xf32>
    %26 = arith.addf %20, %25 : vector<8x8x16xf32>
    %27 = vector.extract_strided_slice %5 {offsets = [0, 0, 0], sizes = [8, 8, 16], strides = [1, 1, 1]} : vector<9x9x16xf32> to vector<8x8x16xf32>
    %c3_22 = arith.constant 3 : index
    %c0_23 = arith.constant 0 : index
    %28 = vector.load %arg2[%c3_22, %c0_23] : memref<9x16xf32, #tpu.memory_space<vmem>>, vector<1x16xf32>
    %29 = vector.shape_cast %28 : vector<1x16xf32> to vector<1x1x16xf32>
    %30 = vector.broadcast %29 : vector<1x1x16xf32> to vector<8x8x16xf32>
    %31 = arith.mulf %27, %30 : vector<8x8x16xf32>
    %32 = arith.addf %26, %31 : vector<8x8x16xf32>
    %33 = vector.extract_strided_slice %7 {offsets = [0, 0, 0], sizes = [8, 8, 16], strides = [1, 1, 1]} : vector<9x9x16xf32> to vector<8x8x16xf32>
    %c4 = arith.constant 4 : index
    %c0_24 = arith.constant 0 : index
    %34 = vector.load %arg2[%c4, %c0_24] : memref<9x16xf32, #tpu.memory_space<vmem>>, vector<1x16xf32>
    %35 = vector.shape_cast %34 : vector<1x16xf32> to vector<1x1x16xf32>
    %36 = vector.broadcast %35 : vector<1x1x16xf32> to vector<8x8x16xf32>
    %37 = arith.mulf %33, %36 : vector<8x8x16xf32>
    %38 = arith.addf %32, %37 : vector<8x8x16xf32>
    %39 = vector.extract_strided_slice %5 {offsets = [0, 1, 0], sizes = [8, 8, 16], strides = [1, 1, 1]} : vector<9x9x16xf32> to vector<8x8x16xf32>
    %c5 = arith.constant 5 : index
    %c0_25 = arith.constant 0 : index
    %40 = vector.load %arg2[%c5, %c0_25] : memref<9x16xf32, #tpu.memory_space<vmem>>, vector<1x16xf32>
    %41 = vector.shape_cast %40 : vector<1x16xf32> to vector<1x1x16xf32>
    %42 = vector.broadcast %41 : vector<1x1x16xf32> to vector<8x8x16xf32>
    %43 = arith.mulf %39, %42 : vector<8x8x16xf32>
    %44 = arith.addf %38, %43 : vector<8x8x16xf32>
    %45 = vector.extract_strided_slice %1 {offsets = [1, 0, 0], sizes = [8, 8, 16], strides = [1, 1, 1]} : vector<9x9x16xf32> to vector<8x8x16xf32>
    %c6 = arith.constant 6 : index
    %c0_26 = arith.constant 0 : index
    %46 = vector.load %arg2[%c6, %c0_26] : memref<9x16xf32, #tpu.memory_space<vmem>>, vector<1x16xf32>
    %47 = vector.shape_cast %46 : vector<1x16xf32> to vector<1x1x16xf32>
    %48 = vector.broadcast %47 : vector<1x1x16xf32> to vector<8x8x16xf32>
    %49 = arith.mulf %45, %48 : vector<8x8x16xf32>
    %50 = arith.addf %44, %49 : vector<8x8x16xf32>
    %51 = vector.extract_strided_slice %3 {offsets = [1, 0, 0], sizes = [8, 8, 16], strides = [1, 1, 1]} : vector<9x9x16xf32> to vector<8x8x16xf32>
    %c7 = arith.constant 7 : index
    %c0_27 = arith.constant 0 : index
    %52 = vector.load %arg2[%c7, %c0_27] : memref<9x16xf32, #tpu.memory_space<vmem>>, vector<1x16xf32>
    %53 = vector.shape_cast %52 : vector<1x16xf32> to vector<1x1x16xf32>
    %54 = vector.broadcast %53 : vector<1x1x16xf32> to vector<8x8x16xf32>
    %55 = arith.mulf %51, %54 : vector<8x8x16xf32>
    %56 = arith.addf %50, %55 : vector<8x8x16xf32>
    %57 = vector.extract_strided_slice %1 {offsets = [1, 1, 0], sizes = [8, 8, 16], strides = [1, 1, 1]} : vector<9x9x16xf32> to vector<8x8x16xf32>
    %c8 = arith.constant 8 : index
    %c0_28 = arith.constant 0 : index
    %58 = vector.load %arg2[%c8, %c0_28] : memref<9x16xf32, #tpu.memory_space<vmem>>, vector<1x16xf32>
    %59 = vector.shape_cast %58 : vector<1x16xf32> to vector<1x1x16xf32>
    %60 = vector.broadcast %59 : vector<1x1x16xf32> to vector<8x8x16xf32>
    %61 = arith.mulf %57, %60 : vector<8x8x16xf32>
    %62 = arith.addf %56, %61 : vector<8x8x16xf32>
    %c0_29 = arith.constant 0 : index
    %c0_30 = arith.constant 0 : index
    %63 = vector.load %arg3[%c0_29, %c0_30] : memref<1x16xf32, #tpu.memory_space<vmem>>, vector<1x16xf32>
    %64 = vector.shape_cast %63 : vector<1x16xf32> to vector<1x1x16xf32>
    %65 = vector.broadcast %64 : vector<1x1x16xf32> to vector<8x8x16xf32>
    %66 = arith.addf %62, %65 : vector<8x8x16xf32>
    %cst_31 = arith.constant 0.000000e+00 : f32
    %67 = vector.broadcast %cst_31 : f32 to vector<8x8x16xf32>
    %68 = arith.maximumf %66, %67 : vector<8x8x16xf32>
    %c0_32 = arith.constant 0 : index
    %c0_33 = arith.constant 0 : index
    %69 = vector.load %arg4[%c0_32, %c0_33] : memref<16x32xbf16, #tpu.memory_space<vmem>>, vector<16x32xbf16>
    %c0_34 = arith.constant 0 : index
    %c0_35 = arith.constant 0 : index
    %70 = vector.load %arg5[%c0_34, %c0_35] : memref<1x32xf32, #tpu.memory_space<vmem>>, vector<1x32xf32>
    %71 = vector.shape_cast %68 : vector<8x8x16xf32> to vector<64x16xf32>
    %72 = arith.truncf %71 : vector<64x16xf32> to vector<64x16xbf16>
    %cst_36 = arith.constant dense<0.000000e+00> : vector<64x32xf32>
    %73 = tpu.matmul %72, %69, %cst_36 {dimension_numbers = #tpu.dot_dimension_numbers<[1], [0], [0], [1], [0, 0, 1, 1], [], []>} : vector<64x16xbf16>, vector<16x32xbf16>, vector<64x32xf32> -> vector<64x32xf32>
    %74 = vector.broadcast %70 : vector<1x32xf32> to vector<64x32xf32>
    %75 = arith.addf %73, %74 : vector<64x32xf32>
    %cst_37 = arith.constant 0.000000e+00 : f32
    %76 = vector.broadcast %cst_37 : f32 to vector<64x32xf32>
    %77 = arith.maximumf %75, %76 : vector<64x32xf32>
    %78 = vector.shape_cast %77 : vector<64x32xf32> to vector<1x8x8x32xf32>
    %c0_38 = arith.constant 0 : index
    %c0_39 = arith.constant 0 : index
    %c0_40 = arith.constant 0 : index
    %c0_41 = arith.constant 0 : index
    %79 = vector.load %arg6[%c0_38, %c0_39, %c0_40, %c0_41] : memref<1x8x8x32xf32, #tpu.memory_space<vmem>>, vector<1x8x8x32xf32>
    tpu.vector_store %arg6[%c0_38, %c0_39, %c0_40, %c0_41], %78 {strides = array<i32>} : memref<1x8x8x32xf32, #tpu.memory_space<vmem>>, vector<1x8x8x32xf32>,
    return
  }
  func.func @transform_0(%arg0: i32) -> (i32, i32, i32, i32, i32) {
    %c0_i32 = arith.constant 0 : i32
    %c0_i32_0 = arith.constant 0 : i32
    %c0_i32_1 = arith.constant 0 : i32
    %c0_i32_2 = arith.constant 0 : i32
    %c0_i32_3 = arith.constant 0 : i32
    return %c0_i32, %arg0, %c0_i32_0, %c0_i32_1, %c0_i32_2 : i32, i32, i32, i32, i32
  }
  func.func @transform_1(%arg0: i32) -> (i32, i32) {
    %c0_i32 = arith.constant 0 : i32
    %c0_i32_0 = arith.constant 0 : i32
    %c0_i32_1 = arith.constant 0 : i32
    return %c0_i32, %c0_i32_0 : i32, i32
  }
  func.func @transform_2(%arg0: i32) -> (i32, i32) {
    %c0_i32 = arith.constant 0 : i32
    %c0_i32_0 = arith.constant 0 : i32
    %c0_i32_1 = arith.constant 0 : i32
    return %c0_i32, %c0_i32_0 : i32, i32
  }
  func.func @transform_3(%arg0: i32) -> (i32, i32) {
    %c0_i32 = arith.constant 0 : i32
    %c0_i32_0 = arith.constant 0 : i32
    %c0_i32_1 = arith.constant 0 : i32
    return %c0_i32, %c0_i32_0 : i32, i32
  }
  func.func @transform_4(%arg0: i32) -> (i32, i32) {
    %c0_i32 = arith.constant 0 : i32
    %c0_i32_0 = arith.constant 0 : i32
    %c0_i32_1 = arith.constant 0 : i32
    return %c0_i32, %c0_i32_0 : i32, i32
  }
  func.func @transform_5(%arg0: i32) -> (i32, i32, i32, i32) {
    %c0_i32 = arith.constant 0 : i32
    %c0_i32_0 = arith.constant 0 : i32
    %c0_i32_1 = arith.constant 0 : i32
    %c0_i32_2 = arith.constant 0 : i32
    return %arg0, %c0_i32, %c0_i32_0, %c0_i32_1 : i32, i32, i32, i32
  }
}

module attributes {stable_mosaic.version = 11 : i64} {
  func.func @_dws_block_kernel(%arg0: i32, %arg1: memref<1x1x10x10x32xf32, #tpu.memory_space<vmem>>, %arg2: memref<9x32xf32, #tpu.memory_space<vmem>>, %arg3: memref<1x32xf32, #tpu.memory_space<vmem>>, %arg4: memref<32x32xbf16, #tpu.memory_space<vmem>>, %arg5: memref<1x32xf32, #tpu.memory_space<vmem>>, %arg6: memref<1x8x8x32xf32, #tpu.memory_space<vmem>>) attributes {dimension_semantics = [#tpu.dimension_semantics<parallel>], iteration_bounds = array<i64: 2>, scalar_prefetch = 0 : i64, scratch_operands = 0 : i64, tpu.core_type = #tpu.core_type<tc>, window_params = [{transform_indices = @transform_0, window_bounds = array<i64: 1, 1, 10, 10, 32>}, {pipeline_mode = #tpu.pipeline_mode<synchronous>, transform_indices = @transform_1, window_bounds = array<i64: 9, 32>}, {pipeline_mode = #tpu.pipeline_mode<synchronous>, transform_indices = @transform_2, window_bounds = array<i64: 1, 32>}, {pipeline_mode = #tpu.pipeline_mode<synchronous>, transform_indices = @transform_3, window_bounds = array<i64: 32, 32>}, {pipeline_mode = #tpu.pipeline_mode<synchronous>, transform_indices = @transform_4, window_bounds = array<i64: 1, 32>}, {transform_indices = @transform_5, window_bounds = array<i64: 1, 8, 8, 32>}]} {
    %c0 = arith.constant 0 : index
    %c0_0 = arith.constant 0 : index
    %c0_1 = arith.constant 0 : index
    %c0_2 = arith.constant 0 : index
    %c0_3 = arith.constant 0 : index
    %0 = vector.load %arg1[%c0, %c0_0, %c0_1, %c0_2, %c0_3] : memref<1x1x10x10x32xf32, #tpu.memory_space<vmem>>, vector<1x1x10x10x32xf32>
    %1 = vector.shape_cast %0 : vector<1x1x10x10x32xf32> to vector<10x10x32xf32>
    %cst = arith.constant 0.000000e+00 : f32
    %2 = vector.broadcast %cst : f32 to vector<8x8x32xf32>
    %3 = vector.extract_strided_slice %1 {offsets = [0, 0, 0], sizes = [8, 8, 32], strides = [1, 1, 1]} : vector<10x10x32xf32> to vector<8x8x32xf32>
    %c0_4 = arith.constant 0 : index
    %c0_5 = arith.constant 0 : index
    %4 = vector.load %arg2[%c0_4, %c0_5] : memref<9x32xf32, #tpu.memory_space<vmem>>, vector<1x32xf32>
    %5 = vector.shape_cast %4 : vector<1x32xf32> to vector<1x1x32xf32>
    %6 = vector.broadcast %5 : vector<1x1x32xf32> to vector<8x8x32xf32>
    %7 = arith.mulf %3, %6 : vector<8x8x32xf32>
    %8 = arith.addf %2, %7 : vector<8x8x32xf32>
    %9 = vector.extract_strided_slice %1 {offsets = [0, 1, 0], sizes = [8, 8, 32], strides = [1, 1, 1]} : vector<10x10x32xf32> to vector<8x8x32xf32>
    %c1 = arith.constant 1 : index
    %c0_6 = arith.constant 0 : index
    %10 = vector.load %arg2[%c1, %c0_6] : memref<9x32xf32, #tpu.memory_space<vmem>>, vector<1x32xf32>
    %11 = vector.shape_cast %10 : vector<1x32xf32> to vector<1x1x32xf32>
    %12 = vector.broadcast %11 : vector<1x1x32xf32> to vector<8x8x32xf32>
    %13 = arith.mulf %9, %12 : vector<8x8x32xf32>
    %14 = arith.addf %8, %13 : vector<8x8x32xf32>
    %15 = vector.extract_strided_slice %1 {offsets = [0, 2, 0], sizes = [8, 8, 32], strides = [1, 1, 1]} : vector<10x10x32xf32> to vector<8x8x32xf32>
    %c2 = arith.constant 2 : index
    %c0_7 = arith.constant 0 : index
    %16 = vector.load %arg2[%c2, %c0_7] : memref<9x32xf32, #tpu.memory_space<vmem>>, vector<1x32xf32>
    %17 = vector.shape_cast %16 : vector<1x32xf32> to vector<1x1x32xf32>
    %18 = vector.broadcast %17 : vector<1x1x32xf32> to vector<8x8x32xf32>
    %19 = arith.mulf %15, %18 : vector<8x8x32xf32>
    %20 = arith.addf %14, %19 : vector<8x8x32xf32>
    %21 = vector.extract_strided_slice %1 {offsets = [1, 0, 0], sizes = [8, 8, 32], strides = [1, 1, 1]} : vector<10x10x32xf32> to vector<8x8x32xf32>
    %c3 = arith.constant 3 : index
    %c0_8 = arith.constant 0 : index
    %22 = vector.load %arg2[%c3, %c0_8] : memref<9x32xf32, #tpu.memory_space<vmem>>, vector<1x32xf32>
    %23 = vector.shape_cast %22 : vector<1x32xf32> to vector<1x1x32xf32>
    %24 = vector.broadcast %23 : vector<1x1x32xf32> to vector<8x8x32xf32>
    %25 = arith.mulf %21, %24 : vector<8x8x32xf32>
    %26 = arith.addf %20, %25 : vector<8x8x32xf32>
    %27 = vector.extract_strided_slice %1 {offsets = [1, 1, 0], sizes = [8, 8, 32], strides = [1, 1, 1]} : vector<10x10x32xf32> to vector<8x8x32xf32>
    %c4 = arith.constant 4 : index
    %c0_9 = arith.constant 0 : index
    %28 = vector.load %arg2[%c4, %c0_9] : memref<9x32xf32, #tpu.memory_space<vmem>>, vector<1x32xf32>
    %29 = vector.shape_cast %28 : vector<1x32xf32> to vector<1x1x32xf32>
    %30 = vector.broadcast %29 : vector<1x1x32xf32> to vector<8x8x32xf32>
    %31 = arith.mulf %27, %30 : vector<8x8x32xf32>
    %32 = arith.addf %26, %31 : vector<8x8x32xf32>
    %33 = vector.extract_strided_slice %1 {offsets = [1, 2, 0], sizes = [8, 8, 32], strides = [1, 1, 1]} : vector<10x10x32xf32> to vector<8x8x32xf32>
    %c5 = arith.constant 5 : index
    %c0_10 = arith.constant 0 : index
    %34 = vector.load %arg2[%c5, %c0_10] : memref<9x32xf32, #tpu.memory_space<vmem>>, vector<1x32xf32>
    %35 = vector.shape_cast %34 : vector<1x32xf32> to vector<1x1x32xf32>
    %36 = vector.broadcast %35 : vector<1x1x32xf32> to vector<8x8x32xf32>
    %37 = arith.mulf %33, %36 : vector<8x8x32xf32>
    %38 = arith.addf %32, %37 : vector<8x8x32xf32>
    %39 = vector.extract_strided_slice %1 {offsets = [2, 0, 0], sizes = [8, 8, 32], strides = [1, 1, 1]} : vector<10x10x32xf32> to vector<8x8x32xf32>
    %c6 = arith.constant 6 : index
    %c0_11 = arith.constant 0 : index
    %40 = vector.load %arg2[%c6, %c0_11] : memref<9x32xf32, #tpu.memory_space<vmem>>, vector<1x32xf32>
    %41 = vector.shape_cast %40 : vector<1x32xf32> to vector<1x1x32xf32>
    %42 = vector.broadcast %41 : vector<1x1x32xf32> to vector<8x8x32xf32>
    %43 = arith.mulf %39, %42 : vector<8x8x32xf32>
    %44 = arith.addf %38, %43 : vector<8x8x32xf32>
    %45 = vector.extract_strided_slice %1 {offsets = [2, 1, 0], sizes = [8, 8, 32], strides = [1, 1, 1]} : vector<10x10x32xf32> to vector<8x8x32xf32>
    %c7 = arith.constant 7 : index
    %c0_12 = arith.constant 0 : index
    %46 = vector.load %arg2[%c7, %c0_12] : memref<9x32xf32, #tpu.memory_space<vmem>>, vector<1x32xf32>
    %47 = vector.shape_cast %46 : vector<1x32xf32> to vector<1x1x32xf32>
    %48 = vector.broadcast %47 : vector<1x1x32xf32> to vector<8x8x32xf32>
    %49 = arith.mulf %45, %48 : vector<8x8x32xf32>
    %50 = arith.addf %44, %49 : vector<8x8x32xf32>
    %51 = vector.extract_strided_slice %1 {offsets = [2, 2, 0], sizes = [8, 8, 32], strides = [1, 1, 1]} : vector<10x10x32xf32> to vector<8x8x32xf32>
    %c8 = arith.constant 8 : index
    %c0_13 = arith.constant 0 : index
    %52 = vector.load %arg2[%c8, %c0_13] : memref<9x32xf32, #tpu.memory_space<vmem>>, vector<1x32xf32>
    %53 = vector.shape_cast %52 : vector<1x32xf32> to vector<1x1x32xf32>
    %54 = vector.broadcast %53 : vector<1x1x32xf32> to vector<8x8x32xf32>
    %55 = arith.mulf %51, %54 : vector<8x8x32xf32>
    %56 = arith.addf %50, %55 : vector<8x8x32xf32>
    %c0_14 = arith.constant 0 : index
    %c0_15 = arith.constant 0 : index
    %57 = vector.load %arg3[%c0_14, %c0_15] : memref<1x32xf32, #tpu.memory_space<vmem>>, vector<1x32xf32>
    %58 = vector.shape_cast %57 : vector<1x32xf32> to vector<1x1x32xf32>
    %59 = vector.broadcast %58 : vector<1x1x32xf32> to vector<8x8x32xf32>
    %60 = arith.addf %56, %59 : vector<8x8x32xf32>
    %cst_16 = arith.constant 0.000000e+00 : f32
    %61 = vector.broadcast %cst_16 : f32 to vector<8x8x32xf32>
    %62 = arith.maximumf %60, %61 : vector<8x8x32xf32>
    %c0_17 = arith.constant 0 : index
    %c0_18 = arith.constant 0 : index
    %63 = vector.load %arg4[%c0_17, %c0_18] : memref<32x32xbf16, #tpu.memory_space<vmem>>, vector<32x32xbf16>
    %c0_19 = arith.constant 0 : index
    %c0_20 = arith.constant 0 : index
    %64 = vector.load %arg5[%c0_19, %c0_20] : memref<1x32xf32, #tpu.memory_space<vmem>>, vector<1x32xf32>
    %65 = vector.shape_cast %62 : vector<8x8x32xf32> to vector<64x32xf32>
    %66 = arith.truncf %65 : vector<64x32xf32> to vector<64x32xbf16>
    %cst_21 = arith.constant dense<0.000000e+00> : vector<64x32xf32>
    %67 = tpu.matmul %66, %63, %cst_21 {dimension_numbers = #tpu.dot_dimension_numbers<[1], [0], [0], [1], [0, 0, 1, 1], [], []>} : vector<64x32xbf16>, vector<32x32xbf16>, vector<64x32xf32> -> vector<64x32xf32>
    %68 = vector.broadcast %64 : vector<1x32xf32> to vector<64x32xf32>
    %69 = arith.addf %67, %68 : vector<64x32xf32>
    %cst_22 = arith.constant 0.000000e+00 : f32
    %70 = vector.broadcast %cst_22 : f32 to vector<64x32xf32>
    %71 = arith.maximumf %69, %70 : vector<64x32xf32>
    %72 = vector.shape_cast %71 : vector<64x32xf32> to vector<1x8x8x32xf32>
    %c0_23 = arith.constant 0 : index
    %c0_24 = arith.constant 0 : index
    %c0_25 = arith.constant 0 : index
    %c0_26 = arith.constant 0 : index
    %73 = vector.load %arg6[%c0_23, %c0_24, %c0_25, %c0_26] : memref<1x8x8x32xf32, #tpu.memory_space<vmem>>, vector<1x8x8x32xf32>
    tpu.vector_store %arg6[%c0_23, %c0_24, %c0_25, %c0_26], %72 {strides = array<i32>} : memref<1x8x8x32xf32, #tpu.memory_space<vmem>>, vector<1x8x8x32xf32>,
    return
  }
  func.func @transform_0(%arg0: i32) -> (i32, i32, i32, i32, i32) {
    %c0_i32 = arith.constant 0 : i32
    %c0_i32_0 = arith.constant 0 : i32
    %c0_i32_1 = arith.constant 0 : i32
    %c0_i32_2 = arith.constant 0 : i32
    %c0_i32_3 = arith.constant 0 : i32
    return %c0_i32, %arg0, %c0_i32_0, %c0_i32_1, %c0_i32_2 : i32, i32, i32, i32, i32
  }
  func.func @transform_1(%arg0: i32) -> (i32, i32) {
    %c0_i32 = arith.constant 0 : i32
    %c0_i32_0 = arith.constant 0 : i32
    %c0_i32_1 = arith.constant 0 : i32
    return %c0_i32, %c0_i32_0 : i32, i32
  }
  func.func @transform_2(%arg0: i32) -> (i32, i32) {
    %c0_i32 = arith.constant 0 : i32
    %c0_i32_0 = arith.constant 0 : i32
    %c0_i32_1 = arith.constant 0 : i32
    return %c0_i32, %c0_i32_0 : i32, i32
  }
  func.func @transform_3(%arg0: i32) -> (i32, i32) {
    %c0_i32 = arith.constant 0 : i32
    %c0_i32_0 = arith.constant 0 : i32
    %c0_i32_1 = arith.constant 0 : i32
    return %c0_i32, %c0_i32_0 : i32, i32
  }
  func.func @transform_4(%arg0: i32) -> (i32, i32) {
    %c0_i32 = arith.constant 0 : i32
    %c0_i32_0 = arith.constant 0 : i32
    %c0_i32_1 = arith.constant 0 : i32
    return %c0_i32, %c0_i32_0 : i32, i32
  }
  func.func @transform_5(%arg0: i32) -> (i32, i32, i32, i32) {
    %c0_i32 = arith.constant 0 : i32
    %c0_i32_0 = arith.constant 0 : i32
    %c0_i32_1 = arith.constant 0 : i32
    %c0_i32_2 = arith.constant 0 : i32
    return %arg0, %c0_i32, %c0_i32_0, %c0_i32_1 : i32, i32, i32, i32
  }
}

module attributes {stable_mosaic.version = 11 : i64} {
  func.func @_dws_block_kernel(%arg0: i32, %arg1: memref<4x1x5x5x32xf32, #tpu.memory_space<vmem>>, %arg2: memref<9x32xf32, #tpu.memory_space<vmem>>, %arg3: memref<1x32xf32, #tpu.memory_space<vmem>>, %arg4: memref<32x64xbf16, #tpu.memory_space<vmem>>, %arg5: memref<1x64xf32, #tpu.memory_space<vmem>>, %arg6: memref<1x4x4x64xf32, #tpu.memory_space<vmem>>) attributes {dimension_semantics = [#tpu.dimension_semantics<parallel>], iteration_bounds = array<i64: 2>, scalar_prefetch = 0 : i64, scratch_operands = 0 : i64, tpu.core_type = #tpu.core_type<tc>, window_params = [{transform_indices = @transform_0, window_bounds = array<i64: 4, 1, 5, 5, 32>}, {pipeline_mode = #tpu.pipeline_mode<synchronous>, transform_indices = @transform_1, window_bounds = array<i64: 9, 32>}, {pipeline_mode = #tpu.pipeline_mode<synchronous>, transform_indices = @transform_2, window_bounds = array<i64: 1, 32>}, {pipeline_mode = #tpu.pipeline_mode<synchronous>, transform_indices = @transform_3, window_bounds = array<i64: 32, 64>}, {pipeline_mode = #tpu.pipeline_mode<synchronous>, transform_indices = @transform_4, window_bounds = array<i64: 1, 64>}, {transform_indices = @transform_5, window_bounds = array<i64: 1, 4, 4, 64>}]} {
    %c0 = arith.constant 0 : index
    %c0_0 = arith.constant 0 : index
    %c0_1 = arith.constant 0 : index
    %c0_2 = arith.constant 0 : index
    %c0_3 = arith.constant 0 : index
    %0 = vector.load %arg1[%c0, %c0_0, %c0_1, %c0_2, %c0_3] : memref<4x1x5x5x32xf32, #tpu.memory_space<vmem>>, vector<1x1x5x5x32xf32>
    %1 = vector.shape_cast %0 : vector<1x1x5x5x32xf32> to vector<5x5x32xf32>
    %c1 = arith.constant 1 : index
    %c0_4 = arith.constant 0 : index
    %c0_5 = arith.constant 0 : index
    %c0_6 = arith.constant 0 : index
    %c0_7 = arith.constant 0 : index
    %2 = vector.load %arg1[%c1, %c0_4, %c0_5, %c0_6, %c0_7] : memref<4x1x5x5x32xf32, #tpu.memory_space<vmem>>, vector<1x1x5x5x32xf32>
    %3 = vector.shape_cast %2 : vector<1x1x5x5x32xf32> to vector<5x5x32xf32>
    %c2 = arith.constant 2 : index
    %c0_8 = arith.constant 0 : index
    %c0_9 = arith.constant 0 : index
    %c0_10 = arith.constant 0 : index
    %c0_11 = arith.constant 0 : index
    %4 = vector.load %arg1[%c2, %c0_8, %c0_9, %c0_10, %c0_11] : memref<4x1x5x5x32xf32, #tpu.memory_space<vmem>>, vector<1x1x5x5x32xf32>
    %5 = vector.shape_cast %4 : vector<1x1x5x5x32xf32> to vector<5x5x32xf32>
    %c3 = arith.constant 3 : index
    %c0_12 = arith.constant 0 : index
    %c0_13 = arith.constant 0 : index
    %c0_14 = arith.constant 0 : index
    %c0_15 = arith.constant 0 : index
    %6 = vector.load %arg1[%c3, %c0_12, %c0_13, %c0_14, %c0_15] : memref<4x1x5x5x32xf32, #tpu.memory_space<vmem>>, vector<1x1x5x5x32xf32>
    %7 = vector.shape_cast %6 : vector<1x1x5x5x32xf32> to vector<5x5x32xf32>
    %cst = arith.constant 0.000000e+00 : f32
    %8 = vector.broadcast %cst : f32 to vector<4x4x32xf32>
    %9 = vector.extract_strided_slice %1 {offsets = [0, 0, 0], sizes = [4, 4, 32], strides = [1, 1, 1]} : vector<5x5x32xf32> to vector<4x4x32xf32>
    %c0_16 = arith.constant 0 : index
    %c0_17 = arith.constant 0 : index
    %10 = vector.load %arg2[%c0_16, %c0_17] : memref<9x32xf32, #tpu.memory_space<vmem>>, vector<1x32xf32>
    %11 = vector.shape_cast %10 : vector<1x32xf32> to vector<1x1x32xf32>
    %12 = vector.broadcast %11 : vector<1x1x32xf32> to vector<4x4x32xf32>
    %13 = arith.mulf %9, %12 : vector<4x4x32xf32>
    %14 = arith.addf %8, %13 : vector<4x4x32xf32>
    %15 = vector.extract_strided_slice %3 {offsets = [0, 0, 0], sizes = [4, 4, 32], strides = [1, 1, 1]} : vector<5x5x32xf32> to vector<4x4x32xf32>
    %c1_18 = arith.constant 1 : index
    %c0_19 = arith.constant 0 : index
    %16 = vector.load %arg2[%c1_18, %c0_19] : memref<9x32xf32, #tpu.memory_space<vmem>>, vector<1x32xf32>
    %17 = vector.shape_cast %16 : vector<1x32xf32> to vector<1x1x32xf32>
    %18 = vector.broadcast %17 : vector<1x1x32xf32> to vector<4x4x32xf32>
    %19 = arith.mulf %15, %18 : vector<4x4x32xf32>
    %20 = arith.addf %14, %19 : vector<4x4x32xf32>
    %21 = vector.extract_strided_slice %1 {offsets = [0, 1, 0], sizes = [4, 4, 32], strides = [1, 1, 1]} : vector<5x5x32xf32> to vector<4x4x32xf32>
    %c2_20 = arith.constant 2 : index
    %c0_21 = arith.constant 0 : index
    %22 = vector.load %arg2[%c2_20, %c0_21] : memref<9x32xf32, #tpu.memory_space<vmem>>, vector<1x32xf32>
    %23 = vector.shape_cast %22 : vector<1x32xf32> to vector<1x1x32xf32>
    %24 = vector.broadcast %23 : vector<1x1x32xf32> to vector<4x4x32xf32>
    %25 = arith.mulf %21, %24 : vector<4x4x32xf32>
    %26 = arith.addf %20, %25 : vector<4x4x32xf32>
    %27 = vector.extract_strided_slice %5 {offsets = [0, 0, 0], sizes = [4, 4, 32], strides = [1, 1, 1]} : vector<5x5x32xf32> to vector<4x4x32xf32>
    %c3_22 = arith.constant 3 : index
    %c0_23 = arith.constant 0 : index
    %28 = vector.load %arg2[%c3_22, %c0_23] : memref<9x32xf32, #tpu.memory_space<vmem>>, vector<1x32xf32>
    %29 = vector.shape_cast %28 : vector<1x32xf32> to vector<1x1x32xf32>
    %30 = vector.broadcast %29 : vector<1x1x32xf32> to vector<4x4x32xf32>
    %31 = arith.mulf %27, %30 : vector<4x4x32xf32>
    %32 = arith.addf %26, %31 : vector<4x4x32xf32>
    %33 = vector.extract_strided_slice %7 {offsets = [0, 0, 0], sizes = [4, 4, 32], strides = [1, 1, 1]} : vector<5x5x32xf32> to vector<4x4x32xf32>
    %c4 = arith.constant 4 : index
    %c0_24 = arith.constant 0 : index
    %34 = vector.load %arg2[%c4, %c0_24] : memref<9x32xf32, #tpu.memory_space<vmem>>, vector<1x32xf32>
    %35 = vector.shape_cast %34 : vector<1x32xf32> to vector<1x1x32xf32>
    %36 = vector.broadcast %35 : vector<1x1x32xf32> to vector<4x4x32xf32>
    %37 = arith.mulf %33, %36 : vector<4x4x32xf32>
    %38 = arith.addf %32, %37 : vector<4x4x32xf32>
    %39 = vector.extract_strided_slice %5 {offsets = [0, 1, 0], sizes = [4, 4, 32], strides = [1, 1, 1]} : vector<5x5x32xf32> to vector<4x4x32xf32>
    %c5 = arith.constant 5 : index
    %c0_25 = arith.constant 0 : index
    %40 = vector.load %arg2[%c5, %c0_25] : memref<9x32xf32, #tpu.memory_space<vmem>>, vector<1x32xf32>
    %41 = vector.shape_cast %40 : vector<1x32xf32> to vector<1x1x32xf32>
    %42 = vector.broadcast %41 : vector<1x1x32xf32> to vector<4x4x32xf32>
    %43 = arith.mulf %39, %42 : vector<4x4x32xf32>
    %44 = arith.addf %38, %43 : vector<4x4x32xf32>
    %45 = vector.extract_strided_slice %1 {offsets = [1, 0, 0], sizes = [4, 4, 32], strides = [1, 1, 1]} : vector<5x5x32xf32> to vector<4x4x32xf32>
    %c6 = arith.constant 6 : index
    %c0_26 = arith.constant 0 : index
    %46 = vector.load %arg2[%c6, %c0_26] : memref<9x32xf32, #tpu.memory_space<vmem>>, vector<1x32xf32>
    %47 = vector.shape_cast %46 : vector<1x32xf32> to vector<1x1x32xf32>
    %48 = vector.broadcast %47 : vector<1x1x32xf32> to vector<4x4x32xf32>
    %49 = arith.mulf %45, %48 : vector<4x4x32xf32>
    %50 = arith.addf %44, %49 : vector<4x4x32xf32>
    %51 = vector.extract_strided_slice %3 {offsets = [1, 0, 0], sizes = [4, 4, 32], strides = [1, 1, 1]} : vector<5x5x32xf32> to vector<4x4x32xf32>
    %c7 = arith.constant 7 : index
    %c0_27 = arith.constant 0 : index
    %52 = vector.load %arg2[%c7, %c0_27] : memref<9x32xf32, #tpu.memory_space<vmem>>, vector<1x32xf32>
    %53 = vector.shape_cast %52 : vector<1x32xf32> to vector<1x1x32xf32>
    %54 = vector.broadcast %53 : vector<1x1x32xf32> to vector<4x4x32xf32>
    %55 = arith.mulf %51, %54 : vector<4x4x32xf32>
    %56 = arith.addf %50, %55 : vector<4x4x32xf32>
    %57 = vector.extract_strided_slice %1 {offsets = [1, 1, 0], sizes = [4, 4, 32], strides = [1, 1, 1]} : vector<5x5x32xf32> to vector<4x4x32xf32>
    %c8 = arith.constant 8 : index
    %c0_28 = arith.constant 0 : index
    %58 = vector.load %arg2[%c8, %c0_28] : memref<9x32xf32, #tpu.memory_space<vmem>>, vector<1x32xf32>
    %59 = vector.shape_cast %58 : vector<1x32xf32> to vector<1x1x32xf32>
    %60 = vector.broadcast %59 : vector<1x1x32xf32> to vector<4x4x32xf32>
    %61 = arith.mulf %57, %60 : vector<4x4x32xf32>
    %62 = arith.addf %56, %61 : vector<4x4x32xf32>
    %c0_29 = arith.constant 0 : index
    %c0_30 = arith.constant 0 : index
    %63 = vector.load %arg3[%c0_29, %c0_30] : memref<1x32xf32, #tpu.memory_space<vmem>>, vector<1x32xf32>
    %64 = vector.shape_cast %63 : vector<1x32xf32> to vector<1x1x32xf32>
    %65 = vector.broadcast %64 : vector<1x1x32xf32> to vector<4x4x32xf32>
    %66 = arith.addf %62, %65 : vector<4x4x32xf32>
    %cst_31 = arith.constant 0.000000e+00 : f32
    %67 = vector.broadcast %cst_31 : f32 to vector<4x4x32xf32>
    %68 = arith.maximumf %66, %67 : vector<4x4x32xf32>
    %c0_32 = arith.constant 0 : index
    %c0_33 = arith.constant 0 : index
    %69 = vector.load %arg4[%c0_32, %c0_33] : memref<32x64xbf16, #tpu.memory_space<vmem>>, vector<32x64xbf16>
    %c0_34 = arith.constant 0 : index
    %c0_35 = arith.constant 0 : index
    %70 = vector.load %arg5[%c0_34, %c0_35] : memref<1x64xf32, #tpu.memory_space<vmem>>, vector<1x64xf32>
    %71 = vector.extract_strided_slice %68 {offsets = [0, 0, 0], sizes = [1, 4, 32], strides = [1, 1, 1]} : vector<4x4x32xf32> to vector<1x4x32xf32>
    %72 = vector.shape_cast %71 : vector<1x4x32xf32> to vector<4x32xf32>
    %73 = arith.truncf %72 : vector<4x32xf32> to vector<4x32xbf16>
    %cst_36 = arith.constant dense<0.000000e+00> : vector<4x64xf32>
    %74 = tpu.matmul %73, %69, %cst_36 {dimension_numbers = #tpu.dot_dimension_numbers<[1], [0], [0], [1], [0, 0, 1, 1], [], []>} : vector<4x32xbf16>, vector<32x64xbf16>, vector<4x64xf32> -> vector<4x64xf32>
    %75 = vector.broadcast %70 : vector<1x64xf32> to vector<4x64xf32>
    %76 = arith.addf %74, %75 : vector<4x64xf32>
    %cst_37 = arith.constant 0.000000e+00 : f32
    %77 = vector.broadcast %cst_37 : f32 to vector<4x64xf32>
    %78 = arith.maximumf %76, %77 : vector<4x64xf32>
    %c0_38 = arith.constant 0 : index
    %c0_39 = arith.constant 0 : index
    %c0_40 = arith.constant 0 : index
    %c0_41 = arith.constant 0 : index
    %79 = vector.load %arg6[%c0_38, %c0_39, %c0_40, %c0_41] : memref<1x4x4x64xf32, #tpu.memory_space<vmem>>, vector<1x1x4x64xf32>
    %80 = vector.shape_cast %79 : vector<1x1x4x64xf32> to vector<4x64xf32>
    %81 = vector.shape_cast %78 : vector<4x64xf32> to vector<1x1x4x64xf32>
    tpu.vector_store %arg6[%c0_38, %c0_39, %c0_40, %c0_41], %81 {strides = array<i32>} : memref<1x4x4x64xf32, #tpu.memory_space<vmem>>, vector<1x1x4x64xf32>,
    %82 = vector.extract_strided_slice %68 {offsets = [1, 0, 0], sizes = [1, 4, 32], strides = [1, 1, 1]} : vector<4x4x32xf32> to vector<1x4x32xf32>
    %83 = vector.shape_cast %82 : vector<1x4x32xf32> to vector<4x32xf32>
    %84 = arith.truncf %83 : vector<4x32xf32> to vector<4x32xbf16>
    %cst_42 = arith.constant dense<0.000000e+00> : vector<4x64xf32>
    %85 = tpu.matmul %84, %69, %cst_42 {dimension_numbers = #tpu.dot_dimension_numbers<[1], [0], [0], [1], [0, 0, 1, 1], [], []>} : vector<4x32xbf16>, vector<32x64xbf16>, vector<4x64xf32> -> vector<4x64xf32>
    %86 = vector.broadcast %70 : vector<1x64xf32> to vector<4x64xf32>
    %87 = arith.addf %85, %86 : vector<4x64xf32>
    %cst_43 = arith.constant 0.000000e+00 : f32
    %88 = vector.broadcast %cst_43 : f32 to vector<4x64xf32>
    %89 = arith.maximumf %87, %88 : vector<4x64xf32>
    %c0_44 = arith.constant 0 : index
    %c1_45 = arith.constant 1 : index
    %c0_46 = arith.constant 0 : index
    %c0_47 = arith.constant 0 : index
    %90 = vector.load %arg6[%c0_44, %c1_45, %c0_46, %c0_47] : memref<1x4x4x64xf32, #tpu.memory_space<vmem>>, vector<1x1x4x64xf32>
    %91 = vector.shape_cast %90 : vector<1x1x4x64xf32> to vector<4x64xf32>
    %92 = vector.shape_cast %89 : vector<4x64xf32> to vector<1x1x4x64xf32>
    tpu.vector_store %arg6[%c0_44, %c1_45, %c0_46, %c0_47], %92 {strides = array<i32>} : memref<1x4x4x64xf32, #tpu.memory_space<vmem>>, vector<1x1x4x64xf32>,
    %93 = vector.extract_strided_slice %68 {offsets = [2, 0, 0], sizes = [1, 4, 32], strides = [1, 1, 1]} : vector<4x4x32xf32> to vector<1x4x32xf32>
    %94 = vector.shape_cast %93 : vector<1x4x32xf32> to vector<4x32xf32>
    %95 = arith.truncf %94 : vector<4x32xf32> to vector<4x32xbf16>
    %cst_48 = arith.constant dense<0.000000e+00> : vector<4x64xf32>
    %96 = tpu.matmul %95, %69, %cst_48 {dimension_numbers = #tpu.dot_dimension_numbers<[1], [0], [0], [1], [0, 0, 1, 1], [], []>} : vector<4x32xbf16>, vector<32x64xbf16>, vector<4x64xf32> -> vector<4x64xf32>
    %97 = vector.broadcast %70 : vector<1x64xf32> to vector<4x64xf32>
    %98 = arith.addf %96, %97 : vector<4x64xf32>
    %cst_49 = arith.constant 0.000000e+00 : f32
    %99 = vector.broadcast %cst_49 : f32 to vector<4x64xf32>
    %100 = arith.maximumf %98, %99 : vector<4x64xf32>
    %c0_50 = arith.constant 0 : index
    %c2_51 = arith.constant 2 : index
    %c0_52 = arith.constant 0 : index
    %c0_53 = arith.constant 0 : index
    %101 = vector.load %arg6[%c0_50, %c2_51, %c0_52, %c0_53] : memref<1x4x4x64xf32, #tpu.memory_space<vmem>>, vector<1x1x4x64xf32>
    %102 = vector.shape_cast %101 : vector<1x1x4x64xf32> to vector<4x64xf32>
    %103 = vector.shape_cast %100 : vector<4x64xf32> to vector<1x1x4x64xf32>
    tpu.vector_store %arg6[%c0_50, %c2_51, %c0_52, %c0_53], %103 {strides = array<i32>} : memref<1x4x4x64xf32, #tpu.memory_space<vmem>>, vector<1x1x4x64xf32>,
    %104 = vector.extract_strided_slice %68 {offsets = [3, 0, 0], sizes = [1, 4, 32], strides = [1, 1, 1]} : vector<4x4x32xf32> to vector<1x4x32xf32>
    %105 = vector.shape_cast %104 : vector<1x4x32xf32> to vector<4x32xf32>
    %106 = arith.truncf %105 : vector<4x32xf32> to vector<4x32xbf16>
    %cst_54 = arith.constant dense<0.000000e+00> : vector<4x64xf32>
    %107 = tpu.matmul %106, %69, %cst_54 {dimension_numbers = #tpu.dot_dimension_numbers<[1], [0], [0], [1], [0, 0, 1, 1], [], []>} : vector<4x32xbf16>, vector<32x64xbf16>, vector<4x64xf32> -> vector<4x64xf32>
    %108 = vector.broadcast %70 : vector<1x64xf32> to vector<4x64xf32>
    %109 = arith.addf %107, %108 : vector<4x64xf32>
    %cst_55 = arith.constant 0.000000e+00 : f32
    %110 = vector.broadcast %cst_55 : f32 to vector<4x64xf32>
    %111 = arith.maximumf %109, %110 : vector<4x64xf32>
    %c0_56 = arith.constant 0 : index
    %c3_57 = arith.constant 3 : index
    %c0_58 = arith.constant 0 : index
    %c0_59 = arith.constant 0 : index
    %112 = vector.load %arg6[%c0_56, %c3_57, %c0_58, %c0_59] : memref<1x4x4x64xf32, #tpu.memory_space<vmem>>, vector<1x1x4x64xf32>
    %113 = vector.shape_cast %112 : vector<1x1x4x64xf32> to vector<4x64xf32>
    %114 = vector.shape_cast %111 : vector<4x64xf32> to vector<1x1x4x64xf32>
    tpu.vector_store %arg6[%c0_56, %c3_57, %c0_58, %c0_59], %114 {strides = array<i32>} : memref<1x4x4x64xf32, #tpu.memory_space<vmem>>, vector<1x1x4x64xf32>,
    return
  }
  func.func @transform_0(%arg0: i32) -> (i32, i32, i32, i32, i32) {
    %c0_i32 = arith.constant 0 : i32
    %c0_i32_0 = arith.constant 0 : i32
    %c0_i32_1 = arith.constant 0 : i32
    %c0_i32_2 = arith.constant 0 : i32
    %c0_i32_3 = arith.constant 0 : i32
    return %c0_i32, %arg0, %c0_i32_0, %c0_i32_1, %c0_i32_2 : i32, i32, i32, i32, i32
  }
  func.func @transform_1(%arg0: i32) -> (i32, i32) {
    %c0_i32 = arith.constant 0 : i32
    %c0_i32_0 = arith.constant 0 : i32
    %c0_i32_1 = arith.constant 0 : i32
    return %c0_i32, %c0_i32_0 : i32, i32
  }
  func.func @transform_2(%arg0: i32) -> (i32, i32) {
    %c0_i32 = arith.constant 0 : i32
    %c0_i32_0 = arith.constant 0 : i32
    %c0_i32_1 = arith.constant 0 : i32
    return %c0_i32, %c0_i32_0 : i32, i32
  }
  func.func @transform_3(%arg0: i32) -> (i32, i32) {
    %c0_i32 = arith.constant 0 : i32
    %c0_i32_0 = arith.constant 0 : i32
    %c0_i32_1 = arith.constant 0 : i32
    return %c0_i32, %c0_i32_0 : i32, i32
  }
  func.func @transform_4(%arg0: i32) -> (i32, i32) {
    %c0_i32 = arith.constant 0 : i32
    %c0_i32_0 = arith.constant 0 : i32
    %c0_i32_1 = arith.constant 0 : i32
    return %c0_i32, %c0_i32_0 : i32, i32
  }
  func.func @transform_5(%arg0: i32) -> (i32, i32, i32, i32) {
    %c0_i32 = arith.constant 0 : i32
    %c0_i32_0 = arith.constant 0 : i32
    %c0_i32_1 = arith.constant 0 : i32
    %c0_i32_2 = arith.constant 0 : i32
    return %arg0, %c0_i32, %c0_i32_0, %c0_i32_1 : i32, i32, i32, i32
  }
}

module attributes {stable_mosaic.version = 11 : i64} {
  func.func @_dws_block_kernel(%arg0: i32, %arg1: memref<1x1x6x6x64xf32, #tpu.memory_space<vmem>>, %arg2: memref<9x64xf32, #tpu.memory_space<vmem>>, %arg3: memref<1x64xf32, #tpu.memory_space<vmem>>, %arg4: memref<64x64xbf16, #tpu.memory_space<vmem>>, %arg5: memref<1x64xf32, #tpu.memory_space<vmem>>, %arg6: memref<1x4x4x64xf32, #tpu.memory_space<vmem>>) attributes {dimension_semantics = [#tpu.dimension_semantics<parallel>], iteration_bounds = array<i64: 2>, scalar_prefetch = 0 : i64, scratch_operands = 0 : i64, tpu.core_type = #tpu.core_type<tc>, window_params = [{transform_indices = @transform_0, window_bounds = array<i64: 1, 1, 6, 6, 64>}, {pipeline_mode = #tpu.pipeline_mode<synchronous>, transform_indices = @transform_1, window_bounds = array<i64: 9, 64>}, {pipeline_mode = #tpu.pipeline_mode<synchronous>, transform_indices = @transform_2, window_bounds = array<i64: 1, 64>}, {pipeline_mode = #tpu.pipeline_mode<synchronous>, transform_indices = @transform_3, window_bounds = array<i64: 64, 64>}, {pipeline_mode = #tpu.pipeline_mode<synchronous>, transform_indices = @transform_4, window_bounds = array<i64: 1, 64>}, {transform_indices = @transform_5, window_bounds = array<i64: 1, 4, 4, 64>}]} {
    %c0 = arith.constant 0 : index
    %c0_0 = arith.constant 0 : index
    %c0_1 = arith.constant 0 : index
    %c0_2 = arith.constant 0 : index
    %c0_3 = arith.constant 0 : index
    %0 = vector.load %arg1[%c0, %c0_0, %c0_1, %c0_2, %c0_3] : memref<1x1x6x6x64xf32, #tpu.memory_space<vmem>>, vector<1x1x6x6x64xf32>
    %1 = vector.shape_cast %0 : vector<1x1x6x6x64xf32> to vector<6x6x64xf32>
    %cst = arith.constant 0.000000e+00 : f32
    %2 = vector.broadcast %cst : f32 to vector<4x4x64xf32>
    %3 = vector.extract_strided_slice %1 {offsets = [0, 0, 0], sizes = [4, 4, 64], strides = [1, 1, 1]} : vector<6x6x64xf32> to vector<4x4x64xf32>
    %c0_4 = arith.constant 0 : index
    %c0_5 = arith.constant 0 : index
    %4 = vector.load %arg2[%c0_4, %c0_5] : memref<9x64xf32, #tpu.memory_space<vmem>>, vector<1x64xf32>
    %5 = vector.shape_cast %4 : vector<1x64xf32> to vector<1x1x64xf32>
    %6 = vector.broadcast %5 : vector<1x1x64xf32> to vector<4x4x64xf32>
    %7 = arith.mulf %3, %6 : vector<4x4x64xf32>
    %8 = arith.addf %2, %7 : vector<4x4x64xf32>
    %9 = vector.extract_strided_slice %1 {offsets = [0, 1, 0], sizes = [4, 4, 64], strides = [1, 1, 1]} : vector<6x6x64xf32> to vector<4x4x64xf32>
    %c1 = arith.constant 1 : index
    %c0_6 = arith.constant 0 : index
    %10 = vector.load %arg2[%c1, %c0_6] : memref<9x64xf32, #tpu.memory_space<vmem>>, vector<1x64xf32>
    %11 = vector.shape_cast %10 : vector<1x64xf32> to vector<1x1x64xf32>
    %12 = vector.broadcast %11 : vector<1x1x64xf32> to vector<4x4x64xf32>
    %13 = arith.mulf %9, %12 : vector<4x4x64xf32>
    %14 = arith.addf %8, %13 : vector<4x4x64xf32>
    %15 = vector.extract_strided_slice %1 {offsets = [0, 2, 0], sizes = [4, 4, 64], strides = [1, 1, 1]} : vector<6x6x64xf32> to vector<4x4x64xf32>
    %c2 = arith.constant 2 : index
    %c0_7 = arith.constant 0 : index
    %16 = vector.load %arg2[%c2, %c0_7] : memref<9x64xf32, #tpu.memory_space<vmem>>, vector<1x64xf32>
    %17 = vector.shape_cast %16 : vector<1x64xf32> to vector<1x1x64xf32>
    %18 = vector.broadcast %17 : vector<1x1x64xf32> to vector<4x4x64xf32>
    %19 = arith.mulf %15, %18 : vector<4x4x64xf32>
    %20 = arith.addf %14, %19 : vector<4x4x64xf32>
    %21 = vector.extract_strided_slice %1 {offsets = [1, 0, 0], sizes = [4, 4, 64], strides = [1, 1, 1]} : vector<6x6x64xf32> to vector<4x4x64xf32>
    %c3 = arith.constant 3 : index
    %c0_8 = arith.constant 0 : index
    %22 = vector.load %arg2[%c3, %c0_8] : memref<9x64xf32, #tpu.memory_space<vmem>>, vector<1x64xf32>
    %23 = vector.shape_cast %22 : vector<1x64xf32> to vector<1x1x64xf32>
    %24 = vector.broadcast %23 : vector<1x1x64xf32> to vector<4x4x64xf32>
    %25 = arith.mulf %21, %24 : vector<4x4x64xf32>
    %26 = arith.addf %20, %25 : vector<4x4x64xf32>
    %27 = vector.extract_strided_slice %1 {offsets = [1, 1, 0], sizes = [4, 4, 64], strides = [1, 1, 1]} : vector<6x6x64xf32> to vector<4x4x64xf32>
    %c4 = arith.constant 4 : index
    %c0_9 = arith.constant 0 : index
    %28 = vector.load %arg2[%c4, %c0_9] : memref<9x64xf32, #tpu.memory_space<vmem>>, vector<1x64xf32>
    %29 = vector.shape_cast %28 : vector<1x64xf32> to vector<1x1x64xf32>
    %30 = vector.broadcast %29 : vector<1x1x64xf32> to vector<4x4x64xf32>
    %31 = arith.mulf %27, %30 : vector<4x4x64xf32>
    %32 = arith.addf %26, %31 : vector<4x4x64xf32>
    %33 = vector.extract_strided_slice %1 {offsets = [1, 2, 0], sizes = [4, 4, 64], strides = [1, 1, 1]} : vector<6x6x64xf32> to vector<4x4x64xf32>
    %c5 = arith.constant 5 : index
    %c0_10 = arith.constant 0 : index
    %34 = vector.load %arg2[%c5, %c0_10] : memref<9x64xf32, #tpu.memory_space<vmem>>, vector<1x64xf32>
    %35 = vector.shape_cast %34 : vector<1x64xf32> to vector<1x1x64xf32>
    %36 = vector.broadcast %35 : vector<1x1x64xf32> to vector<4x4x64xf32>
    %37 = arith.mulf %33, %36 : vector<4x4x64xf32>
    %38 = arith.addf %32, %37 : vector<4x4x64xf32>
    %39 = vector.extract_strided_slice %1 {offsets = [2, 0, 0], sizes = [4, 4, 64], strides = [1, 1, 1]} : vector<6x6x64xf32> to vector<4x4x64xf32>
    %c6 = arith.constant 6 : index
    %c0_11 = arith.constant 0 : index
    %40 = vector.load %arg2[%c6, %c0_11] : memref<9x64xf32, #tpu.memory_space<vmem>>, vector<1x64xf32>
    %41 = vector.shape_cast %40 : vector<1x64xf32> to vector<1x1x64xf32>
    %42 = vector.broadcast %41 : vector<1x1x64xf32> to vector<4x4x64xf32>
    %43 = arith.mulf %39, %42 : vector<4x4x64xf32>
    %44 = arith.addf %38, %43 : vector<4x4x64xf32>
    %45 = vector.extract_strided_slice %1 {offsets = [2, 1, 0], sizes = [4, 4, 64], strides = [1, 1, 1]} : vector<6x6x64xf32> to vector<4x4x64xf32>
    %c7 = arith.constant 7 : index
    %c0_12 = arith.constant 0 : index
    %46 = vector.load %arg2[%c7, %c0_12] : memref<9x64xf32, #tpu.memory_space<vmem>>, vector<1x64xf32>
    %47 = vector.shape_cast %46 : vector<1x64xf32> to vector<1x1x64xf32>
    %48 = vector.broadcast %47 : vector<1x1x64xf32> to vector<4x4x64xf32>
    %49 = arith.mulf %45, %48 : vector<4x4x64xf32>
    %50 = arith.addf %44, %49 : vector<4x4x64xf32>
    %51 = vector.extract_strided_slice %1 {offsets = [2, 2, 0], sizes = [4, 4, 64], strides = [1, 1, 1]} : vector<6x6x64xf32> to vector<4x4x64xf32>
    %c8 = arith.constant 8 : index
    %c0_13 = arith.constant 0 : index
    %52 = vector.load %arg2[%c8, %c0_13] : memref<9x64xf32, #tpu.memory_space<vmem>>, vector<1x64xf32>
    %53 = vector.shape_cast %52 : vector<1x64xf32> to vector<1x1x64xf32>
    %54 = vector.broadcast %53 : vector<1x1x64xf32> to vector<4x4x64xf32>
    %55 = arith.mulf %51, %54 : vector<4x4x64xf32>
    %56 = arith.addf %50, %55 : vector<4x4x64xf32>
    %c0_14 = arith.constant 0 : index
    %c0_15 = arith.constant 0 : index
    %57 = vector.load %arg3[%c0_14, %c0_15] : memref<1x64xf32, #tpu.memory_space<vmem>>, vector<1x64xf32>
    %58 = vector.shape_cast %57 : vector<1x64xf32> to vector<1x1x64xf32>
    %59 = vector.broadcast %58 : vector<1x1x64xf32> to vector<4x4x64xf32>
    %60 = arith.addf %56, %59 : vector<4x4x64xf32>
    %cst_16 = arith.constant 0.000000e+00 : f32
    %61 = vector.broadcast %cst_16 : f32 to vector<4x4x64xf32>
    %62 = arith.maximumf %60, %61 : vector<4x4x64xf32>
    %c0_17 = arith.constant 0 : index
    %c0_18 = arith.constant 0 : index
    %63 = vector.load %arg4[%c0_17, %c0_18] : memref<64x64xbf16, #tpu.memory_space<vmem>>, vector<64x64xbf16>
    %c0_19 = arith.constant 0 : index
    %c0_20 = arith.constant 0 : index
    %64 = vector.load %arg5[%c0_19, %c0_20] : memref<1x64xf32, #tpu.memory_space<vmem>>, vector<1x64xf32>
    %65 = vector.extract_strided_slice %62 {offsets = [0, 0, 0], sizes = [1, 4, 64], strides = [1, 1, 1]} : vector<4x4x64xf32> to vector<1x4x64xf32>
    %66 = vector.shape_cast %65 : vector<1x4x64xf32> to vector<4x64xf32>
    %67 = arith.truncf %66 : vector<4x64xf32> to vector<4x64xbf16>
    %cst_21 = arith.constant dense<0.000000e+00> : vector<4x64xf32>
    %68 = tpu.matmul %67, %63, %cst_21 {dimension_numbers = #tpu.dot_dimension_numbers<[1], [0], [0], [1], [0, 0, 1, 1], [], []>} : vector<4x64xbf16>, vector<64x64xbf16>, vector<4x64xf32> -> vector<4x64xf32>
    %69 = vector.broadcast %64 : vector<1x64xf32> to vector<4x64xf32>
    %70 = arith.addf %68, %69 : vector<4x64xf32>
    %cst_22 = arith.constant 0.000000e+00 : f32
    %71 = vector.broadcast %cst_22 : f32 to vector<4x64xf32>
    %72 = arith.maximumf %70, %71 : vector<4x64xf32>
    %c0_23 = arith.constant 0 : index
    %c0_24 = arith.constant 0 : index
    %c0_25 = arith.constant 0 : index
    %c0_26 = arith.constant 0 : index
    %73 = vector.load %arg6[%c0_23, %c0_24, %c0_25, %c0_26] : memref<1x4x4x64xf32, #tpu.memory_space<vmem>>, vector<1x1x4x64xf32>
    %74 = vector.shape_cast %73 : vector<1x1x4x64xf32> to vector<4x64xf32>
    %75 = vector.shape_cast %72 : vector<4x64xf32> to vector<1x1x4x64xf32>
    tpu.vector_store %arg6[%c0_23, %c0_24, %c0_25, %c0_26], %75 {strides = array<i32>} : memref<1x4x4x64xf32, #tpu.memory_space<vmem>>, vector<1x1x4x64xf32>,
    %76 = vector.extract_strided_slice %62 {offsets = [1, 0, 0], sizes = [1, 4, 64], strides = [1, 1, 1]} : vector<4x4x64xf32> to vector<1x4x64xf32>
    %77 = vector.shape_cast %76 : vector<1x4x64xf32> to vector<4x64xf32>
    %78 = arith.truncf %77 : vector<4x64xf32> to vector<4x64xbf16>
    %cst_27 = arith.constant dense<0.000000e+00> : vector<4x64xf32>
    %79 = tpu.matmul %78, %63, %cst_27 {dimension_numbers = #tpu.dot_dimension_numbers<[1], [0], [0], [1], [0, 0, 1, 1], [], []>} : vector<4x64xbf16>, vector<64x64xbf16>, vector<4x64xf32> -> vector<4x64xf32>
    %80 = vector.broadcast %64 : vector<1x64xf32> to vector<4x64xf32>
    %81 = arith.addf %79, %80 : vector<4x64xf32>
    %cst_28 = arith.constant 0.000000e+00 : f32
    %82 = vector.broadcast %cst_28 : f32 to vector<4x64xf32>
    %83 = arith.maximumf %81, %82 : vector<4x64xf32>
    %c0_29 = arith.constant 0 : index
    %c1_30 = arith.constant 1 : index
    %c0_31 = arith.constant 0 : index
    %c0_32 = arith.constant 0 : index
    %84 = vector.load %arg6[%c0_29, %c1_30, %c0_31, %c0_32] : memref<1x4x4x64xf32, #tpu.memory_space<vmem>>, vector<1x1x4x64xf32>
    %85 = vector.shape_cast %84 : vector<1x1x4x64xf32> to vector<4x64xf32>
    %86 = vector.shape_cast %83 : vector<4x64xf32> to vector<1x1x4x64xf32>
    tpu.vector_store %arg6[%c0_29, %c1_30, %c0_31, %c0_32], %86 {strides = array<i32>} : memref<1x4x4x64xf32, #tpu.memory_space<vmem>>, vector<1x1x4x64xf32>,
    %87 = vector.extract_strided_slice %62 {offsets = [2, 0, 0], sizes = [1, 4, 64], strides = [1, 1, 1]} : vector<4x4x64xf32> to vector<1x4x64xf32>
    %88 = vector.shape_cast %87 : vector<1x4x64xf32> to vector<4x64xf32>
    %89 = arith.truncf %88 : vector<4x64xf32> to vector<4x64xbf16>
    %cst_33 = arith.constant dense<0.000000e+00> : vector<4x64xf32>
    %90 = tpu.matmul %89, %63, %cst_33 {dimension_numbers = #tpu.dot_dimension_numbers<[1], [0], [0], [1], [0, 0, 1, 1], [], []>} : vector<4x64xbf16>, vector<64x64xbf16>, vector<4x64xf32> -> vector<4x64xf32>
    %91 = vector.broadcast %64 : vector<1x64xf32> to vector<4x64xf32>
    %92 = arith.addf %90, %91 : vector<4x64xf32>
    %cst_34 = arith.constant 0.000000e+00 : f32
    %93 = vector.broadcast %cst_34 : f32 to vector<4x64xf32>
    %94 = arith.maximumf %92, %93 : vector<4x64xf32>
    %c0_35 = arith.constant 0 : index
    %c2_36 = arith.constant 2 : index
    %c0_37 = arith.constant 0 : index
    %c0_38 = arith.constant 0 : index
    %95 = vector.load %arg6[%c0_35, %c2_36, %c0_37, %c0_38] : memref<1x4x4x64xf32, #tpu.memory_space<vmem>>, vector<1x1x4x64xf32>
    %96 = vector.shape_cast %95 : vector<1x1x4x64xf32> to vector<4x64xf32>
    %97 = vector.shape_cast %94 : vector<4x64xf32> to vector<1x1x4x64xf32>
    tpu.vector_store %arg6[%c0_35, %c2_36, %c0_37, %c0_38], %97 {strides = array<i32>} : memref<1x4x4x64xf32, #tpu.memory_space<vmem>>, vector<1x1x4x64xf32>,
    %98 = vector.extract_strided_slice %62 {offsets = [3, 0, 0], sizes = [1, 4, 64], strides = [1, 1, 1]} : vector<4x4x64xf32> to vector<1x4x64xf32>
    %99 = vector.shape_cast %98 : vector<1x4x64xf32> to vector<4x64xf32>
    %100 = arith.truncf %99 : vector<4x64xf32> to vector<4x64xbf16>
    %cst_39 = arith.constant dense<0.000000e+00> : vector<4x64xf32>
    %101 = tpu.matmul %100, %63, %cst_39 {dimension_numbers = #tpu.dot_dimension_numbers<[1], [0], [0], [1], [0, 0, 1, 1], [], []>} : vector<4x64xbf16>, vector<64x64xbf16>, vector<4x64xf32> -> vector<4x64xf32>
    %102 = vector.broadcast %64 : vector<1x64xf32> to vector<4x64xf32>
    %103 = arith.addf %101, %102 : vector<4x64xf32>
    %cst_40 = arith.constant 0.000000e+00 : f32
    %104 = vector.broadcast %cst_40 : f32 to vector<4x64xf32>
    %105 = arith.maximumf %103, %104 : vector<4x64xf32>
    %c0_41 = arith.constant 0 : index
    %c3_42 = arith.constant 3 : index
    %c0_43 = arith.constant 0 : index
    %c0_44 = arith.constant 0 : index
    %106 = vector.load %arg6[%c0_41, %c3_42, %c0_43, %c0_44] : memref<1x4x4x64xf32, #tpu.memory_space<vmem>>, vector<1x1x4x64xf32>
    %107 = vector.shape_cast %106 : vector<1x1x4x64xf32> to vector<4x64xf32>
    %108 = vector.shape_cast %105 : vector<4x64xf32> to vector<1x1x4x64xf32>
    tpu.vector_store %arg6[%c0_41, %c3_42, %c0_43, %c0_44], %108 {strides = array<i32>} : memref<1x4x4x64xf32, #tpu.memory_space<vmem>>, vector<1x1x4x64xf32>,
    return
  }
  func.func @transform_0(%arg0: i32) -> (i32, i32, i32, i32, i32) {
    %c0_i32 = arith.constant 0 : i32
    %c0_i32_0 = arith.constant 0 : i32
    %c0_i32_1 = arith.constant 0 : i32
    %c0_i32_2 = arith.constant 0 : i32
    %c0_i32_3 = arith.constant 0 : i32
    return %c0_i32, %arg0, %c0_i32_0, %c0_i32_1, %c0_i32_2 : i32, i32, i32, i32, i32
  }
  func.func @transform_1(%arg0: i32) -> (i32, i32) {
    %c0_i32 = arith.constant 0 : i32
    %c0_i32_0 = arith.constant 0 : i32
    %c0_i32_1 = arith.constant 0 : i32
    return %c0_i32, %c0_i32_0 : i32, i32
  }
  func.func @transform_2(%arg0: i32) -> (i32, i32) {
    %c0_i32 = arith.constant 0 : i32
    %c0_i32_0 = arith.constant 0 : i32
    %c0_i32_1 = arith.constant 0 : i32
    return %c0_i32, %c0_i32_0 : i32, i32
  }
  func.func @transform_3(%arg0: i32) -> (i32, i32) {
    %c0_i32 = arith.constant 0 : i32
    %c0_i32_0 = arith.constant 0 : i32
    %c0_i32_1 = arith.constant 0 : i32
    return %c0_i32, %c0_i32_0 : i32, i32
  }
  func.func @transform_4(%arg0: i32) -> (i32, i32) {
    %c0_i32 = arith.constant 0 : i32
    %c0_i32_0 = arith.constant 0 : i32
    %c0_i32_1 = arith.constant 0 : i32
    return %c0_i32, %c0_i32_0 : i32, i32
  }
  func.func @transform_5(%arg0: i32) -> (i32, i32, i32, i32) {
    %c0_i32 = arith.constant 0 : i32
    %c0_i32_0 = arith.constant 0 : i32
    %c0_i32_1 = arith.constant 0 : i32
    %c0_i32_2 = arith.constant 0 : i32
    return %arg0, %c0_i32, %c0_i32_0, %c0_i32_1 : i32, i32, i32, i32
  }
}

module attributes {stable_mosaic.version = 11 : i64} {
  func.func @_dws_block_kernel(%arg0: i32, %arg1: memref<4x1x3x3x64xf32, #tpu.memory_space<vmem>>, %arg2: memref<9x64xf32, #tpu.memory_space<vmem>>, %arg3: memref<1x64xf32, #tpu.memory_space<vmem>>, %arg4: memref<64x128xbf16, #tpu.memory_space<vmem>>, %arg5: memref<1x128xf32, #tpu.memory_space<vmem>>, %arg6: memref<1x2x2x128xf32, #tpu.memory_space<vmem>>) attributes {dimension_semantics = [#tpu.dimension_semantics<parallel>], iteration_bounds = array<i64: 2>, scalar_prefetch = 0 : i64, scratch_operands = 0 : i64, tpu.core_type = #tpu.core_type<tc>, window_params = [{transform_indices = @transform_0, window_bounds = array<i64: 4, 1, 3, 3, 64>}, {pipeline_mode = #tpu.pipeline_mode<synchronous>, transform_indices = @transform_1, window_bounds = array<i64: 9, 64>}, {pipeline_mode = #tpu.pipeline_mode<synchronous>, transform_indices = @transform_2, window_bounds = array<i64: 1, 64>}, {pipeline_mode = #tpu.pipeline_mode<synchronous>, transform_indices = @transform_3, window_bounds = array<i64: 64, 128>}, {pipeline_mode = #tpu.pipeline_mode<synchronous>, transform_indices = @transform_4, window_bounds = array<i64: 1, 128>}, {transform_indices = @transform_5, window_bounds = array<i64: 1, 2, 2, 128>}]} {
    %c0 = arith.constant 0 : index
    %c0_0 = arith.constant 0 : index
    %c0_1 = arith.constant 0 : index
    %c0_2 = arith.constant 0 : index
    %c0_3 = arith.constant 0 : index
    %0 = vector.load %arg1[%c0, %c0_0, %c0_1, %c0_2, %c0_3] : memref<4x1x3x3x64xf32, #tpu.memory_space<vmem>>, vector<1x1x3x3x64xf32>
    %1 = vector.shape_cast %0 : vector<1x1x3x3x64xf32> to vector<3x3x64xf32>
    %c1 = arith.constant 1 : index
    %c0_4 = arith.constant 0 : index
    %c0_5 = arith.constant 0 : index
    %c0_6 = arith.constant 0 : index
    %c0_7 = arith.constant 0 : index
    %2 = vector.load %arg1[%c1, %c0_4, %c0_5, %c0_6, %c0_7] : memref<4x1x3x3x64xf32, #tpu.memory_space<vmem>>, vector<1x1x3x3x64xf32>
    %3 = vector.shape_cast %2 : vector<1x1x3x3x64xf32> to vector<3x3x64xf32>
    %c2 = arith.constant 2 : index
    %c0_8 = arith.constant 0 : index
    %c0_9 = arith.constant 0 : index
    %c0_10 = arith.constant 0 : index
    %c0_11 = arith.constant 0 : index
    %4 = vector.load %arg1[%c2, %c0_8, %c0_9, %c0_10, %c0_11] : memref<4x1x3x3x64xf32, #tpu.memory_space<vmem>>, vector<1x1x3x3x64xf32>
    %5 = vector.shape_cast %4 : vector<1x1x3x3x64xf32> to vector<3x3x64xf32>
    %c3 = arith.constant 3 : index
    %c0_12 = arith.constant 0 : index
    %c0_13 = arith.constant 0 : index
    %c0_14 = arith.constant 0 : index
    %c0_15 = arith.constant 0 : index
    %6 = vector.load %arg1[%c3, %c0_12, %c0_13, %c0_14, %c0_15] : memref<4x1x3x3x64xf32, #tpu.memory_space<vmem>>, vector<1x1x3x3x64xf32>
    %7 = vector.shape_cast %6 : vector<1x1x3x3x64xf32> to vector<3x3x64xf32>
    %cst = arith.constant 0.000000e+00 : f32
    %8 = vector.broadcast %cst : f32 to vector<2x2x64xf32>
    %9 = vector.extract_strided_slice %1 {offsets = [0, 0, 0], sizes = [2, 2, 64], strides = [1, 1, 1]} : vector<3x3x64xf32> to vector<2x2x64xf32>
    %c0_16 = arith.constant 0 : index
    %c0_17 = arith.constant 0 : index
    %10 = vector.load %arg2[%c0_16, %c0_17] : memref<9x64xf32, #tpu.memory_space<vmem>>, vector<1x64xf32>
    %11 = vector.shape_cast %10 : vector<1x64xf32> to vector<1x1x64xf32>
    %12 = vector.broadcast %11 : vector<1x1x64xf32> to vector<2x2x64xf32>
    %13 = arith.mulf %9, %12 : vector<2x2x64xf32>
    %14 = arith.addf %8, %13 : vector<2x2x64xf32>
    %15 = vector.extract_strided_slice %3 {offsets = [0, 0, 0], sizes = [2, 2, 64], strides = [1, 1, 1]} : vector<3x3x64xf32> to vector<2x2x64xf32>
    %c1_18 = arith.constant 1 : index
    %c0_19 = arith.constant 0 : index
    %16 = vector.load %arg2[%c1_18, %c0_19] : memref<9x64xf32, #tpu.memory_space<vmem>>, vector<1x64xf32>
    %17 = vector.shape_cast %16 : vector<1x64xf32> to vector<1x1x64xf32>
    %18 = vector.broadcast %17 : vector<1x1x64xf32> to vector<2x2x64xf32>
    %19 = arith.mulf %15, %18 : vector<2x2x64xf32>
    %20 = arith.addf %14, %19 : vector<2x2x64xf32>
    %21 = vector.extract_strided_slice %1 {offsets = [0, 1, 0], sizes = [2, 2, 64], strides = [1, 1, 1]} : vector<3x3x64xf32> to vector<2x2x64xf32>
    %c2_20 = arith.constant 2 : index
    %c0_21 = arith.constant 0 : index
    %22 = vector.load %arg2[%c2_20, %c0_21] : memref<9x64xf32, #tpu.memory_space<vmem>>, vector<1x64xf32>
    %23 = vector.shape_cast %22 : vector<1x64xf32> to vector<1x1x64xf32>
    %24 = vector.broadcast %23 : vector<1x1x64xf32> to vector<2x2x64xf32>
    %25 = arith.mulf %21, %24 : vector<2x2x64xf32>
    %26 = arith.addf %20, %25 : vector<2x2x64xf32>
    %27 = vector.extract_strided_slice %5 {offsets = [0, 0, 0], sizes = [2, 2, 64], strides = [1, 1, 1]} : vector<3x3x64xf32> to vector<2x2x64xf32>
    %c3_22 = arith.constant 3 : index
    %c0_23 = arith.constant 0 : index
    %28 = vector.load %arg2[%c3_22, %c0_23] : memref<9x64xf32, #tpu.memory_space<vmem>>, vector<1x64xf32>
    %29 = vector.shape_cast %28 : vector<1x64xf32> to vector<1x1x64xf32>
    %30 = vector.broadcast %29 : vector<1x1x64xf32> to vector<2x2x64xf32>
    %31 = arith.mulf %27, %30 : vector<2x2x64xf32>
    %32 = arith.addf %26, %31 : vector<2x2x64xf32>
    %33 = vector.extract_strided_slice %7 {offsets = [0, 0, 0], sizes = [2, 2, 64], strides = [1, 1, 1]} : vector<3x3x64xf32> to vector<2x2x64xf32>
    %c4 = arith.constant 4 : index
    %c0_24 = arith.constant 0 : index
    %34 = vector.load %arg2[%c4, %c0_24] : memref<9x64xf32, #tpu.memory_space<vmem>>, vector<1x64xf32>
    %35 = vector.shape_cast %34 : vector<1x64xf32> to vector<1x1x64xf32>
    %36 = vector.broadcast %35 : vector<1x1x64xf32> to vector<2x2x64xf32>
    %37 = arith.mulf %33, %36 : vector<2x2x64xf32>
    %38 = arith.addf %32, %37 : vector<2x2x64xf32>
    %39 = vector.extract_strided_slice %5 {offsets = [0, 1, 0], sizes = [2, 2, 64], strides = [1, 1, 1]} : vector<3x3x64xf32> to vector<2x2x64xf32>
    %c5 = arith.constant 5 : index
    %c0_25 = arith.constant 0 : index
    %40 = vector.load %arg2[%c5, %c0_25] : memref<9x64xf32, #tpu.memory_space<vmem>>, vector<1x64xf32>
    %41 = vector.shape_cast %40 : vector<1x64xf32> to vector<1x1x64xf32>
    %42 = vector.broadcast %41 : vector<1x1x64xf32> to vector<2x2x64xf32>
    %43 = arith.mulf %39, %42 : vector<2x2x64xf32>
    %44 = arith.addf %38, %43 : vector<2x2x64xf32>
    %45 = vector.extract_strided_slice %1 {offsets = [1, 0, 0], sizes = [2, 2, 64], strides = [1, 1, 1]} : vector<3x3x64xf32> to vector<2x2x64xf32>
    %c6 = arith.constant 6 : index
    %c0_26 = arith.constant 0 : index
    %46 = vector.load %arg2[%c6, %c0_26] : memref<9x64xf32, #tpu.memory_space<vmem>>, vector<1x64xf32>
    %47 = vector.shape_cast %46 : vector<1x64xf32> to vector<1x1x64xf32>
    %48 = vector.broadcast %47 : vector<1x1x64xf32> to vector<2x2x64xf32>
    %49 = arith.mulf %45, %48 : vector<2x2x64xf32>
    %50 = arith.addf %44, %49 : vector<2x2x64xf32>
    %51 = vector.extract_strided_slice %3 {offsets = [1, 0, 0], sizes = [2, 2, 64], strides = [1, 1, 1]} : vector<3x3x64xf32> to vector<2x2x64xf32>
    %c7 = arith.constant 7 : index
    %c0_27 = arith.constant 0 : index
    %52 = vector.load %arg2[%c7, %c0_27] : memref<9x64xf32, #tpu.memory_space<vmem>>, vector<1x64xf32>
    %53 = vector.shape_cast %52 : vector<1x64xf32> to vector<1x1x64xf32>
    %54 = vector.broadcast %53 : vector<1x1x64xf32> to vector<2x2x64xf32>
    %55 = arith.mulf %51, %54 : vector<2x2x64xf32>
    %56 = arith.addf %50, %55 : vector<2x2x64xf32>
    %57 = vector.extract_strided_slice %1 {offsets = [1, 1, 0], sizes = [2, 2, 64], strides = [1, 1, 1]} : vector<3x3x64xf32> to vector<2x2x64xf32>
    %c8 = arith.constant 8 : index
    %c0_28 = arith.constant 0 : index
    %58 = vector.load %arg2[%c8, %c0_28] : memref<9x64xf32, #tpu.memory_space<vmem>>, vector<1x64xf32>
    %59 = vector.shape_cast %58 : vector<1x64xf32> to vector<1x1x64xf32>
    %60 = vector.broadcast %59 : vector<1x1x64xf32> to vector<2x2x64xf32>
    %61 = arith.mulf %57, %60 : vector<2x2x64xf32>
    %62 = arith.addf %56, %61 : vector<2x2x64xf32>
    %c0_29 = arith.constant 0 : index
    %c0_30 = arith.constant 0 : index
    %63 = vector.load %arg3[%c0_29, %c0_30] : memref<1x64xf32, #tpu.memory_space<vmem>>, vector<1x64xf32>
    %64 = vector.shape_cast %63 : vector<1x64xf32> to vector<1x1x64xf32>
    %65 = vector.broadcast %64 : vector<1x1x64xf32> to vector<2x2x64xf32>
    %66 = arith.addf %62, %65 : vector<2x2x64xf32>
    %cst_31 = arith.constant 0.000000e+00 : f32
    %67 = vector.broadcast %cst_31 : f32 to vector<2x2x64xf32>
    %68 = arith.maximumf %66, %67 : vector<2x2x64xf32>
    %c0_32 = arith.constant 0 : index
    %c0_33 = arith.constant 0 : index
    %69 = vector.load %arg4[%c0_32, %c0_33] : memref<64x128xbf16, #tpu.memory_space<vmem>>, vector<64x128xbf16>
    %c0_34 = arith.constant 0 : index
    %c0_35 = arith.constant 0 : index
    %70 = vector.load %arg5[%c0_34, %c0_35] : memref<1x128xf32, #tpu.memory_space<vmem>>, vector<1x128xf32>
    %71 = vector.extract_strided_slice %68 {offsets = [0, 0, 0], sizes = [1, 2, 64], strides = [1, 1, 1]} : vector<2x2x64xf32> to vector<1x2x64xf32>
    %72 = vector.shape_cast %71 : vector<1x2x64xf32> to vector<2x64xf32>
    %73 = arith.truncf %72 : vector<2x64xf32> to vector<2x64xbf16>
    %cst_36 = arith.constant dense<0.000000e+00> : vector<2x128xf32>
    %74 = tpu.matmul %73, %69, %cst_36 {dimension_numbers = #tpu.dot_dimension_numbers<[1], [0], [0], [1], [0, 0, 1, 1], [], []>} : vector<2x64xbf16>, vector<64x128xbf16>, vector<2x128xf32> -> vector<2x128xf32>
    %75 = vector.broadcast %70 : vector<1x128xf32> to vector<2x128xf32>
    %76 = arith.addf %74, %75 : vector<2x128xf32>
    %cst_37 = arith.constant 0.000000e+00 : f32
    %77 = vector.broadcast %cst_37 : f32 to vector<2x128xf32>
    %78 = arith.maximumf %76, %77 : vector<2x128xf32>
    %c0_38 = arith.constant 0 : index
    %c0_39 = arith.constant 0 : index
    %c0_40 = arith.constant 0 : index
    %c0_41 = arith.constant 0 : index
    %79 = vector.load %arg6[%c0_38, %c0_39, %c0_40, %c0_41] : memref<1x2x2x128xf32, #tpu.memory_space<vmem>>, vector<1x1x2x128xf32>
    %80 = vector.shape_cast %79 : vector<1x1x2x128xf32> to vector<2x128xf32>
    %81 = vector.shape_cast %78 : vector<2x128xf32> to vector<1x1x2x128xf32>
    tpu.vector_store %arg6[%c0_38, %c0_39, %c0_40, %c0_41], %81 {strides = array<i32>} : memref<1x2x2x128xf32, #tpu.memory_space<vmem>>, vector<1x1x2x128xf32>,
    %82 = vector.extract_strided_slice %68 {offsets = [1, 0, 0], sizes = [1, 2, 64], strides = [1, 1, 1]} : vector<2x2x64xf32> to vector<1x2x64xf32>
    %83 = vector.shape_cast %82 : vector<1x2x64xf32> to vector<2x64xf32>
    %84 = arith.truncf %83 : vector<2x64xf32> to vector<2x64xbf16>
    %cst_42 = arith.constant dense<0.000000e+00> : vector<2x128xf32>
    %85 = tpu.matmul %84, %69, %cst_42 {dimension_numbers = #tpu.dot_dimension_numbers<[1], [0], [0], [1], [0, 0, 1, 1], [], []>} : vector<2x64xbf16>, vector<64x128xbf16>, vector<2x128xf32> -> vector<2x128xf32>
    %86 = vector.broadcast %70 : vector<1x128xf32> to vector<2x128xf32>
    %87 = arith.addf %85, %86 : vector<2x128xf32>
    %cst_43 = arith.constant 0.000000e+00 : f32
    %88 = vector.broadcast %cst_43 : f32 to vector<2x128xf32>
    %89 = arith.maximumf %87, %88 : vector<2x128xf32>
    %c0_44 = arith.constant 0 : index
    %c1_45 = arith.constant 1 : index
    %c0_46 = arith.constant 0 : index
    %c0_47 = arith.constant 0 : index
    %90 = vector.load %arg6[%c0_44, %c1_45, %c0_46, %c0_47] : memref<1x2x2x128xf32, #tpu.memory_space<vmem>>, vector<1x1x2x128xf32>
    %91 = vector.shape_cast %90 : vector<1x1x2x128xf32> to vector<2x128xf32>
    %92 = vector.shape_cast %89 : vector<2x128xf32> to vector<1x1x2x128xf32>
    tpu.vector_store %arg6[%c0_44, %c1_45, %c0_46, %c0_47], %92 {strides = array<i32>} : memref<1x2x2x128xf32, #tpu.memory_space<vmem>>, vector<1x1x2x128xf32>,
    return
  }
  func.func @transform_0(%arg0: i32) -> (i32, i32, i32, i32, i32) {
    %c0_i32 = arith.constant 0 : i32
    %c0_i32_0 = arith.constant 0 : i32
    %c0_i32_1 = arith.constant 0 : i32
    %c0_i32_2 = arith.constant 0 : i32
    %c0_i32_3 = arith.constant 0 : i32
    return %c0_i32, %arg0, %c0_i32_0, %c0_i32_1, %c0_i32_2 : i32, i32, i32, i32, i32
  }
  func.func @transform_1(%arg0: i32) -> (i32, i32) {
    %c0_i32 = arith.constant 0 : i32
    %c0_i32_0 = arith.constant 0 : i32
    %c0_i32_1 = arith.constant 0 : i32
    return %c0_i32, %c0_i32_0 : i32, i32
  }
  func.func @transform_2(%arg0: i32) -> (i32, i32) {
    %c0_i32 = arith.constant 0 : i32
    %c0_i32_0 = arith.constant 0 : i32
    %c0_i32_1 = arith.constant 0 : i32
    return %c0_i32, %c0_i32_0 : i32, i32
  }
  func.func @transform_3(%arg0: i32) -> (i32, i32) {
    %c0_i32 = arith.constant 0 : i32
    %c0_i32_0 = arith.constant 0 : i32
    %c0_i32_1 = arith.constant 0 : i32
    return %c0_i32, %c0_i32_0 : i32, i32
  }
  func.func @transform_4(%arg0: i32) -> (i32, i32) {
    %c0_i32 = arith.constant 0 : i32
    %c0_i32_0 = arith.constant 0 : i32
    %c0_i32_1 = arith.constant 0 : i32
    return %c0_i32, %c0_i32_0 : i32, i32
  }
  func.func @transform_5(%arg0: i32) -> (i32, i32, i32, i32) {
    %c0_i32 = arith.constant 0 : i32
    %c0_i32_0 = arith.constant 0 : i32
    %c0_i32_1 = arith.constant 0 : i32
    %c0_i32_2 = arith.constant 0 : i32
    return %arg0, %c0_i32, %c0_i32_0, %c0_i32_1 : i32, i32, i32, i32
  }
}

module attributes {stable_mosaic.version = 11 : i64} {
  func.func @_dws_block_kernel(%arg0: i32, %arg1: memref<1x1x4x4x128xf32, #tpu.memory_space<vmem>>, %arg2: memref<9x128xf32, #tpu.memory_space<vmem>>, %arg3: memref<1x128xf32, #tpu.memory_space<vmem>>, %arg4: memref<128x128xbf16, #tpu.memory_space<vmem>>, %arg5: memref<1x128xf32, #tpu.memory_space<vmem>>, %arg6: memref<1x2x2x128xf32, #tpu.memory_space<vmem>>) attributes {dimension_semantics = [#tpu.dimension_semantics<parallel>], iteration_bounds = array<i64: 2>, scalar_prefetch = 0 : i64, scratch_operands = 0 : i64, tpu.core_type = #tpu.core_type<tc>, window_params = [{transform_indices = @transform_0, window_bounds = array<i64: 1, 1, 4, 4, 128>}, {pipeline_mode = #tpu.pipeline_mode<synchronous>, transform_indices = @transform_1, window_bounds = array<i64: 9, 128>}, {pipeline_mode = #tpu.pipeline_mode<synchronous>, transform_indices = @transform_2, window_bounds = array<i64: 1, 128>}, {pipeline_mode = #tpu.pipeline_mode<synchronous>, transform_indices = @transform_3, window_bounds = array<i64: 128, 128>}, {pipeline_mode = #tpu.pipeline_mode<synchronous>, transform_indices = @transform_4, window_bounds = array<i64: 1, 128>}, {transform_indices = @transform_5, window_bounds = array<i64: 1, 2, 2, 128>}]} {
    %c0 = arith.constant 0 : index
    %c0_0 = arith.constant 0 : index
    %c0_1 = arith.constant 0 : index
    %c0_2 = arith.constant 0 : index
    %c0_3 = arith.constant 0 : index
    %0 = vector.load %arg1[%c0, %c0_0, %c0_1, %c0_2, %c0_3] : memref<1x1x4x4x128xf32, #tpu.memory_space<vmem>>, vector<1x1x4x4x128xf32>
    %1 = vector.shape_cast %0 : vector<1x1x4x4x128xf32> to vector<4x4x128xf32>
    %cst = arith.constant 0.000000e+00 : f32
    %2 = vector.broadcast %cst : f32 to vector<2x2x128xf32>
    %3 = vector.extract_strided_slice %1 {offsets = [0, 0, 0], sizes = [2, 2, 128], strides = [1, 1, 1]} : vector<4x4x128xf32> to vector<2x2x128xf32>
    %c0_4 = arith.constant 0 : index
    %c0_5 = arith.constant 0 : index
    %4 = vector.load %arg2[%c0_4, %c0_5] : memref<9x128xf32, #tpu.memory_space<vmem>>, vector<1x128xf32>
    %5 = vector.shape_cast %4 : vector<1x128xf32> to vector<1x1x128xf32>
    %6 = vector.broadcast %5 : vector<1x1x128xf32> to vector<2x2x128xf32>
    %7 = arith.mulf %3, %6 : vector<2x2x128xf32>
    %8 = arith.addf %2, %7 : vector<2x2x128xf32>
    %9 = vector.extract_strided_slice %1 {offsets = [0, 1, 0], sizes = [2, 2, 128], strides = [1, 1, 1]} : vector<4x4x128xf32> to vector<2x2x128xf32>
    %c1 = arith.constant 1 : index
    %c0_6 = arith.constant 0 : index
    %10 = vector.load %arg2[%c1, %c0_6] : memref<9x128xf32, #tpu.memory_space<vmem>>, vector<1x128xf32>
    %11 = vector.shape_cast %10 : vector<1x128xf32> to vector<1x1x128xf32>
    %12 = vector.broadcast %11 : vector<1x1x128xf32> to vector<2x2x128xf32>
    %13 = arith.mulf %9, %12 : vector<2x2x128xf32>
    %14 = arith.addf %8, %13 : vector<2x2x128xf32>
    %15 = vector.extract_strided_slice %1 {offsets = [0, 2, 0], sizes = [2, 2, 128], strides = [1, 1, 1]} : vector<4x4x128xf32> to vector<2x2x128xf32>
    %c2 = arith.constant 2 : index
    %c0_7 = arith.constant 0 : index
    %16 = vector.load %arg2[%c2, %c0_7] : memref<9x128xf32, #tpu.memory_space<vmem>>, vector<1x128xf32>
    %17 = vector.shape_cast %16 : vector<1x128xf32> to vector<1x1x128xf32>
    %18 = vector.broadcast %17 : vector<1x1x128xf32> to vector<2x2x128xf32>
    %19 = arith.mulf %15, %18 : vector<2x2x128xf32>
    %20 = arith.addf %14, %19 : vector<2x2x128xf32>
    %21 = vector.extract_strided_slice %1 {offsets = [1, 0, 0], sizes = [2, 2, 128], strides = [1, 1, 1]} : vector<4x4x128xf32> to vector<2x2x128xf32>
    %c3 = arith.constant 3 : index
    %c0_8 = arith.constant 0 : index
    %22 = vector.load %arg2[%c3, %c0_8] : memref<9x128xf32, #tpu.memory_space<vmem>>, vector<1x128xf32>
    %23 = vector.shape_cast %22 : vector<1x128xf32> to vector<1x1x128xf32>
    %24 = vector.broadcast %23 : vector<1x1x128xf32> to vector<2x2x128xf32>
    %25 = arith.mulf %21, %24 : vector<2x2x128xf32>
    %26 = arith.addf %20, %25 : vector<2x2x128xf32>
    %27 = vector.extract_strided_slice %1 {offsets = [1, 1, 0], sizes = [2, 2, 128], strides = [1, 1, 1]} : vector<4x4x128xf32> to vector<2x2x128xf32>
    %c4 = arith.constant 4 : index
    %c0_9 = arith.constant 0 : index
    %28 = vector.load %arg2[%c4, %c0_9] : memref<9x128xf32, #tpu.memory_space<vmem>>, vector<1x128xf32>
    %29 = vector.shape_cast %28 : vector<1x128xf32> to vector<1x1x128xf32>
    %30 = vector.broadcast %29 : vector<1x1x128xf32> to vector<2x2x128xf32>
    %31 = arith.mulf %27, %30 : vector<2x2x128xf32>
    %32 = arith.addf %26, %31 : vector<2x2x128xf32>
    %33 = vector.extract_strided_slice %1 {offsets = [1, 2, 0], sizes = [2, 2, 128], strides = [1, 1, 1]} : vector<4x4x128xf32> to vector<2x2x128xf32>
    %c5 = arith.constant 5 : index
    %c0_10 = arith.constant 0 : index
    %34 = vector.load %arg2[%c5, %c0_10] : memref<9x128xf32, #tpu.memory_space<vmem>>, vector<1x128xf32>
    %35 = vector.shape_cast %34 : vector<1x128xf32> to vector<1x1x128xf32>
    %36 = vector.broadcast %35 : vector<1x1x128xf32> to vector<2x2x128xf32>
    %37 = arith.mulf %33, %36 : vector<2x2x128xf32>
    %38 = arith.addf %32, %37 : vector<2x2x128xf32>
    %39 = vector.extract_strided_slice %1 {offsets = [2, 0, 0], sizes = [2, 2, 128], strides = [1, 1, 1]} : vector<4x4x128xf32> to vector<2x2x128xf32>
    %c6 = arith.constant 6 : index
    %c0_11 = arith.constant 0 : index
    %40 = vector.load %arg2[%c6, %c0_11] : memref<9x128xf32, #tpu.memory_space<vmem>>, vector<1x128xf32>
    %41 = vector.shape_cast %40 : vector<1x128xf32> to vector<1x1x128xf32>
    %42 = vector.broadcast %41 : vector<1x1x128xf32> to vector<2x2x128xf32>
    %43 = arith.mulf %39, %42 : vector<2x2x128xf32>
    %44 = arith.addf %38, %43 : vector<2x2x128xf32>
    %45 = vector.extract_strided_slice %1 {offsets = [2, 1, 0], sizes = [2, 2, 128], strides = [1, 1, 1]} : vector<4x4x128xf32> to vector<2x2x128xf32>
    %c7 = arith.constant 7 : index
    %c0_12 = arith.constant 0 : index
    %46 = vector.load %arg2[%c7, %c0_12] : memref<9x128xf32, #tpu.memory_space<vmem>>, vector<1x128xf32>
    %47 = vector.shape_cast %46 : vector<1x128xf32> to vector<1x1x128xf32>
    %48 = vector.broadcast %47 : vector<1x1x128xf32> to vector<2x2x128xf32>
    %49 = arith.mulf %45, %48 : vector<2x2x128xf32>
    %50 = arith.addf %44, %49 : vector<2x2x128xf32>
    %51 = vector.extract_strided_slice %1 {offsets = [2, 2, 0], sizes = [2, 2, 128], strides = [1, 1, 1]} : vector<4x4x128xf32> to vector<2x2x128xf32>
    %c8 = arith.constant 8 : index
    %c0_13 = arith.constant 0 : index
    %52 = vector.load %arg2[%c8, %c0_13] : memref<9x128xf32, #tpu.memory_space<vmem>>, vector<1x128xf32>
    %53 = vector.shape_cast %52 : vector<1x128xf32> to vector<1x1x128xf32>
    %54 = vector.broadcast %53 : vector<1x1x128xf32> to vector<2x2x128xf32>
    %55 = arith.mulf %51, %54 : vector<2x2x128xf32>
    %56 = arith.addf %50, %55 : vector<2x2x128xf32>
    %c0_14 = arith.constant 0 : index
    %c0_15 = arith.constant 0 : index
    %57 = vector.load %arg3[%c0_14, %c0_15] : memref<1x128xf32, #tpu.memory_space<vmem>>, vector<1x128xf32>
    %58 = vector.shape_cast %57 : vector<1x128xf32> to vector<1x1x128xf32>
    %59 = vector.broadcast %58 : vector<1x1x128xf32> to vector<2x2x128xf32>
    %60 = arith.addf %56, %59 : vector<2x2x128xf32>
    %cst_16 = arith.constant 0.000000e+00 : f32
    %61 = vector.broadcast %cst_16 : f32 to vector<2x2x128xf32>
    %62 = arith.maximumf %60, %61 : vector<2x2x128xf32>
    %c0_17 = arith.constant 0 : index
    %c0_18 = arith.constant 0 : index
    %63 = vector.load %arg4[%c0_17, %c0_18] : memref<128x128xbf16, #tpu.memory_space<vmem>>, vector<128x128xbf16>
    %c0_19 = arith.constant 0 : index
    %c0_20 = arith.constant 0 : index
    %64 = vector.load %arg5[%c0_19, %c0_20] : memref<1x128xf32, #tpu.memory_space<vmem>>, vector<1x128xf32>
    %65 = vector.extract_strided_slice %62 {offsets = [0, 0, 0], sizes = [1, 2, 128], strides = [1, 1, 1]} : vector<2x2x128xf32> to vector<1x2x128xf32>
    %66 = vector.shape_cast %65 : vector<1x2x128xf32> to vector<2x128xf32>
    %67 = arith.truncf %66 : vector<2x128xf32> to vector<2x128xbf16>
    %cst_21 = arith.constant dense<0.000000e+00> : vector<2x128xf32>
    %68 = tpu.matmul %67, %63, %cst_21 {dimension_numbers = #tpu.dot_dimension_numbers<[1], [0], [0], [1], [0, 0, 1, 1], [], []>} : vector<2x128xbf16>, vector<128x128xbf16>, vector<2x128xf32> -> vector<2x128xf32>
    %69 = vector.broadcast %64 : vector<1x128xf32> to vector<2x128xf32>
    %70 = arith.addf %68, %69 : vector<2x128xf32>
    %cst_22 = arith.constant 0.000000e+00 : f32
    %71 = vector.broadcast %cst_22 : f32 to vector<2x128xf32>
    %72 = arith.maximumf %70, %71 : vector<2x128xf32>
    %c0_23 = arith.constant 0 : index
    %c0_24 = arith.constant 0 : index
    %c0_25 = arith.constant 0 : index
    %c0_26 = arith.constant 0 : index
    %73 = vector.load %arg6[%c0_23, %c0_24, %c0_25, %c0_26] : memref<1x2x2x128xf32, #tpu.memory_space<vmem>>, vector<1x1x2x128xf32>
    %74 = vector.shape_cast %73 : vector<1x1x2x128xf32> to vector<2x128xf32>
    %75 = vector.shape_cast %72 : vector<2x128xf32> to vector<1x1x2x128xf32>
    tpu.vector_store %arg6[%c0_23, %c0_24, %c0_25, %c0_26], %75 {strides = array<i32>} : memref<1x2x2x128xf32, #tpu.memory_space<vmem>>, vector<1x1x2x128xf32>,
    %76 = vector.extract_strided_slice %62 {offsets = [1, 0, 0], sizes = [1, 2, 128], strides = [1, 1, 1]} : vector<2x2x128xf32> to vector<1x2x128xf32>
    %77 = vector.shape_cast %76 : vector<1x2x128xf32> to vector<2x128xf32>
    %78 = arith.truncf %77 : vector<2x128xf32> to vector<2x128xbf16>
    %cst_27 = arith.constant dense<0.000000e+00> : vector<2x128xf32>
    %79 = tpu.matmul %78, %63, %cst_27 {dimension_numbers = #tpu.dot_dimension_numbers<[1], [0], [0], [1], [0, 0, 1, 1], [], []>} : vector<2x128xbf16>, vector<128x128xbf16>, vector<2x128xf32> -> vector<2x128xf32>
    %80 = vector.broadcast %64 : vector<1x128xf32> to vector<2x128xf32>
    %81 = arith.addf %79, %80 : vector<2x128xf32>
    %cst_28 = arith.constant 0.000000e+00 : f32
    %82 = vector.broadcast %cst_28 : f32 to vector<2x128xf32>
    %83 = arith.maximumf %81, %82 : vector<2x128xf32>
    %c0_29 = arith.constant 0 : index
    %c1_30 = arith.constant 1 : index
    %c0_31 = arith.constant 0 : index
    %c0_32 = arith.constant 0 : index
    %84 = vector.load %arg6[%c0_29, %c1_30, %c0_31, %c0_32] : memref<1x2x2x128xf32, #tpu.memory_space<vmem>>, vector<1x1x2x128xf32>
    %85 = vector.shape_cast %84 : vector<1x1x2x128xf32> to vector<2x128xf32>
    %86 = vector.shape_cast %83 : vector<2x128xf32> to vector<1x1x2x128xf32>
    tpu.vector_store %arg6[%c0_29, %c1_30, %c0_31, %c0_32], %86 {strides = array<i32>} : memref<1x2x2x128xf32, #tpu.memory_space<vmem>>, vector<1x1x2x128xf32>,
    return
  }
  func.func @transform_0(%arg0: i32) -> (i32, i32, i32, i32, i32) {
    %c0_i32 = arith.constant 0 : i32
    %c0_i32_0 = arith.constant 0 : i32
    %c0_i32_1 = arith.constant 0 : i32
    %c0_i32_2 = arith.constant 0 : i32
    %c0_i32_3 = arith.constant 0 : i32
    return %c0_i32, %arg0, %c0_i32_0, %c0_i32_1, %c0_i32_2 : i32, i32, i32, i32, i32
  }
  func.func @transform_1(%arg0: i32) -> (i32, i32) {
    %c0_i32 = arith.constant 0 : i32
    %c0_i32_0 = arith.constant 0 : i32
    %c0_i32_1 = arith.constant 0 : i32
    return %c0_i32, %c0_i32_0 : i32, i32
  }
  func.func @transform_2(%arg0: i32) -> (i32, i32) {
    %c0_i32 = arith.constant 0 : i32
    %c0_i32_0 = arith.constant 0 : i32
    %c0_i32_1 = arith.constant 0 : i32
    return %c0_i32, %c0_i32_0 : i32, i32
  }
  func.func @transform_3(%arg0: i32) -> (i32, i32) {
    %c0_i32 = arith.constant 0 : i32
    %c0_i32_0 = arith.constant 0 : i32
    %c0_i32_1 = arith.constant 0 : i32
    return %c0_i32, %c0_i32_0 : i32, i32
  }
  func.func @transform_4(%arg0: i32) -> (i32, i32) {
    %c0_i32 = arith.constant 0 : i32
    %c0_i32_0 = arith.constant 0 : i32
    %c0_i32_1 = arith.constant 0 : i32
    return %c0_i32, %c0_i32_0 : i32, i32
  }
  func.func @transform_5(%arg0: i32) -> (i32, i32, i32, i32) {
    %c0_i32 = arith.constant 0 : i32
    %c0_i32_0 = arith.constant 0 : i32
    %c0_i32_1 = arith.constant 0 : i32
    %c0_i32_2 = arith.constant 0 : i32
    return %arg0, %c0_i32, %c0_i32_0, %c0_i32_1 : i32, i32, i32, i32
  }
}

module attributes {stable_mosaic.version = 11 : i64} {
  func.func @_dws_block_kernel(%arg0: i32, %arg1: memref<4x1x2x2x128xf32, #tpu.memory_space<vmem>>, %arg2: memref<9x128xf32, #tpu.memory_space<vmem>>, %arg3: memref<1x128xf32, #tpu.memory_space<vmem>>, %arg4: memref<128x256xbf16, #tpu.memory_space<vmem>>, %arg5: memref<1x256xf32, #tpu.memory_space<vmem>>, %arg6: memref<1x1x1x256xf32, #tpu.memory_space<vmem>>) attributes {dimension_semantics = [#tpu.dimension_semantics<parallel>], iteration_bounds = array<i64: 2>, scalar_prefetch = 0 : i64, scratch_operands = 0 : i64, tpu.core_type = #tpu.core_type<tc>, window_params = [{transform_indices = @transform_0, window_bounds = array<i64: 4, 1, 2, 2, 128>}, {pipeline_mode = #tpu.pipeline_mode<synchronous>, transform_indices = @transform_1, window_bounds = array<i64: 9, 128>}, {pipeline_mode = #tpu.pipeline_mode<synchronous>, transform_indices = @transform_2, window_bounds = array<i64: 1, 128>}, {pipeline_mode = #tpu.pipeline_mode<synchronous>, transform_indices = @transform_3, window_bounds = array<i64: 128, 256>}, {pipeline_mode = #tpu.pipeline_mode<synchronous>, transform_indices = @transform_4, window_bounds = array<i64: 1, 256>}, {transform_indices = @transform_5, window_bounds = array<i64: 1, 1, 1, 256>}]} {
    %c0 = arith.constant 0 : index
    %c0_0 = arith.constant 0 : index
    %c0_1 = arith.constant 0 : index
    %c0_2 = arith.constant 0 : index
    %c0_3 = arith.constant 0 : index
    %0 = vector.load %arg1[%c0, %c0_0, %c0_1, %c0_2, %c0_3] : memref<4x1x2x2x128xf32, #tpu.memory_space<vmem>>, vector<1x1x2x2x128xf32>
    %1 = vector.shape_cast %0 : vector<1x1x2x2x128xf32> to vector<2x2x128xf32>
    %c1 = arith.constant 1 : index
    %c0_4 = arith.constant 0 : index
    %c0_5 = arith.constant 0 : index
    %c0_6 = arith.constant 0 : index
    %c0_7 = arith.constant 0 : index
    %2 = vector.load %arg1[%c1, %c0_4, %c0_5, %c0_6, %c0_7] : memref<4x1x2x2x128xf32, #tpu.memory_space<vmem>>, vector<1x1x2x2x128xf32>
    %3 = vector.shape_cast %2 : vector<1x1x2x2x128xf32> to vector<2x2x128xf32>
    %c2 = arith.constant 2 : index
    %c0_8 = arith.constant 0 : index
    %c0_9 = arith.constant 0 : index
    %c0_10 = arith.constant 0 : index
    %c0_11 = arith.constant 0 : index
    %4 = vector.load %arg1[%c2, %c0_8, %c0_9, %c0_10, %c0_11] : memref<4x1x2x2x128xf32, #tpu.memory_space<vmem>>, vector<1x1x2x2x128xf32>
    %5 = vector.shape_cast %4 : vector<1x1x2x2x128xf32> to vector<2x2x128xf32>
    %c3 = arith.constant 3 : index
    %c0_12 = arith.constant 0 : index
    %c0_13 = arith.constant 0 : index
    %c0_14 = arith.constant 0 : index
    %c0_15 = arith.constant 0 : index
    %6 = vector.load %arg1[%c3, %c0_12, %c0_13, %c0_14, %c0_15] : memref<4x1x2x2x128xf32, #tpu.memory_space<vmem>>, vector<1x1x2x2x128xf32>
    %7 = vector.shape_cast %6 : vector<1x1x2x2x128xf32> to vector<2x2x128xf32>
    %cst = arith.constant 0.000000e+00 : f32
    %8 = vector.broadcast %cst : f32 to vector<1x1x128xf32>
    %9 = vector.extract_strided_slice %1 {offsets = [0, 0, 0], sizes = [1, 1, 128], strides = [1, 1, 1]} : vector<2x2x128xf32> to vector<1x1x128xf32>
    %c0_16 = arith.constant 0 : index
    %c0_17 = arith.constant 0 : index
    %10 = vector.load %arg2[%c0_16, %c0_17] : memref<9x128xf32, #tpu.memory_space<vmem>>, vector<1x128xf32>
    %11 = vector.shape_cast %10 : vector<1x128xf32> to vector<1x1x128xf32>
    %12 = arith.mulf %9, %11 : vector<1x1x128xf32>
    %13 = arith.addf %8, %12 : vector<1x1x128xf32>
    %14 = vector.extract_strided_slice %3 {offsets = [0, 0, 0], sizes = [1, 1, 128], strides = [1, 1, 1]} : vector<2x2x128xf32> to vector<1x1x128xf32>
    %c1_18 = arith.constant 1 : index
    %c0_19 = arith.constant 0 : index
    %15 = vector.load %arg2[%c1_18, %c0_19] : memref<9x128xf32, #tpu.memory_space<vmem>>, vector<1x128xf32>
    %16 = vector.shape_cast %15 : vector<1x128xf32> to vector<1x1x128xf32>
    %17 = arith.mulf %14, %16 : vector<1x1x128xf32>
    %18 = arith.addf %13, %17 : vector<1x1x128xf32>
    %19 = vector.extract_strided_slice %1 {offsets = [0, 1, 0], sizes = [1, 1, 128], strides = [1, 1, 1]} : vector<2x2x128xf32> to vector<1x1x128xf32>
    %c2_20 = arith.constant 2 : index
    %c0_21 = arith.constant 0 : index
    %20 = vector.load %arg2[%c2_20, %c0_21] : memref<9x128xf32, #tpu.memory_space<vmem>>, vector<1x128xf32>
    %21 = vector.shape_cast %20 : vector<1x128xf32> to vector<1x1x128xf32>
    %22 = arith.mulf %19, %21 : vector<1x1x128xf32>
    %23 = arith.addf %18, %22 : vector<1x1x128xf32>
    %24 = vector.extract_strided_slice %5 {offsets = [0, 0, 0], sizes = [1, 1, 128], strides = [1, 1, 1]} : vector<2x2x128xf32> to vector<1x1x128xf32>
    %c3_22 = arith.constant 3 : index
    %c0_23 = arith.constant 0 : index
    %25 = vector.load %arg2[%c3_22, %c0_23] : memref<9x128xf32, #tpu.memory_space<vmem>>, vector<1x128xf32>
    %26 = vector.shape_cast %25 : vector<1x128xf32> to vector<1x1x128xf32>
    %27 = arith.mulf %24, %26 : vector<1x1x128xf32>
    %28 = arith.addf %23, %27 : vector<1x1x128xf32>
    %29 = vector.extract_strided_slice %7 {offsets = [0, 0, 0], sizes = [1, 1, 128], strides = [1, 1, 1]} : vector<2x2x128xf32> to vector<1x1x128xf32>
    %c4 = arith.constant 4 : index
    %c0_24 = arith.constant 0 : index
    %30 = vector.load %arg2[%c4, %c0_24] : memref<9x128xf32, #tpu.memory_space<vmem>>, vector<1x128xf32>
    %31 = vector.shape_cast %30 : vector<1x128xf32> to vector<1x1x128xf32>
    %32 = arith.mulf %29, %31 : vector<1x1x128xf32>
    %33 = arith.addf %28, %32 : vector<1x1x128xf32>
    %34 = vector.extract_strided_slice %5 {offsets = [0, 1, 0], sizes = [1, 1, 128], strides = [1, 1, 1]} : vector<2x2x128xf32> to vector<1x1x128xf32>
    %c5 = arith.constant 5 : index
    %c0_25 = arith.constant 0 : index
    %35 = vector.load %arg2[%c5, %c0_25] : memref<9x128xf32, #tpu.memory_space<vmem>>, vector<1x128xf32>
    %36 = vector.shape_cast %35 : vector<1x128xf32> to vector<1x1x128xf32>
    %37 = arith.mulf %34, %36 : vector<1x1x128xf32>
    %38 = arith.addf %33, %37 : vector<1x1x128xf32>
    %39 = vector.extract_strided_slice %1 {offsets = [1, 0, 0], sizes = [1, 1, 128], strides = [1, 1, 1]} : vector<2x2x128xf32> to vector<1x1x128xf32>
    %c6 = arith.constant 6 : index
    %c0_26 = arith.constant 0 : index
    %40 = vector.load %arg2[%c6, %c0_26] : memref<9x128xf32, #tpu.memory_space<vmem>>, vector<1x128xf32>
    %41 = vector.shape_cast %40 : vector<1x128xf32> to vector<1x1x128xf32>
    %42 = arith.mulf %39, %41 : vector<1x1x128xf32>
    %43 = arith.addf %38, %42 : vector<1x1x128xf32>
    %44 = vector.extract_strided_slice %3 {offsets = [1, 0, 0], sizes = [1, 1, 128], strides = [1, 1, 1]} : vector<2x2x128xf32> to vector<1x1x128xf32>
    %c7 = arith.constant 7 : index
    %c0_27 = arith.constant 0 : index
    %45 = vector.load %arg2[%c7, %c0_27] : memref<9x128xf32, #tpu.memory_space<vmem>>, vector<1x128xf32>
    %46 = vector.shape_cast %45 : vector<1x128xf32> to vector<1x1x128xf32>
    %47 = arith.mulf %44, %46 : vector<1x1x128xf32>
    %48 = arith.addf %43, %47 : vector<1x1x128xf32>
    %49 = vector.extract_strided_slice %1 {offsets = [1, 1, 0], sizes = [1, 1, 128], strides = [1, 1, 1]} : vector<2x2x128xf32> to vector<1x1x128xf32>
    %c8 = arith.constant 8 : index
    %c0_28 = arith.constant 0 : index
    %50 = vector.load %arg2[%c8, %c0_28] : memref<9x128xf32, #tpu.memory_space<vmem>>, vector<1x128xf32>
    %51 = vector.shape_cast %50 : vector<1x128xf32> to vector<1x1x128xf32>
    %52 = arith.mulf %49, %51 : vector<1x1x128xf32>
    %53 = arith.addf %48, %52 : vector<1x1x128xf32>
    %c0_29 = arith.constant 0 : index
    %c0_30 = arith.constant 0 : index
    %54 = vector.load %arg3[%c0_29, %c0_30] : memref<1x128xf32, #tpu.memory_space<vmem>>, vector<1x128xf32>
    %55 = vector.shape_cast %54 : vector<1x128xf32> to vector<1x1x128xf32>
    %56 = arith.addf %53, %55 : vector<1x1x128xf32>
    %cst_31 = arith.constant 0.000000e+00 : f32
    %57 = vector.broadcast %cst_31 : f32 to vector<1x1x128xf32>
    %58 = arith.maximumf %56, %57 : vector<1x1x128xf32>
    %c0_32 = arith.constant 0 : index
    %c0_33 = arith.constant 0 : index
    %59 = vector.load %arg4[%c0_32, %c0_33] : memref<128x256xbf16, #tpu.memory_space<vmem>>, vector<128x256xbf16>
    %c0_34 = arith.constant 0 : index
    %c0_35 = arith.constant 0 : index
    %60 = vector.load %arg5[%c0_34, %c0_35] : memref<1x256xf32, #tpu.memory_space<vmem>>, vector<1x256xf32>
    %61 = vector.shape_cast %58 : vector<1x1x128xf32> to vector<1x128xf32>
    %62 = arith.truncf %61 : vector<1x128xf32> to vector<1x128xbf16>
    %cst_36 = arith.constant dense<0.000000e+00> : vector<1x256xf32>
    %63 = tpu.matmul %62, %59, %cst_36 {dimension_numbers = #tpu.dot_dimension_numbers<[1], [0], [0], [1], [0, 0, 1, 1], [], []>} : vector<1x128xbf16>, vector<128x256xbf16>, vector<1x256xf32> -> vector<1x256xf32>
    %64 = arith.addf %63, %60 : vector<1x256xf32>
    %cst_37 = arith.constant 0.000000e+00 : f32
    %65 = vector.broadcast %cst_37 : f32 to vector<1x256xf32>
    %66 = arith.maximumf %64, %65 : vector<1x256xf32>
    %c0_38 = arith.constant 0 : index
    %c0_39 = arith.constant 0 : index
    %c0_40 = arith.constant 0 : index
    %c0_41 = arith.constant 0 : index
    %67 = vector.load %arg6[%c0_38, %c0_39, %c0_40, %c0_41] : memref<1x1x1x256xf32, #tpu.memory_space<vmem>>, vector<1x1x1x256xf32>
    %68 = vector.shape_cast %67 : vector<1x1x1x256xf32> to vector<1x256xf32>
    %69 = vector.shape_cast %66 : vector<1x256xf32> to vector<1x1x1x256xf32>
    tpu.vector_store %arg6[%c0_38, %c0_39, %c0_40, %c0_41], %69 {strides = array<i32>} : memref<1x1x1x256xf32, #tpu.memory_space<vmem>>, vector<1x1x1x256xf32>,
    return
  }
  func.func @transform_0(%arg0: i32) -> (i32, i32, i32, i32, i32) {
    %c0_i32 = arith.constant 0 : i32
    %c0_i32_0 = arith.constant 0 : i32
    %c0_i32_1 = arith.constant 0 : i32
    %c0_i32_2 = arith.constant 0 : i32
    %c0_i32_3 = arith.constant 0 : i32
    return %c0_i32, %arg0, %c0_i32_0, %c0_i32_1, %c0_i32_2 : i32, i32, i32, i32, i32
  }
  func.func @transform_1(%arg0: i32) -> (i32, i32) {
    %c0_i32 = arith.constant 0 : i32
    %c0_i32_0 = arith.constant 0 : i32
    %c0_i32_1 = arith.constant 0 : i32
    return %c0_i32, %c0_i32_0 : i32, i32
  }
  func.func @transform_2(%arg0: i32) -> (i32, i32) {
    %c0_i32 = arith.constant 0 : i32
    %c0_i32_0 = arith.constant 0 : i32
    %c0_i32_1 = arith.constant 0 : i32
    return %c0_i32, %c0_i32_0 : i32, i32
  }
  func.func @transform_3(%arg0: i32) -> (i32, i32) {
    %c0_i32 = arith.constant 0 : i32
    %c0_i32_0 = arith.constant 0 : i32
    %c0_i32_1 = arith.constant 0 : i32
    return %c0_i32, %c0_i32_0 : i32, i32
  }
  func.func @transform_4(%arg0: i32) -> (i32, i32) {
    %c0_i32 = arith.constant 0 : i32
    %c0_i32_0 = arith.constant 0 : i32
    %c0_i32_1 = arith.constant 0 : i32
    return %c0_i32, %c0_i32_0 : i32, i32
  }
  func.func @transform_5(%arg0: i32) -> (i32, i32, i32, i32) {
    %c0_i32 = arith.constant 0 : i32
    %c0_i32_0 = arith.constant 0 : i32
    %c0_i32_1 = arith.constant 0 : i32
    %c0_i32_2 = arith.constant 0 : i32
    return %arg0, %c0_i32, %c0_i32_0, %c0_i32_1 : i32, i32, i32, i32
  }
}

module attributes {stable_mosaic.version = 11 : i64} {
  func.func @_dws_block_kernel(%arg0: i32, %arg1: memref<4x1x2x2x256xf32, #tpu.memory_space<vmem>>, %arg2: memref<9x256xf32, #tpu.memory_space<vmem>>, %arg3: memref<1x256xf32, #tpu.memory_space<vmem>>, %arg4: memref<256x256xbf16, #tpu.memory_space<vmem>>, %arg5: memref<1x256xf32, #tpu.memory_space<vmem>>, %arg6: memref<1x1x1x256xf32, #tpu.memory_space<vmem>>) attributes {dimension_semantics = [#tpu.dimension_semantics<parallel>], iteration_bounds = array<i64: 2>, scalar_prefetch = 0 : i64, scratch_operands = 0 : i64, tpu.core_type = #tpu.core_type<tc>, window_params = [{transform_indices = @transform_0, window_bounds = array<i64: 4, 1, 2, 2, 256>}, {pipeline_mode = #tpu.pipeline_mode<synchronous>, transform_indices = @transform_1, window_bounds = array<i64: 9, 256>}, {pipeline_mode = #tpu.pipeline_mode<synchronous>, transform_indices = @transform_2, window_bounds = array<i64: 1, 256>}, {pipeline_mode = #tpu.pipeline_mode<synchronous>, transform_indices = @transform_3, window_bounds = array<i64: 256, 256>}, {pipeline_mode = #tpu.pipeline_mode<synchronous>, transform_indices = @transform_4, window_bounds = array<i64: 1, 256>}, {transform_indices = @transform_5, window_bounds = array<i64: 1, 1, 1, 256>}]} {
    %c0 = arith.constant 0 : index
    %c0_0 = arith.constant 0 : index
    %c0_1 = arith.constant 0 : index
    %c0_2 = arith.constant 0 : index
    %c0_3 = arith.constant 0 : index
    %0 = vector.load %arg1[%c0, %c0_0, %c0_1, %c0_2, %c0_3] : memref<4x1x2x2x256xf32, #tpu.memory_space<vmem>>, vector<1x1x2x2x256xf32>
    %1 = vector.shape_cast %0 : vector<1x1x2x2x256xf32> to vector<2x2x256xf32>
    %c1 = arith.constant 1 : index
    %c0_4 = arith.constant 0 : index
    %c0_5 = arith.constant 0 : index
    %c0_6 = arith.constant 0 : index
    %c0_7 = arith.constant 0 : index
    %2 = vector.load %arg1[%c1, %c0_4, %c0_5, %c0_6, %c0_7] : memref<4x1x2x2x256xf32, #tpu.memory_space<vmem>>, vector<1x1x2x2x256xf32>
    %3 = vector.shape_cast %2 : vector<1x1x2x2x256xf32> to vector<2x2x256xf32>
    %c2 = arith.constant 2 : index
    %c0_8 = arith.constant 0 : index
    %c0_9 = arith.constant 0 : index
    %c0_10 = arith.constant 0 : index
    %c0_11 = arith.constant 0 : index
    %4 = vector.load %arg1[%c2, %c0_8, %c0_9, %c0_10, %c0_11] : memref<4x1x2x2x256xf32, #tpu.memory_space<vmem>>, vector<1x1x2x2x256xf32>
    %5 = vector.shape_cast %4 : vector<1x1x2x2x256xf32> to vector<2x2x256xf32>
    %c3 = arith.constant 3 : index
    %c0_12 = arith.constant 0 : index
    %c0_13 = arith.constant 0 : index
    %c0_14 = arith.constant 0 : index
    %c0_15 = arith.constant 0 : index
    %6 = vector.load %arg1[%c3, %c0_12, %c0_13, %c0_14, %c0_15] : memref<4x1x2x2x256xf32, #tpu.memory_space<vmem>>, vector<1x1x2x2x256xf32>
    %7 = vector.shape_cast %6 : vector<1x1x2x2x256xf32> to vector<2x2x256xf32>
    %cst = arith.constant 0.000000e+00 : f32
    %8 = vector.broadcast %cst : f32 to vector<1x1x256xf32>
    %9 = vector.extract_strided_slice %1 {offsets = [0, 0, 0], sizes = [1, 1, 256], strides = [1, 1, 1]} : vector<2x2x256xf32> to vector<1x1x256xf32>
    %c0_16 = arith.constant 0 : index
    %c0_17 = arith.constant 0 : index
    %10 = vector.load %arg2[%c0_16, %c0_17] : memref<9x256xf32, #tpu.memory_space<vmem>>, vector<1x256xf32>
    %11 = vector.shape_cast %10 : vector<1x256xf32> to vector<1x1x256xf32>
    %12 = arith.mulf %9, %11 : vector<1x1x256xf32>
    %13 = arith.addf %8, %12 : vector<1x1x256xf32>
    %14 = vector.extract_strided_slice %3 {offsets = [0, 0, 0], sizes = [1, 1, 256], strides = [1, 1, 1]} : vector<2x2x256xf32> to vector<1x1x256xf32>
    %c1_18 = arith.constant 1 : index
    %c0_19 = arith.constant 0 : index
    %15 = vector.load %arg2[%c1_18, %c0_19] : memref<9x256xf32, #tpu.memory_space<vmem>>, vector<1x256xf32>
    %16 = vector.shape_cast %15 : vector<1x256xf32> to vector<1x1x256xf32>
    %17 = arith.mulf %14, %16 : vector<1x1x256xf32>
    %18 = arith.addf %13, %17 : vector<1x1x256xf32>
    %19 = vector.extract_strided_slice %1 {offsets = [0, 1, 0], sizes = [1, 1, 256], strides = [1, 1, 1]} : vector<2x2x256xf32> to vector<1x1x256xf32>
    %c2_20 = arith.constant 2 : index
    %c0_21 = arith.constant 0 : index
    %20 = vector.load %arg2[%c2_20, %c0_21] : memref<9x256xf32, #tpu.memory_space<vmem>>, vector<1x256xf32>
    %21 = vector.shape_cast %20 : vector<1x256xf32> to vector<1x1x256xf32>
    %22 = arith.mulf %19, %21 : vector<1x1x256xf32>
    %23 = arith.addf %18, %22 : vector<1x1x256xf32>
    %24 = vector.extract_strided_slice %5 {offsets = [0, 0, 0], sizes = [1, 1, 256], strides = [1, 1, 1]} : vector<2x2x256xf32> to vector<1x1x256xf32>
    %c3_22 = arith.constant 3 : index
    %c0_23 = arith.constant 0 : index
    %25 = vector.load %arg2[%c3_22, %c0_23] : memref<9x256xf32, #tpu.memory_space<vmem>>, vector<1x256xf32>
    %26 = vector.shape_cast %25 : vector<1x256xf32> to vector<1x1x256xf32>
    %27 = arith.mulf %24, %26 : vector<1x1x256xf32>
    %28 = arith.addf %23, %27 : vector<1x1x256xf32>
    %29 = vector.extract_strided_slice %7 {offsets = [0, 0, 0], sizes = [1, 1, 256], strides = [1, 1, 1]} : vector<2x2x256xf32> to vector<1x1x256xf32>
    %c4 = arith.constant 4 : index
    %c0_24 = arith.constant 0 : index
    %30 = vector.load %arg2[%c4, %c0_24] : memref<9x256xf32, #tpu.memory_space<vmem>>, vector<1x256xf32>
    %31 = vector.shape_cast %30 : vector<1x256xf32> to vector<1x1x256xf32>
    %32 = arith.mulf %29, %31 : vector<1x1x256xf32>
    %33 = arith.addf %28, %32 : vector<1x1x256xf32>
    %34 = vector.extract_strided_slice %5 {offsets = [0, 1, 0], sizes = [1, 1, 256], strides = [1, 1, 1]} : vector<2x2x256xf32> to vector<1x1x256xf32>
    %c5 = arith.constant 5 : index
    %c0_25 = arith.constant 0 : index
    %35 = vector.load %arg2[%c5, %c0_25] : memref<9x256xf32, #tpu.memory_space<vmem>>, vector<1x256xf32>
    %36 = vector.shape_cast %35 : vector<1x256xf32> to vector<1x1x256xf32>
    %37 = arith.mulf %34, %36 : vector<1x1x256xf32>
    %38 = arith.addf %33, %37 : vector<1x1x256xf32>
    %39 = vector.extract_strided_slice %1 {offsets = [1, 0, 0], sizes = [1, 1, 256], strides = [1, 1, 1]} : vector<2x2x256xf32> to vector<1x1x256xf32>
    %c6 = arith.constant 6 : index
    %c0_26 = arith.constant 0 : index
    %40 = vector.load %arg2[%c6, %c0_26] : memref<9x256xf32, #tpu.memory_space<vmem>>, vector<1x256xf32>
    %41 = vector.shape_cast %40 : vector<1x256xf32> to vector<1x1x256xf32>
    %42 = arith.mulf %39, %41 : vector<1x1x256xf32>
    %43 = arith.addf %38, %42 : vector<1x1x256xf32>
    %44 = vector.extract_strided_slice %3 {offsets = [1, 0, 0], sizes = [1, 1, 256], strides = [1, 1, 1]} : vector<2x2x256xf32> to vector<1x1x256xf32>
    %c7 = arith.constant 7 : index
    %c0_27 = arith.constant 0 : index
    %45 = vector.load %arg2[%c7, %c0_27] : memref<9x256xf32, #tpu.memory_space<vmem>>, vector<1x256xf32>
    %46 = vector.shape_cast %45 : vector<1x256xf32> to vector<1x1x256xf32>
    %47 = arith.mulf %44, %46 : vector<1x1x256xf32>
    %48 = arith.addf %43, %47 : vector<1x1x256xf32>
    %49 = vector.extract_strided_slice %1 {offsets = [1, 1, 0], sizes = [1, 1, 256], strides = [1, 1, 1]} : vector<2x2x256xf32> to vector<1x1x256xf32>
    %c8 = arith.constant 8 : index
    %c0_28 = arith.constant 0 : index
    %50 = vector.load %arg2[%c8, %c0_28] : memref<9x256xf32, #tpu.memory_space<vmem>>, vector<1x256xf32>
    %51 = vector.shape_cast %50 : vector<1x256xf32> to vector<1x1x256xf32>
    %52 = arith.mulf %49, %51 : vector<1x1x256xf32>
    %53 = arith.addf %48, %52 : vector<1x1x256xf32>
    %c0_29 = arith.constant 0 : index
    %c0_30 = arith.constant 0 : index
    %54 = vector.load %arg3[%c0_29, %c0_30] : memref<1x256xf32, #tpu.memory_space<vmem>>, vector<1x256xf32>
    %55 = vector.shape_cast %54 : vector<1x256xf32> to vector<1x1x256xf32>
    %56 = arith.addf %53, %55 : vector<1x1x256xf32>
    %cst_31 = arith.constant 0.000000e+00 : f32
    %57 = vector.broadcast %cst_31 : f32 to vector<1x1x256xf32>
    %58 = arith.maximumf %56, %57 : vector<1x1x256xf32>
    %c0_32 = arith.constant 0 : index
    %c0_33 = arith.constant 0 : index
    %59 = vector.load %arg4[%c0_32, %c0_33] : memref<256x256xbf16, #tpu.memory_space<vmem>>, vector<256x256xbf16>
    %c0_34 = arith.constant 0 : index
    %c0_35 = arith.constant 0 : index
    %60 = vector.load %arg5[%c0_34, %c0_35] : memref<1x256xf32, #tpu.memory_space<vmem>>, vector<1x256xf32>
    %61 = vector.shape_cast %58 : vector<1x1x256xf32> to vector<1x256xf32>
    %62 = arith.truncf %61 : vector<1x256xf32> to vector<1x256xbf16>
    %cst_36 = arith.constant dense<0.000000e+00> : vector<1x256xf32>
    %63 = tpu.matmul %62, %59, %cst_36 {dimension_numbers = #tpu.dot_dimension_numbers<[1], [0], [0], [1], [0, 0, 1, 1], [], []>} : vector<1x256xbf16>, vector<256x256xbf16>, vector<1x256xf32> -> vector<1x256xf32>
    %64 = arith.addf %63, %60 : vector<1x256xf32>
    %cst_37 = arith.constant 0.000000e+00 : f32
    %65 = vector.broadcast %cst_37 : f32 to vector<1x256xf32>
    %66 = arith.maximumf %64, %65 : vector<1x256xf32>
    %c0_38 = arith.constant 0 : index
    %c0_39 = arith.constant 0 : index
    %c0_40 = arith.constant 0 : index
    %c0_41 = arith.constant 0 : index
    %67 = vector.load %arg6[%c0_38, %c0_39, %c0_40, %c0_41] : memref<1x1x1x256xf32, #tpu.memory_space<vmem>>, vector<1x1x1x256xf32>
    %68 = vector.shape_cast %67 : vector<1x1x1x256xf32> to vector<1x256xf32>
    %69 = vector.shape_cast %66 : vector<1x256xf32> to vector<1x1x1x256xf32>
    tpu.vector_store %arg6[%c0_38, %c0_39, %c0_40, %c0_41], %69 {strides = array<i32>} : memref<1x1x1x256xf32, #tpu.memory_space<vmem>>, vector<1x1x1x256xf32>,
    return
  }
  func.func @transform_0(%arg0: i32) -> (i32, i32, i32, i32, i32) {
    %c0_i32 = arith.constant 0 : i32
    %c0_i32_0 = arith.constant 0 : i32
    %c0_i32_1 = arith.constant 0 : i32
    %c0_i32_2 = arith.constant 0 : i32
    %c0_i32_3 = arith.constant 0 : i32
    return %c0_i32, %arg0, %c0_i32_0, %c0_i32_1, %c0_i32_2 : i32, i32, i32, i32, i32
  }
  func.func @transform_1(%arg0: i32) -> (i32, i32) {
    %c0_i32 = arith.constant 0 : i32
    %c0_i32_0 = arith.constant 0 : i32
    %c0_i32_1 = arith.constant 0 : i32
    return %c0_i32, %c0_i32_0 : i32, i32
  }
  func.func @transform_2(%arg0: i32) -> (i32, i32) {
    %c0_i32 = arith.constant 0 : i32
    %c0_i32_0 = arith.constant 0 : i32
    %c0_i32_1 = arith.constant 0 : i32
    return %c0_i32, %c0_i32_0 : i32, i32
  }
  func.func @transform_3(%arg0: i32) -> (i32, i32) {
    %c0_i32 = arith.constant 0 : i32
    %c0_i32_0 = arith.constant 0 : i32
    %c0_i32_1 = arith.constant 0 : i32
    return %c0_i32, %c0_i32_0 : i32, i32
  }
  func.func @transform_4(%arg0: i32) -> (i32, i32) {
    %c0_i32 = arith.constant 0 : i32
    %c0_i32_0 = arith.constant 0 : i32
    %c0_i32_1 = arith.constant 0 : i32
    return %c0_i32, %c0_i32_0 : i32, i32
  }
  func.func @transform_5(%arg0: i32) -> (i32, i32, i32, i32) {
    %c0_i32 = arith.constant 0 : i32
    %c0_i32_0 = arith.constant 0 : i32
    %c0_i32_1 = arith.constant 0 : i32
    %c0_i32_2 = arith.constant 0 : i32
    return %arg0, %c0_i32, %c0_i32_0, %c0_i32_1 : i32, i32, i32, i32
  }
}

module attributes {stable_mosaic.version = 11 : i64} {
  func.func @_matmul_bias_act_kernel(%arg0: i32, %arg1: memref<2x256xbf16, #tpu.memory_space<vmem>>, %arg2: memref<256x128xbf16, #tpu.memory_space<vmem>>, %arg3: memref<1x128xf32, #tpu.memory_space<vmem>>, %arg4: memref<2x128xf32, #tpu.memory_space<vmem>>) attributes {dimension_semantics = [#tpu.dimension_semantics<parallel>], iteration_bounds = array<i64: 1>, scalar_prefetch = 0 : i64, scratch_operands = 0 : i64, tpu.core_type = #tpu.core_type<tc>, window_params = [{transform_indices = @transform_0, window_bounds = array<i64: 2, 256>}, {pipeline_mode = #tpu.pipeline_mode<synchronous>, transform_indices = @transform_1, window_bounds = array<i64: 256, 128>}, {pipeline_mode = #tpu.pipeline_mode<synchronous>, transform_indices = @transform_2, window_bounds = array<i64: 1, 128>}, {transform_indices = @transform_3, window_bounds = array<i64: 2, 128>}]} {
    %c0 = arith.constant 0 : index
    %c0_0 = arith.constant 0 : index
    %0 = vector.load %arg1[%c0, %c0_0] : memref<2x256xbf16, #tpu.memory_space<vmem>>, vector<2x256xbf16>
    %c0_1 = arith.constant 0 : index
    %c0_2 = arith.constant 0 : index
    %1 = vector.load %arg2[%c0_1, %c0_2] : memref<256x128xbf16, #tpu.memory_space<vmem>>, vector<256x128xbf16>
    %cst = arith.constant dense<0.000000e+00> : vector<2x128xf32>
    %2 = tpu.matmul %0, %1, %cst {dimension_numbers = #tpu.dot_dimension_numbers<[1], [0], [0], [1], [0, 0, 1, 1], [], []>} : vector<2x256xbf16>, vector<256x128xbf16>, vector<2x128xf32> -> vector<2x128xf32>
    %c0_3 = arith.constant 0 : index
    %c0_4 = arith.constant 0 : index
    %3 = vector.load %arg3[%c0_3, %c0_4] : memref<1x128xf32, #tpu.memory_space<vmem>>, vector<1x128xf32>
    %4 = vector.broadcast %3 : vector<1x128xf32> to vector<2x128xf32>
    %5 = arith.addf %2, %4 : vector<2x128xf32>
    %c0_5 = arith.constant 0 : index
    %c0_6 = arith.constant 0 : index
    %6 = vector.load %arg4[%c0_5, %c0_6] : memref<2x128xf32, #tpu.memory_space<vmem>>, vector<2x128xf32>
    tpu.vector_store %arg4[%c0_5, %c0_6], %5 {strides = array<i32>} : memref<2x128xf32, #tpu.memory_space<vmem>>, vector<2x128xf32>,
    return
  }
  func.func @transform_0(%arg0: i32) -> (i32, i32) {
    %c0_i32 = arith.constant 0 : i32
    %c0_i32_0 = arith.constant 0 : i32
    return %arg0, %c0_i32 : i32, i32
  }
  func.func @transform_1(%arg0: i32) -> (i32, i32) {
    %c0_i32 = arith.constant 0 : i32
    %c0_i32_0 = arith.constant 0 : i32
    %c0_i32_1 = arith.constant 0 : i32
    return %c0_i32, %c0_i32_0 : i32, i32
  }
  func.func @transform_2(%arg0: i32) -> (i32, i32) {
    %c0_i32 = arith.constant 0 : i32
    %c0_i32_0 = arith.constant 0 : i32
    %c0_i32_1 = arith.constant 0 : i32
    return %c0_i32, %c0_i32_0 : i32, i32
  }
  func.func @transform_3(%arg0: i32) -> (i32, i32) {
    %c0_i32 = arith.constant 0 : i32
    %c0_i32_0 = arith.constant 0 : i32
    return %arg0, %c0_i32 : i32, i32
  }
}

</mosaic_0001>

<bundles_post_ra>
// kernel: mobilenet_v1_forward.15
= control target key start
LH: loop header
LB: loop body
LE: loop exit
PB: predicated region body
PF: predicated region fallthrough
CT: control target
= control target key end

     0   :  { %s799_s12 = smov 0   ;;  %s963_s0 = inlined_call_operand.vmem [shape: bf16[512,32], index: 0, kind: input, shape index: {}]   ;;  %s964_s1 = inlined_call_operand.vmem [shape: bf16[32,8], index: 1, kind: input, shape index: {}]   ;;  %s965_s2 = inlined_call_operand.vmem [shape: f32[1,8], index: 2, kind: input, shape index: {}]   ;;  %s966_s3 = inlined_call_operand.vmem [shape: f32[512,8], index: 3, kind: output, shape index: {}]  }
   0x1 LB: > { %s641_s13 = sadd.s32 4294967295, %s777_s12   ;;  %p645_p0 = scmp.ge.s32.totalorder %s777_s12, 1  ;;  %s777_s12 = sphi %s799_s12, %s13_s12  }
   0x2   : > { %p138_p1 = scmp.lt.s32.totalorder %s777_s12, 3 }
   0x4   : > { %p139_p2 = pnand %p645_p0, %p138_p1 }
   0x5   : > { %v753_v0 = vld [vmem:[%s964_s1] sm:$0xff] (!%p139_p2)   ;;  %s646_s16 = sshll.u32 (!%p139_p2), %s641_s13, 5  ;;  %v754_v1 = vld [vmem:[%s964_s1 + $0x8] sm:$0xff] (!%p139_p2)   ;;  %vm310_vm0 = vcmask (!%p139_p2), 261120   ;;  %vm552_vm1 = vcmask (!%p139_p2), 64512  }
   0x6   : > { %142 = sbr.rel (%p139_p2) target bundleno = 263 (0x107), region = 32  ;;  %p163_p3 = scmp.lt.s32.totalorder (!%p139_p2), %s646_s16, 63  ;;  %705 = vmatprep.subr.bf16.mxu0 (!%p139_p2), %v753_v0  ;;  %741 = vmatprep.subr.bf16.mxu1 (!%p139_p2), %v753_v0  ;;  %v856_v18 = vld [vmem:[%s965_s2] ss:$0 sm:$0xff] (!%p139_p2) }
   0x7   : > { %706 = vmatpush3.bf16.msra.mxu0 (!%p139_p2), %v753_v0  ;;  %743 = vmatpush3.bf16.msra.mxu1 (!%p139_p2), %v753_v0 }
   0x8   : > { %707 = vmatprep.subr.bf16.mxu0 (!%p139_p2), %v754_v1  ;;  %742 = vmatprep.subr.bf16.mxu1 (!%p139_p2), %v754_v1 }
   0xb   : > { %708 = vmatpush3.bf16.msra.mxu0 (!%p139_p2), %v754_v1  ;;  %744 = vmatpush3.bf16.msra.mxu1 (!%p139_p2), %v754_v1 }
   0xd   : > { %s968_s16 = smov (!%p163_p3, %s646_s16), 63 }
   0xe   : > { %s647_s19 = sshll.u32 %s968_s16, 2  ;;  %s649_s25 = sshll.u32 %s968_s16, 3 }
   0xf   : > { %s819_s22 = scalar_lea.vmem %s963_s0, %s647_s19  ;;  %s863_s28 = scalar_lea.vmem %s966_s3, %s649_s25 }
  0x10   : > { %v755_v2 = vld [vmem:[%s819_s22] sm:$0xff]   ;;  %v757_v4 = vld [vmem:[%s819_s22 + $0x8] sm:$0xff]   ;;  %v759_v6 = vld [vmem:[%s819_s22 + $0x10] sm:$0xff]  }
  0x11   : > { %v756_v3 = vld [vmem:[%s819_s22 + $0x40] sm:$0xff]   ;;  %709 = vmatprep.mubr.msk.bf16.mxu0 %vm310_vm0, %v755_v2  ;;  %v758_v5 = vld [vmem:[%s819_s22 + $0x48] sm:$0xff]   ;;  %v760_v7 = vld [vmem:[%s819_s22 + $0x50] sm:$0xff]  }
  0x12   : > { %725 = vmatprep.mubr.msk.bf16.mxu1 %vm310_vm0, %v756_v3  ;;  %710 = vmatmul.mubr.msk.bf16.vlgmr.msra.gmra.mrb[0].mxu0 %vm310_vm0, %v757_v4  ;;  %v761_v8 = vld [vmem:[%s819_s22 + $0x18] sm:$0xff]   ;;  %v763_v10 = vld [vmem:[%s819_s22 + $0x20] sm:$0xff]   ;;  %v765_v12 = vld [vmem:[%s819_s22 + $0x28] sm:$0xff]  }
  0x13   : > { %726 = vmatmul.mubr.msk.bf16.vlgmr.msra.gmra.mrb[0].mxu1 %vm310_vm0, %v758_v5  ;;  %713 = vmatprep.mubr.msk.bf16.mxu0 %vm310_vm0, %v759_v6  ;;  %v762_v9 = vld [vmem:[%s819_s22 + $0x58] sm:$0xff]   ;;  %v764_v11 = vld [vmem:[%s819_s22 + $0x60] sm:$0xff]   ;;  %v766_v13 = vld [vmem:[%s819_s22 + $0x68] sm:$0xff]  }
  0x14   : > { %729 = vmatprep.mubr.msk.bf16.mxu1 %vm310_vm0, %v760_v7  ;;  %v767_v14 = vld [vmem:[%s819_s22 + $0x30] sm:$0xff]   ;;  %v769_v16 = vld [vmem:[%s819_s22 + $0x38] sm:$0xff]  }
  0x15   : > { %v768_v15 = vld [vmem:[%s819_s22 + $0x70] sm:$0xff]   ;;  %v770_v17 = vld [vmem:[%s819_s22 + $0x78] sm:$0xff]  }
  0x1a   : > { %714 = vmatmul.mubr.msk.bf16.gmra.mrb[4].mxu0 %vm310_vm0, %v761_v8 }
  0x1b   : > { %730 = vmatmul.mubr.msk.bf16.gmra.mrb[4].mxu1 %vm310_vm0, %v762_v9  ;;  %717 = vmatprep.mubr.msk.bf16.mxu0 %vm310_vm0, %v763_v10 }
  0x1c   : > { %733 = vmatprep.mubr.msk.bf16.mxu1 %vm310_vm0, %v764_v11 }
  0x22   : > { %718 = vmatmul.mubr.msk.bf16.gmra.mrb[8].mxu0 %vm310_vm0, %v765_v12 }
  0x23   : > { %734 = vmatmul.mubr.msk.bf16.gmra.mrb[8].mxu1 %vm310_vm0, %v766_v13  ;;  %721 = vmatprep.mubr.msk.bf16.mxu0 %vm310_vm0, %v767_v14 }
  0x24   : > { %737 = vmatprep.mubr.msk.bf16.mxu1 %vm310_vm0, %v768_v15 }
  0x2a   : > { %722 = vmatmul.mubr.msk.bf16.gmra.mrb[12].mxu0 %vm310_vm0, %v769_v16 }
  0x2b   : > { %738 = vmatmul.mubr.msk.bf16.gmra.mrb[12].mxu1 %vm310_vm0, %v770_v17 }
  0xe5   : > { %v711_v19 = vpop.f32.mrb[0].mxu0 }
  0xe6   : > { %v402_v20 = vadd.f32 %v711_v19, %v856_v18  ;;  %v727_v21 = vpop.f32.mrb[0].mxu1  ;;  %v393_v22 = vpop.f32.mrb[1].mxu0 }
  0xe7   : > { %v466_v23 = vadd.f32 %v727_v21, %v856_v18  ;;  %v394_v24 = vadd.f32 %v856_v18, %v393_v22  ;;  %v457_v25 = vpop.f32.mrb[1].mxu1  ;;  %v712_v26 = vpop.f32.mrb[2].mxu0 }
  0xe8   : > { %v522_v27 = vmax.f32 %v402_v20, 0.0  ;;  %v458_v28 = vadd.f32 %v856_v18, %v457_v25  ;;  %v405_v29 = vadd.f32 %v712_v26, %v856_v18  ;;  %v728_v30 = vpop.f32.mrb[2].mxu1  ;;  %v396_v31 = vpop.f32.mrb[3].mxu0 }
  0xe9   : > { %v538_v32 = vmax.f32 %v466_v23, 0.0  ;;  %v520_v33 = vmax.f32 %v394_v24, 0.0  ;;  %v469_v34 = vadd.f32 %v728_v30, %v856_v18  ;;  %v397_v35 = vadd.f32 %v856_v18, %v396_v31  ;;  %v460_v36 = vpop.f32.mrb[3].mxu1 }
  0xea   : > { %555 = vst.msk [vmem:[%s863_s28 + $0x10] sm:$0xff] %vm552_vm1, %v522_v27  ;;  %v536_v37 = vmax.f32 %v458_v28, 0.0  ;;  %v523_v38 = vmax.f32 %v405_v29, 0.0  ;;  %v461_v39 = vadd.f32 %v856_v18, %v460_v36 }
  0xeb   : > { %571 = vst.msk [vmem:[%s863_s28 + $0x90] sm:$0xff] %vm552_vm1, %v538_v32  ;;  %553 = vst.msk [vmem:[%s863_s28] sm:$0xff] %vm552_vm1, %v520_v33  ;;  %v539_v40 = vmax.f32 %v469_v34, 0.0  ;;  %v521_v41 = vmax.f32 %v397_v35, 0.0 }
  0xec   : > { %569 = vst.msk [vmem:[%s863_s28 + $0x80] sm:$0xff] %vm552_vm1, %v536_v37  ;;  %556 = vst.msk [vmem:[%s863_s28 + $0x18] sm:$0xff] %vm552_vm1, %v523_v38  ;;  %v537_v42 = vmax.f32 %v461_v39, 0.0 }
  0xed   : > { %572 = vst.msk [vmem:[%s863_s28 + $0x98] sm:$0xff] %vm552_vm1, %v539_v40  ;;  %554 = vst.msk [vmem:[%s863_s28 + $0x8] sm:$0xff] %vm552_vm1, %v521_v41  ;;  %v715_v43 = vpop.f32.mrb[4].mxu0 }
  0xee   : > { %570 = vst.msk [vmem:[%s863_s28 + $0x88] sm:$0xff] %vm552_vm1, %v537_v42  ;;  %v418_v44 = vadd.f32 %v715_v43, %v856_v18  ;;  %v731_v45 = vpop.f32.mrb[4].mxu1  ;;  %v409_v46 = vpop.f32.mrb[5].mxu0 }
  0xef   : > { %v482_v47 = vadd.f32 %v731_v45, %v856_v18  ;;  %v410_v48 = vadd.f32 %v856_v18, %v409_v46  ;;  %v473_v49 = vpop.f32.mrb[5].mxu1  ;;  %v716_v50 = vpop.f32.mrb[6].mxu0 }
  0xf0   : > { %v526_v51 = vmax.f32 %v418_v44, 0.0  ;;  %v474_v52 = vadd.f32 %v856_v18, %v473_v49  ;;  %v421_v53 = vadd.f32 %v716_v50, %v856_v18  ;;  %v732_v54 = vpop.f32.mrb[6].mxu1  ;;  %v412_v55 = vpop.f32.mrb[7].mxu0 }
  0xf1   : > { %v542_v56 = vmax.f32 %v482_v47, 0.0  ;;  %v524_v57 = vmax.f32 %v410_v48, 0.0  ;;  %v485_v58 = vadd.f32 %v732_v54, %v856_v18  ;;  %v413_v59 = vadd.f32 %v856_v18, %v412_v55  ;;  %v476_v60 = vpop.f32.mrb[7].mxu1 }
  0xf2   : > { %559 = vst.msk [vmem:[%s863_s28 + $0x30] sm:$0xff] %vm552_vm1, %v526_v51  ;;  %v540_v61 = vmax.f32 %v474_v52, 0.0  ;;  %v527_v62 = vmax.f32 %v421_v53, 0.0  ;;  %v477_v63 = vadd.f32 %v856_v18, %v476_v60 }
  0xf3   : > { %575 = vst.msk [vmem:[%s863_s28 + $0xb0] sm:$0xff] %vm552_vm1, %v542_v56  ;;  %557 = vst.msk [vmem:[%s863_s28 + $0x20] sm:$0xff] %vm552_vm1, %v524_v57  ;;  %v543_v0 = vmax.f32 %v485_v58, 0.0  ;;  %v525_v1 = vmax.f32 %v413_v59, 0.0 }
  0xf4   : > { %573 = vst.msk [vmem:[%s863_s28 + $0xa0] sm:$0xff] %vm552_vm1, %v540_v61  ;;  %560 = vst.msk [vmem:[%s863_s28 + $0x38] sm:$0xff] %vm552_vm1, %v527_v62  ;;  %v541_v2 = vmax.f32 %v477_v63, 0.0 }
  0xf5   : > { %576 = vst.msk [vmem:[%s863_s28 + $0xb8] sm:$0xff] %vm552_vm1, %v543_v0  ;;  %558 = vst.msk [vmem:[%s863_s28 + $0x28] sm:$0xff] %vm552_vm1, %v525_v1  ;;  %v719_v3 = vpop.f32.mrb[8].mxu0 }
  0xf6   : > { %574 = vst.msk [vmem:[%s863_s28 + $0xa8] sm:$0xff] %vm552_vm1, %v541_v2  ;;  %v434_v4 = vadd.f32 %v719_v3, %v856_v18  ;;  %v735_v5 = vpop.f32.mrb[8].mxu1  ;;  %v425_v6 = vpop.f32.mrb[9].mxu0 }
  0xf7   : > { %v498_v7 = vadd.f32 %v735_v5, %v856_v18  ;;  %v426_v8 = vadd.f32 %v856_v18, %v425_v6  ;;  %v489_v9 = vpop.f32.mrb[9].mxu1  ;;  %v720_v10 = vpop.f32.mrb[10].mxu0 }
  0xf8   : > { %v530_v11 = vmax.f32 %v434_v4, 0.0  ;;  %v490_v12 = vadd.f32 %v856_v18, %v489_v9  ;;  %v437_v13 = vadd.f32 %v720_v10, %v856_v18  ;;  %v736_v14 = vpop.f32.mrb[10].mxu1  ;;  %v428_v15 = vpop.f32.mrb[11].mxu0 }
  0xf9   : > { %v546_v16 = vmax.f32 %v498_v7, 0.0  ;;  %v528_v17 = vmax.f32 %v426_v8, 0.0  ;;  %v501_v19 = vadd.f32 %v736_v14, %v856_v18  ;;  %v429_v20 = vadd.f32 %v856_v18, %v428_v15  ;;  %v492_v21 = vpop.f32.mrb[11].mxu1 }
  0xfa   : > { %563 = vst.msk [vmem:[%s863_s28 + $0x50] sm:$0xff] %vm552_vm1, %v530_v11  ;;  %v544_v22 = vmax.f32 %v490_v12, 0.0  ;;  %v531_v23 = vmax.f32 %v437_v13, 0.0  ;;  %v493_v24 = vadd.f32 %v856_v18, %v492_v21 }
  0xfb   : > { %579 = vst.msk [vmem:[%s863_s28 + $0xd0] sm:$0xff] %vm552_vm1, %v546_v16  ;;  %561 = vst.msk [vmem:[%s863_s28 + $0x40] sm:$0xff] %vm552_vm1, %v528_v17  ;;  %v547_v25 = vmax.f32 %v501_v19, 0.0  ;;  %v529_v26 = vmax.f32 %v429_v20, 0.0 }
  0xfc   : > { %577 = vst.msk [vmem:[%s863_s28 + $0xc0] sm:$0xff] %vm552_vm1, %v544_v22  ;;  %564 = vst.msk [vmem:[%s863_s28 + $0x58] sm:$0xff] %vm552_vm1, %v531_v23  ;;  %v545_v27 = vmax.f32 %v493_v24, 0.0 }
  0xfd   : > { %580 = vst.msk [vmem:[%s863_s28 + $0xd8] sm:$0xff] %vm552_vm1, %v547_v25  ;;  %562 = vst.msk [vmem:[%s863_s28 + $0x48] sm:$0xff] %vm552_vm1, %v529_v26  ;;  %v723_v28 = vpop.f32.mrb[12].mxu0 }
  0xfe   : > { %578 = vst.msk [vmem:[%s863_s28 + $0xc8] sm:$0xff] %vm552_vm1, %v545_v27  ;;  %v450_v29 = vadd.f32 %v723_v28, %v856_v18  ;;  %v739_v30 = vpop.f32.mrb[12].mxu1  ;;  %v441_v31 = vpop.f32.mrb[13].mxu0 }
  0xff   : > { %v514_v32 = vadd.f32 %v739_v30, %v856_v18  ;;  %v442_v33 = vadd.f32 %v856_v18, %v441_v31  ;;  %v505_v34 = vpop.f32.mrb[13].mxu1  ;;  %v724_v35 = vpop.f32.mrb[14].mxu0 }
 0x100   : > { %v534_v36 = vmax.f32 %v450_v29, 0.0  ;;  %v506_v37 = vadd.f32 %v856_v18, %v505_v34  ;;  %v453_v38 = vadd.f32 %v724_v35, %v856_v18  ;;  %v740_v39 = vpop.f32.mrb[14].mxu1  ;;  %v444_v40 = vpop.f32.mrb[15].mxu0 }
 0x101   : > { %v550_v41 = vmax.f32 %v514_v32, 0.0  ;;  %v532_v42 = vmax.f32 %v442_v33, 0.0  ;;  %v517_v43 = vadd.f32 %v740_v39, %v856_v18  ;;  %v445_v44 = vadd.f32 %v856_v18, %v444_v40  ;;  %v508_v45 = vpop.f32.mrb[15].mxu1 }
 0x102   : > { %567 = vst.msk [vmem:[%s863_s28 + $0x70] sm:$0xff] %vm552_vm1, %v534_v36  ;;  %v548_v46 = vmax.f32 %v506_v37, 0.0  ;;  %v535_v47 = vmax.f32 %v453_v38, 0.0  ;;  %v509_v48 = vadd.f32 %v856_v18, %v508_v45 }
 0x103   : > { %583 = vst.msk [vmem:[%s863_s28 + $0xf0] sm:$0xff] %vm552_vm1, %v550_v41  ;;  %565 = vst.msk [vmem:[%s863_s28 + $0x60] sm:$0xff] %vm552_vm1, %v532_v42  ;;  %v551_v49 = vmax.f32 %v517_v43, 0.0  ;;  %v533_v50 = vmax.f32 %v445_v44, 0.0 }
 0x104   : > { %581 = vst.msk [vmem:[%s863_s28 + $0xe0] sm:$0xff] %vm552_vm1, %v548_v46  ;;  %568 = vst.msk [vmem:[%s863_s28 + $0x78] sm:$0xff] %vm552_vm1, %v535_v47  ;;  %v549_v51 = vmax.f32 %v509_v48, 0.0 }
 0x105   : > { %584 = vst.msk [vmem:[%s863_s28 + $0xf8] sm:$0xff] %vm552_vm1, %v551_v49  ;;  %566 = vst.msk [vmem:[%s863_s28 + $0x68] sm:$0xff] %vm552_vm1, %v533_v50 }
 0x106   : > { %582 = vst.msk [vmem:[%s863_s28 + $0xe8] sm:$0xff] %vm552_vm1, %v549_v51 }
 0x107 PF: > { %s13_s12 = sadd.s32 1, %s777_s12  }
 0x108   : > { %p10_p4 = scmp.ge.s32.totalorder %s13_s12, 4  }
 0x10a   :  { %12 = sbr.rel (!%p10_p4) target bundleno = 1 (0x1), region = 62 }

// kernel: mobilenet_v1_forward.17
= control target key start
LH: loop header
LB: loop body
LE: loop exit
PB: predicated region body
PF: predicated region fallthrough
CT: control target
= control target key end

     0   :  { %s1314_s18 = smov 0   ;;  %s1316_s19 = smov 0   ;;  %s1853_s0 = inlined_call_operand.vmem [shape: f32[4,2,9,9,16], index: 0, kind: input, shape index: {}]   ;;  %s1854_s1 = inlined_call_operand.vmem [shape: f32[9,16], index: 1, kind: input, shape index: {}]   ;;  %s1855_s2 = inlined_call_operand.vmem [shape: f32[1,16], index: 2, kind: input, shape index: {}]   ;;  %s1856_s3 = inlined_call_operand.vmem [shape: bf16[16,32], index: 3, kind: input, shape index: {}]   ;;  %s1857_s4 = inlined_call_operand.vmem [shape: f32[1,32], index: 4, kind: input, shape index: {}]   ;;  %s1858_s5 = inlined_call_operand.vmem [shape: f32[2,8,8,32], index: 5, kind: output, shape index: {}]  }
   0x1   :  { %s1318_s20 = smov 0  }
   0x2 LB: > { %s1155_s21 = sadd.s32 4294967295, %s1282_s20   ;;  %s1331_s22 = sadd.s32 1, %s1282_s20   ;;  %s1282_s20 = sphi %s1318_s20, %s1861_s20   ;;  %s1278_s19 = sphi %s1316_s19, %s1860_s19   ;;  %s1274_s18 = sphi %s1314_s18, %s1859_s18  }
   0x3   : > { %s19_s23 = ssub.s32 %s1282_s20, %s1331_s22  ;;  %s22_s24 = sadd.s32 1, %s1278_s19 }
   0x4   : > { %p20_p0 = scmp.eq.s32.totalorder %s19_s23, 0  ;;  %p29_p1 = scmp.ne.s32.totalorder %s1278_s19, %s1274_s18 }
   0x5   : > { %p30_p2 = scmp.eq.s32.totalorder %s1282_s20, 0  ;;  %p1158_p4 = scmp.ge.s32.totalorder %s1282_s20, 2 }
   0x6   : > { %s1340_s25 = scalar_select %p20_p0, %s1278_s19, %s22_s24  }
   0x7   : > { %p31_p3 = por %p30_p2, %p29_p1  ;;  %177 = sbr.rel (%p1158_p4) target bundleno = 55 (0x37), region = 32 }
   0xe   : > { %180 = sbr.rel (!%p31_p3) target bundleno = 55 (0x37), region = 36  ;;  %s182_s26 = sand.u32 (%p31_p3), 1, %s1278_s19  }
   0xf   : > { %s1233_s27 = smul.u32 (%p31_p3), 144, %s1282_s20 }
  0x10   : > { %s1232_s28 = smul.u32 (%p31_p3), 576, %s182_s26 }
  0x11   : > { %s1348_s6 = scalar_lea.vmem (%p31_p3), %s1853_s0, %s1233_s27 }
  0x12   : > { %v357_v0 = vld [vmem:[%s1348_s6] sm:$0xff] (%p31_p3)  ;;  %v359_v1 = vld [vmem:[%s1348_s6 + $0x8] sm:$0xff] (%p31_p3)  ;;  %v361_v2 = vld [vmem:[%s1348_s6 + $0x10] sm:$0xff] (%p31_p3)  ;;  %s1353_s7 = scalar_lea.vmem (%p31_p3), [#allocation2], %s1232_s28 }
  0x13   : > { %358 = vst [vmem:[%s1353_s7] sm:$0xff] (%p31_p3), %v357_v0  ;;  %360 = vst [vmem:[%s1353_s7 + $0x8] sm:$0xff] (%p31_p3), %v359_v1  ;;  %v363_v3 = vld [vmem:[%s1348_s6 + $0x18] sm:$0xff] (%p31_p3)  ;;  %v365_v4 = vld [vmem:[%s1348_s6 + $0x20] sm:$0xff] (%p31_p3) }
  0x14   : > { %362 = vst [vmem:[%s1353_s7 + $0x10] sm:$0xff] (%p31_p3), %v361_v2  ;;  %v367_v5 = vld [vmem:[%s1348_s6 + $0x28] sm:$0xff] (%p31_p3)  ;;  %364 = vst [vmem:[%s1353_s7 + $0x18] sm:$0xff] (%p31_p3), %v363_v3  ;;  %v369_v6 = vld [vmem:[%s1348_s6 + $0x30] sm:$0xff] (%p31_p3) }
  0x15   : > { %366 = vst [vmem:[%s1353_s7 + $0x20] sm:$0xff] %v365_v4  ;;  %368 = vst [vmem:[%s1353_s7 + $0x28] sm:$0xff] %v367_v5  ;;  %v371_v7 = vld [vmem:[%s1348_s6 + $0x38] sm:$0xff]  ;;  %v373_v8 = vld [vmem:[%s1348_s6 + $0x40] sm:$0xff] }
  0x16   : > { %370 = vst [vmem:[%s1353_s7 + $0x30] sm:$0xff] %v369_v6  ;;  %372 = vst [vmem:[%s1353_s7 + $0x38] sm:$0xff] %v371_v7  ;;  %v375_v9 = vld [vmem:[%s1348_s6 + $0x48] sm:$0xff]  ;;  %v377_v10 = vld [vmem:[%s1348_s6 + $0x50] sm:$0xff] }
  0x17   : > { %374 = vst [vmem:[%s1353_s7 + $0x40] sm:$0xff] %v373_v8  ;;  %v379_v11 = vld [vmem:[%s1348_s6 + $0x58] sm:$0xff]  ;;  %376 = vst [vmem:[%s1353_s7 + $0x48] sm:$0xff] %v375_v9  ;;  %v381_v12 = vld [vmem:[%s1348_s6 + $0x60] sm:$0xff] }
  0x18   : > { %378 = vst [vmem:[%s1353_s7 + $0x50] sm:$0xff] %v377_v10  ;;  %380 = vst [vmem:[%s1353_s7 + $0x58] sm:$0xff] %v379_v11  ;;  %v383_v13 = vld [vmem:[%s1348_s6 + $0x68] sm:$0xff]  ;;  %v385_v14 = vld [vmem:[%s1348_s6 + $0x70] sm:$0xff] }
  0x19   : > { %382 = vst [vmem:[%s1353_s7 + $0x60] sm:$0xff] %v381_v12  ;;  %384 = vst [vmem:[%s1353_s7 + $0x68] sm:$0xff] %v383_v13  ;;  %v387_v15 = vld [vmem:[%s1348_s6 + $0x78] sm:$0xff]  ;;  %v389_v16 = vld [vmem:[%s1348_s6 + $0x80] sm:$0xff] }
  0x1a   : > { %386 = vst [vmem:[%s1353_s7 + $0x70] sm:$0xff] %v385_v14  ;;  %v391_v17 = vld [vmem:[%s1348_s6 + $0x88] sm:$0xff]  ;;  %388 = vst [vmem:[%s1353_s7 + $0x78] sm:$0xff] %v387_v15  ;;  %v393_v18 = vld [vmem:[%s1348_s6 + $0x120] sm:$0xff] }
  0x1b   : > { %390 = vst [vmem:[%s1353_s7 + $0x80] sm:$0xff] %v389_v16  ;;  %392 = vst [vmem:[%s1353_s7 + $0x88] sm:$0xff] %v391_v17  ;;  %v395_v19 = vld [vmem:[%s1348_s6 + $0x128] sm:$0xff]  ;;  %v397_v20 = vld [vmem:[%s1348_s6 + $0x130] sm:$0xff] }
  0x1c   : > { %394 = vst [vmem:[%s1353_s7 + $0x90] sm:$0xff] %v393_v18  ;;  %396 = vst [vmem:[%s1353_s7 + $0x98] sm:$0xff] %v395_v19  ;;  %v399_v21 = vld [vmem:[%s1348_s6 + $0x138] sm:$0xff]  ;;  %v401_v22 = vld [vmem:[%s1348_s6 + $0x140] sm:$0xff] }
  0x1d   : > { %398 = vst [vmem:[%s1353_s7 + $0xa0] sm:$0xff] %v397_v20  ;;  %v403_v23 = vld [vmem:[%s1348_s6 + $0x148] sm:$0xff]  ;;  %400 = vst [vmem:[%s1353_s7 + $0xa8] sm:$0xff] %v399_v21  ;;  %v405_v24 = vld [vmem:[%s1348_s6 + $0x150] sm:$0xff] }
  0x1e   : > { %402 = vst [vmem:[%s1353_s7 + $0xb0] sm:$0xff] %v401_v22  ;;  %404 = vst [vmem:[%s1353_s7 + $0xb8] sm:$0xff] %v403_v23  ;;  %v407_v25 = vld [vmem:[%s1348_s6 + $0x158] sm:$0xff]  ;;  %v409_v26 = vld [vmem:[%s1348_s6 + $0x160] sm:$0xff] }
  0x1f   : > { %406 = vst [vmem:[%s1353_s7 + $0xc0] sm:$0xff] %v405_v24  ;;  %408 = vst [vmem:[%s1353_s7 + $0xc8] sm:$0xff] %v407_v25  ;;  %v411_v27 = vld [vmem:[%s1348_s6 + $0x168] sm:$0xff]  ;;  %v413_v28 = vld [vmem:[%s1348_s6 + $0x170] sm:$0xff] }
  0x20   : > { %410 = vst [vmem:[%s1353_s7 + $0xd0] sm:$0xff] %v409_v26  ;;  %v415_v29 = vld [vmem:[%s1348_s6 + $0x178] sm:$0xff]  ;;  %412 = vst [vmem:[%s1353_s7 + $0xd8] sm:$0xff] %v411_v27  ;;  %v417_v30 = vld [vmem:[%s1348_s6 + $0x180] sm:$0xff] }
  0x21   : > { %414 = vst [vmem:[%s1353_s7 + $0xe0] sm:$0xff] %v413_v28  ;;  %416 = vst [vmem:[%s1353_s7 + $0xe8] sm:$0xff] %v415_v29  ;;  %v419_v31 = vld [vmem:[%s1348_s6 + $0x188] sm:$0xff]  ;;  %v421_v32 = vld [vmem:[%s1348_s6 + $0x190] sm:$0xff] }
  0x22   : > { %418 = vst [vmem:[%s1353_s7 + $0xf0] sm:$0xff] %v417_v30  ;;  %420 = vst [vmem:[%s1353_s7 + $0xf8] sm:$0xff] %v419_v31  ;;  %v423_v33 = vld [vmem:[%s1348_s6 + $0x198] sm:$0xff]  ;;  %v425_v34 = vld [vmem:[%s1348_s6 + $0x1a0] sm:$0xff] }
  0x23   : > { %422 = vst [vmem:[%s1353_s7 + $0x100] sm:$0xff] %v421_v32  ;;  %v427_v35 = vld [vmem:[%s1348_s6 + $0x1a8] sm:$0xff]  ;;  %424 = vst [vmem:[%s1353_s7 + $0x108] sm:$0xff] %v423_v33  ;;  %v429_v36 = vld [vmem:[%s1348_s6 + $0x240] sm:$0xff] }
  0x24   : > { %426 = vst [vmem:[%s1353_s7 + $0x110] sm:$0xff] %v425_v34  ;;  %428 = vst [vmem:[%s1353_s7 + $0x118] sm:$0xff] %v427_v35  ;;  %v431_v37 = vld [vmem:[%s1348_s6 + $0x248] sm:$0xff]  ;;  %v433_v38 = vld [vmem:[%s1348_s6 + $0x250] sm:$0xff] }
  0x25   : > { %430 = vst [vmem:[%s1353_s7 + $0x120] sm:$0xff] %v429_v36  ;;  %432 = vst [vmem:[%s1353_s7 + $0x128] sm:$0xff] %v431_v37  ;;  %v435_v39 = vld [vmem:[%s1348_s6 + $0x258] sm:$0xff]  ;;  %v437_v40 = vld [vmem:[%s1348_s6 + $0x260] sm:$0xff] }
  0x26   : > { %434 = vst [vmem:[%s1353_s7 + $0x130] sm:$0xff] %v433_v38  ;;  %v439_v41 = vld [vmem:[%s1348_s6 + $0x268] sm:$0xff]  ;;  %436 = vst [vmem:[%s1353_s7 + $0x138] sm:$0xff] %v435_v39  ;;  %v441_v42 = vld [vmem:[%s1348_s6 + $0x270] sm:$0xff] }
  0x27   : > { %438 = vst [vmem:[%s1353_s7 + $0x140] sm:$0xff] %v437_v40  ;;  %440 = vst [vmem:[%s1353_s7 + $0x148] sm:$0xff] %v439_v41  ;;  %v443_v43 = vld [vmem:[%s1348_s6 + $0x278] sm:$0xff]  ;;  %v445_v44 = vld [vmem:[%s1348_s6 + $0x280] sm:$0xff] }
  0x28   : > { %442 = vst [vmem:[%s1353_s7 + $0x150] sm:$0xff] %v441_v42  ;;  %444 = vst [vmem:[%s1353_s7 + $0x158] sm:$0xff] %v443_v43  ;;  %v447_v45 = vld [vmem:[%s1348_s6 + $0x288] sm:$0xff]  ;;  %v449_v46 = vld [vmem:[%s1348_s6 + $0x290] sm:$0xff] }
  0x29   : > { %446 = vst [vmem:[%s1353_s7 + $0x160] sm:$0xff] %v445_v44  ;;  %v451_v47 = vld [vmem:[%s1348_s6 + $0x298] sm:$0xff]  ;;  %448 = vst [vmem:[%s1353_s7 + $0x168] sm:$0xff] %v447_v45  ;;  %v453_v48 = vld [vmem:[%s1348_s6 + $0x2a0] sm:$0xff] }
  0x2a   : > { %450 = vst [vmem:[%s1353_s7 + $0x170] sm:$0xff] %v449_v46  ;;  %452 = vst [vmem:[%s1353_s7 + $0x178] sm:$0xff] %v451_v47  ;;  %v455_v49 = vld [vmem:[%s1348_s6 + $0x2a8] sm:$0xff]  ;;  %v457_v50 = vld [vmem:[%s1348_s6 + $0x2b0] sm:$0xff] }
  0x2b   : > { %454 = vst [vmem:[%s1353_s7 + $0x180] sm:$0xff] %v453_v48  ;;  %456 = vst [vmem:[%s1353_s7 + $0x188] sm:$0xff] %v455_v49  ;;  %v459_v51 = vld [vmem:[%s1348_s6 + $0x2b8] sm:$0xff]  ;;  %v461_v52 = vld [vmem:[%s1348_s6 + $0x2c0] sm:$0xff] }
  0x2c   : > { %458 = vst [vmem:[%s1353_s7 + $0x190] sm:$0xff] %v457_v50  ;;  %v463_v53 = vld [vmem:[%s1348_s6 + $0x2c8] sm:$0xff]  ;;  %460 = vst [vmem:[%s1353_s7 + $0x198] sm:$0xff] %v459_v51  ;;  %v465_v54 = vld [vmem:[%s1348_s6 + $0x360] sm:$0xff] }
  0x2d   : > { %462 = vst [vmem:[%s1353_s7 + $0x1a0] sm:$0xff] %v461_v52  ;;  %464 = vst [vmem:[%s1353_s7 + $0x1a8] sm:$0xff] %v463_v53  ;;  %v467_v55 = vld [vmem:[%s1348_s6 + $0x368] sm:$0xff]  ;;  %v469_v56 = vld [vmem:[%s1348_s6 + $0x370] sm:$0xff] }
  0x2e   : > { %466 = vst [vmem:[%s1353_s7 + $0x1b0] sm:$0xff] %v465_v54  ;;  %468 = vst [vmem:[%s1353_s7 + $0x1b8] sm:$0xff] %v467_v55  ;;  %v471_v57 = vld [vmem:[%s1348_s6 + $0x378] sm:$0xff]  ;;  %v473_v58 = vld [vmem:[%s1348_s6 + $0x380] sm:$0xff] }
  0x2f   : > { %470 = vst [vmem:[%s1353_s7 + $0x1c0] sm:$0xff] %v469_v56  ;;  %v475_v59 = vld [vmem:[%s1348_s6 + $0x388] sm:$0xff]  ;;  %472 = vst [vmem:[%s1353_s7 + $0x1c8] sm:$0xff] %v471_v57  ;;  %v477_v60 = vld [vmem:[%s1348_s6 + $0x390] sm:$0xff] }
  0x30   : > { %474 = vst [vmem:[%s1353_s7 + $0x1d0] sm:$0xff] %v473_v58  ;;  %476 = vst [vmem:[%s1353_s7 + $0x1d8] sm:$0xff] %v475_v59  ;;  %v479_v61 = vld [vmem:[%s1348_s6 + $0x398] sm:$0xff]  ;;  %v481_v62 = vld [vmem:[%s1348_s6 + $0x3a0] sm:$0xff] }
  0x31   : > { %478 = vst [vmem:[%s1353_s7 + $0x1e0] sm:$0xff] %v477_v60  ;;  %480 = vst [vmem:[%s1353_s7 + $0x1e8] sm:$0xff] %v479_v61  ;;  %v483_v63 = vld [vmem:[%s1348_s6 + $0x3a8] sm:$0xff]  ;;  %v485_v0 = vld [vmem:[%s1348_s6 + $0x3b0] sm:$0xff] }
  0x32   : > { %482 = vst [vmem:[%s1353_s7 + $0x1f0] sm:$0xff] %v481_v62  ;;  %v487_v1 = vld [vmem:[%s1348_s6 + $0x3b8] sm:$0xff]  ;;  %484 = vst [vmem:[%s1353_s7 + $0x1f8] sm:$0xff] %v483_v63  ;;  %v489_v2 = vld [vmem:[%s1348_s6 + $0x3c0] sm:$0xff] }
  0x33   : > { %486 = vst [vmem:[%s1353_s7 + $0x200] sm:$0xff] %v485_v0  ;;  %488 = vst [vmem:[%s1353_s7 + $0x208] sm:$0xff] %v487_v1  ;;  %v491_v3 = vld [vmem:[%s1348_s6 + $0x3c8] sm:$0xff]  ;;  %v493_v4 = vld [vmem:[%s1348_s6 + $0x3d0] sm:$0xff] }
  0x34   : > { %490 = vst [vmem:[%s1353_s7 + $0x210] sm:$0xff] %v489_v2  ;;  %492 = vst [vmem:[%s1353_s7 + $0x218] sm:$0xff] %v491_v3  ;;  %v495_v5 = vld [vmem:[%s1348_s6 + $0x3d8] sm:$0xff]  ;;  %v497_v6 = vld [vmem:[%s1348_s6 + $0x3e0] sm:$0xff] }
  0x35   : > { %494 = vst [vmem:[%s1353_s7 + $0x220] sm:$0xff] %v493_v4  ;;  %v499_v7 = vld [vmem:[%s1348_s6 + $0x3e8] sm:$0xff]  ;;  %496 = vst [vmem:[%s1353_s7 + $0x228] sm:$0xff] %v495_v5 }
  0x36   : > { %498 = vst [vmem:[%s1353_s7 + $0x230] sm:$0xff] %v497_v6  ;;  %500 = vst [vmem:[%s1353_s7 + $0x238] sm:$0xff] %v499_v7 }
  0x37 PF: > { %p1160_p5 = scmp.ge.s32.totalorder %s1282_s20, 1  ;;  %p505_p6 = scmp.lt.s32.totalorder %s1282_s20, 3 }
  0x39   : > { %p506_p7 = pnand %p1160_p5, %p505_p6 }
  0x3a   : > { %v1259_v8 = vld [vmem:[%s1856_s3] sm:$0xff] (!%p506_p7)   ;;  %s512_s10 = sand.u32 (!%p506_p7), 1, %s1274_s18   ;;  %vm678_vm0 = vcmask (!%p506_p7), 1046528   ;;  %vm999_vm1 = vcmask (!%p506_p7), 130048   ;;  %p539_p8 = scmp.lt.s32.totalorder (!%p506_p7), %s1155_s21, 1  ;;  %vm1085_vm2 = vcmask (!%p506_p7), 261120  }
  0x3b   : > { %509 = sbr.rel (%p506_p7) target bundleno = 357 (0x165), region = 74  ;;  %1220 = vmatprep.subr.bf16.mxu0 (!%p506_p7), %v1259_v8  ;;  %1230 = vmatprep.subr.bf16.mxu1 (!%p506_p7), %v1259_v8  ;;  %v1505_v9 = vld [vmem:[%s1854_s1] ss:$0 sm:$0xff] (!%p506_p7)  ;;  %v1510_v10 = vld [vmem:[%s1854_s1 + $0x2] ss:$0 sm:$0xff] (!%p506_p7) }
  0x3c   : > { %s1234_s11 = smul.u32 (!%p506_p7), 576, %s512_s10  ;;  %1221 = vmatpush3.bf16.msra.mxu0 (!%p506_p7), %v1259_v8  ;;  %1231 = vmatpush3.bf16.msra.mxu1 (!%p506_p7), %v1259_v8  ;;  %v1515_v11 = vld [vmem:[%s1854_s1 + $0x1] ss:$0 sm:$0xff] (!%p506_p7)  ;;  %v1520_v12 = vld [vmem:[%s1854_s1 + $0x3] ss:$0 sm:$0xff] (!%p506_p7) }
  0x3d   : > { %v1571_v42 = vld [vmem:[%s1854_s1 + $0x4] ss:$0 sm:$0xff] (!%p506_p7)  ;;  %v1578_v49 = vld [vmem:[%s1854_s1 + $0x5] ss:$0 sm:$0xff] (!%p506_p7)  ;;  %v1593_v3 = vld [vmem:[%s1854_s1 + $0x6] ss:$0 sm:$0xff] (!%p506_p7) }
  0x3e   : > { %s1522_s24 = scalar_lea.vmem (!%p506_p7), [#allocation2], %s1234_s11  ;;  %v1602_v8 = vld [vmem:[%s1854_s1 + $0x7] ss:$0 sm:$0xff] (!%p506_p7) }
  0x3f   : > { %v545_v13 = vld [vmem:[%s1522_s24] sm:$0xff] (!%p506_p7)  ;;  %v546_v14 = vld [vmem:[%s1522_s24 + $0x8] sm:$0x1] (!%p506_p7)  ;;  %v1527_v15 = vld [vmem:[%s1522_s24 + $0x10] sm:$0xff] (!%p506_p7) }
  0x40   : > { %v1530_v16 = vld [vmem:[%s1522_s24 + $0x18] sm:$0x1] (!%p506_p7)  ;;  %v1533_v17 = vld [vmem:[%s1522_s24 + $0x20] sm:$0xff] (!%p506_p7)  ;;  %v1536_v18 = vld [vmem:[%s1522_s24 + $0x28] sm:$0x1] (!%p506_p7)  ;;  %v604_v19 = vmul.f32 (!%p506_p7), %v1505_v9, %v545_v13  ;;  %v605_v20 = vmul.f32 (!%p506_p7), %v1505_v9, %v1527_v15  ;;  %v646_v21 = vmul.f32 (!%p506_p7), %v1510_v10, %v545_v13  ;;  %v647_v22 = vmul.f32 (!%p506_p7), %v1510_v10, %v546_v14 }
  0x41   : > { %v1163_v23 = vld [vmem:[%s1522_s24 + $0x90] sm:$0xff] (!%p506_p7)  ;;  %v1164_v24 = vld [vmem:[%s1522_s24 + $0xa0] sm:$0xff] (!%p506_p7)  ;;  %v606_v26 = vmul.f32 (!%p506_p7), %v1505_v9, %v1533_v17  ;;  %v648_v27 = vmul.f32 (!%p506_p7), %v1510_v10, %v1527_v15  ;;  %v649_v28 = vmul.f32 (!%p506_p7), %v1510_v10, %v1530_v16  ;;  %v650_v29 = vmul.f32 (!%p506_p7), %v1510_v10, %v1533_v17  ;;  %v1173_v43 = vld [vmem:[%s1522_s24 + $0x128] sm:$0x1] (!%p506_p7) }
  0x42   : > { %v1546_v25 = vld [vmem:[%s1522_s24 + $0xb0] sm:$0xff]  ;;  %v1172_v30 = vld [vmem:[%s1522_s24 + $0x120] sm:$0xff]  ;;  %v625_v32 = vmul.f32 %v1515_v11, %v1163_v23  ;;  %v626_v33 = vmul.f32 %v1515_v11, %v1164_v24  ;;  %v651_v35 = vmul.f32 %v1510_v10, %v1536_v18  ;;  %v679_v38 = vrot.slane %v646_v21, 1  ;;  %v1175_v54 = vld [vmem:[%s1522_s24 + $0x138] sm:$0x1]  ;;  %s1863_s21 = smov (!%p539_p8, %s1155_s21), 1 }
  0x43   : > { %v1174_v31 = vld [vmem:[%s1522_s24 + $0x130] sm:$0xff]  ;;  %v627_v34 = vmul.f32 %v1515_v11, %v1546_v25  ;;  %v1176_v36 = vld [vmem:[%s1522_s24 + $0x140] sm:$0xff]  ;;  %v680_v39 = vrot.slane %v647_v22, 1  ;;  %v724_v40 = vmul.f32 %v1520_v12, %v1172_v30  ;;  %v682_v48 = vrot.slane %v648_v27, 1  ;;  %v1609_v21 = vld [vmem:[%s1854_s1 + $0x8] ss:$0 sm:$0xff] }
  0x44   : > { %v1188_v37 = vld [vmem:[%s1522_s24 + $0x1b0] sm:$0xff]  ;;  %v725_v41 = vmul.f32 %v1520_v12, %v1174_v31  ;;  %v1189_v44 = vld [vmem:[%s1522_s24 + $0x1c0] sm:$0xff]  ;;  %v633_v45 = vadd.f32 %v625_v32, %v604_v19  ;;  %v634_v46 = vadd.f32 %v626_v33, %v605_v20  ;;  %v683_v51 = vrot.slane %v649_v28, 1  ;;  %s1214_s15 = sshll.u32 %s1863_s21, 6 }
  0x45   : > { %v635_v47 = vadd.f32 %v627_v34, %v606_v26  ;;  %v681_v50 = vsel %vm678_vm0, %v679_v38, %v680_v39  ;;  %v685_v52 = vrot.slane %v650_v29, 1  ;;  %v686_v53 = vrot.slane %v651_v35, 1  ;;  %v1619_v32 = vld [vmem:[%s1522_s24 + $0x40] sm:$0xff]  ;;  %v1622_v33 = vld [vmem:[%s1522_s24 + $0x50] sm:$0xff]  ;;  %s543_s18 = scalar_lea.vmem %s1858_s5, %s1214_s15 }
  0x46   : > { %v711_v55 = vadd.f32 %v681_v50, %v633_v45  ;;  %v726_v56 = vmul.f32 %v1520_v12, %v1176_v36  ;;  %v745_v57 = vmul.f32 %v1571_v42, %v1188_v37  ;;  %v746_v58 = vmul.f32 %v1571_v42, %v1189_v44  ;;  %v1645_v45 = vld [vmem:[%s1522_s24 + $0xf0] sm:$0xff]  ;;  %v1652_v50 = vld [vmem:[%s1522_s24 + $0x48] sm:$0x1] }
  0x47   : > { %v684_v59 = vsel %vm678_vm0, %v682_v48, %v683_v51  ;;  %v687_v60 = vsel %vm678_vm0, %v685_v52, %v686_v53  ;;  %v766_v61 = vmul.f32 %v1578_v49, %v1172_v30  ;;  %v767_v62 = vmul.f32 %v1578_v49, %v1173_v43  ;;  %v1639_v43 = vld [vmem:[%s1522_s24 + $0xd0] sm:$0xff]  ;;  %v1658_v52 = vld [vmem:[%s1855_s2] ss:$0 sm:$0xff] }
  0x48   : > { %v712_v63 = vadd.f32 %v684_v59, %v634_v46  ;;  %v713_v0 = vadd.f32 %v687_v60, %v635_v47  ;;  %v732_v1 = vadd.f32 %v724_v40, %v711_v55  ;;  %v768_v2 = vmul.f32 %v1578_v49, %v1174_v31  ;;  %v1668_v59 = vld [vmem:[%s1522_s24 + $0x58] sm:$0x1]  ;;  %v1671_v60 = vld [vmem:[%s1522_s24 + $0x68] sm:$0x1] }
  0x49   : > { %v769_v4 = vmul.f32 %v1578_v49, %v1175_v54  ;;  %v1597_v5 = vmul.f32 %v1578_v49, %v1176_v36  ;;  %v798_v6 = vrot.slane %v766_v61, 1  ;;  %v799_v7 = vrot.slane %v767_v62, 1 }
  0x4a   : > { %v733_v13 = vadd.f32 %v725_v41, %v712_v63  ;;  %v1604_v14 = vadd.f32 %v726_v56, %v713_v0  ;;  %v753_v19 = vadd.f32 %v745_v57, %v732_v1  ;;  %v801_v20 = vrot.slane %v768_v2, 1  ;;  %v1636_v41 = vld [vmem:[%s1522_s24 + $0x60] sm:$0xff] }
  0x4b   : > { %v800_v22 = vsel %vm678_vm0, %v798_v6, %v799_v7  ;;  %v802_v23 = vrot.slane %v769_v4, 1  ;;  %v804_v26 = vrot.slane %v1597_v5, 1  ;;  %v843_v27 = vmul.f32 %v1593_v3, %v1527_v15  ;;  %v1180_v6 = vld [vmem:[%s1522_s24 + $0x160] sm:$0xff] }
  0x4c   : > { %v754_v28 = vadd.f32 %v746_v58, %v733_v13  ;;  %v830_v29 = vadd.f32 %v800_v22, %v753_v19  ;;  %v844_v30 = vmul.f32 %v1593_v3, %v1533_v17  ;;  %v864_v31 = vmul.f32 %v1602_v8, %v1164_v24  ;;  %v1182_v19 = vld [vmem:[%s1522_s24 + $0x170] sm:$0xff] }
  0x4d   : > { %v803_v34 = vsel %vm678_vm0, %v801_v20, %v802_v23  ;;  %v865_v35 = vmul.f32 %v1602_v8, %v1546_v25  ;;  %v885_v36 = vmul.f32 %v1609_v21, %v1527_v15  ;;  %v886_v37 = vmul.f32 %v1609_v21, %v1530_v16  ;;  %v1642_v25 = vld [vmem:[%s1522_s24 + $0xe0] sm:$0xff] }
  0x4e   : > { %v831_v38 = vadd.f32 %v803_v34, %v754_v28  ;;  %v851_v39 = vadd.f32 %v843_v27, %v830_v29  ;;  %v887_v24 = vmul.f32 %v1609_v21, %v1533_v17  ;;  %v888_v40 = vmul.f32 %v1609_v21, %v1536_v18  ;;  %v1184_v20 = vld [vmem:[%s1522_s24 + $0x180] sm:$0xff] }
  0x4f   : > { %v917_v44 = vrot.slane %v885_v36, 1  ;;  %v918_v15 = vrot.slane %v886_v37, 1  ;;  %v608_v16 = vmul.f32 %v1505_v9, %v1619_v32  ;;  %v609_v17 = vmul.f32 %v1505_v9, %v1622_v33  ;;  %v1193_v36 = vld [vmem:[%s1522_s24 + $0x200] sm:$0xff] }
  0x50   : > { %v852_v46 = vadd.f32 %v844_v30, %v831_v38  ;;  %v872_v18 = vadd.f32 %v864_v31, %v851_v39  ;;  %v920_v47 = vrot.slane %v887_v24, 1  ;;  %v921_v48 = vrot.slane %v888_v40, 1  ;;  %v1192_v31 = vld [vmem:[%s1522_s24 + $0x1f0] sm:$0xff] }
  0x51   : > { %v919_v51 = vsel %vm678_vm0, %v917_v44, %v918_v15  ;;  %v610_v53 = vmul.f32 %v1505_v9, %v1636_v41  ;;  %v629_v54 = vmul.f32 %v1515_v11, %v1639_v43  ;;  %v630_v55 = vmul.f32 %v1515_v11, %v1642_v25  ;;  %v1181_v44 = vld [vmem:[%s1522_s24 + $0x168] sm:$0x1] }
  0x52   : > { %v873_v56 = vadd.f32 %v865_v35, %v852_v46  ;;  %v922_v57 = vsel %vm678_vm0, %v920_v47, %v921_v48  ;;  %v949_v58 = vadd.f32 %v919_v51, %v872_v18  ;;  %v631_v61 = vmul.f32 %v1515_v11, %v1645_v45  ;;  %v1183_v46 = vld [vmem:[%s1522_s24 + $0x178] sm:$0x1] }
  0x53   : > { %v637_v62 = vadd.f32 %v629_v54, %v608_v16  ;;  %v638_v63 = vadd.f32 %v630_v55, %v609_v17  ;;  %v654_v0 = vmul.f32 %v1510_v10, %v1619_v32  ;;  %v655_v1 = vmul.f32 %v1510_v10, %v1652_v50 }
  0x54   : > { %v950_v2 = vadd.f32 %v922_v57, %v873_v56  ;;  %v964_v4 = vadd.f32 %v1658_v52, %v949_v58  ;;  %v639_v7 = vadd.f32 %v631_v61, %v610_v53  ;;  %v656_v13 = vmul.f32 %v1510_v10, %v1622_v33 }
  0x55   : > { %v657_v22 = vmul.f32 %v1510_v10, %v1668_v59  ;;  %v658_v23 = vmul.f32 %v1510_v10, %v1636_v41  ;;  %v659_v27 = vmul.f32 %v1510_v10, %v1671_v60  ;;  %v691_v28 = vrot.slane %v654_v0, 1 }
  0x56   : > { %v965_v29 = vadd.f32 %v1658_v52, %v950_v2  ;;  %v972_v30 = vmax.f32 %v964_v4, 0.0  ;;  %v692_v34 = vrot.slane %v655_v1, 1  ;;  %v694_v35 = vrot.slane %v656_v13, 1 }
  0x57   : > { %v695_v37 = vrot.slane %v657_v22, 1  ;;  %v697_v38 = vrot.slane %v658_v23, 1  ;;  %v698_v39 = vrot.slane %v659_v27, 1  ;;  %v728_v24 = vmul.f32 %v1520_v12, %v1180_v6 }
  0x58   : > { %v973_v40 = vmax.f32 %v965_v29, 0.0  ;;  %v693_v15 = vsel %vm678_vm0, %v691_v28, %v692_v34  ;;  %v729_v16 = vmul.f32 %v1520_v12, %v1182_v19  ;;  %v730_v17 = vmul.f32 %v1520_v12, %v1184_v20  ;;  %v1718_v28 = vld [vmem:[%s1522_s24 + $0x30] sm:$0xff]  ;;  %v1166_v34 = vld [vmem:[%s1522_s24 + $0xc0] sm:$0xff] }
  0x59   : > { %v696_v18 = vsel %vm678_vm0, %v694_v35, %v695_v37  ;;  %v699_v47 = vsel %vm678_vm0, %v697_v38, %v698_v39  ;;  %v715_v48 = vadd.f32 %v693_v15, %v637_v62  ;;  %v749_v51 = vmul.f32 %v1571_v42, %v1192_v31 }
  0x5a   : > { %v983_v53 = vpack.c.bf16 %v973_v40, %v972_v30  ;;  %v716_v54 = vadd.f32 %v696_v18, %v638_v63  ;;  %v717_v55 = vadd.f32 %v699_v47, %v639_v7  ;;  %v750_v56 = vmul.f32 %v1571_v42, %v1193_v36  ;;  %v1190_v47 = vld [vmem:[%s1522_s24 + $0x1d0] sm:$0xff] }
  0x5b   : > { %v736_v57 = vadd.f32 %v728_v24, %v715_v48  ;;  %v774_v58 = vmul.f32 %v1578_v49, %v1180_v6  ;;  %v775_v61 = vmul.f32 %v1578_v49, %v1181_v44  ;;  %v776_v0 = vmul.f32 %v1578_v49, %v1182_v19 }
  0x5c   : > { %1222 = vmatprep.mubr.msk.bf16.mxu0 %vm999_vm1, %v983_v53  ;;  %v737_v1 = vadd.f32 %v729_v16, %v716_v54  ;;  %v1708_v2 = vadd.f32 %v730_v17, %v717_v55  ;;  %v777_v62 = vmul.f32 %v1578_v49, %v1183_v46  ;;  %v1712_v63 = vmul.f32 %v1578_v49, %v1184_v20  ;;  %v1178_v16 = vld [vmem:[%s1522_s24 + $0x150] sm:$0xff]  ;;  %v1177_v53 = vld [vmem:[%s1522_s24 + $0x148] sm:$0x1]  ;;  %v1179_v54 = vld [vmem:[%s1522_s24 + $0x158] sm:$0x1] }
  0x5d   : > { %v757_v4 = vadd.f32 %v749_v51, %v736_v57  ;;  %v810_v7 = vrot.slane %v774_v58, 1  ;;  %v811_v13 = vrot.slane %v775_v61, 1  ;;  %v813_v6 = vrot.slane %v776_v0, 1 }
  0x5e   : > { %v758_v22 = vadd.f32 %v750_v56, %v737_v1  ;;  %v814_v23 = vrot.slane %v777_v62, 1  ;;  %v816_v19 = vrot.slane %v1712_v63, 1  ;;  %v847_v27 = vmul.f32 %v1593_v3, %v1622_v33 }
  0x5f   : > { %v812_v29 = vsel %vm678_vm0, %v810_v7, %v811_v13  ;;  %v848_v20 = vmul.f32 %v1593_v3, %v1636_v41  ;;  %v868_v30 = vmul.f32 %v1602_v8, %v1642_v25  ;;  %v869_v31 = vmul.f32 %v1602_v8, %v1645_v45  ;;  %v552_v45 = vld [vmem:[%s1522_s24 + $0x38] sm:$0x1] }
  0x60   : > { %v815_v35 = vsel %vm678_vm0, %v813_v6, %v814_v23  ;;  %v834_v36 = vadd.f32 %v812_v29, %v757_v4  ;;  %v893_v37 = vmul.f32 %v1609_v21, %v1622_v33  ;;  %v894_v38 = vmul.f32 %v1609_v21, %v1668_v59 }
  0x61   : > { %v835_v39 = vadd.f32 %v815_v35, %v758_v22  ;;  %v895_v24 = vmul.f32 %v1609_v21, %v1636_v41  ;;  %v896_v25 = vmul.f32 %v1609_v21, %v1671_v60  ;;  %v607_v40 = vmul.f32 %v1505_v9, %v1718_v28  ;;  %v1191_v41 = vld [vmem:[%s1522_s24 + $0x1e0] sm:$0xff] }
  0x62   : > { %v855_v44 = vadd.f32 %v847_v27, %v834_v36  ;;  %v929_v15 = vrot.slane %v893_v37, 1  ;;  %v930_v33 = vrot.slane %v894_v38, 1  ;;  %v628_v17 = vmul.f32 %v1515_v11, %v1166_v34 }
  0x63   : > { %v856_v59 = vadd.f32 %v848_v20, %v835_v39  ;;  %v932_v46 = vrot.slane %v895_v24, 1  ;;  %v933_v18 = vrot.slane %v896_v25, 1  ;;  %v652_v60 = vmul.f32 %v1510_v10, %v1718_v28 }
  0x64   : > { %v876_v48 = vadd.f32 %v868_v30, %v855_v44  ;;  %v931_v51 = vsel %vm678_vm0, %v929_v15, %v930_v33  ;;  %v636_v55 = vadd.f32 %v628_v17, %v607_v40  ;;  %v653_v56 = vmul.f32 %v1510_v10, %v552_v45  ;;  %v559_v33 = vld [vmem:[%s1522_s24 + $0x70] sm:$0xff] }
  0x65   : > { %v877_v57 = vadd.f32 %v869_v31, %v856_v59  ;;  %v934_v58 = vsel %vm678_vm0, %v932_v46, %v933_v18  ;;  %v688_v61 = vrot.slane %v652_v60, 1  ;;  %v727_v0 = vmul.f32 %v1520_v12, %v1178_v16 }
  0x66   : > { %v953_v1 = vadd.f32 %v931_v51, %v876_v48  ;;  %v689_v62 = vrot.slane %v653_v56, 1  ;;  %v747_v4 = vmul.f32 %v1571_v42, %v1190_v47  ;;  %v748_v7 = vmul.f32 %v1571_v42, %v1191_v41  ;;  %v1186_v51 = vld [vmem:[%s1522_s24 + $0x190] sm:$0xff] }
  0x67   : > { %v954_v13 = vadd.f32 %v934_v58, %v877_v57  ;;  %v771_v6 = vmul.f32 %v1578_v49, %v1177_v53  ;;  %v772_v22 = vmul.f32 %v1578_v49, %v1178_v16  ;;  %v773_v23 = vmul.f32 %v1578_v49, %v1179_v54  ;;  %v1185_v57 = vld [vmem:[%s1522_s24 + $0x188] sm:$0x1]  ;;  %v1195_v58 = vld [vmem:[%s1522_s24 + $0x220] sm:$0xff] }
  0x68   : > { %v968_v27 = vadd.f32 %v1658_v52, %v953_v1  ;;  %v690_v29 = vsel %vm678_vm0, %v688_v61, %v689_v62  ;;  %v755_v20 = vadd.f32 %v747_v4, %v1604_v14  ;;  %v845_v30 = vmul.f32 %v1593_v3, %v1718_v28  ;;  %v1187_v62 = vld [vmem:[%s1522_s24 + $0x198] sm:$0x1] }
  0x69   : > { %v969_v31 = vadd.f32 %v1658_v52, %v954_v13  ;;  %v714_v35 = vadd.f32 %v690_v29, %v636_v55  ;;  %v805_v36 = vrot.slane %v771_v6, 1  ;;  %v807_v37 = vrot.slane %v772_v22, 1  ;;  %v1194_v55 = vld [vmem:[%s1522_s24 + $0x210] sm:$0xff] }
  0x6a   : > { %v976_v38 = vmax.f32 %v968_v27, 0.0  ;;  %v808_v39 = vrot.slane %v773_v23, 1  ;;  %v846_v24 = vmul.f32 %v1593_v3, %v1619_v32  ;;  %v866_v25 = vmul.f32 %v1602_v8, %v1166_v34  ;;  %v1170_v34 = vld [vmem:[%s1522_s24 + $0x100] sm:$0xff] }
  0x6b   : > { %v977_v40 = vmax.f32 %v969_v31, 0.0  ;;  %v735_v44 = vadd.f32 %v727_v0, %v714_v35  ;;  %v806_v14 = vsel %vm678_vm0, %v804_v26, %v805_v36  ;;  %v867_v15 = vmul.f32 %v1602_v8, %v1639_v43  ;;  %v560_v43 = vld [vmem:[%s1522_s24 + $0x78] sm:$0x1] }
  0x6c   : > { %v809_v16 = vsel %vm678_vm0, %v807_v37, %v808_v39  ;;  %v832_v17 = vadd.f32 %v806_v14, %v755_v20  ;;  %v889_v59 = vmul.f32 %v1609_v21, %v1718_v28  ;;  %v890_v46 = vmul.f32 %v1609_v21, %v552_v45  ;;  %v1171_v14 = vld [vmem:[%s1522_s24 + $0x110] sm:$0xff] }
  0x6d   : > { %v985_v18 = vpack.c.bf16 %v977_v40, %v976_v38  ;;  %v756_v47 = vadd.f32 %v748_v7, %v735_v44  ;;  %v891_v5 = vmul.f32 %v1609_v21, %v1619_v32  ;;  %v892_v26 = vmul.f32 %v1609_v21, %v1652_v50  ;;  %v562_v44 = vld [vmem:[%s1522_s24 + $0x88] sm:$0x1] }
  0x6e   : > { %v853_v41 = vadd.f32 %v845_v30, %v832_v17  ;;  %v923_v60 = vrot.slane %v889_v59, 1  ;;  %v924_v48 = vrot.slane %v890_v46, 1  ;;  %v611_v28 = vmul.f32 %v1505_v9, %v559_v33  ;;  %v561_v30 = vld [vmem:[%s1522_s24 + $0x80] sm:$0xff] }
  0x6f   : > { %1226 = vmatprep.mubr.msk.bf16.mxu1 %vm999_vm1, %v985_v18  ;;  %v833_v45 = vadd.f32 %v809_v16, %v756_v47  ;;  %v926_v53 = vrot.slane %v891_v5, 1  ;;  %v927_v54 = vrot.slane %v892_v26, 1  ;;  %v632_v32 = vmul.f32 %v1515_v11, %v1170_v34 }
  0x70   : > { %v874_v56 = vadd.f32 %v866_v25, %v853_v41  ;;  %v925_v50 = vsel %vm678_vm0, %v923_v60, %v924_v48  ;;  %v660_v61 = vmul.f32 %v1510_v10, %v559_v33  ;;  %v661_v0 = vmul.f32 %v1510_v10, %v560_v43 }
  0x71   : > { %v854_v1 = vadd.f32 %v846_v24, %v833_v45  ;;  %v928_v9 = vsel %vm678_vm0, %v926_v53, %v927_v54  ;;  %v640_v4 = vadd.f32 %v632_v32, %v611_v28  ;;  %v731_v7 = vmul.f32 %v1520_v12, %v1186_v51 }
  0x72   : > { %v951_v13 = vadd.f32 %v925_v50, %v874_v56  ;;  %v700_v6 = vrot.slane %v660_v61, 1  ;;  %v701_v11 = vrot.slane %v661_v0, 1  ;;  %v751_v22 = vmul.f32 %v1571_v42, %v1194_v55 }
  0x73   : > { %v875_v23 = vadd.f32 %v867_v15, %v854_v1  ;;  %v752_v27 = vmul.f32 %v1571_v42, %v1195_v58  ;;  %v779_v29 = vmul.f32 %v1578_v49, %v1185_v57  ;;  %v780_v10 = vmul.f32 %v1578_v49, %v1186_v51  ;;  %v1206_v58 = vld [vmem:[%s1857_s4] ss:$0 sm:$0xff] }
  0x74   : > { %v966_v20 = vadd.f32 %v1658_v52, %v951_v13  ;;  %v702_v31 = vsel %vm678_vm0, %v700_v6, %v701_v11  ;;  %v759_v12 = vadd.f32 %v751_v22, %v1708_v2  ;;  %v781_v35 = vmul.f32 %v1578_v49, %v1187_v62 }
  0x75   : > { %v952_v36 = vadd.f32 %v928_v9, %v875_v23  ;;  %v718_v37 = vadd.f32 %v702_v31, %v640_v4  ;;  %v817_v38 = vrot.slane %v779_v29, 1  ;;  %v819_v39 = vrot.slane %v780_v10, 1 }
  0x76   : > { %v974_v42 = vmax.f32 %v966_v20, 0.0  ;;  %v820_v24 = vrot.slane %v781_v35, 1  ;;  %v849_v25 = vmul.f32 %v1593_v3, %v559_v33  ;;  %v850_v2 = vmul.f32 %v1593_v3, %v561_v30 }
  0x77   : > { %v967_v40 = vadd.f32 %v1658_v52, %v952_v36  ;;  %v739_v15 = vadd.f32 %v731_v7, %v718_v37  ;;  %v818_v16 = vsel %vm678_vm0, %v816_v19, %v817_v38  ;;  %v870_v59 = vmul.f32 %v1602_v8, %v1170_v34 }
  0x78   : > { %v821_v49 = vsel %vm678_vm0, %v819_v39, %v820_v24  ;;  %v836_v17 = vadd.f32 %v818_v16, %v759_v12  ;;  %v897_v46 = vmul.f32 %v1609_v21, %v559_v33  ;;  %v898_v5 = vmul.f32 %v1609_v21, %v560_v43 }
  0x79   : > { %v975_v18 = vmax.f32 %v967_v40, 0.0  ;;  %v760_v47 = vadd.f32 %v752_v27, %v739_v15  ;;  %v899_v26 = vmul.f32 %v1609_v21, %v561_v30  ;;  %v871_v63 = vmul.f32 %v1602_v8, %v1171_v14 }
  0x7a   : > { %v857_v41 = vadd.f32 %v849_v25, %v836_v17  ;;  %v900_v19 = vmul.f32 %v1609_v21, %v562_v44  ;;  %v935_v60 = vrot.slane %v897_v46, 1  ;;  %v936_v51 = vrot.slane %v898_v5, 1 }
  0x7b   : > { %v984_v3 = vpack.c.bf16 %v975_v18, %v974_v42  ;;  %v837_v48 = vadd.f32 %v821_v49, %v760_v47  ;;  %v938_v28 = vrot.slane %v899_v26, 1 }
  0x7c   : > { %v878_v34 = vadd.f32 %v870_v59, %v857_v41  ;;  %v939_v33 = vrot.slane %v900_v19, 1  ;;  %v937_v43 = vsel %vm678_vm0, %v935_v60, %v936_v51 }
  0x7d   : > { %1223 = vmatmul.mubr.msk.bf16.vlgmr.msra.gmra.mrb[0].mxu0 %vm999_vm1, %v984_v3  ;;  %v858_v45 = vadd.f32 %v850_v2, %v837_v48 }
  0x7e   : > { %v940_v53 = vsel %vm678_vm0, %v938_v28, %v939_v33  ;;  %v955_v54 = vadd.f32 %v937_v43, %v878_v34 }
  0x7f   : > { %v879_v8 = vadd.f32 %v871_v63, %v858_v45 }
  0x80   : > { %v970_v21 = vadd.f32 %v1658_v52, %v955_v54 }
  0x81   : > { %v956_v55 = vadd.f32 %v940_v53, %v879_v8 }
  0x82   : > { %v978_v56 = vmax.f32 %v970_v21, 0.0 }
  0x83   : > { %v971_v32 = vadd.f32 %v1658_v52, %v956_v55 }
  0x85   : > { %v979_v50 = vmax.f32 %v971_v32, 0.0 }
  0x87   : > { %v986_v57 = vpack.c.bf16 %v979_v50, %v978_v56 }
  0x89   : > { %1227 = vmatmul.mubr.msk.bf16.vlgmr.msra.gmra.mrb[0].mxu1 %vm999_vm1, %v986_v57 }
 0x150   : > { %v1224_v61 = vpop.f32.mrb[0].mxu0 }
 0x151   : > { %v1055_v0 = vadd.f32 %v1224_v61, %v1206_v58  ;;  %v1046_v1 = vpop.f32.mrb[1].mxu0 }
 0x152   : > { %v1047_v52 = vadd.f32 %v1206_v58, %v1046_v1  ;;  %v1225_v9 = vpop.f32.mrb[2].mxu0 }
 0x153   : > { %v1079_v62 = vmax.f32 %v1055_v0, 0.0  ;;  %v1058_v4 = vadd.f32 %v1225_v9, %v1206_v58  ;;  %v1049_v7 = vpop.f32.mrb[3].mxu0 }
 0x154   : > { %v1077_v13 = vmax.f32 %v1047_v52, 0.0  ;;  %v1050_v6 = vadd.f32 %v1206_v58, %v1049_v7 }
 0x155   : > { %1088 = vst.msk [vmem:[%s543_s18 + $0x10] sm:$0xff] %vm1085_vm2, %v1079_v62  ;;  %v1080_v11 = vmax.f32 %v1058_v4, 0.0 }
 0x156   : > { %1086 = vst.msk [vmem:[%s543_s18] sm:$0xff] %vm1085_vm2, %v1077_v13  ;;  %v1078_v22 = vmax.f32 %v1050_v6, 0.0 }
 0x157   : > { %1089 = vst.msk [vmem:[%s543_s18 + $0x18] sm:$0xff] %vm1085_vm2, %v1080_v11 }
 0x158   : > { %1087 = vst.msk [vmem:[%s543_s18 + $0x8] sm:$0xff] %vm1085_vm2, %v1078_v22 }
 0x15c   : > { %v1228_v23 = vpop.f32.mrb[0].mxu1 }
 0x15d   : > { %v1071_v27 = vadd.f32 %v1228_v23, %v1206_v58  ;;  %v1062_v29 = vpop.f32.mrb[1].mxu1 }
 0x15e   : > { %v1063_v10 = vadd.f32 %v1206_v58, %v1062_v29  ;;  %v1229_v20 = vpop.f32.mrb[2].mxu1 }
 0x15f   : > { %v1083_v30 = vmax.f32 %v1071_v27, 0.0  ;;  %v1074_v31 = vadd.f32 %v1229_v20, %v1206_v58  ;;  %v1065_v12 = vpop.f32.mrb[3].mxu1 }
 0x160   : > { %v1081_v35 = vmax.f32 %v1063_v10, 0.0  ;;  %v1066_v36 = vadd.f32 %v1206_v58, %v1065_v12 }
 0x161   : > { %1092 = vst.msk [vmem:[%s543_s18 + $0x30] sm:$0xff] %vm1085_vm2, %v1083_v30  ;;  %v1084_v37 = vmax.f32 %v1074_v31, 0.0 }
 0x162   : > { %1090 = vst.msk [vmem:[%s543_s18 + $0x20] sm:$0xff] %vm1085_vm2, %v1081_v35  ;;  %v1082_v38 = vmax.f32 %v1066_v36, 0.0 }
 0x163   : > { %1093 = vst.msk [vmem:[%s543_s18 + $0x38] sm:$0xff] %vm1085_vm2, %v1084_v37 }
 0x164   : > { %1091 = vst.msk [vmem:[%s543_s18 + $0x28] sm:$0xff] %vm1085_vm2, %v1082_v38 }
 0x165 PF: > { %p12_p9 = scmp.ge.s32.totalorder %s1331_s22, 4   ;;  %s1859_s18 = smov %s1278_s19 }
 0x166   : > { %s1860_s19 = smov %s1340_s25  ;;  %s1861_s20 = smov %s1331_s22 }
 0x167   :  { %14 = sbr.rel (!%p12_p9) target bundleno = 2 (0x2), region = 116 }

// kernel: mobilenet_v1_forward.16
= control target key start
LH: loop header
LB: loop body
LE: loop exit
PB: predicated region body
PF: predicated region fallthrough
CT: control target
= control target key end

     0   :  { %s2554_s18 = smov 0   ;;  %s3991_s0 = inlined_call_operand.vmem [shape: f32[1,2,18,18,8], index: 0, kind: input, shape index: {}]   ;;  %s3992_s1 = inlined_call_operand.vmem [shape: f32[9,8], index: 1, kind: input, shape index: {}]   ;;  %s3993_s2 = inlined_call_operand.vmem [shape: f32[1,8], index: 2, kind: input, shape index: {}]   ;;  %s3994_s3 = inlined_call_operand.vmem [shape: bf16[8,16], index: 3, kind: input, shape index: {}]   ;;  %s3995_s4 = inlined_call_operand.vmem [shape: f32[1,16], index: 4, kind: input, shape index: {}]   ;;  %s3996_s5 = inlined_call_operand.vmem [shape: f32[2,16,16,16], index: 5, kind: output, shape index: {}]  }
   0x1 LB: > { %s2388_s19 = sadd.s32 4294967295, %s2522_s18   ;;  %p2392_p0 = scmp.ge.s32.totalorder %s2522_s18, 1  ;;  %s2522_s18 = sphi %s2554_s18, %s15_s18  }
   0x2   : > { %p187_p1 = scmp.lt.s32.totalorder %s2522_s18, 3 }
   0x4   : > { %p188_p2 = pnand %p2392_p0, %p187_p1 }
   0x5   : > { %v2030_v0 = vld [vmem:[%s3994_s3] sm:$0xf] (!%p188_p2)  ;;  %vm2103_vm0 = vcmask (!%p188_p2), 1043456   ;;  %p215_p3 = scmp.lt.s32.totalorder (!%p188_p2), %s2388_s19, 1  ;;  %vm450_vm1 = vcmask (!%p188_p2), 1046528   ;;  %vm696_vm2 = vcmask (!%p188_p2), 1045504  }
   0x6   : > { %191 = sbr.rel (%p188_p2) target bundleno = 546 (0x222), region = 40  ;;  %2479 = vmatprep.subr.msk.bf16.mxu0 (!%p188_p2), %vm2103_vm0, %v2030_v0  ;;  %2480 = vmatprep.subr.msk.bf16.mxu1 (!%p188_p2), %vm2103_vm0, %v2030_v0  ;;  %v2105_v1 = vsel (!%p188_p2), %vm2103_vm0, %v2030_v0, 0  ;;  %v2571_v2 = vld [vmem:[%s3992_s1] ss:$0 sm:$0xff] (!%p188_p2)  ;;  %v2576_v3 = vld [vmem:[%s3992_s1 + $0x1] ss:$0 sm:$0xff] (!%p188_p2) }
   0x7   : > { %2444 = vmatpush3.bf16.msra.mxu0 (!%p188_p2), %v2105_v1  ;;  %2478 = vmatpush3.bf16.msra.mxu1 (!%p188_p2), %v2105_v1  ;;  %v2586_v4 = vld [vmem:[%s3992_s1 + $0x2] ss:$0 sm:$0xff] (!%p188_p2)  ;;  %v2613_v22 = vld [vmem:[%s3992_s1 + $0x3] ss:$0 sm:$0xff] (!%p188_p2)  ;;  %v2627_v32 = vld [vmem:[%s3992_s1 + $0x4] ss:$0 sm:$0xff] (!%p188_p2) }
   0x8   : > { %v2639_v38 = vld [vmem:[%s3992_s1 + $0x5] ss:$0 sm:$0xff] (!%p188_p2)  ;;  %v2658_v51 = vld [vmem:[%s3992_s1 + $0x6] ss:$0 sm:$0xff] (!%p188_p2)  ;;  %v2663_v52 = vld [vmem:[%s3992_s1 + $0x7] ss:$0 sm:$0xff] (!%p188_p2) }
   0x9   : > { %v2668_v57 = vld [vmem:[%s3992_s1 + $0x8] ss:$0 sm:$0xff] (!%p188_p2)  ;;  %vm2054_vm3 = vcmask (!%p188_p2), 64512   ;;  %vm2300_vm4 = vcmask (!%p188_p2), 130048  }
   0xd   : > { %s3998_s19 = smov (!%p215_p3, %s2388_s19), 1 }
   0xe   : > { %s2481_s22 = smul.u32 432, %s3998_s19  ;;  %s2425_s20 = sshll.u32 %s3998_s19, 8 }
  0x10   : > { %s2581_s29 = scalar_lea.vmem %s3991_s0, %s2481_s22  ;;  %s3883_s22 = scalar_lea.vmem %s3996_s5, %s2425_s20 }
  0x11   : > { %v226_v5 = vld [vmem:[%s2581_s29] sm:$0xff]  ;;  %v227_v6 = vld [vmem:[%s2581_s29 + $0x8] sm:$0xff]  ;;  %v228_v7 = vld [vmem:[%s2581_s29 + $0x10] sm:$0x3] }
  0x12   : > { %v231_v8 = vld [vmem:[%s2581_s29 + $0x28] sm:$0x3]  ;;  %v285_v9 = vmul.f32 %v2571_v2, %v226_v5  ;;  %v286_v10 = vmul.f32 %v2571_v2, %v227_v6  ;;  %v354_v11 = vmul.f32 %v2576_v3, %v226_v5  ;;  %v355_v12 = vmul.f32 %v2576_v3, %v227_v6  ;;  %v2597_v13 = vld [vmem:[%s2581_s29 + $0x40] sm:$0x3]  ;;  %v2620_v27 = vld [vmem:[%s2581_s29 + $0x18] sm:$0xff] }
  0x13   : > { %v356_v14 = vmul.f32 %v2576_v3, %v228_v7  ;;  %v2601_v15 = vmul.f32 %v2576_v3, %v231_v8  ;;  %v600_v16 = vmul.f32 %v2586_v4, %v226_v5  ;;  %v601_v17 = vmul.f32 %v2586_v4, %v227_v6  ;;  %v2630_v33 = vld [vmem:[%s2581_s29 + $0x20] sm:$0xff]  ;;  %v2671_v58 = vld [vmem:[%s2581_s29 + $0x30] sm:$0xff]  ;;  %v2674_v59 = vld [vmem:[%s2581_s29 + $0x38] sm:$0xff] }
  0x14   : > { %v2607_v18 = vmul.f32 %v2576_v3, %v2597_v13  ;;  %v451_v19 = vrot.slane %v354_v11, 1  ;;  %v452_v20 = vrot.slane %v355_v12, 1  ;;  %v602_v21 = vmul.f32 %v2586_v4, %v228_v7 }
  0x15   : > { %v454_v23 = vrot.slane %v356_v14, 1  ;;  %v459_v24 = vrot.slane %v2601_v15, 1  ;;  %v2617_v25 = vmul.f32 %v2586_v4, %v231_v8  ;;  %v697_v26 = vrot.slane %v600_v16, 2 }
  0x16   : > { %v453_v28 = vsel %vm450_vm1, %v451_v19, %v452_v20  ;;  %v464_v29 = vrot.slane %v2607_v18, 1  ;;  %v698_v30 = vrot.slane %v601_v17, 2  ;;  %v700_v31 = vrot.slane %v602_v21, 2 }
  0x17   : > { %v455_v34 = vsel %vm450_vm1, %v452_v20, %v454_v23  ;;  %v563_v35 = vadd.f32 %v453_v28, %v285_v9  ;;  %v705_v36 = vrot.slane %v2617_v25, 2  ;;  %v846_v37 = vmul.f32 %v2613_v22, %v2620_v27 }
  0x18   : > { %v564_v39 = vadd.f32 %v455_v34, %v286_v10  ;;  %v699_v40 = vsel %vm696_vm2, %v697_v26, %v698_v30  ;;  %v701_v41 = vsel %vm696_vm2, %v698_v30, %v700_v31  ;;  %v847_v42 = vmul.f32 %v2613_v22, %v2630_v33  ;;  %v250_v31 = vld [vmem:[%s2581_s29 + $0xc0] sm:$0xff]  ;;  %v251_v34 = vld [vmem:[%s2581_s29 + $0xc8] sm:$0xff] }
  0x19   : > { %v809_v43 = vadd.f32 %v699_v40, %v563_v35  ;;  %v915_v44 = vmul.f32 %v2627_v32, %v2620_v27  ;;  %v916_v45 = vmul.f32 %v2627_v32, %v2630_v33  ;;  %v917_v46 = vmul.f32 %v2627_v32, %v231_v8 }
  0x1a   : > { %v810_v47 = vadd.f32 %v701_v41, %v564_v39  ;;  %v1160_v48 = vmul.f32 %v2639_v38, %v2620_v27  ;;  %v1161_v49 = vmul.f32 %v2639_v38, %v2630_v33  ;;  %v1162_v50 = vmul.f32 %v2639_v38, %v231_v8  ;;  %v252_v41 = vld [vmem:[%s2581_s29 + $0xd0] sm:$0x3] }
  0x1b   : > { %v878_v53 = vadd.f32 %v846_v37, %v809_v43  ;;  %v1011_v54 = vrot.slane %v915_v44, 1  ;;  %v1012_v55 = vrot.slane %v916_v45, 1  ;;  %v1014_v56 = vrot.slane %v917_v46, 1 }
  0x1c   : > { %v879_v60 = vadd.f32 %v847_v42, %v810_v47  ;;  %v1256_v61 = vrot.slane %v1160_v48, 2  ;;  %v1257_v62 = vrot.slane %v1161_v49, 2  ;;  %v1259_v63 = vrot.slane %v1162_v50, 2  ;;  %v2700_v42 = vld [vmem:[%s2581_s29 + $0x100] sm:$0x3] }
  0x1d   : > { %v1013_v0 = vsel %vm450_vm1, %v1011_v54, %v1012_v55  ;;  %v1015_v1 = vsel %vm450_vm1, %v1012_v55, %v1014_v56  ;;  %v1405_v5 = vmul.f32 %v2658_v51, %v2671_v58  ;;  %v1406_v6 = vmul.f32 %v2658_v51, %v2674_v59 }
  0x1e   : > { %v1123_v7 = vadd.f32 %v1013_v0, %v878_v53  ;;  %v1124_v8 = vadd.f32 %v1015_v1, %v879_v60  ;;  %v1258_v9 = vsel %vm696_vm2, %v1256_v61, %v1257_v62  ;;  %v1260_v10 = vsel %vm696_vm2, %v1257_v62, %v1259_v63  ;;  %v2711_v53 = vld [vmem:[%s3993_s2] ss:$0 sm:$0xff] }
  0x1f   : > { %v1474_v11 = vmul.f32 %v2663_v52, %v2671_v58  ;;  %v1475_v12 = vmul.f32 %v2663_v52, %v2674_v59  ;;  %v1476_v14 = vmul.f32 %v2663_v52, %v2597_v13  ;;  %v1719_v16 = vmul.f32 %v2668_v57, %v2671_v58 }
  0x20   : > { %v1368_v17 = vadd.f32 %v1258_v9, %v1123_v7  ;;  %v1369_v19 = vadd.f32 %v1260_v10, %v1124_v8  ;;  %v1720_v20 = vmul.f32 %v2668_v57, %v2674_v59  ;;  %v1721_v21 = vmul.f32 %v2668_v57, %v2597_v13  ;;  %v2726_v10 = vld [vmem:[%s2581_s29 + $0xd8] sm:$0xff] }
  0x21   : > { %v1570_v23 = vrot.slane %v1474_v11, 1  ;;  %v1571_v26 = vrot.slane %v1475_v12, 1  ;;  %v1573_v28 = vrot.slane %v1476_v14, 1  ;;  %v1815_v30 = vrot.slane %v1719_v16, 2 }
  0x22   : > { %v1437_v35 = vadd.f32 %v1405_v5, %v1368_v17  ;;  %v1438_v37 = vadd.f32 %v1406_v6, %v1369_v19  ;;  %v1816_v39 = vrot.slane %v1720_v20, 2  ;;  %v1818_v40 = vrot.slane %v1721_v21, 2 }
  0x23   : > { %v1572_v43 = vsel %vm450_vm1, %v1570_v23, %v1571_v26  ;;  %v1574_v44 = vsel %vm450_vm1, %v1571_v26, %v1573_v28  ;;  %v301_v45 = vmul.f32 %v2571_v2, %v250_v31  ;;  %v302_v46 = vmul.f32 %v2571_v2, %v251_v34  ;;  %v2734_v23 = vld [vmem:[%s2581_s29 + $0xe0] sm:$0xff] }
  0x24   : > { %v1682_v47 = vadd.f32 %v1572_v43, %v1437_v35  ;;  %v1683_v48 = vadd.f32 %v1574_v44, %v1438_v37  ;;  %v1817_v49 = vsel %vm696_vm2, %v1815_v30, %v1816_v39  ;;  %v1819_v50 = vsel %vm696_vm2, %v1816_v39, %v1818_v40  ;;  %v2737_v30 = vld [vmem:[%s2581_s29 + $0xe8] sm:$0x3] }
  0x25   : > { %v378_v54 = vmul.f32 %v2576_v3, %v250_v31  ;;  %v379_v55 = vmul.f32 %v2576_v3, %v251_v34  ;;  %v380_v56 = vmul.f32 %v2576_v3, %v252_v41  ;;  %v2718_v60 = vmul.f32 %v2576_v3, %v2700_v42 }
  0x26   : > { %v1927_v61 = vadd.f32 %v1817_v49, %v1682_v47  ;;  %v1928_v62 = vadd.f32 %v1819_v50, %v1683_v48  ;;  %v624_v63 = vmul.f32 %v2586_v4, %v250_v31  ;;  %v625_v0 = vmul.f32 %v2586_v4, %v251_v34  ;;  %v2755_v48 = vld [vmem:[%s2581_s29 + $0xf0] sm:$0xff] }
  0x27   : > { %v491_v1 = vrot.slane %v378_v54, 1  ;;  %v492_v5 = vrot.slane %v379_v55, 1  ;;  %v494_v6 = vrot.slane %v380_v56, 1  ;;  %v504_v7 = vrot.slane %v2718_v60, 1  ;;  %v2758_v56 = vld [vmem:[%s2581_s29 + $0xf8] sm:$0xff] }
  0x28   : > { %v1966_v8 = vadd.f32 %v2711_v53, %v1927_v61  ;;  %v1967_v9 = vadd.f32 %v2711_v53, %v1928_v62  ;;  %v626_v11 = vmul.f32 %v2586_v4, %v252_v41  ;;  %v737_v12 = vrot.slane %v624_v63, 2 }
  0x29   : > { %v493_v14 = vsel %vm450_vm1, %v491_v1, %v492_v5  ;;  %v495_v16 = vsel %vm450_vm1, %v492_v5, %v494_v6  ;;  %v738_v17 = vrot.slane %v625_v0, 2  ;;  %v862_v19 = vmul.f32 %v2613_v22, %v2726_v10 }
  0x2a   : > { %v1998_v20 = vmax.f32 %v1966_v8, 0.0  ;;  %v1999_v21 = vmax.f32 %v1967_v9, 0.0  ;;  %v579_v26 = vadd.f32 %v493_v14, %v301_v45  ;;  %v580_v28 = vadd.f32 %v495_v16, %v302_v46 }
  0x2b   : > { %v739_v31 = vsel %vm696_vm2, %v737_v12, %v738_v17  ;;  %v740_v34 = vrot.slane %v626_v11, 2  ;;  %v863_v35 = vmul.f32 %v2613_v22, %v2734_v23  ;;  %v939_v37 = vmul.f32 %v2627_v32, %v2726_v10 }
  0x2c   : > { %v2032_v39 = vpack.c.bf16 %v1999_v21, %v1998_v20  ;;  %v825_v40 = vadd.f32 %v739_v31, %v579_v26  ;;  %v940_v41 = vmul.f32 %v2627_v32, %v2734_v23  ;;  %v941_v43 = vmul.f32 %v2627_v32, %v2737_v30 }
  0x2d   : > { %v741_v44 = vsel %vm696_vm2, %v738_v17, %v740_v34  ;;  %v1051_v45 = vrot.slane %v939_v37, 1  ;;  %v1184_v46 = vmul.f32 %v2639_v38, %v2726_v10  ;;  %v1185_v47 = vmul.f32 %v2639_v38, %v2734_v23 }
  0x2e   : > { %2445 = vmatprep.mubr.msk.bf16.mxu0 %vm2054_vm3, %v2032_v39  ;;  %v826_v49 = vadd.f32 %v741_v44, %v580_v28  ;;  %v894_v50 = vadd.f32 %v862_v19, %v825_v40  ;;  %v1052_v54 = vrot.slane %v940_v41, 1  ;;  %v1054_v55 = vrot.slane %v941_v43, 1 }
  0x2f   : > { %v1186_v61 = vmul.f32 %v2639_v38, %v2737_v30  ;;  %v1296_v62 = vrot.slane %v1184_v46, 2  ;;  %v1297_v63 = vrot.slane %v1185_v47, 2  ;;  %v1421_v0 = vmul.f32 %v2658_v51, %v2755_v48 }
  0x30   : > { %v895_v1 = vadd.f32 %v863_v35, %v826_v49  ;;  %v1053_v5 = vsel %vm450_vm1, %v1051_v45, %v1052_v54  ;;  %v1055_v6 = vsel %vm450_vm1, %v1052_v54, %v1054_v55  ;;  %v1422_v8 = vmul.f32 %v2658_v51, %v2758_v56 }
  0x31   : > { %v1139_v9 = vadd.f32 %v1053_v5, %v894_v50  ;;  %v1298_v11 = vsel %vm696_vm2, %v1296_v62, %v1297_v63  ;;  %v1299_v12 = vrot.slane %v1186_v61, 2  ;;  %v1498_v14 = vmul.f32 %v2663_v52, %v2755_v48 }
  0x32   : > { %v1140_v16 = vadd.f32 %v1055_v6, %v895_v1  ;;  %v1499_v17 = vmul.f32 %v2663_v52, %v2758_v56  ;;  %v1500_v19 = vmul.f32 %v2663_v52, %v2700_v42  ;;  %v1743_v20 = vmul.f32 %v2668_v57, %v2755_v48 }
  0x33   : > { %v1300_v21 = vsel %vm696_vm2, %v1297_v63, %v1299_v12  ;;  %v1384_v26 = vadd.f32 %v1298_v11, %v1139_v9  ;;  %v1610_v28 = vrot.slane %v1498_v14, 1  ;;  %v1744_v31 = vmul.f32 %v2668_v57, %v2758_v56 }
  0x34   : > { %v1385_v34 = vadd.f32 %v1300_v21, %v1140_v16  ;;  %v1611_v35 = vrot.slane %v1499_v17, 1  ;;  %v1613_v37 = vrot.slane %v1500_v19, 1  ;;  %v1745_v39 = vmul.f32 %v2668_v57, %v2700_v42 }
  0x35   : > { %v1453_v40 = vadd.f32 %v1421_v0, %v1384_v26  ;;  %v1855_v41 = vrot.slane %v1743_v20, 2  ;;  %v1856_v43 = vrot.slane %v1744_v31, 2  ;;  %v287_v44 = vmul.f32 %v2571_v2, %v2620_v27 }
  0x36   : > { %v1454_v45 = vadd.f32 %v1422_v8, %v1385_v34  ;;  %v1612_v46 = vsel %vm450_vm1, %v1610_v28, %v1611_v35  ;;  %v1614_v47 = vsel %vm450_vm1, %v1611_v35, %v1613_v37  ;;  %v1858_v49 = vrot.slane %v1745_v39, 2 }
  0x37   : > { %v1698_v50 = vadd.f32 %v1612_v46, %v1453_v40  ;;  %v1857_v54 = vsel %vm696_vm2, %v1855_v41, %v1856_v43  ;;  %v288_v55 = vmul.f32 %v2571_v2, %v2630_v33  ;;  %v357_v61 = vmul.f32 %v2576_v3, %v2620_v27 }
  0x38   : > { %v1699_v62 = vadd.f32 %v1614_v47, %v1454_v45  ;;  %v1859_v63 = vsel %vm696_vm2, %v1856_v43, %v1858_v49  ;;  %v358_v0 = vmul.f32 %v2576_v3, %v2630_v33  ;;  %v603_v1 = vmul.f32 %v2586_v4, %v2620_v27 }
  0x39   : > { %v1943_v5 = vadd.f32 %v1857_v54, %v1698_v50  ;;  %v456_v6 = vrot.slane %v357_v61, 1  ;;  %v604_v8 = vmul.f32 %v2586_v4, %v2630_v33  ;;  %v848_v9 = vmul.f32 %v2613_v22, %v2671_v58  ;;  %v2826_v50 = vld [vmem:[%s2581_s29 + $0x48] sm:$0xff] }
  0x3a   : > { %v1944_v11 = vadd.f32 %v1859_v63, %v1699_v62  ;;  %v457_v12 = vrot.slane %v358_v0, 1  ;;  %v702_v14 = vrot.slane %v603_v1, 2  ;;  %v849_v16 = vmul.f32 %v2613_v22, %v2674_v59 }
  0x3b   : > { %v1982_v17 = vadd.f32 %v2711_v53, %v1943_v5  ;;  %v703_v19 = vrot.slane %v604_v8, 2  ;;  %v918_v27 = vmul.f32 %v2627_v32, %v2671_v58  ;;  %v919_v20 = vmul.f32 %v2627_v32, %v2674_v59 }
  0x3c   : > { %v1983_v33 = vadd.f32 %v2711_v53, %v1944_v11  ;;  %v458_v21 = vsel %vm450_vm1, %v456_v6, %v457_v12  ;;  %v460_v26 = vsel %vm450_vm1, %v457_v12, %v459_v24  ;;  %v920_v28 = vmul.f32 %v2627_v32, %v2597_v13  ;;  %v2838_v6 = vld [vmem:[%s2581_s29 + $0x58] sm:$0x3] }
  0x3d   : > { %v2014_v31 = vmax.f32 %v1982_v17, 0.0  ;;  %v565_v34 = vadd.f32 %v458_v21, %v287_v44  ;;  %v566_v35 = vadd.f32 %v460_v26, %v288_v55  ;;  %v704_v37 = vsel %vm696_vm2, %v702_v14, %v703_v19 }
  0x3e   : > { %v2015_v39 = vmax.f32 %v1983_v33, 0.0  ;;  %v706_v40 = vsel %vm696_vm2, %v703_v19, %v705_v36  ;;  %v1016_v41 = vrot.slane %v918_v27, 1  ;;  %v1017_v43 = vrot.slane %v919_v20, 1  ;;  %v2829_v36 = vld [vmem:[%s2581_s29 + $0x50] sm:$0xff] }
  0x3f   : > { %v811_v15 = vadd.f32 %v704_v37, %v565_v34  ;;  %v812_v45 = vadd.f32 %v706_v40, %v566_v35  ;;  %v1019_v24 = vrot.slane %v920_v28, 1  ;;  %v1163_v46 = vmul.f32 %v2639_v38, %v2671_v58 }
  0x40   : > { %v2040_v47 = vpack.c.bf16 %v2015_v39, %v2014_v31  ;;  %v1018_v44 = vsel %vm450_vm1, %v1016_v41, %v1017_v43  ;;  %v1164_v49 = vmul.f32 %v2639_v38, %v2674_v59  ;;  %v1165_v25 = vmul.f32 %v2639_v38, %v2597_v13 }
  0x41   : > { %v880_v54 = vadd.f32 %v848_v9, %v811_v15  ;;  %v881_v55 = vadd.f32 %v849_v16, %v812_v45  ;;  %v1020_v61 = vsel %vm450_vm1, %v1017_v43, %v1019_v24  ;;  %v1261_v62 = vrot.slane %v1163_v46, 2 }
  0x42   : > { %2461 = vmatprep.mubr.msk.bf16.mxu1 %vm2054_vm3, %v2040_v47  ;;  %v1262_v63 = vrot.slane %v1164_v49, 2  ;;  %v1264_v0 = vrot.slane %v1165_v25, 2  ;;  %v1407_v1 = vmul.f32 %v2658_v51, %v2826_v50  ;;  %v1408_v5 = vmul.f32 %v2658_v51, %v2829_v36 }
  0x43   : > { %v1125_v8 = vadd.f32 %v1018_v44, %v880_v54  ;;  %v1126_v11 = vadd.f32 %v1020_v61, %v881_v55  ;;  %v1477_v9 = vmul.f32 %v2663_v52, %v2826_v50  ;;  %v1478_v12 = vmul.f32 %v2663_v52, %v2829_v36 }
  0x44   : > { %v1263_v14 = vsel %vm696_vm2, %v1261_v62, %v1262_v63  ;;  %v1265_v16 = vsel %vm696_vm2, %v1262_v63, %v1264_v0  ;;  %v1479_v17 = vmul.f32 %v2663_v52, %v2838_v6  ;;  %v1722_v19 = vmul.f32 %v2668_v57, %v2826_v50 }
  0x45   : > { %v1370_v27 = vadd.f32 %v1263_v14, %v1125_v8  ;;  %v1371_v20 = vadd.f32 %v1265_v16, %v1126_v11  ;;  %v1575_v33 = vrot.slane %v1477_v9, 1  ;;  %v1576_v21 = vrot.slane %v1478_v12, 1 }
  0x46   : > { %v1578_v26 = vrot.slane %v1479_v17, 1  ;;  %v1723_v28 = vmul.f32 %v2668_v57, %v2829_v36  ;;  %v1724_v31 = vmul.f32 %v2668_v57, %v2838_v6  ;;  %v1820_v34 = vrot.slane %v1722_v19, 2 }
  0x47   : > { %v1439_v35 = vadd.f32 %v1407_v1, %v1370_v27  ;;  %v1440_v37 = vadd.f32 %v1408_v5, %v1371_v20  ;;  %v1577_v39 = vsel %vm450_vm1, %v1575_v33, %v1576_v21  ;;  %v303_v40 = vmul.f32 %v2571_v2, %v2726_v10 }
  0x48   : > { %v1579_v41 = vsel %vm450_vm1, %v1576_v21, %v1578_v26  ;;  %v1821_v43 = vrot.slane %v1723_v28, 2  ;;  %v1823_v15 = vrot.slane %v1724_v31, 2  ;;  %v304_v45 = vmul.f32 %v2571_v2, %v2734_v23 }
  0x49   : > { %v1684_v24 = vadd.f32 %v1577_v39, %v1439_v35  ;;  %v1685_v46 = vadd.f32 %v1579_v41, %v1440_v37  ;;  %v381_v47 = vmul.f32 %v2576_v3, %v2726_v10  ;;  %v382_v44 = vmul.f32 %v2576_v3, %v2734_v23 }
  0x4a   : > { %v1822_v49 = vsel %vm696_vm2, %v1820_v34, %v1821_v43  ;;  %v1824_v25 = vsel %vm696_vm2, %v1821_v43, %v1823_v15  ;;  %v383_v54 = vmul.f32 %v2576_v3, %v2737_v30  ;;  %v627_v55 = vmul.f32 %v2586_v4, %v2726_v10 }
  0x4b   : > { %v1929_v61 = vadd.f32 %v1822_v49, %v1684_v24  ;;  %v1930_v62 = vadd.f32 %v1824_v25, %v1685_v46  ;;  %v496_v63 = vrot.slane %v381_v47, 1  ;;  %v497_v0 = vrot.slane %v382_v44, 1  ;;  %v2901_v49 = vld [vmem:[%s2581_s29 + $0x110] sm:$0xff] }
  0x4c   : > { %v499_v1 = vrot.slane %v383_v54, 1  ;;  %v628_v5 = vmul.f32 %v2586_v4, %v2734_v23  ;;  %v629_v8 = vmul.f32 %v2586_v4, %v2737_v30  ;;  %v742_v11 = vrot.slane %v627_v55, 2 }
  0x4d   : > { %v1968_v9 = vadd.f32 %v2711_v53, %v1929_v61  ;;  %v1969_v12 = vadd.f32 %v2711_v53, %v1930_v62  ;;  %v498_v14 = vsel %vm450_vm1, %v496_v63, %v497_v0  ;;  %v864_v10 = vmul.f32 %v2613_v22, %v2755_v48 }
  0x4e   : > { %v500_v16 = vsel %vm450_vm1, %v497_v0, %v499_v1  ;;  %v581_v17 = vadd.f32 %v498_v14, %v303_v40  ;;  %v743_v19 = vrot.slane %v628_v5, 2  ;;  %v745_v27 = vrot.slane %v629_v8, 2  ;;  %v2910_v5 = vld [vmem:[%s2581_s29 + $0x118] sm:$0x3] }
  0x4f   : > { %v2000_v20 = vmax.f32 %v1968_v9, 0.0  ;;  %v2001_v23 = vmax.f32 %v1969_v12, 0.0  ;;  %v582_v33 = vadd.f32 %v500_v16, %v304_v45  ;;  %v865_v30 = vmul.f32 %v2613_v22, %v2758_v56  ;;  %v2896_v45 = vld [vmem:[%s2581_s29 + $0x108] sm:$0xff] }
  0x50   : > { %v744_v21 = vsel %vm696_vm2, %v742_v11, %v743_v19  ;;  %v746_v26 = vsel %vm696_vm2, %v743_v19, %v745_v27  ;;  %v942_v28 = vmul.f32 %v2627_v32, %v2755_v48  ;;  %v943_v31 = vmul.f32 %v2627_v32, %v2758_v56 }
  0x51   : > { %v2033_v34 = vpack.c.bf16 %v2001_v23, %v2000_v20  ;;  %v827_v35 = vadd.f32 %v744_v21, %v581_v17  ;;  %v828_v37 = vadd.f32 %v746_v26, %v582_v33  ;;  %v944_v39 = vmul.f32 %v2627_v32, %v2700_v42 }
  0x52   : > { %v1056_v40 = vrot.slane %v942_v28, 1  ;;  %v1057_v41 = vrot.slane %v943_v31, 1  ;;  %v1187_v43 = vmul.f32 %v2639_v38, %v2755_v48  ;;  %v1188_v15 = vmul.f32 %v2639_v38, %v2758_v56 }
  0x53   : > { %2446 = vmatmul.mubr.msk.bf16.vlgmr.msra.gmra.mrb[0].mxu0 %vm2054_vm3, %v2033_v34  ;;  %v896_v24 = vadd.f32 %v864_v10, %v827_v35  ;;  %v897_v46 = vadd.f32 %v865_v30, %v828_v37  ;;  %v1059_v47 = vrot.slane %v944_v39, 1  ;;  %v1189_v44 = vmul.f32 %v2639_v38, %v2700_v42 }
  0x54   : > { %v1058_v25 = vsel %vm450_vm1, %v1056_v40, %v1057_v41  ;;  %v1301_v54 = vrot.slane %v1187_v43, 2  ;;  %v1302_v55 = vrot.slane %v1188_v15, 2  ;;  %v1423_v61 = vmul.f32 %v2658_v51, %v2896_v45 }
  0x55   : > { %v1060_v62 = vsel %vm450_vm1, %v1057_v41, %v1059_v47  ;;  %v1141_v63 = vadd.f32 %v1058_v25, %v896_v24  ;;  %v1304_v0 = vrot.slane %v1189_v44, 2  ;;  %v1424_v1 = vmul.f32 %v2658_v51, %v2901_v49 }
  0x56   : > { %v1142_v8 = vadd.f32 %v1060_v62, %v897_v46  ;;  %v1303_v11 = vsel %vm696_vm2, %v1301_v54, %v1302_v55  ;;  %v1501_v9 = vmul.f32 %v2663_v52, %v2896_v45  ;;  %v1502_v12 = vmul.f32 %v2663_v52, %v2901_v49 }
  0x57   : > { %v1305_v14 = vsel %vm696_vm2, %v1302_v55, %v1304_v0  ;;  %v1386_v10 = vadd.f32 %v1303_v11, %v1141_v63  ;;  %v1503_v16 = vmul.f32 %v2663_v52, %v2910_v5  ;;  %v1746_v17 = vmul.f32 %v2668_v57, %v2896_v45 }
  0x58   : > { %v1387_v19 = vadd.f32 %v1305_v14, %v1142_v8  ;;  %v1615_v27 = vrot.slane %v1501_v9, 1  ;;  %v1616_v20 = vrot.slane %v1502_v12, 1  ;;  %v1747_v23 = vmul.f32 %v2668_v57, %v2901_v49 }
  0x59   : > { %v1455_v33 = vadd.f32 %v1423_v61, %v1386_v10  ;;  %v1618_v30 = vrot.slane %v1503_v16, 1  ;;  %v1748_v21 = vmul.f32 %v2668_v57, %v2910_v5  ;;  %v1860_v26 = vrot.slane %v1746_v17, 2 }
  0x5a   : > { %v1456_v28 = vadd.f32 %v1424_v1, %v1387_v19  ;;  %v1617_v31 = vsel %vm450_vm1, %v1615_v27, %v1616_v20  ;;  %v1861_v34 = vrot.slane %v1747_v23, 2  ;;  %v289_v35 = vmul.f32 %v2571_v2, %v2671_v58 }
  0x5b   : > { %v1619_v37 = vsel %vm450_vm1, %v1616_v20, %v1618_v30  ;;  %v1700_v39 = vadd.f32 %v1617_v31, %v1455_v33  ;;  %v1863_v40 = vrot.slane %v1748_v21, 2  ;;  %v290_v41 = vmul.f32 %v2571_v2, %v2674_v59  ;;  %v2967_v31 = vld [vmem:[%s2581_s29 + $0x60] sm:$0xff] }
  0x5c   : > { %v1701_v43 = vadd.f32 %v1619_v37, %v1456_v28  ;;  %v1862_v15 = vsel %vm696_vm2, %v1860_v26, %v1861_v34  ;;  %v360_v24 = vmul.f32 %v2576_v3, %v2671_v58  ;;  %v361_v46 = vmul.f32 %v2576_v3, %v2674_v59 }
  0x5d   : > { %v1864_v47 = vsel %vm696_vm2, %v1861_v34, %v1863_v40  ;;  %v1945_v44 = vadd.f32 %v1862_v15, %v1700_v39  ;;  %v606_v25 = vmul.f32 %v2586_v4, %v2671_v58  ;;  %v607_v54 = vmul.f32 %v2586_v4, %v2674_v59  ;;  %v2971_v40 = vld [vmem:[%s2581_s29 + $0x68] sm:$0xff] }
  0x5e   : > { %v1946_v55 = vadd.f32 %v1864_v47, %v1701_v43  ;;  %v461_v61 = vrot.slane %v360_v24, 1  ;;  %v462_v62 = vrot.slane %v361_v46, 1  ;;  %v608_v63 = vmul.f32 %v2586_v4, %v2597_v13 }
  0x5f   : > { %v1984_v0 = vadd.f32 %v2711_v53, %v1945_v44  ;;  %v707_v1 = vrot.slane %v606_v25, 2  ;;  %v708_v8 = vrot.slane %v607_v54, 2  ;;  %v850_v11 = vmul.f32 %v2613_v22, %v2826_v50  ;;  %v2984_v54 = vld [vmem:[%s2581_s29 + $0x70] sm:$0x3] }
  0x60   : > { %v1985_v9 = vadd.f32 %v2711_v53, %v1946_v55  ;;  %v463_v58 = vsel %vm450_vm1, %v461_v61, %v462_v62  ;;  %v465_v59 = vsel %vm450_vm1, %v462_v62, %v464_v29  ;;  %v710_v12 = vrot.slane %v608_v63, 2 }
  0x61   : > { %v2016_v14 = vmax.f32 %v1984_v0, 0.0  ;;  %v567_v10 = vadd.f32 %v463_v58, %v289_v35  ;;  %v568_v13 = vadd.f32 %v465_v59, %v290_v41  ;;  %v709_v16 = vsel %vm696_vm2, %v707_v1, %v708_v8 }
  0x62   : > { %v2017_v17 = vmax.f32 %v1985_v9, 0.0  ;;  %v711_v19 = vsel %vm696_vm2, %v708_v8, %v710_v12  ;;  %v851_v27 = vmul.f32 %v2613_v22, %v2829_v36  ;;  %v921_v20 = vmul.f32 %v2627_v32, %v2826_v50 }
  0x63   : > { %v813_v18 = vadd.f32 %v709_v16, %v567_v10  ;;  %v814_v23 = vadd.f32 %v711_v19, %v568_v13  ;;  %v922_v29 = vmul.f32 %v2627_v32, %v2829_v36  ;;  %v923_v33 = vmul.f32 %v2627_v32, %v2838_v6 }
  0x64   : > { %v2041_v30 = vpack.c.bf16 %v2017_v17, %v2016_v14  ;;  %v1021_v21 = vrot.slane %v921_v20, 1  ;;  %v1166_v26 = vmul.f32 %v2639_v38, %v2826_v50  ;;  %v1167_v28 = vmul.f32 %v2639_v38, %v2829_v36 }
  0x65   : > { %v882_v34 = vadd.f32 %v850_v11, %v813_v18  ;;  %v883_v35 = vadd.f32 %v851_v27, %v814_v23  ;;  %v1022_v37 = vrot.slane %v922_v29, 1  ;;  %v1024_v39 = vrot.slane %v923_v33, 1 }
  0x66   : > { %2462 = vmatmul.mubr.msk.bf16.vlgmr.msra.gmra.mrb[0].mxu1 %vm2054_vm3, %v2041_v30  ;;  %v1168_v41 = vmul.f32 %v2639_v38, %v2838_v6  ;;  %v1266_v43 = vrot.slane %v1166_v26, 2  ;;  %v1267_v15 = vrot.slane %v1167_v28, 2  ;;  %v1409_v24 = vmul.f32 %v2658_v51, %v2967_v31 }
  0x67   : > { %v1023_v46 = vsel %vm450_vm1, %v1021_v21, %v1022_v37  ;;  %v1025_v47 = vsel %vm450_vm1, %v1022_v37, %v1024_v39  ;;  %v1410_v44 = vmul.f32 %v2658_v51, %v2971_v40  ;;  %v1480_v25 = vmul.f32 %v2663_v52, %v2967_v31 }
  0x68   : > { %v1127_v55 = vadd.f32 %v1023_v46, %v882_v34  ;;  %v1128_v61 = vadd.f32 %v1025_v47, %v883_v35  ;;  %v1268_v62 = vsel %vm696_vm2, %v1266_v43, %v1267_v15  ;;  %v1269_v63 = vrot.slane %v1168_v41, 2 }
  0x69   : > { %v1481_v0 = vmul.f32 %v2663_v52, %v2971_v40  ;;  %v1482_v1 = vmul.f32 %v2663_v52, %v2984_v54  ;;  %v1580_v8 = vrot.slane %v1480_v25, 1  ;;  %v1725_v11 = vmul.f32 %v2668_v57, %v2967_v31 }
  0x6a   : > { %v1270_v9 = vsel %vm696_vm2, %v1267_v15, %v1269_v63  ;;  %v1372_v58 = vadd.f32 %v1268_v62, %v1127_v55  ;;  %v1726_v59 = vmul.f32 %v2668_v57, %v2971_v40  ;;  %v1727_v12 = vmul.f32 %v2668_v57, %v2984_v54 }
  0x6b   : > { %v1373_v14 = vadd.f32 %v1270_v9, %v1128_v61  ;;  %v1581_v10 = vrot.slane %v1481_v0, 1  ;;  %v1583_v13 = vrot.slane %v1482_v1, 1  ;;  %v1825_v16 = vrot.slane %v1725_v11, 2 }
  0x6c   : > { %v1441_v17 = vadd.f32 %v1409_v24, %v1372_v58  ;;  %v1826_v19 = vrot.slane %v1726_v59, 2  ;;  %v1828_v27 = vrot.slane %v1727_v12, 2  ;;  %v305_v20 = vmul.f32 %v2571_v2, %v2755_v48 }
  0x6d   : > { %v1442_v18 = vadd.f32 %v1410_v44, %v1373_v14  ;;  %v1582_v23 = vsel %vm450_vm1, %v1580_v8, %v1581_v10  ;;  %v1584_v29 = vsel %vm450_vm1, %v1581_v10, %v1583_v13  ;;  %v306_v33 = vmul.f32 %v2571_v2, %v2758_v56 }
  0x6e   : > { %v1686_v30 = vadd.f32 %v1582_v23, %v1441_v17  ;;  %v1827_v21 = vsel %vm696_vm2, %v1825_v16, %v1826_v19  ;;  %v1829_v26 = vsel %vm696_vm2, %v1826_v19, %v1828_v27  ;;  %v384_v28 = vmul.f32 %v2576_v3, %v2755_v48 }
  0x6f   : > { %v1687_v34 = vadd.f32 %v1584_v29, %v1442_v18  ;;  %v385_v35 = vmul.f32 %v2576_v3, %v2758_v56  ;;  %v630_v37 = vmul.f32 %v2586_v4, %v2755_v48  ;;  %v631_v39 = vmul.f32 %v2586_v4, %v2758_v56 }
  0x70   : > { %v1931_v41 = vadd.f32 %v1827_v21, %v1686_v30  ;;  %v501_v43 = vrot.slane %v384_v28, 1  ;;  %v632_v15 = vmul.f32 %v2586_v4, %v2700_v42  ;;  %v866_v24 = vmul.f32 %v2613_v22, %v2896_v45  ;;  %v3045_v30 = vld [vmem:[%s2581_s29 + $0x128] sm:$0xff] }
  0x71   : > { %v1932_v46 = vadd.f32 %v1829_v26, %v1687_v34  ;;  %v502_v47 = vrot.slane %v385_v35, 1  ;;  %v747_v44 = vrot.slane %v630_v37, 2  ;;  %v748_v25 = vrot.slane %v631_v39, 2  ;;  %v3052_v35 = vld [vmem:[%s2581_s29 + $0x130] sm:$0x3] }
  0x72   : > { %v1970_v55 = vadd.f32 %v2711_v53, %v1931_v41  ;;  %v750_v61 = vrot.slane %v632_v15, 2  ;;  %v867_v48 = vmul.f32 %v2613_v22, %v2901_v49  ;;  %v945_v56 = vmul.f32 %v2627_v32, %v2896_v45 }
  0x73   : > { %v1971_v62 = vadd.f32 %v2711_v53, %v1932_v46  ;;  %v503_v42 = vsel %vm450_vm1, %v501_v43, %v502_v47  ;;  %v505_v63 = vsel %vm450_vm1, %v502_v47, %v504_v7  ;;  %v749_v0 = vsel %vm696_vm2, %v747_v44, %v748_v25 }
  0x74   : > { %v2002_v1 = vmax.f32 %v1970_v55, 0.0  ;;  %v583_v8 = vadd.f32 %v503_v42, %v305_v20  ;;  %v584_v11 = vadd.f32 %v505_v63, %v306_v33  ;;  %v751_v9 = vsel %vm696_vm2, %v748_v25, %v750_v61  ;;  %v3041_v20 = vld [vmem:[%s2581_s29 + $0x120] sm:$0xff] }
  0x75   : > { %v2003_v58 = vmax.f32 %v1971_v62, 0.0  ;;  %v946_v59 = vmul.f32 %v2627_v32, %v2901_v49  ;;  %v947_v12 = vmul.f32 %v2627_v32, %v2910_v5  ;;  %v1061_v14 = vrot.slane %v945_v56, 1 }
  0x76   : > { %v829_v60 = vadd.f32 %v749_v0, %v583_v8  ;;  %v830_v10 = vadd.f32 %v751_v9, %v584_v11  ;;  %v1190_v7 = vmul.f32 %v2639_v38, %v2896_v45  ;;  %v1191_v13 = vmul.f32 %v2639_v38, %v2901_v49 }
  0x77   : > { %v2034_v16 = vpack.c.bf16 %v2003_v58, %v2002_v1  ;;  %v1062_v17 = vrot.slane %v946_v59, 1  ;;  %v1064_v19 = vrot.slane %v947_v12, 1  ;;  %v1192_v27 = vmul.f32 %v2639_v38, %v2910_v5 }
  0x78   : > { %v898_v18 = vadd.f32 %v866_v24, %v829_v60  ;;  %v899_v23 = vadd.f32 %v867_v48, %v830_v10  ;;  %v1306_v29 = vrot.slane %v1190_v7, 2  ;;  %v1307_v33 = vrot.slane %v1191_v13, 2 }
  0x79   : > { %2449 = vmatprep.mubr.msk.bf16.mxu0 %vm2054_vm3, %v2034_v16  ;;  %v1063_v21 = vsel %vm450_vm1, %v1061_v14, %v1062_v17  ;;  %v1065_v26 = vsel %vm450_vm1, %v1062_v17, %v1064_v19  ;;  %v1309_v28 = vrot.slane %v1192_v27, 2  ;;  %v1425_v34 = vmul.f32 %v2658_v51, %v3041_v20 }
  0x7a   : > { %v1143_v37 = vadd.f32 %v1063_v21, %v898_v18  ;;  %v1144_v39 = vadd.f32 %v1065_v26, %v899_v23  ;;  %v1308_v41 = vsel %vm696_vm2, %v1306_v29, %v1307_v33  ;;  %v1426_v43 = vmul.f32 %v2658_v51, %v3045_v30 }
  0x7b   : > { %v1310_v15 = vsel %vm696_vm2, %v1307_v33, %v1309_v28  ;;  %v1504_v24 = vmul.f32 %v2663_v52, %v3041_v20  ;;  %v1505_v46 = vmul.f32 %v2663_v52, %v3045_v30  ;;  %v1506_v47 = vmul.f32 %v2663_v52, %v3052_v35 }
  0x7c   : > { %v1388_v44 = vadd.f32 %v1308_v41, %v1143_v37  ;;  %v1389_v25 = vadd.f32 %v1310_v15, %v1144_v39  ;;  %v1749_v55 = vmul.f32 %v2668_v57, %v3041_v20  ;;  %v1750_v61 = vmul.f32 %v2668_v57, %v3045_v30 }
  0x7d   : > { %v1620_v48 = vrot.slane %v1504_v24, 1  ;;  %v1621_v56 = vrot.slane %v1505_v46, 1  ;;  %v1623_v62 = vrot.slane %v1506_v47, 1  ;;  %v1751_v42 = vmul.f32 %v2668_v57, %v3052_v35 }
  0x7e   : > { %v1457_v63 = vadd.f32 %v1425_v34, %v1388_v44  ;;  %v1458_v0 = vadd.f32 %v1426_v43, %v1389_v25  ;;  %v1865_v1 = vrot.slane %v1749_v55, 2  ;;  %v1866_v8 = vrot.slane %v1750_v61, 2 }
  0x7f   : > { %v1622_v11 = vsel %vm450_vm1, %v1620_v48, %v1621_v56  ;;  %v1624_v9 = vsel %vm450_vm1, %v1621_v56, %v1623_v62  ;;  %v1868_v58 = vrot.slane %v1751_v42, 2  ;;  %v291_v59 = vmul.f32 %v2571_v2, %v2826_v50  ;;  %v3112_v42 = vld [vmem:[%s2581_s29 + $0x78] sm:$0xff] }
  0x80   : > { %v1702_v12 = vadd.f32 %v1622_v11, %v1457_v63  ;;  %v1703_v14 = vadd.f32 %v1624_v9, %v1458_v0  ;;  %v1867_v60 = vsel %vm696_vm2, %v1865_v1, %v1866_v8  ;;  %v292_v10 = vmul.f32 %v2571_v2, %v2829_v36  ;;  %v3117_v11 = vld [vmem:[%s2581_s29 + $0x80] sm:$0xff] }
  0x81   : > { %v1869_v7 = vsel %vm696_vm2, %v1866_v8, %v1868_v58  ;;  %v363_v13 = vmul.f32 %v2576_v3, %v2826_v50  ;;  %v364_v16 = vmul.f32 %v2576_v3, %v2829_v36  ;;  %v365_v17 = vmul.f32 %v2576_v3, %v2838_v6 }
  0x82   : > { %v1947_v19 = vadd.f32 %v1867_v60, %v1702_v12  ;;  %v1948_v27 = vadd.f32 %v1869_v7, %v1703_v14  ;;  %v609_v18 = vmul.f32 %v2586_v4, %v2826_v50  ;;  %v610_v23 = vmul.f32 %v2586_v4, %v2829_v36  ;;  %v3127_v7 = vld [vmem:[%s2581_s29 + $0x88] sm:$0x3] }
  0x83   : > { %v466_v2 = vrot.slane %v363_v13, 1  ;;  %v467_v29 = vrot.slane %v364_v16, 1  ;;  %v469_v33 = vrot.slane %v365_v17, 1  ;;  %v611_v21 = vmul.f32 %v2586_v4, %v2838_v6 }
  0x84   : > { %v1986_v26 = vadd.f32 %v2711_v53, %v1947_v19  ;;  %v1987_v28 = vadd.f32 %v2711_v53, %v1948_v27  ;;  %v712_v34 = vrot.slane %v609_v18, 2  ;;  %v713_v3 = vrot.slane %v610_v23, 2 }
  0x85   : > { %v468_v37 = vsel %vm450_vm1, %v466_v2, %v467_v29  ;;  %v470_v39 = vsel %vm450_vm1, %v467_v29, %v469_v33  ;;  %v715_v50 = vrot.slane %v611_v21, 2  ;;  %v852_v36 = vmul.f32 %v2613_v22, %v2967_v31 }
  0x86   : > { %v2018_v41 = vmax.f32 %v1986_v26, 0.0  ;;  %v2019_v43 = vmax.f32 %v1987_v28, 0.0  ;;  %v569_v15 = vadd.f32 %v468_v37, %v291_v59  ;;  %v570_v24 = vadd.f32 %v470_v39, %v292_v10 }
  0x87   : > { %v714_v4 = vsel %vm696_vm2, %v712_v34, %v713_v3  ;;  %v716_v6 = vsel %vm696_vm2, %v713_v3, %v715_v50  ;;  %v853_v46 = vmul.f32 %v2613_v22, %v2971_v40  ;;  %v924_v47 = vmul.f32 %v2627_v32, %v2967_v31  ;;  %v3145_v34 = vld [vmem:[%s3992_s1] ss:$0 sm:$0xff] }
  0x88   : > { %v2042_v44 = vpack.c.bf16 %v2019_v43, %v2018_v41  ;;  %v815_v25 = vadd.f32 %v714_v4, %v569_v15  ;;  %v816_v55 = vadd.f32 %v716_v6, %v570_v24  ;;  %v925_v61 = vmul.f32 %v2627_v32, %v2971_v40  ;;  %v3157_v4 = vld [vmem:[%s3992_s1 + $0x1] ss:$0 sm:$0xff] }
  0x89   : > { %v926_v48 = vmul.f32 %v2627_v32, %v2984_v54  ;;  %v1026_v56 = vrot.slane %v924_v47, 1  ;;  %v1169_v62 = vmul.f32 %v2639_v38, %v2967_v31  ;;  %v1170_v22 = vmul.f32 %v2639_v38, %v2971_v40 }
  0x8a   : > { %2465 = vmatprep.mubr.msk.bf16.mxu1 %vm2054_vm3, %v2042_v44  ;;  %v884_v63 = vadd.f32 %v852_v36, %v815_v25  ;;  %v885_v0 = vadd.f32 %v853_v46, %v816_v55  ;;  %v1027_v1 = vrot.slane %v925_v61, 1  ;;  %v1171_v8 = vmul.f32 %v2639_v38, %v2984_v54  ;;  %v3169_v55 = vld [vmem:[%s3992_s1 + $0x2] ss:$0 sm:$0xff] }
  0x8b   : > { %v1029_v32 = vrot.slane %v926_v48, 1  ;;  %v1271_v9 = vrot.slane %v1169_v62, 2  ;;  %v1272_v58 = vrot.slane %v1170_v22, 2  ;;  %v1411_v59 = vmul.f32 %v2658_v51, %v3112_v42 }
  0x8c   : > { %v1028_v12 = vsel %vm450_vm1, %v1026_v56, %v1027_v1  ;;  %v1274_v14 = vrot.slane %v1171_v8, 2  ;;  %v1412_v60 = vmul.f32 %v2658_v51, %v3117_v11  ;;  %v1483_v10 = vmul.f32 %v2663_v52, %v3112_v42 }
  0x8d   : > { %v1030_v38 = vsel %vm450_vm1, %v1027_v1, %v1029_v32  ;;  %v1129_v13 = vadd.f32 %v1028_v12, %v884_v63  ;;  %v1273_v16 = vsel %vm696_vm2, %v1271_v9, %v1272_v58  ;;  %v1484_v17 = vmul.f32 %v2663_v52, %v3117_v11 }
  0x8e   : > { %v1130_v19 = vadd.f32 %v1030_v38, %v885_v0  ;;  %v1275_v27 = vsel %vm696_vm2, %v1272_v58, %v1274_v14  ;;  %v1485_v18 = vmul.f32 %v2663_v52, %v3127_v7  ;;  %v1585_v51 = vrot.slane %v1483_v10, 1 }
  0x8f   : > { %v1374_v23 = vadd.f32 %v1273_v16, %v1129_v13  ;;  %v1586_v2 = vrot.slane %v1484_v17, 1  ;;  %v1728_v29 = vmul.f32 %v2668_v57, %v3112_v42  ;;  %v1729_v33 = vmul.f32 %v2668_v57, %v3117_v11 }
  0x90   : > { %v1375_v21 = vadd.f32 %v1275_v27, %v1130_v19  ;;  %v1588_v26 = vrot.slane %v1485_v18, 1  ;;  %v1730_v28 = vmul.f32 %v2668_v57, %v3127_v7  ;;  %v307_v52 = vmul.f32 %v3145_v34, %v2896_v45 }
  0x91   : > { %v1443_v3 = vadd.f32 %v1411_v59, %v1374_v23  ;;  %v1587_v37 = vsel %vm450_vm1, %v1585_v51, %v1586_v2  ;;  %v1830_v39 = vrot.slane %v1728_v29, 2  ;;  %v1831_v50 = vrot.slane %v1729_v33, 2 }
  0x92   : > { %v1444_v36 = vadd.f32 %v1412_v60, %v1375_v21  ;;  %v1589_v41 = vsel %vm450_vm1, %v1586_v2, %v1588_v26  ;;  %v1833_v43 = vrot.slane %v1730_v28, 2  ;;  %v308_v57 = vmul.f32 %v3145_v34, %v2901_v49  ;;  %v3206_v2 = vld [vmem:[%s3992_s1 + $0x5] ss:$0 sm:$0xff] }
  0x93   : > { %v1688_v15 = vadd.f32 %v1587_v37, %v1443_v3  ;;  %v1832_v24 = vsel %vm696_vm2, %v1830_v39, %v1831_v50  ;;  %v387_v6 = vmul.f32 %v3157_v4, %v2896_v45  ;;  %v388_v46 = vmul.f32 %v3157_v4, %v2901_v49  ;;  %v3216_v3 = vld [vmem:[%s2581_s29 + $0x140] sm:$0xff] }
  0x94   : > { %v1689_v47 = vadd.f32 %v1589_v41, %v1444_v36  ;;  %v1834_v44 = vsel %vm696_vm2, %v1831_v50, %v1833_v43  ;;  %v389_v25 = vmul.f32 %v3157_v4, %v2910_v5  ;;  %v633_v61 = vmul.f32 %v3169_v55, %v2896_v45  ;;  %v3182_v45 = vld [vmem:[%s3992_s1 + $0x3] ss:$0 sm:$0xff] }
  0x95   : > { %v1933_v48 = vadd.f32 %v1832_v24, %v1688_v15  ;;  %v506_v56 = vrot.slane %v387_v6, 1  ;;  %v507_v62 = vrot.slane %v388_v46, 1  ;;  %v634_v22 = vmul.f32 %v3169_v55, %v2901_v49 }
  0x96   : > { %v1934_v63 = vadd.f32 %v1834_v44, %v1689_v47  ;;  %v509_v0 = vrot.slane %v389_v25, 1  ;;  %v635_v1 = vmul.f32 %v3169_v55, %v2910_v5  ;;  %v752_v8 = vrot.slane %v633_v61, 2  ;;  %v3235_v44 = vld [vmem:[%s3992_s1 + $0x7] ss:$0 sm:$0xff]  ;;  %v3240_v61 = vld [vmem:[%s2581_s29 + $0x148] sm:$0x3] }
  0x97   : > { %v1972_v32 = vadd.f32 %v2711_v53, %v1933_v48  ;;  %v508_v9 = vsel %vm450_vm1, %v506_v56, %v507_v62  ;;  %v753_v58 = vrot.slane %v634_v22, 2  ;;  %v868_v59 = vmul.f32 %v3182_v45, %v3041_v20 }
  0x98   : > { %v1973_v49 = vadd.f32 %v2711_v53, %v1934_v63  ;;  %v510_v12 = vsel %vm450_vm1, %v507_v62, %v509_v0  ;;  %v585_v14 = vadd.f32 %v508_v9, %v307_v52  ;;  %v755_v5 = vrot.slane %v635_v1, 2  ;;  %v3195_v53 = vld [vmem:[%s3992_s1 + $0x4] ss:$0 sm:$0xff]  ;;  %v3213_v52 = vld [vmem:[%s2581_s29 + $0x138] sm:$0xff] }
  0x99   : > { %v2004_v60 = vmax.f32 %v1972_v32, 0.0  ;;  %v586_v10 = vadd.f32 %v510_v12, %v308_v57  ;;  %v754_v38 = vsel %vm696_vm2, %v752_v8, %v753_v58  ;;  %v869_v13 = vmul.f32 %v3182_v45, %v3045_v30  ;;  %v3224_v57 = vld [vmem:[%s3992_s1 + $0x6] ss:$0 sm:$0xff]  ;;  %v3251_v8 = vld [vmem:[%s3992_s1 + $0x8] ss:$0 sm:$0xff] }
  0x9a   : > { %v2005_v16 = vmax.f32 %v1973_v49, 0.0  ;;  %v756_v17 = vsel %vm696_vm2, %v753_v58, %v755_v5  ;;  %v831_v19 = vadd.f32 %v754_v38, %v585_v14  ;;  %v948_v27 = vmul.f32 %v3195_v53, %v3041_v20 }
  0x9b   : > { %v832_v18 = vadd.f32 %v756_v17, %v586_v10  ;;  %v949_v51 = vmul.f32 %v3195_v53, %v3045_v30  ;;  %v950_v23 = vmul.f32 %v3195_v53, %v3052_v35  ;;  %v1193_v29 = vmul.f32 %v3206_v2, %v3041_v20 }
  0x9c   : > { %v2035_v33 = vpack.c.bf16 %v2005_v16, %v2004_v60  ;;  %v900_v21 = vadd.f32 %v868_v59, %v831_v19  ;;  %v1066_v26 = vrot.slane %v948_v27, 1  ;;  %v1194_v28 = vmul.f32 %v3206_v2, %v3045_v30 }
  0x9d   : > { %v901_v37 = vadd.f32 %v869_v13, %v832_v18  ;;  %v1067_v39 = vrot.slane %v949_v51, 1  ;;  %v1069_v50 = vrot.slane %v950_v23, 1  ;;  %v1195_v36 = vmul.f32 %v3206_v2, %v3052_v35 }
  0x9e   : > { %2450 = vmatmul.mubr.msk.bf16.gmra.mrb[4].mxu0 %vm2054_vm3, %v2035_v33  ;;  %v1311_v41 = vrot.slane %v1193_v29, 2  ;;  %v1312_v43 = vrot.slane %v1194_v28, 2  ;;  %v1427_v15 = vmul.f32 %v3224_v57, %v3213_v52  ;;  %v1428_v24 = vmul.f32 %v3224_v57, %v3216_v3 }
  0x9f   : > { %v1068_v6 = vsel %vm450_vm1, %v1066_v26, %v1067_v39  ;;  %v1070_v46 = vsel %vm450_vm1, %v1067_v39, %v1069_v50  ;;  %v1314_v47 = vrot.slane %v1195_v36, 2  ;;  %v1507_v25 = vmul.f32 %v3235_v44, %v3213_v52 }
  0xa0   : > { %v1145_v48 = vadd.f32 %v1068_v6, %v900_v21  ;;  %v1146_v56 = vadd.f32 %v1070_v46, %v901_v37  ;;  %v1313_v62 = vsel %vm696_vm2, %v1311_v41, %v1312_v43  ;;  %v1508_v22 = vmul.f32 %v3235_v44, %v3216_v3  ;;  %v3284_v46 = vld [vmem:[%s3993_s2] ss:$0 sm:$0xff] }
  0xa1   : > { %v1315_v63 = vsel %vm696_vm2, %v1312_v43, %v1314_v47  ;;  %v1509_v0 = vmul.f32 %v3235_v44, %v3240_v61  ;;  %v1625_v1 = vrot.slane %v1507_v25, 1  ;;  %v1752_v32 = vmul.f32 %v3251_v8, %v3213_v52 }
  0xa2   : > { %v1390_v9 = vadd.f32 %v1313_v62, %v1145_v48  ;;  %v1391_v58 = vadd.f32 %v1315_v63, %v1146_v56  ;;  %v1626_v59 = vrot.slane %v1508_v22, 1  ;;  %v1753_v49 = vmul.f32 %v3251_v8, %v3216_v3 }
  0xa3   : > { %v1628_v12 = vrot.slane %v1509_v0, 1  ;;  %v1754_v14 = vmul.f32 %v3251_v8, %v3240_v61  ;;  %v1870_v5 = vrot.slane %v1752_v32, 2  ;;  %v293_v60 = vmul.f32 %v3145_v34, %v2967_v31 }
  0xa4   : > { %v1459_v10 = vadd.f32 %v1427_v15, %v1390_v9  ;;  %v1460_v38 = vadd.f32 %v1428_v24, %v1391_v58  ;;  %v1627_v13 = vsel %vm450_vm1, %v1625_v1, %v1626_v59  ;;  %v1871_v16 = vrot.slane %v1753_v49, 2 }
  0xa5   : > { %v1629_v17 = vsel %vm450_vm1, %v1626_v59, %v1628_v12  ;;  %v1873_v19 = vrot.slane %v1754_v14, 2  ;;  %v294_v27 = vmul.f32 %v3145_v34, %v2971_v40  ;;  %v366_v18 = vmul.f32 %v3157_v4, %v2967_v31 }
  0xa6   : > { %v1704_v51 = vadd.f32 %v1627_v13, %v1459_v10  ;;  %v1705_v23 = vadd.f32 %v1629_v17, %v1460_v38  ;;  %v1872_v29 = vsel %vm696_vm2, %v1870_v5, %v1871_v16  ;;  %v367_v33 = vmul.f32 %v3157_v4, %v2971_v40  ;;  %v3309_v17 = vld [vmem:[%s2581_s29 + $0x98] sm:$0xff] }
  0xa7   : > { %v1874_v21 = vsel %vm696_vm2, %v1871_v16, %v1873_v19  ;;  %v368_v26 = vmul.f32 %v3157_v4, %v2984_v54  ;;  %v471_v28 = vrot.slane %v366_v18, 1  ;;  %v612_v37 = vmul.f32 %v3169_v55, %v2967_v31  ;;  %v3306_v16 = vld [vmem:[%s2581_s29 + $0x90] sm:$0xff] }
  0xa8   : > { %v1949_v39 = vadd.f32 %v1872_v29, %v1704_v51  ;;  %v1950_v50 = vadd.f32 %v1874_v21, %v1705_v23  ;;  %v472_v36 = vrot.slane %v367_v33, 1  ;;  %v613_v41 = vmul.f32 %v3169_v55, %v2971_v40 }
  0xa9   : > { %v474_v43 = vrot.slane %v368_v26, 1  ;;  %v614_v15 = vmul.f32 %v3169_v55, %v2984_v54  ;;  %v717_v24 = vrot.slane %v612_v37, 2  ;;  %v854_v6 = vmul.f32 %v3182_v45, %v3112_v42  ;;  %v3319_v26 = vld [vmem:[%s2581_s29 + $0xa0] sm:$0x3] }
  0xaa   : > { %v1988_v31 = vadd.f32 %v3284_v46, %v1949_v39  ;;  %v1989_v47 = vadd.f32 %v3284_v46, %v1950_v50  ;;  %v473_v25 = vsel %vm450_vm1, %v471_v28, %v472_v36  ;;  %v718_v40 = vrot.slane %v613_v41, 2 }
  0xab   : > { %v475_v48 = vsel %vm450_vm1, %v472_v36, %v474_v43  ;;  %v571_v56 = vadd.f32 %v473_v25, %v293_v60  ;;  %v720_v54 = vrot.slane %v614_v15, 2  ;;  %v855_v62 = vmul.f32 %v3182_v45, %v3117_v11 }
  0xac   : > { %v2020_v22 = vmax.f32 %v1988_v31, 0.0  ;;  %v2021_v63 = vmax.f32 %v1989_v47, 0.0  ;;  %v572_v0 = vadd.f32 %v475_v48, %v294_v27  ;;  %v719_v1 = vsel %vm696_vm2, %v717_v24, %v718_v40 }
  0xad   : > { %v721_v32 = vsel %vm696_vm2, %v718_v40, %v720_v54  ;;  %v817_v9 = vadd.f32 %v719_v1, %v571_v56  ;;  %v927_v58 = vmul.f32 %v3195_v53, %v3112_v42  ;;  %v928_v59 = vmul.f32 %v3195_v53, %v3117_v11 }
  0xae   : > { %v2043_v49 = vpack.c.bf16 %v2021_v63, %v2020_v22  ;;  %v818_v12 = vadd.f32 %v721_v32, %v572_v0  ;;  %v929_v14 = vmul.f32 %v3195_v53, %v3127_v7  ;;  %v1172_v5 = vmul.f32 %v3206_v2, %v3112_v42 }
  0xaf   : > { %v886_v60 = vadd.f32 %v854_v6, %v817_v9  ;;  %v1031_v10 = vrot.slane %v927_v58, 1  ;;  %v1032_v38 = vrot.slane %v928_v59, 1  ;;  %v1173_v13 = vmul.f32 %v3206_v2, %v3117_v11 }
  0xb0   : > { %2466 = vmatmul.mubr.msk.bf16.gmra.mrb[4].mxu1 %vm2054_vm3, %v2043_v49  ;;  %v887_v19 = vadd.f32 %v855_v62, %v818_v12  ;;  %v1034_v27 = vrot.slane %v929_v14, 1  ;;  %v1174_v18 = vmul.f32 %v3206_v2, %v3127_v7  ;;  %v1276_v51 = vrot.slane %v1172_v5, 2 }
  0xb1   : > { %v1033_v23 = vsel %vm450_vm1, %v1031_v10, %v1032_v38  ;;  %v1277_v29 = vrot.slane %v1173_v13, 2  ;;  %v1413_v33 = vmul.f32 %v3224_v57, %v3306_v16  ;;  %v1414_v21 = vmul.f32 %v3224_v57, %v3309_v17 }
  0xb2   : > { %v1035_v28 = vsel %vm450_vm1, %v1032_v38, %v1034_v27  ;;  %v1131_v37 = vadd.f32 %v1033_v23, %v886_v60  ;;  %v1279_v39 = vrot.slane %v1174_v18, 2  ;;  %v1486_v50 = vmul.f32 %v3235_v44, %v3306_v16 }
  0xb3   : > { %v1132_v36 = vadd.f32 %v1035_v28, %v887_v19  ;;  %v1278_v41 = vsel %vm696_vm2, %v1276_v51, %v1277_v29  ;;  %v1487_v43 = vmul.f32 %v3235_v44, %v3309_v17  ;;  %v1488_v15 = vmul.f32 %v3235_v44, %v3319_v26 }
  0xb4   : > { %v1280_v24 = vsel %vm696_vm2, %v1277_v29, %v1279_v39  ;;  %v1376_v6 = vadd.f32 %v1278_v41, %v1131_v37  ;;  %v1590_v31 = vrot.slane %v1486_v50, 1  ;;  %v1731_v47 = vmul.f32 %v3251_v8, %v3306_v16 }
  0xb5   : > { %v1377_v25 = vadd.f32 %v1280_v24, %v1132_v36  ;;  %v1591_v40 = vrot.slane %v1487_v43, 1  ;;  %v1593_v48 = vrot.slane %v1488_v15, 1  ;;  %v1732_v56 = vmul.f32 %v3251_v8, %v3309_v17 }
  0xb6   : > { %v1445_v54 = vadd.f32 %v1413_v33, %v1376_v6  ;;  %v1733_v62 = vmul.f32 %v3251_v8, %v3319_v26  ;;  %v1835_v22 = vrot.slane %v1731_v47, 2  ;;  %v309_v63 = vmul.f32 %v3145_v34, %v3041_v20 }
  0xb7   : > { %v1446_v0 = vadd.f32 %v1414_v21, %v1377_v25  ;;  %v1592_v1 = vsel %vm450_vm1, %v1590_v31, %v1591_v40  ;;  %v1594_v32 = vsel %vm450_vm1, %v1591_v40, %v1593_v48  ;;  %v1836_v9 = vrot.slane %v1732_v56, 2 }
  0xb8   : > { %v1690_v58 = vadd.f32 %v1592_v1, %v1445_v54  ;;  %v1838_v59 = vrot.slane %v1733_v62, 2  ;;  %v310_v49 = vmul.f32 %v3145_v34, %v3045_v30  ;;  %v390_v12 = vmul.f32 %v3157_v4, %v3041_v20 }
  0xb9   : > { %v1691_v14 = vadd.f32 %v1594_v32, %v1446_v0  ;;  %v1837_v5 = vsel %vm696_vm2, %v1835_v22, %v1836_v9  ;;  %v391_v60 = vmul.f32 %v3157_v4, %v3045_v30  ;;  %v392_v10 = vmul.f32 %v3157_v4, %v3052_v35 }
  0xba   : > { %v1839_v38 = vsel %vm696_vm2, %v1836_v9, %v1838_v59  ;;  %v1935_v13 = vadd.f32 %v1837_v5, %v1690_v58  ;;  %v511_v19 = vrot.slane %v390_v12, 1  ;;  %v636_v27 = vmul.f32 %v3169_v55, %v3041_v20  ;;  %v3381_v58 = vld [vmem:[%s2581_s29 + $0x158] sm:$0xff] }
  0xbb   : > { %v1936_v18 = vadd.f32 %v1839_v38, %v1691_v14  ;;  %v512_v51 = vrot.slane %v391_v60, 1  ;;  %v514_v23 = vrot.slane %v392_v10, 1  ;;  %v637_v29 = vmul.f32 %v3169_v55, %v3045_v30 }
  0xbc   : > { %v1974_v33 = vadd.f32 %v3284_v46, %v1935_v13  ;;  %v638_v21 = vmul.f32 %v3169_v55, %v3052_v35  ;;  %v757_v28 = vrot.slane %v636_v27, 2  ;;  %v870_v37 = vmul.f32 %v3182_v45, %v3213_v52  ;;  %v3392_v13 = vld [vmem:[%s2581_s29 + $0x160] sm:$0x3] }
  0xbd   : > { %v1975_v39 = vadd.f32 %v3284_v46, %v1936_v18  ;;  %v513_v50 = vsel %vm450_vm1, %v511_v19, %v512_v51  ;;  %v515_v20 = vsel %vm450_vm1, %v512_v51, %v514_v23  ;;  %v758_v36 = vrot.slane %v637_v29, 2 }
  0xbe   : > { %v2006_v41 = vmax.f32 %v1974_v33, 0.0  ;;  %v587_v43 = vadd.f32 %v513_v50, %v309_v63  ;;  %v588_v30 = vadd.f32 %v515_v20, %v310_v49  ;;  %v760_v15 = vrot.slane %v638_v21, 2  ;;  %v3375_v63 = vld [vmem:[%s2581_s29 + $0x150] sm:$0xff] }
  0xbf   : > { %v2007_v24 = vmax.f32 %v1975_v39, 0.0  ;;  %v759_v6 = vsel %vm696_vm2, %v757_v28, %v758_v36  ;;  %v871_v35 = vmul.f32 %v3182_v45, %v3216_v3  ;;  %v951_v31 = vmul.f32 %v3195_v53, %v3213_v52 }
  0xc0   : > { %v761_v47 = vsel %vm696_vm2, %v758_v36, %v760_v15  ;;  %v833_v25 = vadd.f32 %v759_v6, %v587_v43  ;;  %v952_v40 = vmul.f32 %v3195_v53, %v3216_v3  ;;  %v953_v48 = vmul.f32 %v3195_v53, %v3240_v61 }
  0xc1   : > { %v2036_v56 = vpack.c.bf16 %v2007_v24, %v2006_v41  ;;  %v834_v54 = vadd.f32 %v761_v47, %v588_v30  ;;  %v1071_v62 = vrot.slane %v951_v31, 1  ;;  %v1196_v22 = vmul.f32 %v3206_v2, %v3213_v52 }
  0xc2   : > { %v902_v0 = vadd.f32 %v870_v37, %v833_v25  ;;  %v1072_v1 = vrot.slane %v952_v40, 1  ;;  %v1074_v32 = vrot.slane %v953_v48, 1  ;;  %v1197_v9 = vmul.f32 %v3206_v2, %v3216_v3 }
  0xc3   : > { %2453 = vmatprep.mubr.msk.bf16.mxu0 %vm2054_vm3, %v2036_v56  ;;  %v903_v59 = vadd.f32 %v871_v35, %v834_v54  ;;  %v1198_v49 = vmul.f32 %v3206_v2, %v3240_v61  ;;  %v1316_v12 = vrot.slane %v1196_v22, 2  ;;  %v1429_v14 = vmul.f32 %v3224_v57, %v3375_v63 }
  0xc4   : > { %v1073_v5 = vsel %vm450_vm1, %v1071_v62, %v1072_v1  ;;  %v1075_v60 = vsel %vm450_vm1, %v1072_v1, %v1074_v32  ;;  %v1317_v10 = vrot.slane %v1197_v9, 2  ;;  %v1430_v38 = vmul.f32 %v3224_v57, %v3381_v58 }
  0xc5   : > { %v1147_v19 = vadd.f32 %v1073_v5, %v902_v0  ;;  %v1148_v27 = vadd.f32 %v1075_v60, %v903_v59  ;;  %v1319_v18 = vrot.slane %v1198_v49, 2  ;;  %v1510_v51 = vmul.f32 %v3235_v44, %v3375_v63 }
  0xc6   : > { %v1318_v23 = vsel %vm696_vm2, %v1316_v12, %v1317_v10  ;;  %v1511_v29 = vmul.f32 %v3235_v44, %v3381_v58  ;;  %v1512_v33 = vmul.f32 %v3235_v44, %v3392_v13  ;;  %v1755_v21 = vmul.f32 %v3251_v8, %v3375_v63 }
  0xc7   : > { %v1320_v28 = vsel %vm696_vm2, %v1317_v10, %v1319_v18  ;;  %v1392_v37 = vadd.f32 %v1318_v23, %v1147_v19  ;;  %v1630_v39 = vrot.slane %v1510_v51, 1  ;;  %v1756_v50 = vmul.f32 %v3251_v8, %v3381_v58 }
  0xc8   : > { %v1393_v20 = vadd.f32 %v1320_v28, %v1148_v27  ;;  %v1631_v36 = vrot.slane %v1511_v29, 1  ;;  %v1633_v41 = vrot.slane %v1512_v33, 1  ;;  %v1757_v43 = vmul.f32 %v3251_v8, %v3392_v13 }
  0xc9   : > { %v1461_v30 = vadd.f32 %v1429_v14, %v1392_v37  ;;  %v1875_v15 = vrot.slane %v1755_v21, 2  ;;  %v1876_v24 = vrot.slane %v1756_v50, 2  ;;  %v295_v6 = vmul.f32 %v3145_v34, %v3112_v42 }
  0xca   : > { %v1462_v35 = vadd.f32 %v1430_v38, %v1393_v20  ;;  %v1632_v31 = vsel %vm450_vm1, %v1630_v39, %v1631_v36  ;;  %v1634_v47 = vsel %vm450_vm1, %v1631_v36, %v1633_v41  ;;  %v1878_v25 = vrot.slane %v1757_v43, 2 }
  0xcb   : > { %v1706_v40 = vadd.f32 %v1632_v31, %v1461_v30  ;;  %v1877_v48 = vsel %vm696_vm2, %v1875_v15, %v1876_v24  ;;  %v296_v56 = vmul.f32 %v3145_v34, %v3117_v11  ;;  %v369_v54 = vmul.f32 %v3157_v4, %v3112_v42 }
  0xcc   : > { %v1707_v62 = vadd.f32 %v1634_v47, %v1462_v35  ;;  %v1879_v22 = vsel %vm696_vm2, %v1876_v24, %v1878_v25  ;;  %v370_v0 = vmul.f32 %v3157_v4, %v3117_v11  ;;  %v371_v1 = vmul.f32 %v3157_v4, %v3127_v7 }
  0xcd   : > { %v1951_v32 = vadd.f32 %v1877_v48, %v1706_v40  ;;  %v476_v9 = vrot.slane %v369_v54, 1  ;;  %v615_v59 = vmul.f32 %v3169_v55, %v3112_v42  ;;  %v616_v49 = vmul.f32 %v3169_v55, %v3117_v11  ;;  %v3453_v40 = vld [vmem:[%s2581_s29 + $0xb0] sm:$0xff] }
  0xce   : > { %v1952_v12 = vadd.f32 %v1879_v22, %v1707_v62  ;;  %v477_v14 = vrot.slane %v370_v0, 1  ;;  %v479_v5 = vrot.slane %v371_v1, 1  ;;  %v617_v60 = vmul.f32 %v3169_v55, %v3127_v7 }
  0xcf   : > { %v1990_v10 = vadd.f32 %v3284_v46, %v1951_v32  ;;  %v722_v38 = vrot.slane %v615_v59, 2  ;;  %v723_v19 = vrot.slane %v616_v49, 2  ;;  %v856_v27 = vmul.f32 %v3182_v45, %v3306_v16 }
  0xd0   : > { %v1991_v18 = vadd.f32 %v3284_v46, %v1952_v12  ;;  %v478_v42 = vsel %vm450_vm1, %v476_v9, %v477_v14  ;;  %v480_v51 = vsel %vm450_vm1, %v477_v14, %v479_v5  ;;  %v725_v11 = vrot.slane %v617_v60, 2  ;;  %v3466_v9 = vld [vmem:[%s2581_s29 + $0xb8] sm:$0x3] }
  0xd1   : > { %v2022_v23 = vmax.f32 %v1990_v10, 0.0  ;;  %v573_v29 = vadd.f32 %v478_v42, %v295_v6  ;;  %v574_v33 = vadd.f32 %v480_v51, %v296_v56  ;;  %v724_v7 = vsel %vm696_vm2, %v722_v38, %v723_v19  ;;  %v3449_v6 = vld [vmem:[%s2581_s29 + $0xa8] sm:$0xff] }
  0xd2   : > { %v2023_v21 = vmax.f32 %v1991_v18, 0.0  ;;  %v726_v28 = vsel %vm696_vm2, %v723_v19, %v725_v11  ;;  %v857_v37 = vmul.f32 %v3182_v45, %v3309_v17  ;;  %v930_v39 = vmul.f32 %v3195_v53, %v3306_v16 }
  0xd3   : > { %v819_v50 = vadd.f32 %v724_v7, %v573_v29  ;;  %v820_v20 = vadd.f32 %v726_v28, %v574_v33  ;;  %v931_v36 = vmul.f32 %v3195_v53, %v3309_v17  ;;  %v932_v41 = vmul.f32 %v3195_v53, %v3319_v26 }
  0xd4   : > { %v2044_v43 = vpack.c.bf16 %v2023_v21, %v2022_v23  ;;  %v1036_v30 = vrot.slane %v930_v39, 1  ;;  %v1175_v15 = vmul.f32 %v3206_v2, %v3306_v16  ;;  %v1176_v24 = vmul.f32 %v3206_v2, %v3309_v17 }
  0xd5   : > { %v888_v35 = vadd.f32 %v856_v27, %v819_v50  ;;  %v889_v31 = vadd.f32 %v857_v37, %v820_v20  ;;  %v1037_v47 = vrot.slane %v931_v36, 1  ;;  %v1039_v25 = vrot.slane %v932_v41, 1 }
  0xd6   : > { %2469 = vmatprep.mubr.msk.bf16.mxu1 %vm2054_vm3, %v2044_v43  ;;  %v1177_v48 = vmul.f32 %v3206_v2, %v3319_v26  ;;  %v1281_v56 = vrot.slane %v1175_v15, 2  ;;  %v1282_v54 = vrot.slane %v1176_v24, 2  ;;  %v1415_v62 = vmul.f32 %v3224_v57, %v3449_v6 }
  0xd7   : > { %v1038_v22 = vsel %vm450_vm1, %v1036_v30, %v1037_v47  ;;  %v1040_v0 = vsel %vm450_vm1, %v1037_v47, %v1039_v25  ;;  %v1416_v1 = vmul.f32 %v3224_v57, %v3453_v40  ;;  %v1489_v32 = vmul.f32 %v3235_v44, %v3449_v6 }
  0xd8   : > { %v1133_v59 = vadd.f32 %v1038_v22, %v888_v35  ;;  %v1134_v49 = vadd.f32 %v1040_v0, %v889_v31  ;;  %v1283_v12 = vsel %vm696_vm2, %v1281_v56, %v1282_v54  ;;  %v1284_v14 = vrot.slane %v1177_v48, 2 }
  0xd9   : > { %v1490_v5 = vmul.f32 %v3235_v44, %v3453_v40  ;;  %v1491_v60 = vmul.f32 %v3235_v44, %v3466_v9  ;;  %v1595_v10 = vrot.slane %v1489_v32, 1  ;;  %v1734_v38 = vmul.f32 %v3251_v8, %v3449_v6 }
  0xda   : > { %v1285_v19 = vsel %vm696_vm2, %v1282_v54, %v1284_v14  ;;  %v1378_v27 = vadd.f32 %v1283_v12, %v1133_v59  ;;  %v1735_v18 = vmul.f32 %v3251_v8, %v3453_v40  ;;  %v1736_v42 = vmul.f32 %v3251_v8, %v3466_v9 }
  0xdb   : > { %v1379_v51 = vadd.f32 %v1285_v19, %v1134_v49  ;;  %v1596_v11 = vrot.slane %v1490_v5, 1  ;;  %v1598_v23 = vrot.slane %v1491_v60, 1  ;;  %v1840_v29 = vrot.slane %v1734_v38, 2 }
  0xdc   : > { %v1447_v33 = vadd.f32 %v1415_v62, %v1378_v27  ;;  %v1841_v7 = vrot.slane %v1735_v18, 2  ;;  %v1843_v21 = vrot.slane %v1736_v42, 2  ;;  %v311_v28 = vmul.f32 %v3145_v34, %v3213_v52 }
  0xdd   : > { %v1448_v37 = vadd.f32 %v1416_v1, %v1379_v51  ;;  %v1597_v39 = vsel %vm450_vm1, %v1595_v10, %v1596_v11  ;;  %v1599_v50 = vsel %vm450_vm1, %v1596_v11, %v1598_v23  ;;  %v312_v20 = vmul.f32 %v3145_v34, %v3216_v3 }
  0xde   : > { %v1692_v36 = vadd.f32 %v1597_v39, %v1447_v33  ;;  %v1842_v41 = vsel %vm696_vm2, %v1840_v29, %v1841_v7  ;;  %v1844_v43 = vsel %vm696_vm2, %v1841_v7, %v1843_v21  ;;  %v393_v30 = vmul.f32 %v3157_v4, %v3213_v52 }
  0xdf   : > { %v1693_v15 = vadd.f32 %v1599_v50, %v1448_v37  ;;  %v394_v24 = vmul.f32 %v3157_v4, %v3216_v3  ;;  %v395_v35 = vmul.f32 %v3157_v4, %v3240_v61  ;;  %v639_v31 = vmul.f32 %v3169_v55, %v3213_v52 }
  0xe0   : > { %v1937_v47 = vadd.f32 %v1842_v41, %v1692_v36  ;;  %v516_v25 = vrot.slane %v393_v30, 1  ;;  %v640_v48 = vmul.f32 %v3169_v55, %v3216_v3  ;;  %v641_v56 = vmul.f32 %v3169_v55, %v3240_v61  ;;  %v3527_v36 = vld [vmem:[%s2581_s29 + $0x170] sm:$0xff] }
  0xe1   : > { %v1938_v54 = vadd.f32 %v1844_v43, %v1693_v15  ;;  %v517_v62 = vrot.slane %v394_v24, 1  ;;  %v519_v22 = vrot.slane %v395_v35, 1  ;;  %v762_v0 = vrot.slane %v639_v31, 2 }
  0xe2   : > { %v1976_v1 = vadd.f32 %v3284_v46, %v1937_v47  ;;  %v763_v32 = vrot.slane %v640_v48, 2  ;;  %v765_v59 = vrot.slane %v641_v56, 2  ;;  %v872_v49 = vmul.f32 %v3182_v45, %v3375_v63 }
  0xe3   : > { %v1977_v52 = vadd.f32 %v3284_v46, %v1938_v54  ;;  %v518_v12 = vsel %vm450_vm1, %v516_v25, %v517_v62  ;;  %v520_v3 = vsel %vm450_vm1, %v517_v62, %v519_v22  ;;  %v873_v61 = vmul.f32 %v3182_v45, %v3381_v58  ;;  %v3536_v25 = vld [vmem:[%s2581_s29 + $0x178] sm:$0x3] }
  0xe4   : > { %v2008_v14 = vmax.f32 %v1976_v1, 0.0  ;;  %v589_v5 = vadd.f32 %v518_v12, %v311_v28  ;;  %v590_v60 = vadd.f32 %v520_v3, %v312_v20  ;;  %v764_v10 = vsel %vm696_vm2, %v762_v0, %v763_v32  ;;  %v3521_v28 = vld [vmem:[%s2581_s29 + $0x168] sm:$0xff] }
  0xe5   : > { %v2009_v38 = vmax.f32 %v1977_v52, 0.0  ;;  %v766_v19 = vsel %vm696_vm2, %v763_v32, %v765_v59  ;;  %v954_v27 = vmul.f32 %v3195_v53, %v3375_v63  ;;  %v955_v18 = vmul.f32 %v3195_v53, %v3381_v58 }
  0xe6   : > { %v835_v42 = vadd.f32 %v764_v10, %v589_v5  ;;  %v836_v51 = vadd.f32 %v766_v19, %v590_v60  ;;  %v956_v11 = vmul.f32 %v3195_v53, %v3392_v13  ;;  %v1199_v23 = vmul.f32 %v3206_v2, %v3375_v63 }
  0xe7   : > { %v2037_v29 = vpack.c.bf16 %v2009_v38, %v2008_v14  ;;  %v1076_v33 = vrot.slane %v954_v27, 1  ;;  %v1077_v7 = vrot.slane %v955_v18, 1  ;;  %v1200_v21 = vmul.f32 %v3206_v2, %v3381_v58 }
  0xe8   : > { %v904_v37 = vadd.f32 %v872_v49, %v835_v42  ;;  %v905_v39 = vadd.f32 %v873_v61, %v836_v51  ;;  %v1079_v50 = vrot.slane %v956_v11, 1  ;;  %v1201_v20 = vmul.f32 %v3206_v2, %v3392_v13 }
  0xe9   : > { %2454 = vmatmul.mubr.msk.bf16.gmra.mrb[8].mxu0 %vm2054_vm3, %v2037_v29  ;;  %v1078_v41 = vsel %vm450_vm1, %v1076_v33, %v1077_v7  ;;  %v1321_v43 = vrot.slane %v1199_v23, 2  ;;  %v1322_v30 = vrot.slane %v1200_v21, 2  ;;  %v1431_v15 = vmul.f32 %v3224_v57, %v3521_v28 }
  0xea   : > { %v1080_v24 = vsel %vm450_vm1, %v1077_v7, %v1079_v50  ;;  %v1149_v35 = vadd.f32 %v1078_v41, %v904_v37  ;;  %v1324_v31 = vrot.slane %v1201_v20, 2  ;;  %v1432_v47 = vmul.f32 %v3224_v57, %v3527_v36 }
  0xeb   : > { %v1150_v48 = vadd.f32 %v1080_v24, %v905_v39  ;;  %v1323_v56 = vsel %vm696_vm2, %v1321_v43, %v1322_v30  ;;  %v1513_v54 = vmul.f32 %v3235_v44, %v3521_v28  ;;  %v1514_v62 = vmul.f32 %v3235_v44, %v3527_v36 }
  0xec   : > { %v1325_v22 = vsel %vm696_vm2, %v1322_v30, %v1324_v31  ;;  %v1394_v0 = vadd.f32 %v1323_v56, %v1149_v35  ;;  %v1515_v1 = vmul.f32 %v3235_v44, %v3536_v25  ;;  %v1758_v32 = vmul.f32 %v3251_v8, %v3521_v28 }
  0xed   : > { %v1395_v59 = vadd.f32 %v1325_v22, %v1150_v48  ;;  %v1635_v49 = vrot.slane %v1513_v54, 1  ;;  %v1636_v52 = vrot.slane %v1514_v62, 1  ;;  %v1759_v12 = vmul.f32 %v3251_v8, %v3527_v36 }
  0xee   : > { %v1463_v3 = vadd.f32 %v1431_v15, %v1394_v0  ;;  %v1638_v61 = vrot.slane %v1515_v1, 1  ;;  %v1760_v14 = vmul.f32 %v3251_v8, %v3536_v25  ;;  %v1880_v5 = vrot.slane %v1758_v32, 2 }
  0xef   : > { %v1464_v60 = vadd.f32 %v1432_v47, %v1395_v59  ;;  %v1637_v10 = vsel %vm450_vm1, %v1635_v49, %v1636_v52  ;;  %v1881_v38 = vrot.slane %v1759_v12, 2  ;;  %v297_v19 = vmul.f32 %v3145_v34, %v3306_v16 }
  0xf0   : > { %v1639_v27 = vsel %vm450_vm1, %v1636_v52, %v1638_v61  ;;  %v1708_v18 = vadd.f32 %v1637_v10, %v1463_v3  ;;  %v1883_v42 = vrot.slane %v1760_v14, 2  ;;  %v298_v51 = vmul.f32 %v3145_v34, %v3309_v17 }
  0xf1   : > { %v1709_v11 = vadd.f32 %v1639_v27, %v1464_v60  ;;  %v1882_v23 = vsel %vm696_vm2, %v1880_v5, %v1881_v38  ;;  %v372_v29 = vmul.f32 %v3157_v4, %v3306_v16  ;;  %v373_v33 = vmul.f32 %v3157_v4, %v3309_v17 }
  0xf2   : > { %v1884_v7 = vsel %vm696_vm2, %v1881_v38, %v1883_v42  ;;  %v1953_v21 = vadd.f32 %v1882_v23, %v1708_v18  ;;  %v374_v37 = vmul.f32 %v3157_v4, %v3319_v26  ;;  %v618_v39 = vmul.f32 %v3169_v55, %v3306_v16  ;;  %v3597_v23 = vld [vmem:[%s2581_s29 + $0xc0] sm:$0xff] }
  0xf3   : > { %v1954_v50 = vadd.f32 %v1884_v7, %v1709_v11  ;;  %v481_v20 = vrot.slane %v372_v29, 1  ;;  %v482_v41 = vrot.slane %v373_v33, 1  ;;  %v619_v43 = vmul.f32 %v3169_v55, %v3309_v17  ;;  %v3602_v33 = vld [vmem:[%s2581_s29 + $0xc8] sm:$0xff] }
  0xf4   : > { %v1992_v30 = vadd.f32 %v3284_v46, %v1953_v21  ;;  %v484_v15 = vrot.slane %v374_v37, 1  ;;  %v620_v24 = vmul.f32 %v3169_v55, %v3319_v26  ;;  %v727_v35 = vrot.slane %v618_v39, 2 }
  0xf5   : > { %v1993_v31 = vadd.f32 %v3284_v46, %v1954_v50  ;;  %v483_v47 = vsel %vm450_vm1, %v481_v20, %v482_v41  ;;  %v728_v48 = vrot.slane %v619_v43, 2  ;;  %v858_v16 = vmul.f32 %v3182_v45, %v3449_v6 }
  0xf6   : > { %v2024_v56 = vmax.f32 %v1992_v30, 0.0  ;;  %v485_v54 = vsel %vm450_vm1, %v482_v41, %v484_v15  ;;  %v575_v62 = vadd.f32 %v483_v47, %v297_v19  ;;  %v730_v17 = vrot.slane %v620_v24, 2  ;;  %v3613_v30 = vld [vmem:[%s2581_s29 + $0xd0] sm:$0x3] }
  0xf7   : > { %v2025_v22 = vmax.f32 %v1993_v31, 0.0  ;;  %v576_v0 = vadd.f32 %v485_v54, %v298_v51  ;;  %v729_v1 = vsel %vm696_vm2, %v727_v35, %v728_v48  ;;  %v859_v26 = vmul.f32 %v3182_v45, %v3453_v40 }
  0xf8   : > { %v731_v32 = vsel %vm696_vm2, %v728_v48, %v730_v17  ;;  %v821_v59 = vadd.f32 %v729_v1, %v575_v62  ;;  %v933_v49 = vmul.f32 %v3195_v53, %v3449_v6  ;;  %v934_v52 = vmul.f32 %v3195_v53, %v3453_v40 }
  0xf9   : > { %v2045_v12 = vpack.c.bf16 %v2025_v22, %v2024_v56  ;;  %v822_v3 = vadd.f32 %v731_v32, %v576_v0  ;;  %v935_v61 = vmul.f32 %v3195_v53, %v3466_v9  ;;  %v1178_v14 = vmul.f32 %v3206_v2, %v3449_v6 }
  0xfa   : > { %v890_v5 = vadd.f32 %v858_v16, %v821_v59  ;;  %v1041_v60 = vrot.slane %v933_v49, 1  ;;  %v1042_v10 = vrot.slane %v934_v52, 1  ;;  %v1179_v38 = vmul.f32 %v3206_v2, %v3453_v40 }
  0xfb   : > { %2470 = vmatmul.mubr.msk.bf16.gmra.mrb[8].mxu1 %vm2054_vm3, %v2045_v12  ;;  %v891_v19 = vadd.f32 %v859_v26, %v822_v3  ;;  %v1044_v27 = vrot.slane %v935_v61, 1  ;;  %v1180_v18 = vmul.f32 %v3206_v2, %v3466_v9  ;;  %v1286_v42 = vrot.slane %v1178_v14, 2 }
  0xfc   : > { %v1043_v51 = vsel %vm450_vm1, %v1041_v60, %v1042_v10  ;;  %v1287_v11 = vrot.slane %v1179_v38, 2  ;;  %v1417_v29 = vmul.f32 %v3597_v23, %v3224_v57  ;;  %v1418_v7 = vmul.f32 %v3602_v33, %v3224_v57 }
  0xfd   : > { %v1045_v21 = vsel %vm450_vm1, %v1042_v10, %v1044_v27  ;;  %v1135_v37 = vadd.f32 %v1043_v51, %v890_v5  ;;  %v1289_v39 = vrot.slane %v1180_v18, 2  ;;  %v1492_v50 = vmul.f32 %v3597_v23, %v3235_v44 }
  0xfe   : > { %v1136_v20 = vadd.f32 %v1045_v21, %v891_v19  ;;  %v1288_v41 = vsel %vm696_vm2, %v1286_v42, %v1287_v11  ;;  %v1493_v43 = vmul.f32 %v3602_v33, %v3235_v44  ;;  %v1494_v15 = vmul.f32 %v3613_v30, %v3235_v44 }
  0xff   : > { %v1290_v24 = vsel %vm696_vm2, %v1287_v11, %v1289_v39  ;;  %v1380_v35 = vadd.f32 %v1288_v41, %v1135_v37  ;;  %v1600_v31 = vrot.slane %v1492_v50, 1  ;;  %v1737_v47 = vmul.f32 %v3597_v23, %v3251_v8 }
 0x100   : > { %v1381_v48 = vadd.f32 %v1290_v24, %v1136_v20  ;;  %v1601_v16 = vrot.slane %v1493_v43, 1  ;;  %v1603_v56 = vrot.slane %v1494_v15, 1  ;;  %v1738_v54 = vmul.f32 %v3602_v33, %v3251_v8 }
 0x101   : > { %v1449_v62 = vadd.f32 %v1417_v29, %v1380_v35  ;;  %v1739_v17 = vmul.f32 %v3613_v30, %v3251_v8  ;;  %v1845_v22 = vrot.slane %v1737_v47, 2  ;;  %v313_v0 = vmul.f32 %v3145_v34, %v3375_v63 }
 0x102   : > { %v1450_v1 = vadd.f32 %v1418_v7, %v1381_v48  ;;  %v1602_v26 = vsel %vm450_vm1, %v1600_v31, %v1601_v16  ;;  %v1604_v32 = vsel %vm450_vm1, %v1601_v16, %v1603_v56  ;;  %v1846_v59 = vrot.slane %v1738_v54, 2 }
 0x103   : > { %v1694_v49 = vadd.f32 %v1602_v26, %v1449_v62  ;;  %v1848_v52 = vrot.slane %v1739_v17, 2  ;;  %v314_v12 = vmul.f32 %v3145_v34, %v3381_v58  ;;  %v396_v3 = vmul.f32 %v3157_v4, %v3375_v63 }
 0x104   : > { %v1695_v61 = vadd.f32 %v1604_v32, %v1450_v1  ;;  %v1847_v14 = vsel %vm696_vm2, %v1845_v22, %v1846_v59  ;;  %v397_v5 = vmul.f32 %v3157_v4, %v3381_v58  ;;  %v398_v60 = vmul.f32 %v3157_v4, %v3392_v13  ;;  %v3669_v1 = vld [vmem:[%s2581_s29 + $0x188] sm:$0xff] }
 0x105   : > { %v1849_v10 = vsel %vm696_vm2, %v1846_v59, %v1848_v52  ;;  %v1939_v38 = vadd.f32 %v1847_v14, %v1694_v49  ;;  %v521_v19 = vrot.slane %v396_v3, 1  ;;  %v642_v27 = vmul.f32 %v3169_v55, %v3375_v63 }
 0x106   : > { %v1940_v34 = vadd.f32 %v1849_v10, %v1695_v61  ;;  %v522_v18 = vrot.slane %v397_v5, 1  ;;  %v524_v42 = vrot.slane %v398_v60, 1  ;;  %v643_v51 = vmul.f32 %v3169_v55, %v3381_v58  ;;  %v3680_v61 = vld [vmem:[%s2581_s29 + $0x190] sm:$0x3] }
 0x107   : > { %v1978_v11 = vadd.f32 %v3284_v46, %v1939_v38  ;;  %v644_v29 = vmul.f32 %v3169_v55, %v3392_v13  ;;  %v767_v7 = vrot.slane %v642_v27, 2  ;;  %v874_v4 = vmul.f32 %v3182_v45, %v3521_v28 }
 0x108   : > { %v1979_v21 = vadd.f32 %v3284_v46, %v1940_v34  ;;  %v523_v37 = vsel %vm450_vm1, %v521_v19, %v522_v18  ;;  %v525_v63 = vsel %vm450_vm1, %v522_v18, %v524_v42  ;;  %v768_v39 = vrot.slane %v643_v51, 2 }
 0x109   : > { %v2010_v50 = vmax.f32 %v1978_v11, 0.0  ;;  %v591_v20 = vadd.f32 %v523_v37, %v313_v0  ;;  %v592_v58 = vadd.f32 %v525_v63, %v314_v12  ;;  %v770_v41 = vrot.slane %v644_v29, 2 }
 0x10a   : > { %v2011_v43 = vmax.f32 %v1979_v21, 0.0  ;;  %v769_v15 = vsel %vm696_vm2, %v767_v7, %v768_v39  ;;  %v875_v55 = vmul.f32 %v3182_v45, %v3527_v36  ;;  %v957_v13 = vmul.f32 %v3195_v53, %v3521_v28  ;;  %v3663_v45 = vld [vmem:[%s2581_s29 + $0x180] sm:$0xff] }
 0x10b   : > { %v771_v24 = vsel %vm696_vm2, %v768_v39, %v770_v41  ;;  %v837_v35 = vadd.f32 %v769_v15, %v591_v20  ;;  %v958_v31 = vmul.f32 %v3195_v53, %v3527_v36  ;;  %v959_v47 = vmul.f32 %v3195_v53, %v3536_v25  ;;  %v3711_v15 = vld [vmem:[%s3992_s1 + $0x1] ss:$0 sm:$0xff] }
 0x10c   : > { %v2038_v48 = vpack.c.bf16 %v2011_v43, %v2010_v50  ;;  %v838_v16 = vadd.f32 %v771_v24, %v592_v58  ;;  %v1081_v56 = vrot.slane %v957_v13, 1  ;;  %v1202_v54 = vmul.f32 %v3206_v2, %v3521_v28 }
 0x10d   : > { %v906_v62 = vadd.f32 %v874_v4, %v837_v35  ;;  %v1082_v17 = vrot.slane %v958_v31, 1  ;;  %v1084_v22 = vrot.slane %v959_v47, 1  ;;  %v1203_v0 = vmul.f32 %v3206_v2, %v3527_v36 }
 0x10e   : > { %2457 = vmatprep.mubr.msk.bf16.mxu0 %vm2054_vm3, %v2038_v48  ;;  %v907_v53 = vadd.f32 %v875_v55, %v838_v16  ;;  %v1204_v26 = vmul.f32 %v3206_v2, %v3536_v25  ;;  %v1326_v32 = vrot.slane %v1202_v54, 2  ;;  %v1433_v59 = vmul.f32 %v3224_v57, %v3663_v45  ;;  %v3723_v16 = vld [vmem:[%s3992_s1 + $0x2] ss:$0 sm:$0xff] }
 0x10f   : > { %v1083_v49 = vsel %vm450_vm1, %v1081_v56, %v1082_v17  ;;  %v1085_v52 = vsel %vm450_vm1, %v1082_v17, %v1084_v22  ;;  %v1327_v12 = vrot.slane %v1203_v0, 2  ;;  %v1434_v3 = vmul.f32 %v3224_v57, %v3669_v1 }
 0x110   : > { %v1151_v14 = vadd.f32 %v1083_v49, %v906_v62  ;;  %v1152_v5 = vadd.f32 %v1085_v52, %v907_v53  ;;  %v1329_v60 = vrot.slane %v1204_v26, 2  ;;  %v1516_v2 = vmul.f32 %v3235_v44, %v3663_v45 }
 0x111   : > { %v1328_v10 = vsel %vm696_vm2, %v1326_v32, %v1327_v12  ;;  %v1517_v38 = vmul.f32 %v3235_v44, %v3669_v1  ;;  %v1518_v19 = vmul.f32 %v3235_v44, %v3680_v61  ;;  %v1761_v27 = vmul.f32 %v3251_v8, %v3663_v45  ;;  %v3699_v44 = vld [vmem:[%s3992_s1] ss:$0 sm:$0xff] }
 0x112   : > { %v1330_v57 = vsel %vm696_vm2, %v1327_v12, %v1329_v60  ;;  %v1396_v34 = vadd.f32 %v1328_v10, %v1151_v14  ;;  %v1640_v18 = vrot.slane %v1516_v2, 1  ;;  %v1762_v42 = vmul.f32 %v3251_v8, %v3669_v1 }
 0x113   : > { %v1397_v51 = vadd.f32 %v1330_v57, %v1152_v5  ;;  %v1641_v11 = vrot.slane %v1517_v38, 1  ;;  %v1643_v29 = vrot.slane %v1518_v19, 1  ;;  %v1763_v7 = vmul.f32 %v3251_v8, %v3680_v61 }
 0x114   : > { %v1465_v4 = vadd.f32 %v1433_v59, %v1396_v34  ;;  %v1885_v21 = vrot.slane %v1761_v27, 2  ;;  %v1886_v37 = vrot.slane %v1762_v42, 2  ;;  %v299_v63 = vmul.f32 %v3699_v44, %v3449_v6  ;;  %v3735_v59 = vld [vmem:[%s3992_s1 + $0x3] ss:$0 sm:$0xff] }
 0x115   : > { %v1466_v39 = vadd.f32 %v1434_v3, %v1397_v51  ;;  %v1642_v50 = vsel %vm450_vm1, %v1640_v18, %v1641_v11  ;;  %v1644_v20 = vsel %vm450_vm1, %v1641_v11, %v1643_v29  ;;  %v1888_v58 = vrot.slane %v1763_v7, 2  ;;  %v3760_v51 = vld [vmem:[%s3992_s1 + $0x5] ss:$0 sm:$0xff] }
 0x116   : > { %v1710_v41 = vadd.f32 %v1642_v50, %v1465_v4  ;;  %v1887_v8 = vsel %vm696_vm2, %v1885_v21, %v1886_v37  ;;  %v300_v43 = vmul.f32 %v3699_v44, %v3453_v40  ;;  %v375_v55 = vmul.f32 %v3711_v15, %v3449_v6 }
 0x117   : > { %v1711_v13 = vadd.f32 %v1644_v20, %v1466_v39  ;;  %v1889_v24 = vsel %vm696_vm2, %v1886_v37, %v1888_v58  ;;  %v376_v35 = vmul.f32 %v3711_v15, %v3453_v40  ;;  %v377_v31 = vmul.f32 %v3711_v15, %v3466_v9  ;;  %v3772_v20 = vld [vmem:[%s3992_s1 + $0x6] ss:$0 sm:$0xff] }
 0x118   : > { %v1955_v47 = vadd.f32 %v1887_v8, %v1710_v41  ;;  %v486_v48 = vrot.slane %v375_v55, 1  ;;  %v621_v56 = vmul.f32 %v3723_v16, %v3449_v6  ;;  %v622_v54 = vmul.f32 %v3723_v16, %v3453_v40  ;;  %v2511_v8 = vld [vmem:[%s2581_s29 + $0xe0] sm:$0xff] }
 0x119   : > { %v1956_v62 = vadd.f32 %v1889_v24, %v1711_v13  ;;  %v487_v17 = vrot.slane %v376_v35, 1  ;;  %v489_v22 = vrot.slane %v377_v31, 1  ;;  %v623_v0 = vmul.f32 %v3723_v16, %v3466_v9 }
 0x11a   : > { %v1994_v53 = vadd.f32 %v3284_v46, %v1955_v47  ;;  %v732_v26 = vrot.slane %v621_v56, 2  ;;  %v733_v32 = vrot.slane %v622_v54, 2  ;;  %v860_v6 = vmul.f32 %v3735_v59, %v3597_v23 }
 0x11b   : > { %v1995_v40 = vadd.f32 %v3284_v46, %v1956_v62  ;;  %v488_v49 = vsel %vm450_vm1, %v486_v48, %v487_v17  ;;  %v490_v52 = vsel %vm450_vm1, %v487_v17, %v489_v22  ;;  %v735_v12 = vrot.slane %v623_v0, 2  ;;  %v3749_v46 = vld [vmem:[%s3992_s1 + $0x4] ss:$0 sm:$0xff]  ;;  %v2513_v48 = vld [vmem:[%s2581_s29 + $0xe8] sm:$0x3] }
 0x11c   : > { %v2026_v9 = vmax.f32 %v1994_v53, 0.0  ;;  %v577_v3 = vadd.f32 %v488_v49, %v299_v63  ;;  %v578_v14 = vadd.f32 %v490_v52, %v300_v43  ;;  %v734_v5 = vsel %vm696_vm2, %v732_v26, %v733_v32  ;;  %v3793_v62 = vld [vmem:[%s3992_s1 + $0x8] ss:$0 sm:$0xff] }
 0x11d   : > { %v2027_v60 = vmax.f32 %v1995_v40, 0.0  ;;  %v736_v2 = vsel %vm696_vm2, %v733_v32, %v735_v12  ;;  %v861_v10 = vmul.f32 %v3735_v59, %v3602_v33  ;;  %v936_v38 = vmul.f32 %v3749_v46, %v3597_v23 }
 0x11e   : > { %v823_v19 = vadd.f32 %v734_v5, %v577_v3  ;;  %v824_v27 = vadd.f32 %v736_v2, %v578_v14  ;;  %v937_v57 = vmul.f32 %v3749_v46, %v3602_v33  ;;  %v938_v34 = vmul.f32 %v3749_v46, %v3613_v30 }
 0x11f   : > { %v2046_v18 = vpack.c.bf16 %v2027_v60, %v2026_v9  ;;  %v1046_v42 = vrot.slane %v936_v38, 1  ;;  %v1181_v11 = vmul.f32 %v3760_v51, %v3597_v23  ;;  %v1182_v29 = vmul.f32 %v3760_v51, %v3602_v33  ;;  %v2510_v23 = vld [vmem:[%s2581_s29 + $0xd8] sm:$0xff] }
 0x120   : > { %v892_v7 = vadd.f32 %v860_v6, %v823_v19  ;;  %v893_v4 = vadd.f32 %v861_v10, %v824_v27  ;;  %v1047_v21 = vrot.slane %v937_v57, 1  ;;  %v1049_v37 = vrot.slane %v938_v34, 1 }
 0x121   : > { %2473 = vmatprep.mubr.msk.bf16.mxu1 %vm2054_vm3, %v2046_v18  ;;  %v1183_v63 = vmul.f32 %v3760_v51, %v3613_v30  ;;  %v1291_v39 = vrot.slane %v1181_v11, 2  ;;  %v1292_v50 = vrot.slane %v1182_v29, 2  ;;  %v1419_v33 = vmul.f32 %v2510_v23, %v3772_v20  ;;  %v3783_v30 = vld [vmem:[%s3992_s1 + $0x7] ss:$0 sm:$0xff] }
 0x122   : > { %v1048_v58 = vsel %vm450_vm1, %v1046_v42, %v1047_v21  ;;  %v1050_v41 = vsel %vm450_vm1, %v1047_v21, %v1049_v37  ;;  %v1420_v43 = vmul.f32 %v2511_v8, %v3772_v20  ;;  %v1495_v55 = vmul.f32 %v3783_v30, %v2510_v23 }
 0x123   : > { %v1137_v13 = vadd.f32 %v1048_v58, %v892_v7  ;;  %v1138_v24 = vadd.f32 %v1050_v41, %v893_v4  ;;  %v1293_v35 = vsel %vm696_vm2, %v1291_v39, %v1292_v50  ;;  %v1294_v31 = vrot.slane %v1183_v63, 2  ;;  %v3830_v58 = vld [vmem:[%s3993_s2] ss:$0 sm:$0xff] }
 0x124   : > { %v1496_v47 = vmul.f32 %v3783_v30, %v2511_v8  ;;  %v1497_v56 = vmul.f32 %v2513_v48, %v3783_v30  ;;  %v1605_v54 = vrot.slane %v1495_v55, 1  ;;  %v1740_v17 = vmul.f32 %v3793_v62, %v2510_v23 }
 0x125   : > { %v1295_v22 = vsel %vm696_vm2, %v1292_v50, %v1294_v31  ;;  %v1382_v0 = vadd.f32 %v1293_v35, %v1137_v13  ;;  %v1741_v53 = vmul.f32 %v3793_v62, %v2511_v8  ;;  %v1742_v26 = vmul.f32 %v3793_v62, %v2513_v48 }
 0x126   : > { %v1383_v32 = vadd.f32 %v1295_v22, %v1138_v24  ;;  %v1606_v6 = vrot.slane %v1496_v47, 1  ;;  %v1608_v40 = vrot.slane %v1497_v56, 1  ;;  %v1850_v49 = vrot.slane %v1740_v17, 2  ;;  %v3799_v52 = vpop.f32.mrb[0].mxu0 }
 0x127   : > { %v1451_v12 = vadd.f32 %v1419_v33, %v1382_v0  ;;  %v1851_v9 = vrot.slane %v1741_v53, 2  ;;  %v1853_v3 = vrot.slane %v1742_v26, 2  ;;  %v315_v14 = vmul.f32 %v3699_v44, %v3521_v28  ;;  %v3803_v5 = vpop.f32.mrb[1].mxu0  ;;  %v278_v26 = vld [vmem:[%s2581_s29 + $0x1a0] sm:$0xff] }
 0x128   : > { %v1452_v60 = vadd.f32 %v1420_v43, %v1383_v32  ;;  %v1607_v2 = vsel %vm450_vm1, %v1605_v54, %v1606_v6  ;;  %v1609_v10 = vsel %vm450_vm1, %v1606_v6, %v1608_v40  ;;  %v316_v38 = vmul.f32 %v3699_v44, %v3527_v36  ;;  %v3809_v19 = vpop.f32.mrb[2].mxu0  ;;  %v277_v54 = vld [vmem:[%s2581_s29 + $0x198] sm:$0xff] }
 0x129   : > { %v1696_v27 = vadd.f32 %v1607_v2, %v1451_v12  ;;  %v1852_v57 = vsel %vm696_vm2, %v1850_v49, %v1851_v9  ;;  %v1854_v34 = vsel %vm696_vm2, %v1851_v9, %v1853_v3  ;;  %v399_v18 = vmul.f32 %v3711_v15, %v3521_v28  ;;  %v3815_v42 = vpop.f32.mrb[3].mxu0 }
 0x12a   : > { %v1697_v11 = vadd.f32 %v1609_v10, %v1452_v60  ;;  %v400_v29 = vmul.f32 %v3711_v15, %v3527_v36  ;;  %v401_v7 = vmul.f32 %v3711_v15, %v3536_v25  ;;  %v645_v44 = vmul.f32 %v3723_v16, %v3521_v28 }
 0x12b   : > { %v1941_v4 = vadd.f32 %v1852_v57, %v1696_v27  ;;  %v526_v21 = vrot.slane %v399_v18, 1  ;;  %v646_v37 = vmul.f32 %v3723_v16, %v3527_v36  ;;  %v647_v63 = vmul.f32 %v3723_v16, %v3536_v25 }
 0x12c   : > { %v1942_v39 = vadd.f32 %v1854_v34, %v1697_v11  ;;  %v527_v50 = vrot.slane %v400_v29, 1  ;;  %v529_v23 = vrot.slane %v401_v7, 1  ;;  %v772_v33 = vrot.slane %v645_v44, 2  ;;  %v3871_v44 = vld [vmem:[%s3995_s4] ss:$0 sm:$0xff] }
 0x12d   : > { %v1980_v15 = vadd.f32 %v3830_v58, %v1941_v4  ;;  %v773_v28 = vrot.slane %v646_v37, 2  ;;  %v775_v41 = vrot.slane %v647_v63, 2  ;;  %v876_v36 = vmul.f32 %v3735_v59, %v3663_v45 }
 0x12e   : > { %v1981_v8 = vadd.f32 %v3830_v58, %v1942_v39  ;;  %v528_v25 = vsel %vm450_vm1, %v526_v21, %v527_v50  ;;  %v530_v16 = vsel %vm450_vm1, %v527_v50, %v529_v23  ;;  %v877_v43 = vmul.f32 %v3735_v59, %v3669_v1 }
 0x12f   : > { %v2012_v55 = vmax.f32 %v1980_v15, 0.0  ;;  %v593_v13 = vadd.f32 %v528_v25, %v315_v14  ;;  %v594_v24 = vadd.f32 %v530_v16, %v316_v38  ;;  %v774_v35 = vsel %vm696_vm2, %v772_v33, %v773_v28  ;;  %v279_v14 = vld [vmem:[%s2581_s29 + $0x1a8] sm:$0x3] }
 0x130   : > { %v2013_v31 = vmax.f32 %v1981_v8, 0.0  ;;  %v776_v47 = vsel %vm696_vm2, %v773_v28, %v775_v41  ;;  %v960_v48 = vmul.f32 %v3749_v46, %v3663_v45  ;;  %v961_v56 = vmul.f32 %v3749_v46, %v3669_v1 }
 0x131   : > { %v839_v17 = vadd.f32 %v774_v35, %v593_v13  ;;  %v840_v22 = vadd.f32 %v776_v47, %v594_v24  ;;  %v962_v59 = vmul.f32 %v3749_v46, %v3680_v61  ;;  %v1205_v0 = vmul.f32 %v3760_v51, %v3663_v45 }
 0x132   : > { %v2039_v53 = vpack.c.bf16 %v2013_v31, %v2012_v55  ;;  %v1086_v32 = vrot.slane %v960_v48, 1  ;;  %v1087_v6 = vrot.slane %v961_v56, 1  ;;  %v1206_v40 = vmul.f32 %v3760_v51, %v3669_v1 }
 0x133   : > { %v908_v49 = vadd.f32 %v876_v36, %v839_v17  ;;  %v909_v12 = vadd.f32 %v877_v43, %v840_v22  ;;  %v1089_v9 = vrot.slane %v962_v59, 1  ;;  %v1207_v3 = vmul.f32 %v3760_v51, %v3680_v61 }
 0x134   : > { %2458 = vmatmul.mubr.msk.bf16.gmra.mrb[12].mxu0 %vm2054_vm3, %v2039_v53  ;;  %v1088_v46 = vsel %vm450_vm1, %v1086_v32, %v1087_v6  ;;  %v1331_v60 = vrot.slane %v1205_v0, 2  ;;  %v1332_v45 = vrot.slane %v1206_v40, 2  ;;  %v1435_v2 = vmul.f32 %v3772_v20, %v277_v54 }
 0x135   : > { %v1090_v10 = vsel %vm450_vm1, %v1087_v6, %v1089_v9  ;;  %v1153_v38 = vadd.f32 %v1088_v46, %v908_v49  ;;  %v1334_v1 = vrot.slane %v1207_v3, 2  ;;  %v1436_v27 = vmul.f32 %v3772_v20, %v278_v26 }
 0x136   : > { %v1154_v57 = vadd.f32 %v1090_v10, %v909_v12  ;;  %v1333_v34 = vsel %vm696_vm2, %v1331_v60, %v1332_v45  ;;  %v1519_v61 = vmul.f32 %v3783_v30, %v277_v54  ;;  %v1520_v51 = vmul.f32 %v3783_v30, %v278_v26 }
 0x137   : > { %v1335_v18 = vsel %vm696_vm2, %v1332_v45, %v1334_v1  ;;  %v1398_v11 = vadd.f32 %v1333_v34, %v1153_v38  ;;  %v1521_v29 = vmul.f32 %v3783_v30, %v279_v14  ;;  %v1764_v7 = vmul.f32 %v3793_v62, %v277_v54 }
 0x138   : > { %v1399_v20 = vadd.f32 %v1335_v18, %v1154_v57  ;;  %v1645_v4 = vrot.slane %v1519_v61, 1  ;;  %v1646_v21 = vrot.slane %v1520_v51, 1  ;;  %v1765_v37 = vmul.f32 %v3793_v62, %v278_v26 }
 0x139   : > { %v1467_v63 = vadd.f32 %v1435_v2, %v1398_v11  ;;  %v1648_v39 = vrot.slane %v1521_v29, 1  ;;  %v1766_v50 = vmul.f32 %v3793_v62, %v279_v14  ;;  %v1890_v23 = vrot.slane %v1764_v7, 2  ;;  %v2463_v33 = vpop.f32.mrb[0].mxu1 }
 0x13a   : > { %v1468_v30 = vadd.f32 %v1436_v27, %v1399_v20  ;;  %v1647_v15 = vsel %vm450_vm1, %v1645_v4, %v1646_v21  ;;  %v1891_v28 = vrot.slane %v1765_v37, 2  ;;  %v2150_v41 = vadd.f32 %v3799_v52, %v3871_v44  ;;  %v2205_v36 = vpop.f32.mrb[1].mxu1 }
 0x13b   : > { %v1649_v8 = vsel %vm450_vm1, %v1646_v21, %v1648_v39  ;;  %v1712_v25 = vadd.f32 %v1647_v15, %v1467_v63  ;;  %v1893_v16 = vrot.slane %v1766_v50, 2  ;;  %v2464_v62 = vpop.f32.mrb[2].mxu1  ;;  %v2214_v24 = vadd.f32 %v2463_v33, %v3871_v44 }
 0x13c   : > { %v1713_v43 = vadd.f32 %v1649_v8, %v1468_v30  ;;  %v1892_v55 = vsel %vm696_vm2, %v1890_v23, %v1891_v28  ;;  %v2270_v13 = vmax.f32 %v2150_v41, 0.0  ;;  %v2208_v52 = vpop.f32.mrb[3].mxu1  ;;  %v2142_v47 = vadd.f32 %v3871_v44, %v3803_v5 }
 0x13d   : > { %v1894_v35 = vsel %vm696_vm2, %v1891_v28, %v1893_v16  ;;  %v1957_v31 = vadd.f32 %v1892_v55, %v1712_v25  ;;  %v2206_v48 = vadd.f32 %v3871_v44, %v2205_v36  ;;  %v2286_v54 = vmax.f32 %v2214_v24, 0.0 }
 0x13e   : > { %v1958_v56 = vadd.f32 %v1894_v35, %v1713_v43  ;;  %2303 = vst.msk [vmem:[%s3883_s22 + $0x10] sm:$0xff] %vm2300_vm4, %v2270_v13  ;;  %v2153_v17 = vadd.f32 %v3809_v19, %v3871_v44  ;;  %v2217_v22 = vadd.f32 %v2464_v62, %v3871_v44  ;;  %v2268_v0 = vmax.f32 %v2142_v47, 0.0 }
 0x13f   : > { %v1996_v59 = vadd.f32 %v3830_v58, %v1957_v31  ;;  %v2284_v5 = vmax.f32 %v2206_v48, 0.0  ;;  %v2145_v53 = vadd.f32 %v3871_v44, %v3815_v42  ;;  %2319 = vst.msk [vmem:[%s3883_s22 + $0x90] sm:$0xff] %vm2300_vm4, %v2286_v54  ;;  %v2209_v19 = vadd.f32 %v3871_v44, %v2208_v52 }
 0x140   : > { %v1997_v26 = vadd.f32 %v3830_v58, %v1958_v56  ;;  %v2271_v32 = vmax.f32 %v2153_v17, 0.0  ;;  %v2287_v6 = vmax.f32 %v2217_v22, 0.0  ;;  %2301 = vst.msk [vmem:[%s3883_s22] sm:$0xff] %vm2300_vm4, %v2268_v0 }
 0x141   : > { %v2028_v40 = vmax.f32 %v1996_v59, 0.0  ;;  %2317 = vst.msk [vmem:[%s3883_s22 + $0x80] sm:$0xff] %vm2300_vm4, %v2284_v5  ;;  %v2269_v49 = vmax.f32 %v2145_v53, 0.0  ;;  %v2285_v42 = vmax.f32 %v2209_v19, 0.0 }
 0x142   : > { %v2029_v12 = vmax.f32 %v1997_v26, 0.0  ;;  %2304 = vst.msk [vmem:[%s3883_s22 + $0x18] sm:$0xff] %vm2300_vm4, %v2271_v32  ;;  %2320 = vst.msk [vmem:[%s3883_s22 + $0x98] sm:$0xff] %vm2300_vm4, %v2287_v6 }
 0x143   : > { %2302 = vst.msk [vmem:[%s3883_s22 + $0x8] sm:$0xff] %vm2300_vm4, %v2269_v49  ;;  %2318 = vst.msk [vmem:[%s3883_s22 + $0x88] sm:$0xff] %vm2300_vm4, %v2285_v42 }
 0x144   : > { %v2047_v58 = vpack.c.bf16 %v2029_v12, %v2028_v40 }
 0x146   : > { %2474 = vmatmul.mubr.msk.bf16.gmra.mrb[12].mxu1 %vm2054_vm3, %v2047_v58 }
 0x171   : > { %v2451_v9 = vpop.f32.mrb[4].mxu0 }
 0x172   : > { %v2166_v3 = vadd.f32 %v2451_v9, %v3871_v44  ;;  %v2157_v14 = vpop.f32.mrb[5].mxu0 }
 0x173   : > { %v2158_v46 = vadd.f32 %v3871_v44, %v2157_v14  ;;  %v2452_v60 = vpop.f32.mrb[6].mxu0 }
 0x174   : > { %v2274_v45 = vmax.f32 %v2166_v3, 0.0  ;;  %v2169_v2 = vadd.f32 %v2452_v60, %v3871_v44  ;;  %v2160_v10 = vpop.f32.mrb[7].mxu0 }
 0x175   : > { %v2272_v38 = vmax.f32 %v2158_v46, 0.0  ;;  %v2161_v1 = vadd.f32 %v3871_v44, %v2160_v10 }
 0x176   : > { %2307 = vst.msk [vmem:[%s3883_s22 + $0x30] sm:$0xff] %vm2300_vm4, %v2274_v45  ;;  %v2275_v27 = vmax.f32 %v2169_v2, 0.0 }
 0x177   : > { %2305 = vst.msk [vmem:[%s3883_s22 + $0x20] sm:$0xff] %vm2300_vm4, %v2272_v38  ;;  %v2273_v57 = vmax.f32 %v2161_v1, 0.0 }
 0x178   : > { %2308 = vst.msk [vmem:[%s3883_s22 + $0x38] sm:$0xff] %vm2300_vm4, %v2275_v27 }
 0x179   : > { %2306 = vst.msk [vmem:[%s3883_s22 + $0x28] sm:$0xff] %vm2300_vm4, %v2273_v57 }
 0x183   : > { %v2467_v34 = vpop.f32.mrb[4].mxu1 }
 0x184   : > { %v2230_v61 = vadd.f32 %v2467_v34, %v3871_v44  ;;  %v2221_v51 = vpop.f32.mrb[5].mxu1 }
 0x185   : > { %v2222_v18 = vadd.f32 %v3871_v44, %v2221_v51  ;;  %v2468_v11 = vpop.f32.mrb[6].mxu1 }
 0x186   : > { %v2290_v29 = vmax.f32 %v2230_v61, 0.0  ;;  %v2233_v7 = vadd.f32 %v2468_v11, %v3871_v44  ;;  %v2224_v20 = vpop.f32.mrb[7].mxu1 }
 0x187   : > { %v2288_v4 = vmax.f32 %v2222_v18, 0.0  ;;  %v2225_v21 = vadd.f32 %v3871_v44, %v2224_v20 }
 0x188   : > { %2323 = vst.msk [vmem:[%s3883_s22 + $0xb0] sm:$0xff] %vm2300_vm4, %v2290_v29  ;;  %v2291_v37 = vmax.f32 %v2233_v7, 0.0 }
 0x189   : > { %2321 = vst.msk [vmem:[%s3883_s22 + $0xa0] sm:$0xff] %vm2300_vm4, %v2288_v4  ;;  %v2289_v63 = vmax.f32 %v2225_v21, 0.0 }
 0x18a   : > { %2324 = vst.msk [vmem:[%s3883_s22 + $0xb8] sm:$0xff] %vm2300_vm4, %v2291_v37 }
 0x18b   : > { %2322 = vst.msk [vmem:[%s3883_s22 + $0xa8] sm:$0xff] %vm2300_vm4, %v2289_v63 }
 0x1bc   : > { %v2455_v39 = vpop.f32.mrb[8].mxu0 }
 0x1bd   : > { %v2182_v50 = vadd.f32 %v2455_v39, %v3871_v44  ;;  %v2173_v23 = vpop.f32.mrb[9].mxu0 }
 0x1be   : > { %v2174_v33 = vadd.f32 %v3871_v44, %v2173_v23  ;;  %v2456_v30 = vpop.f32.mrb[10].mxu0 }
 0x1bf   : > { %v2278_v15 = vmax.f32 %v2182_v50, 0.0  ;;  %v2185_v28 = vadd.f32 %v2456_v30, %v3871_v44  ;;  %v2176_v41 = vpop.f32.mrb[11].mxu0 }
 0x1c0   : > { %v2276_v36 = vmax.f32 %v2174_v33, 0.0  ;;  %v2177_v8 = vadd.f32 %v3871_v44, %v2176_v41 }
 0x1c1   : > { %2311 = vst.msk [vmem:[%s3883_s22 + $0x50] sm:$0xff] %vm2300_vm4, %v2278_v15  ;;  %v2279_v25 = vmax.f32 %v2185_v28, 0.0 }
 0x1c2   : > { %2309 = vst.msk [vmem:[%s3883_s22 + $0x40] sm:$0xff] %vm2300_vm4, %v2276_v36  ;;  %v2277_v16 = vmax.f32 %v2177_v8, 0.0 }
 0x1c3   : > { %2312 = vst.msk [vmem:[%s3883_s22 + $0x58] sm:$0xff] %vm2300_vm4, %v2279_v25 }
 0x1c4   : > { %2310 = vst.msk [vmem:[%s3883_s22 + $0x48] sm:$0xff] %vm2300_vm4, %v2277_v16 }
 0x1ce   : > { %v2471_v62 = vpop.f32.mrb[8].mxu1 }
 0x1cf   : > { %v2246_v43 = vadd.f32 %v2471_v62, %v3871_v44  ;;  %v2237_v55 = vpop.f32.mrb[9].mxu1 }
 0x1d0   : > { %v2238_v13 = vadd.f32 %v3871_v44, %v2237_v55  ;;  %v2472_v24 = vpop.f32.mrb[10].mxu1 }
 0x1d1   : > { %v2294_v52 = vmax.f32 %v2246_v43, 0.0  ;;  %v2249_v35 = vadd.f32 %v2472_v24, %v3871_v44  ;;  %v2240_v31 = vpop.f32.mrb[11].mxu1 }
 0x1d2   : > { %v2292_v47 = vmax.f32 %v2238_v13, 0.0  ;;  %v2241_v48 = vadd.f32 %v3871_v44, %v2240_v31 }
 0x1d3   : > { %2327 = vst.msk [vmem:[%s3883_s22 + $0xd0] sm:$0xff] %vm2300_vm4, %v2294_v52  ;;  %v2295_v56 = vmax.f32 %v2249_v35, 0.0 }
 0x1d4   : > { %2325 = vst.msk [vmem:[%s3883_s22 + $0xc0] sm:$0xff] %vm2300_vm4, %v2292_v47  ;;  %v2293_v54 = vmax.f32 %v2241_v48, 0.0 }
 0x1d5   : > { %2328 = vst.msk [vmem:[%s3883_s22 + $0xd8] sm:$0xff] %vm2300_vm4, %v2295_v56 }
 0x1d6   : > { %2326 = vst.msk [vmem:[%s3883_s22 + $0xc8] sm:$0xff] %vm2300_vm4, %v2293_v54 }
 0x207   : > { %v2459_v17 = vpop.f32.mrb[12].mxu0 }
 0x208   : > { %v2198_v22 = vadd.f32 %v2459_v17, %v3871_v44  ;;  %v2189_v59 = vpop.f32.mrb[13].mxu0 }
 0x209   : > { %v2190_v0 = vadd.f32 %v3871_v44, %v2189_v59  ;;  %v2460_v5 = vpop.f32.mrb[14].mxu0 }
 0x20a   : > { %v2282_v53 = vmax.f32 %v2198_v22, 0.0  ;;  %v2201_v26 = vadd.f32 %v2460_v5, %v3871_v44  ;;  %v2192_v32 = vpop.f32.mrb[15].mxu0 }
 0x20b   : > { %v2280_v6 = vmax.f32 %v2190_v0, 0.0  ;;  %v2193_v19 = vadd.f32 %v3871_v44, %v2192_v32 }
 0x20c   : > { %2315 = vst.msk [vmem:[%s3883_s22 + $0x70] sm:$0xff] %vm2300_vm4, %v2282_v53  ;;  %v2283_v40 = vmax.f32 %v2201_v26, 0.0 }
 0x20d   : > { %2313 = vst.msk [vmem:[%s3883_s22 + $0x60] sm:$0xff] %vm2300_vm4, %v2280_v6  ;;  %v2281_v49 = vmax.f32 %v2193_v19, 0.0 }
 0x20e   : > { %2316 = vst.msk [vmem:[%s3883_s22 + $0x78] sm:$0xff] %vm2300_vm4, %v2283_v40 }
 0x20f   : > { %2314 = vst.msk [vmem:[%s3883_s22 + $0x68] sm:$0xff] %vm2300_vm4, %v2281_v49 }
 0x219   : > { %v2475_v12 = vpop.f32.mrb[12].mxu1 }
 0x21a   : > { %v2262_v42 = vadd.f32 %v2475_v12, %v3871_v44  ;;  %v2253_v58 = vpop.f32.mrb[13].mxu1 }
 0x21b   : > { %v2254_v9 = vadd.f32 %v3871_v44, %v2253_v58  ;;  %v2476_v3 = vpop.f32.mrb[14].mxu1 }
 0x21c   : > { %v2298_v14 = vmax.f32 %v2262_v42, 0.0  ;;  %v2265_v46 = vadd.f32 %v2476_v3, %v3871_v44  ;;  %v2256_v60 = vpop.f32.mrb[15].mxu1 }
 0x21d   : > { %v2296_v45 = vmax.f32 %v2254_v9, 0.0  ;;  %v2257_v2 = vadd.f32 %v3871_v44, %v2256_v60 }
 0x21e   : > { %2331 = vst.msk [vmem:[%s3883_s22 + $0xf0] sm:$0xff] %vm2300_vm4, %v2298_v14  ;;  %v2299_v10 = vmax.f32 %v2265_v46, 0.0 }
 0x21f   : > { %2329 = vst.msk [vmem:[%s3883_s22 + $0xe0] sm:$0xff] %vm2300_vm4, %v2296_v45  ;;  %v2297_v38 = vmax.f32 %v2257_v2, 0.0 }
 0x220   : > { %2332 = vst.msk [vmem:[%s3883_s22 + $0xf8] sm:$0xff] %vm2300_vm4, %v2299_v10 }
 0x221   : > { %2330 = vst.msk [vmem:[%s3883_s22 + $0xe8] sm:$0xff] %vm2300_vm4, %v2297_v38 }
 0x222 PF: > { %s15_s18 = sadd.s32 1, %s2522_s18  }
 0x223   : > { %p12_p4 = scmp.ge.s32.totalorder %s15_s18, 4  }
 0x225   :  { %14 = sbr.rel (!%p12_p4) target bundleno = 1 (0x1), region = 70 }

// kernel: mobilenet_v1_forward.18
= control target key start
LH: loop header
LB: loop body
LE: loop exit
PB: predicated region body
PF: predicated region fallthrough
CT: control target
= control target key end

     0   :  { %s1071_s18 = smov 0   ;;  %s1495_s0 = inlined_call_operand.vmem [shape: f32[1,2,10,10,32], index: 0, kind: input, shape index: {}]   ;;  %s1496_s1 = inlined_call_operand.vmem [shape: f32[9,32], index: 1, kind: input, shape index: {}]   ;;  %s1497_s2 = inlined_call_operand.vmem [shape: f32[1,32], index: 2, kind: input, shape index: {}]   ;;  %s1498_s3 = inlined_call_operand.vmem [shape: bf16[32,32], index: 3, kind: input, shape index: {}]   ;;  %s1499_s4 = inlined_call_operand.vmem [shape: f32[1,32], index: 4, kind: input, shape index: {}]   ;;  %s1500_s5 = inlined_call_operand.vmem [shape: f32[2,8,8,32], index: 5, kind: output, shape index: {}]  }
   0x1 LB: > { %s972_s19 = sadd.s32 4294967295, %s1039_s18   ;;  %p976_p0 = scmp.ge.s32.totalorder %s1039_s18, 1  ;;  %s1039_s18 = sphi %s1071_s18, %s15_s18  }
   0x2   : > { %p187_p1 = scmp.lt.s32.totalorder %s1039_s18, 3 }
   0x4   : > { %p188_p2 = pnand %p976_p0, %p187_p1 }
   0x5   : > { %v1031_v0 = vld [vmem:[%s1498_s3] sm:$0xff] (!%p188_p2)   ;;  %p215_p3 = scmp.lt.s32.totalorder (!%p188_p2), %s972_s19, 1  ;;  %v1032_v1 = vld [vmem:[%s1498_s3 + $0x8] sm:$0xff] (!%p188_p2)   ;;  %vm304_vm0 = vcmask (!%p188_p2), 1046528   ;;  %vm382_vm1 = vcmask (!%p188_p2), 1045504   ;;  %vm823_vm2 = vcmask (!%p188_p2), 261120  }
   0x6   : > { %191 = sbr.rel (%p188_p2) target bundleno = 333 (0x14d), region = 40  ;;  %1006 = vmatprep.subr.bf16.mxu0 (!%p188_p2), %v1031_v0  ;;  %1018 = vmatprep.subr.bf16.mxu1 (!%p188_p2), %v1031_v0  ;;  %v1091_v2 = vld [vmem:[%s1496_s1] ss:$0 sm:$0xff] (!%p188_p2)  ;;  %v1096_v3 = vld [vmem:[%s1496_s1 + $0x1] ss:$0 sm:$0xff] (!%p188_p2) }
   0x7   : > { %1007 = vmatpush3.bf16.msra.mxu0 (!%p188_p2), %v1031_v0  ;;  %1020 = vmatpush3.bf16.msra.mxu1 (!%p188_p2), %v1031_v0  ;;  %v1106_v4 = vld [vmem:[%s1496_s1 + $0x2] ss:$0 sm:$0xff] (!%p188_p2)  ;;  %v1139_v27 = vld [vmem:[%s1496_s1 + $0x3] ss:$0 sm:$0xff] (!%p188_p2)  ;;  %v1147_v32 = vld [vmem:[%s1496_s1 + $0x4] ss:$0 sm:$0xff] (!%p188_p2) }
   0x8   : > { %1008 = vmatprep.subr.bf16.mxu0 (!%p188_p2), %v1032_v1  ;;  %1019 = vmatprep.subr.bf16.mxu1 (!%p188_p2), %v1032_v1  ;;  %v1156_v38 = vld [vmem:[%s1496_s1 + $0x5] ss:$0 sm:$0xff] (!%p188_p2)  ;;  %v1176_v59 = vld [vmem:[%s1496_s1 + $0x6] ss:$0 sm:$0xff] (!%p188_p2)  ;;  %v1184_v0 = vld [vmem:[%s1496_s1 + $0x7] ss:$0 sm:$0xff] (!%p188_p2) }
   0xb   : > { %1009 = vmatpush3.bf16.msra.mxu0 (!%p188_p2), %v1032_v1  ;;  %1021 = vmatpush3.bf16.msra.mxu1 (!%p188_p2), %v1032_v1 }
   0xd   : > { %s1502_s19 = smov (!%p215_p3, %s972_s19), 1 }
   0xe   : > { %s1022_s24 = smul.u32 160, %s1502_s19  ;;  %s999_s27 = sshll.u32 %s1502_s19, 6 }
   0xf   : > { %s224_s30 = scalar_lea.vmem %s1500_s5, %s999_s27 }
  0x10   : > { %s1101_s6 = scalar_lea.vmem %s1495_s0, %s1022_s24 }
  0x11   : > { %v226_v5 = vld [vmem:[%s1101_s6] sm:$0xff]  ;;  %v227_v6 = vld [vmem:[%s1101_s6 + $0x8] sm:$0x3]  ;;  %v228_v7 = vld [vmem:[%s1101_s6 + $0x10] sm:$0xff] }
  0x12   : > { %v229_v8 = vld [vmem:[%s1101_s6 + $0x18] sm:$0x3]  ;;  %v1113_v9 = vld [vmem:[%s1101_s6 + $0x28] sm:$0x3]  ;;  %v251_v10 = vmul.f32 %v1091_v2, %v226_v5  ;;  %v252_v11 = vmul.f32 %v1091_v2, %v228_v7  ;;  %v272_v12 = vmul.f32 %v1096_v3, %v226_v5  ;;  %v273_v13 = vmul.f32 %v1096_v3, %v227_v6  ;;  %v1150_v33 = vld [vmem:[%s1101_s6 + $0x20] sm:$0xff] }
  0x13   : > { %v1120_v14 = vld [vmem:[%s1101_s6 + $0x38] sm:$0x3]  ;;  %v274_v15 = vmul.f32 %v1096_v3, %v228_v7  ;;  %v275_v16 = vmul.f32 %v1096_v3, %v229_v8  ;;  %v1126_v17 = vmul.f32 %v1096_v3, %v1113_v9  ;;  %v350_v18 = vmul.f32 %v1106_v4, %v226_v5  ;;  %v1187_v1 = vld [vmem:[%s1101_s6 + $0x30] sm:$0xff] }
  0x14   : > { %v1131_v19 = vmul.f32 %v1096_v3, %v1120_v14  ;;  %v305_v20 = vrot.slane %v272_v12, 1  ;;  %v306_v21 = vrot.slane %v273_v13, 1  ;;  %v351_v22 = vmul.f32 %v1106_v4, %v227_v6 }
  0x15   : > { %v308_v23 = vrot.slane %v274_v15, 1  ;;  %v309_v24 = vrot.slane %v275_v16, 1  ;;  %v312_v25 = vrot.slane %v1126_v17, 1  ;;  %v352_v26 = vmul.f32 %v1106_v4, %v228_v7 }
  0x16   : > { %v307_v28 = vsel %vm304_vm0, %v305_v20, %v306_v21  ;;  %v315_v29 = vrot.slane %v1131_v19, 1  ;;  %v353_v30 = vmul.f32 %v1106_v4, %v229_v8  ;;  %v383_v31 = vrot.slane %v350_v18, 2 }
  0x17   : > { %v310_v34 = vsel %vm304_vm0, %v308_v23, %v309_v24  ;;  %v337_v35 = vadd.f32 %v307_v28, %v251_v10  ;;  %v384_v36 = vrot.slane %v351_v22, 2  ;;  %v386_v37 = vrot.slane %v352_v26, 2  ;;  %v1193_v10 = vld [vmem:[%s1496_s1 + $0x8] ss:$0 sm:$0xff] }
  0x18   : > { %v338_v39 = vadd.f32 %v310_v34, %v252_v11  ;;  %v387_v40 = vrot.slane %v353_v30, 2  ;;  %v428_v41 = vmul.f32 %v1139_v27, %v228_v7  ;;  %v429_v42 = vmul.f32 %v1139_v27, %v1150_v33 }
  0x19   : > { %v385_v43 = vsel %vm382_vm1, %v383_v31, %v384_v36  ;;  %v449_v44 = vmul.f32 %v1147_v32, %v228_v7  ;;  %v450_v45 = vmul.f32 %v1147_v32, %v229_v8  ;;  %v451_v46 = vmul.f32 %v1147_v32, %v1150_v33 }
  0x1a   : > { %v388_v47 = vsel %vm382_vm1, %v386_v37, %v387_v40  ;;  %v415_v48 = vadd.f32 %v385_v43, %v337_v35  ;;  %v452_v49 = vmul.f32 %v1147_v32, %v1113_v9  ;;  %v526_v50 = vmul.f32 %v1156_v38, %v228_v7 }
  0x1b   : > { %v416_v51 = vadd.f32 %v388_v47, %v338_v39  ;;  %v481_v52 = vrot.slane %v449_v44, 1  ;;  %v482_v53 = vrot.slane %v450_v45, 1  ;;  %v484_v54 = vrot.slane %v451_v46, 1  ;;  %v1219_v44 = vld [vmem:[%s1101_s6 + $0x40] sm:$0xff]  ;;  %v1222_v45 = vld [vmem:[%s1101_s6 + $0x48] sm:$0x3] }
  0x1c   : > { %v436_v55 = vadd.f32 %v428_v41, %v415_v48  ;;  %v485_v56 = vrot.slane %v452_v49, 1  ;;  %v527_v57 = vmul.f32 %v1156_v38, %v229_v8  ;;  %v528_v58 = vmul.f32 %v1156_v38, %v1150_v33  ;;  %v1225_v46 = vld [vmem:[%s1101_s6 + $0x50] sm:$0xff] }
  0x1d   : > { %v437_v60 = vadd.f32 %v429_v42, %v416_v51  ;;  %v483_v61 = vsel %vm304_vm0, %v481_v52, %v482_v53  ;;  %v529_v62 = vmul.f32 %v1156_v38, %v1113_v9  ;;  %v558_v63 = vrot.slane %v526_v50, 2  ;;  %v1229_v51 = vld [vmem:[%s1101_s6 + $0x58] sm:$0x3]  ;;  %v1232_v52 = vld [vmem:[%s1101_s6 + $0x68] sm:$0x3] }
  0x1e   : > { %v486_v5 = vsel %vm304_vm0, %v484_v54, %v485_v56  ;;  %v513_v6 = vadd.f32 %v483_v61, %v436_v55  ;;  %v559_v7 = vrot.slane %v527_v57, 2  ;;  %v561_v8 = vrot.slane %v528_v58, 2  ;;  %v1235_v55 = vld [vmem:[%s1101_s6 + $0x78] sm:$0x3] }
  0x1f   : > { %v514_v11 = vadd.f32 %v486_v5, %v437_v60  ;;  %v562_v12 = vrot.slane %v529_v62, 2  ;;  %v603_v13 = vmul.f32 %v1176_v59, %v1150_v33  ;;  %v604_v15 = vmul.f32 %v1176_v59, %v1187_v1  ;;  %v1245_v60 = vld [vmem:[%s1497_s2] ss:$0 sm:$0xff] }
  0x20   : > { %v560_v16 = vsel %vm382_vm1, %v558_v63, %v559_v7  ;;  %v624_v18 = vmul.f32 %v1184_v0, %v1150_v33  ;;  %v625_v20 = vmul.f32 %v1184_v0, %v1113_v9  ;;  %v626_v21 = vmul.f32 %v1184_v0, %v1187_v1 }
  0x21   : > { %v563_v22 = vsel %vm382_vm1, %v561_v8, %v562_v12  ;;  %v590_v23 = vadd.f32 %v560_v16, %v513_v6  ;;  %v627_v24 = vmul.f32 %v1184_v0, %v1120_v14  ;;  %v701_v26 = vmul.f32 %v1193_v10, %v1150_v33 }
  0x22   : > { %v591_v28 = vadd.f32 %v563_v22, %v514_v11  ;;  %v656_v30 = vrot.slane %v624_v18, 1  ;;  %v657_v31 = vrot.slane %v625_v20, 1  ;;  %v659_v34 = vrot.slane %v626_v21, 1 }
  0x23   : > { %v611_v35 = vadd.f32 %v603_v13, %v590_v23  ;;  %v660_v36 = vrot.slane %v627_v24, 1  ;;  %v702_v37 = vmul.f32 %v1193_v10, %v1113_v9  ;;  %v703_v39 = vmul.f32 %v1193_v10, %v1187_v1 }
  0x24   : > { %v612_v40 = vadd.f32 %v604_v15, %v591_v28  ;;  %v658_v41 = vsel %vm304_vm0, %v656_v30, %v657_v31  ;;  %v704_v42 = vmul.f32 %v1193_v10, %v1120_v14  ;;  %v733_v43 = vrot.slane %v701_v26, 2 }
  0x25   : > { %v661_v47 = vsel %vm304_vm0, %v659_v34, %v660_v36  ;;  %v688_v48 = vadd.f32 %v658_v41, %v611_v35  ;;  %v734_v49 = vrot.slane %v702_v37, 2  ;;  %v736_v50 = vrot.slane %v703_v39, 2  ;;  %v1275_v36 = vld [vmem:[%s1101_s6 + $0x60] sm:$0xff] }
  0x26   : > { %v689_v53 = vadd.f32 %v661_v47, %v612_v40  ;;  %v737_v54 = vrot.slane %v704_v42, 2  ;;  %v255_v56 = vmul.f32 %v1091_v2, %v1219_v44  ;;  %v256_v57 = vmul.f32 %v1091_v2, %v1225_v46 }
  0x27   : > { %v735_v58 = vsel %vm382_vm1, %v733_v43, %v734_v49  ;;  %v280_v61 = vmul.f32 %v1096_v3, %v1219_v44  ;;  %v281_v62 = vmul.f32 %v1096_v3, %v1222_v45  ;;  %v282_v63 = vmul.f32 %v1096_v3, %v1225_v46 }
  0x28   : > { %v738_v5 = vsel %vm382_vm1, %v736_v50, %v737_v54  ;;  %v765_v6 = vadd.f32 %v735_v58, %v688_v48  ;;  %v283_v7 = vmul.f32 %v1096_v3, %v1229_v51  ;;  %v1258_v8 = vmul.f32 %v1096_v3, %v1232_v52 }
  0x29   : > { %v766_v11 = vadd.f32 %v738_v5, %v689_v53  ;;  %v1262_v12 = vmul.f32 %v1096_v3, %v1235_v55  ;;  %v317_v13 = vrot.slane %v280_v61, 1  ;;  %v318_v15 = vrot.slane %v281_v62, 1 }
  0x2a   : > { %v780_v16 = vadd.f32 %v1245_v60, %v765_v6  ;;  %v320_v18 = vrot.slane %v282_v63, 1  ;;  %v321_v20 = vrot.slane %v283_v7, 1  ;;  %v324_v21 = vrot.slane %v1258_v8, 1 }
  0x2b   : > { %v781_v22 = vadd.f32 %v1245_v60, %v766_v11  ;;  %v319_v23 = vsel %vm304_vm0, %v317_v13, %v318_v15  ;;  %v327_v24 = vrot.slane %v1262_v12, 1  ;;  %v358_v26 = vmul.f32 %v1106_v4, %v1219_v44 }
  0x2c   : > { %v788_v28 = vmax.f32 %v780_v16, 0.0  ;;  %v322_v30 = vsel %vm304_vm0, %v320_v18, %v321_v20  ;;  %v341_v31 = vadd.f32 %v319_v23, %v255_v56  ;;  %v359_v34 = vmul.f32 %v1106_v4, %v1222_v45 }
  0x2d   : > { %v789_v35 = vmax.f32 %v781_v22, 0.0  ;;  %v342_v37 = vadd.f32 %v322_v30, %v256_v57  ;;  %v360_v39 = vmul.f32 %v1106_v4, %v1225_v46  ;;  %v361_v40 = vmul.f32 %v1106_v4, %v1229_v51  ;;  %v1307_v30 = vld [vmem:[%s1101_s6 + $0x70] sm:$0xff] }
  0x2e   : > { %v395_v41 = vrot.slane %v358_v26, 2  ;;  %v396_v42 = vrot.slane %v359_v34, 2  ;;  %v432_v43 = vmul.f32 %v1139_v27, %v1225_v46  ;;  %v433_v47 = vmul.f32 %v1139_v27, %v1275_v36 }
  0x2f   : > { %v801_v48 = vpack.c.bf16 %v789_v35, %v788_v28  ;;  %v398_v49 = vrot.slane %v360_v39, 2  ;;  %v399_v50 = vrot.slane %v361_v40, 2  ;;  %v457_v53 = vmul.f32 %v1147_v32, %v1225_v46 }
  0x30   : > { %v397_v54 = vsel %vm382_vm1, %v395_v41, %v396_v42  ;;  %v458_v56 = vmul.f32 %v1147_v32, %v1229_v51  ;;  %v459_v57 = vmul.f32 %v1147_v32, %v1275_v36  ;;  %v460_v58 = vmul.f32 %v1147_v32, %v1232_v52 }
  0x31   : > { %1010 = vmatprep.mubr.msk.bf16.mxu0 %vm823_vm2, %v801_v48  ;;  %v400_v61 = vsel %vm382_vm1, %v398_v49, %v399_v50  ;;  %v419_v62 = vadd.f32 %v397_v54, %v341_v31  ;;  %v493_v63 = vrot.slane %v457_v53, 1  ;;  %v534_v5 = vmul.f32 %v1156_v38, %v1225_v46 }
  0x32   : > { %v420_v6 = vadd.f32 %v400_v61, %v342_v37  ;;  %v494_v7 = vrot.slane %v458_v56, 1  ;;  %v496_v11 = vrot.slane %v459_v57, 1  ;;  %v497_v13 = vrot.slane %v460_v58, 1 }
  0x33   : > { %v440_v15 = vadd.f32 %v432_v43, %v419_v62  ;;  %v535_v16 = vmul.f32 %v1156_v38, %v1229_v51  ;;  %v536_v18 = vmul.f32 %v1156_v38, %v1275_v36  ;;  %v537_v20 = vmul.f32 %v1156_v38, %v1232_v52 }
  0x34   : > { %v441_v22 = vadd.f32 %v433_v47, %v420_v6  ;;  %v495_v23 = vsel %vm304_vm0, %v493_v63, %v494_v7  ;;  %v498_v26 = vsel %vm304_vm0, %v496_v11, %v497_v13  ;;  %v570_v28 = vrot.slane %v534_v5, 2 }
  0x35   : > { %v517_v31 = vadd.f32 %v495_v23, %v440_v15  ;;  %v571_v34 = vrot.slane %v535_v16, 2  ;;  %v573_v35 = vrot.slane %v536_v18, 2  ;;  %v574_v37 = vrot.slane %v537_v20, 2 }
  0x36   : > { %v518_v39 = vadd.f32 %v498_v26, %v441_v22  ;;  %v607_v40 = vmul.f32 %v1176_v59, %v1275_v36  ;;  %v608_v41 = vmul.f32 %v1176_v59, %v1307_v30  ;;  %v632_v42 = vmul.f32 %v1184_v0, %v1275_v36 }
  0x37   : > { %v572_v43 = vsel %vm382_vm1, %v570_v28, %v571_v34  ;;  %v575_v47 = vsel %vm382_vm1, %v573_v35, %v574_v37  ;;  %v633_v48 = vmul.f32 %v1184_v0, %v1232_v52  ;;  %v634_v49 = vmul.f32 %v1184_v0, %v1307_v30 }
  0x38   : > { %v594_v50 = vadd.f32 %v572_v43, %v517_v31  ;;  %v595_v53 = vadd.f32 %v575_v47, %v518_v39  ;;  %v635_v54 = vmul.f32 %v1184_v0, %v1235_v55  ;;  %v668_v56 = vrot.slane %v632_v42, 1 }
  0x39   : > { %v669_v57 = vrot.slane %v633_v48, 1  ;;  %v671_v58 = vrot.slane %v634_v49, 1  ;;  %v709_v61 = vmul.f32 %v1193_v10, %v1275_v36  ;;  %v710_v62 = vmul.f32 %v1193_v10, %v1232_v52 }
  0x3a   : > { %v615_v63 = vadd.f32 %v607_v40, %v594_v50  ;;  %v616_v5 = vadd.f32 %v608_v41, %v595_v53  ;;  %v672_v6 = vrot.slane %v635_v54, 1  ;;  %v711_v7 = vmul.f32 %v1193_v10, %v1307_v30 }
  0x3b   : > { %v670_v11 = vsel %vm304_vm0, %v668_v56, %v669_v57  ;;  %v712_v13 = vmul.f32 %v1193_v10, %v1235_v55  ;;  %v745_v15 = vrot.slane %v709_v61, 2  ;;  %v746_v16 = vrot.slane %v710_v62, 2 }
  0x3c   : > { %v673_v18 = vsel %vm304_vm0, %v671_v58, %v672_v6  ;;  %v692_v20 = vadd.f32 %v670_v11, %v615_v63  ;;  %v748_v22 = vrot.slane %v711_v7, 2  ;;  %v253_v23 = vmul.f32 %v1091_v2, %v1150_v33 }
  0x3d   : > { %v693_v26 = vadd.f32 %v673_v18, %v616_v5  ;;  %v747_v28 = vsel %vm382_vm1, %v745_v15, %v746_v16  ;;  %v749_v31 = vrot.slane %v712_v13, 2  ;;  %v254_v34 = vmul.f32 %v1091_v2, %v1187_v1 }
  0x3e   : > { %v769_v35 = vadd.f32 %v747_v28, %v692_v20  ;;  %v276_v37 = vmul.f32 %v1096_v3, %v1150_v33  ;;  %v278_v39 = vmul.f32 %v1096_v3, %v1187_v1  ;;  %v354_v40 = vmul.f32 %v1106_v4, %v1150_v33 }
  0x3f   : > { %v750_v41 = vsel %vm382_vm1, %v748_v22, %v749_v31  ;;  %v355_v42 = vmul.f32 %v1106_v4, %v1113_v9  ;;  %v356_v43 = vmul.f32 %v1106_v4, %v1187_v1  ;;  %v357_v47 = vmul.f32 %v1106_v4, %v1120_v14 }
  0x40   : > { %v770_v48 = vadd.f32 %v750_v41, %v693_v26  ;;  %v784_v49 = vadd.f32 %v1245_v60, %v769_v35  ;;  %v311_v50 = vrot.slane %v276_v37, 1  ;;  %v314_v53 = vrot.slane %v278_v39, 1 }
  0x41   : > { %v389_v54 = vrot.slane %v354_v40, 2  ;;  %v390_v56 = vrot.slane %v355_v42, 2  ;;  %v392_v57 = vrot.slane %v356_v43, 2  ;;  %v393_v33 = vrot.slane %v357_v47, 2 }
  0x42   : > { %v785_v58 = vadd.f32 %v1245_v60, %v770_v48  ;;  %v792_v61 = vmax.f32 %v784_v49, 0.0  ;;  %v313_v9 = vsel %vm304_vm0, %v311_v50, %v312_v25  ;;  %v316_v62 = vsel %vm304_vm0, %v314_v53, %v315_v29 }
  0x43   : > { %v339_v63 = vadd.f32 %v313_v9, %v253_v23  ;;  %v340_v5 = vadd.f32 %v316_v62, %v254_v34  ;;  %v391_v6 = vsel %vm382_vm1, %v389_v54, %v390_v56  ;;  %v394_v7 = vsel %vm382_vm1, %v392_v57, %v393_v33 }
  0x44   : > { %v793_v11 = vmax.f32 %v785_v58, 0.0  ;;  %v430_v13 = vmul.f32 %v1139_v27, %v1187_v1  ;;  %v431_v15 = vmul.f32 %v1139_v27, %v1219_v44  ;;  %v453_v17 = vmul.f32 %v1147_v32, %v1187_v1 }
  0x45   : > { %v417_v25 = vadd.f32 %v391_v6, %v339_v63  ;;  %v418_v19 = vadd.f32 %v394_v7, %v340_v5  ;;  %v454_v29 = vmul.f32 %v1147_v32, %v1120_v14  ;;  %v455_v16 = vmul.f32 %v1147_v32, %v1219_v44 }
  0x46   : > { %v803_v18 = vpack.c.bf16 %v793_v11, %v792_v61  ;;  %v456_v20 = vmul.f32 %v1147_v32, %v1222_v45  ;;  %v487_v22 = vrot.slane %v453_v17, 1  ;;  %v530_v23 = vmul.f32 %v1156_v38, %v1187_v1 }
  0x47   : > { %v438_v26 = vadd.f32 %v430_v13, %v417_v25  ;;  %v439_v28 = vadd.f32 %v431_v15, %v418_v19  ;;  %v488_v31 = vrot.slane %v454_v29, 1  ;;  %v490_v34 = vrot.slane %v455_v16, 1 }
  0x48   : > { %1014 = vmatprep.mubr.msk.bf16.mxu1 %vm823_vm2, %v803_v18  ;;  %v491_v35 = vrot.slane %v456_v20, 1  ;;  %v531_v37 = vmul.f32 %v1156_v38, %v1120_v14  ;;  %v532_v39 = vmul.f32 %v1156_v38, %v1219_v44  ;;  %v533_v40 = vmul.f32 %v1156_v38, %v1222_v45 }
  0x49   : > { %v489_v41 = vsel %vm304_vm0, %v487_v22, %v488_v31  ;;  %v564_v42 = vrot.slane %v530_v23, 2  ;;  %v605_v1 = vmul.f32 %v1176_v59, %v1219_v44  ;;  %v606_v43 = vmul.f32 %v1176_v59, %v1225_v46 }
  0x4a   : > { %v492_v47 = vsel %vm304_vm0, %v490_v34, %v491_v35  ;;  %v515_v48 = vadd.f32 %v489_v41, %v438_v26  ;;  %v565_v49 = vrot.slane %v531_v37, 2  ;;  %v567_v14 = vrot.slane %v532_v39, 2 }
  0x4b   : > { %v516_v50 = vadd.f32 %v492_v47, %v439_v28  ;;  %v568_v53 = vrot.slane %v533_v40, 2  ;;  %v628_v54 = vmul.f32 %v1184_v0, %v1219_v44  ;;  %v629_v56 = vmul.f32 %v1184_v0, %v1222_v45 }
  0x4c   : > { %v566_v57 = vsel %vm382_vm1, %v564_v42, %v565_v49  ;;  %v630_v33 = vmul.f32 %v1184_v0, %v1225_v46  ;;  %v631_v58 = vmul.f32 %v1184_v0, %v1229_v51  ;;  %v705_v61 = vmul.f32 %v1193_v10, %v1219_v44 }
  0x4d   : > { %v569_v9 = vsel %vm382_vm1, %v567_v14, %v568_v53  ;;  %v592_v62 = vadd.f32 %v566_v57, %v515_v48  ;;  %v662_v63 = vrot.slane %v628_v54, 1  ;;  %v663_v5 = vrot.slane %v629_v56, 1  ;;  %v242_v48 = vld [vmem:[%s1101_s6 + $0x80] sm:$0xff] }
  0x4e   : > { %v593_v6 = vadd.f32 %v569_v9, %v516_v50  ;;  %v665_v7 = vrot.slane %v630_v33, 1  ;;  %v666_v11 = vrot.slane %v631_v58, 1  ;;  %v706_v13 = vmul.f32 %v1193_v10, %v1222_v45 }
  0x4f   : > { %v613_v15 = vadd.f32 %v605_v1, %v592_v62  ;;  %v664_v17 = vsel %vm304_vm0, %v662_v63, %v663_v5  ;;  %v707_v25 = vmul.f32 %v1193_v10, %v1225_v46  ;;  %v708_v44 = vmul.f32 %v1193_v10, %v1229_v51  ;;  %v244_v5 = vld [vmem:[%s1101_s6 + $0x90] sm:$0xff] }
  0x50   : > { %v614_v19 = vadd.f32 %v606_v43, %v593_v6  ;;  %v667_v29 = vsel %vm304_vm0, %v665_v7, %v666_v11  ;;  %v739_v16 = vrot.slane %v705_v61, 2  ;;  %v740_v18 = vrot.slane %v706_v13, 2 }
  0x51   : > { %v690_v20 = vadd.f32 %v664_v17, %v613_v15  ;;  %v742_v22 = vrot.slane %v707_v25, 2  ;;  %v743_v23 = vrot.slane %v708_v44, 2  ;;  %v257_v45 = vmul.f32 %v1091_v2, %v1275_v36 }
  0x52   : > { %v691_v26 = vadd.f32 %v667_v29, %v614_v19  ;;  %v741_v28 = vsel %vm382_vm1, %v739_v16, %v740_v18  ;;  %v258_v46 = vmul.f32 %v1091_v2, %v1307_v30  ;;  %v284_v51 = vmul.f32 %v1096_v3, %v1275_v36  ;;  %v245_v18 = vld [vmem:[%s1101_s6 + $0x98] sm:$0x3] }
  0x53   : > { %v744_v31 = vsel %vm382_vm1, %v742_v22, %v743_v23  ;;  %v767_v34 = vadd.f32 %v741_v28, %v690_v20  ;;  %v286_v35 = vmul.f32 %v1096_v3, %v1307_v30  ;;  %v362_v37 = vmul.f32 %v1106_v4, %v1275_v36 }
  0x54   : > { %v768_v39 = vadd.f32 %v744_v31, %v691_v26  ;;  %v323_v40 = vrot.slane %v284_v51, 1  ;;  %v363_v41 = vmul.f32 %v1106_v4, %v1232_v52  ;;  %v364_v2 = vmul.f32 %v1106_v4, %v1307_v30 }
  0x55   : > { %v782_v42 = vadd.f32 %v1245_v60, %v767_v34  ;;  %v326_v1 = vrot.slane %v286_v35, 1  ;;  %v365_v43 = vmul.f32 %v1106_v4, %v1235_v55  ;;  %v401_v47 = vrot.slane %v362_v37, 2  ;;  %v243_v4 = vld [vmem:[%s1101_s6 + $0x88] sm:$0x3] }
  0x56   : > { %v783_v3 = vadd.f32 %v1245_v60, %v768_v39  ;;  %v325_v36 = vsel %vm304_vm0, %v323_v40, %v324_v21  ;;  %v402_v49 = vrot.slane %v363_v41, 2  ;;  %v404_v52 = vrot.slane %v364_v2, 2 }
  0x57   : > { %v790_v14 = vmax.f32 %v782_v42, 0.0  ;;  %v328_v50 = vsel %vm304_vm0, %v326_v1, %v327_v24  ;;  %v343_v53 = vadd.f32 %v325_v36, %v257_v45  ;;  %v405_v54 = vrot.slane %v365_v43, 2 }
  0x58   : > { %v791_v56 = vmax.f32 %v783_v3, 0.0  ;;  %v344_v57 = vadd.f32 %v328_v50, %v258_v46  ;;  %v403_v33 = vsel %vm382_vm1, %v401_v47, %v402_v49  ;;  %v434_v8 = vmul.f32 %v1139_v27, %v1307_v30 }
  0x59   : > { %v406_v21 = vsel %vm382_vm1, %v404_v52, %v405_v54  ;;  %v421_v58 = vadd.f32 %v403_v33, %v343_v53  ;;  %v435_v61 = vmul.f32 %v1139_v27, %v242_v48  ;;  %v461_v12 = vmul.f32 %v1147_v32, %v1307_v30 }
  0x5a   : > { %v802_v24 = vpack.c.bf16 %v791_v56, %v790_v14  ;;  %v422_v9 = vadd.f32 %v406_v21, %v344_v57  ;;  %v462_v62 = vmul.f32 %v1147_v32, %v1235_v55  ;;  %v463_v63 = vmul.f32 %v1147_v32, %v242_v48 }
  0x5b   : > { %v442_v6 = vadd.f32 %v434_v8, %v421_v58  ;;  %v464_v7 = vmul.f32 %v1147_v32, %v243_v4  ;;  %v499_v11 = vrot.slane %v461_v12, 1  ;;  %v538_v13 = vmul.f32 %v1156_v38, %v1307_v30  ;;  %v990_v12 = vld [vmem:[%s1499_s4] ss:$0 sm:$0xff] }
  0x5c   : > { %1011 = vmatmul.mubr.msk.bf16.vlgmr.msra.gmra.mrb[0].mxu0 %vm823_vm2, %v802_v24  ;;  %v443_v27 = vadd.f32 %v435_v61, %v422_v9  ;;  %v500_v15 = vrot.slane %v462_v62, 1  ;;  %v502_v17 = vrot.slane %v463_v63, 1  ;;  %v539_v25 = vmul.f32 %v1156_v38, %v1235_v55 }
  0x5d   : > { %v503_v44 = vrot.slane %v464_v7, 1  ;;  %v540_v19 = vmul.f32 %v1156_v38, %v242_v48  ;;  %v541_v29 = vmul.f32 %v1156_v38, %v243_v4  ;;  %v576_v16 = vrot.slane %v538_v13, 2 }
  0x5e   : > { %v501_v32 = vsel %vm304_vm0, %v499_v11, %v500_v15  ;;  %v577_v20 = vrot.slane %v539_v25, 2  ;;  %v609_v30 = vmul.f32 %v1176_v59, %v242_v48  ;;  %v610_v22 = vmul.f32 %v1176_v59, %v244_v5 }
  0x5f   : > { %v504_v23 = vsel %vm304_vm0, %v502_v17, %v503_v44  ;;  %v519_v45 = vadd.f32 %v501_v32, %v442_v6  ;;  %v579_v26 = vrot.slane %v540_v19, 2  ;;  %v580_v28 = vrot.slane %v541_v29, 2 }
  0x60   : > { %v520_v55 = vadd.f32 %v504_v23, %v443_v27  ;;  %v578_v46 = vsel %vm382_vm1, %v576_v16, %v577_v20  ;;  %v636_v51 = vmul.f32 %v1184_v0, %v242_v48  ;;  %v637_v38 = vmul.f32 %v1184_v0, %v243_v4 }
  0x61   : > { %v581_v31 = vsel %vm382_vm1, %v579_v26, %v580_v28  ;;  %v596_v34 = vadd.f32 %v578_v46, %v519_v45  ;;  %v638_v35 = vmul.f32 %v1184_v0, %v244_v5  ;;  %v639_v37 = vmul.f32 %v1184_v0, %v245_v18 }
  0x62   : > { %v597_v59 = vadd.f32 %v581_v31, %v520_v55  ;;  %v674_v39 = vrot.slane %v636_v51, 1  ;;  %v675_v40 = vrot.slane %v637_v38, 1  ;;  %v713_v41 = vmul.f32 %v1193_v10, %v242_v48 }
  0x63   : > { %v617_v2 = vadd.f32 %v609_v30, %v596_v34  ;;  %v677_v42 = vrot.slane %v638_v35, 1  ;;  %v678_v1 = vrot.slane %v639_v37, 1  ;;  %v714_v43 = vmul.f32 %v1193_v10, %v243_v4 }
  0x64   : > { %v618_v47 = vadd.f32 %v610_v22, %v597_v59  ;;  %v676_v3 = vsel %vm304_vm0, %v674_v39, %v675_v40  ;;  %v715_v36 = vmul.f32 %v1193_v10, %v244_v5  ;;  %v716_v49 = vmul.f32 %v1193_v10, %v245_v18 }
  0x65   : > { %v679_v52 = vsel %vm304_vm0, %v677_v42, %v678_v1  ;;  %v694_v0 = vadd.f32 %v676_v3, %v617_v2  ;;  %v751_v14 = vrot.slane %v713_v41, 2  ;;  %v752_v50 = vrot.slane %v714_v43, 2 }
  0x66   : > { %v695_v53 = vadd.f32 %v679_v52, %v618_v47  ;;  %v754_v48 = vrot.slane %v715_v36, 2  ;;  %v755_v54 = vrot.slane %v716_v49, 2 }
  0x67   : > { %v753_v56 = vsel %vm382_vm1, %v751_v14, %v752_v50 }
  0x68   : > { %v756_v4 = vsel %vm382_vm1, %v754_v48, %v755_v54  ;;  %v771_v57 = vadd.f32 %v753_v56, %v694_v0 }
  0x69   : > { %v772_v33 = vadd.f32 %v756_v4, %v695_v53 }
  0x6a   : > { %v786_v8 = vadd.f32 %v1245_v60, %v771_v57 }
  0x6b   : > { %v787_v21 = vadd.f32 %v1245_v60, %v772_v33 }
  0x6c   : > { %v794_v10 = vmax.f32 %v786_v8, 0.0 }
  0x6d   : > { %v795_v58 = vmax.f32 %v787_v21, 0.0 }
  0x6f   : > { %v804_v61 = vpack.c.bf16 %v795_v58, %v794_v10 }
  0x71   : > { %1015 = vmatmul.mubr.msk.bf16.vlgmr.msra.gmra.mrb[0].mxu1 %vm823_vm2, %v804_v61 }
 0x12f   : > { %v1012_v24 = vpop.f32.mrb[0].mxu0 }
 0x130   : > { %v879_v9 = vadd.f32 %v1012_v24, %v990_v12  ;;  %v870_v62 = vpop.f32.mrb[1].mxu0 }
 0x131   : > { %v871_v63 = vadd.f32 %v990_v12, %v870_v62  ;;  %v1013_v5 = vpop.f32.mrb[2].mxu0 }
 0x132   : > { %v903_v60 = vmax.f32 %v879_v9, 0.0  ;;  %v882_v6 = vadd.f32 %v1013_v5, %v990_v12  ;;  %v873_v7 = vpop.f32.mrb[3].mxu0 }
 0x133   : > { %v901_v11 = vmax.f32 %v871_v63, 0.0  ;;  %v874_v13 = vadd.f32 %v990_v12, %v873_v7 }
 0x134   : > { %911 = vst.msk [vmem:[%s224_s30 + $0x10] sm:$0xff] %vm823_vm2, %v903_v60  ;;  %v904_v27 = vmax.f32 %v882_v6, 0.0 }
 0x135   : > { %909 = vst.msk [vmem:[%s224_s30] sm:$0xff] %vm823_vm2, %v901_v11  ;;  %v902_v15 = vmax.f32 %v874_v13, 0.0 }
 0x136   : > { %912 = vst.msk [vmem:[%s224_s30 + $0x18] sm:$0xff] %vm823_vm2, %v904_v27 }
 0x137   : > { %910 = vst.msk [vmem:[%s224_s30 + $0x8] sm:$0xff] %vm823_vm2, %v902_v15 }
 0x144   : > { %v1016_v17 = vpop.f32.mrb[0].mxu1 }
 0x145   : > { %v895_v25 = vadd.f32 %v1016_v17, %v990_v12  ;;  %v886_v44 = vpop.f32.mrb[1].mxu1 }
 0x146   : > { %v887_v19 = vadd.f32 %v990_v12, %v886_v44  ;;  %v1017_v29 = vpop.f32.mrb[2].mxu1 }
 0x147   : > { %v907_v16 = vmax.f32 %v895_v25, 0.0  ;;  %v898_v18 = vadd.f32 %v1017_v29, %v990_v12  ;;  %v889_v32 = vpop.f32.mrb[3].mxu1 }
 0x148   : > { %v905_v20 = vmax.f32 %v887_v19, 0.0  ;;  %v890_v30 = vadd.f32 %v990_v12, %v889_v32 }
 0x149   : > { %915 = vst.msk [vmem:[%s224_s30 + $0x30] sm:$0xff] %vm823_vm2, %v907_v16  ;;  %v908_v22 = vmax.f32 %v898_v18, 0.0 }
 0x14a   : > { %913 = vst.msk [vmem:[%s224_s30 + $0x20] sm:$0xff] %vm823_vm2, %v905_v20  ;;  %v906_v23 = vmax.f32 %v890_v30, 0.0 }
 0x14b   : > { %916 = vst.msk [vmem:[%s224_s30 + $0x38] sm:$0xff] %vm823_vm2, %v908_v22 }
 0x14c   : > { %914 = vst.msk [vmem:[%s224_s30 + $0x28] sm:$0xff] %vm823_vm2, %v906_v23 }
 0x14d PF: > { %s15_s18 = sadd.s32 1, %s1039_s18  }
 0x14e   : > { %p12_p4 = scmp.ge.s32.totalorder %s15_s18, 4  }
 0x150   :  { %14 = sbr.rel (!%p12_p4) target bundleno = 1 (0x1), region = 70 }

// kernel: mobilenet_v1_forward.19
= control target key start
LH: loop header
LB: loop body
LE: loop exit
PB: predicated region body
PF: predicated region fallthrough
CT: control target
= control target key end

     0   :  { %s974_s18 = smov 0   ;;  %s976_s19 = smov 0   ;;  %s1221_s0 = inlined_call_operand.vmem [shape: f32[4,2,5,5,32], index: 0, kind: input, shape index: {}]   ;;  %s1222_s1 = inlined_call_operand.vmem [shape: f32[9,32], index: 1, kind: input, shape index: {}]   ;;  %s1223_s2 = inlined_call_operand.vmem [shape: f32[1,32], index: 2, kind: input, shape index: {}]   ;;  %s1224_s3 = inlined_call_operand.vmem [shape: bf16[32,64], index: 3, kind: input, shape index: {}]   ;;  %s1225_s4 = inlined_call_operand.vmem [shape: f32[1,64], index: 4, kind: input, shape index: {}]   ;;  %s1226_s5 = inlined_call_operand.vmem [shape: f32[2,4,4,64], index: 5, kind: output, shape index: {}]  }
   0x1   :  { %s978_s20 = smov 0  }
   0x2 LB: > { %s799_s21 = sadd.s32 4294967295, %s940_s20   ;;  %s991_s22 = sadd.s32 1, %s940_s20   ;;  %s940_s20 = sphi %s978_s20, %s1229_s20   ;;  %s936_s19 = sphi %s976_s19, %s1228_s19   ;;  %s932_s18 = sphi %s974_s18, %s1227_s18  }
   0x3   : > { %s19_s23 = ssub.s32 %s940_s20, %s991_s22  ;;  %s22_s24 = sadd.s32 1, %s936_s19 }
   0x4   : > { %p20_p0 = scmp.eq.s32.totalorder %s19_s23, 0  ;;  %p29_p1 = scmp.ne.s32.totalorder %s936_s19, %s932_s18 }
   0x5   : > { %p30_p2 = scmp.eq.s32.totalorder %s940_s20, 0  ;;  %p802_p4 = scmp.ge.s32.totalorder %s940_s20, 2 }
   0x6   : > { %s1000_s25 = scalar_select %p20_p0, %s936_s19, %s22_s24  }
   0x7   : > { %p31_p3 = por %p30_p2, %p29_p1  ;;  %177 = sbr.rel (%p802_p4) target bundleno = 29 (0x1d), region = 32 }
   0xe   : > { %180 = sbr.rel (!%p31_p3) target bundleno = 29 (0x1d), region = 36  ;;  %s182_s26 = sand.u32 (%p31_p3), 1, %s936_s19  }
   0xf   : > { %s888_s27 = smul.u32 (%p31_p3), 40, %s940_s20 }
  0x10   : > { %s887_s28 = smul.u32 (%p31_p3), 160, %s182_s26 }
  0x11   : > { %s1008_s6 = scalar_lea.vmem (%p31_p3), %s1221_s0, %s888_s27 }
  0x12   : > { %v253_v0 = vld [vmem:[%s1008_s6] sm:$0xff] (%p31_p3)  ;;  %v255_v1 = vld [vmem:[%s1008_s6 + $0x8] sm:$0xff] (%p31_p3)  ;;  %v257_v2 = vld [vmem:[%s1008_s6 + $0x10] sm:$0xff] (%p31_p3)  ;;  %s1013_s7 = scalar_lea.vmem (%p31_p3), [#allocation2], %s887_s28 }
  0x13   : > { %254 = vst [vmem:[%s1013_s7] sm:$0xff] (%p31_p3), %v253_v0  ;;  %256 = vst [vmem:[%s1013_s7 + $0x8] sm:$0xff] (%p31_p3), %v255_v1  ;;  %v259_v3 = vld [vmem:[%s1008_s6 + $0x18] sm:$0xff] (%p31_p3)  ;;  %v261_v4 = vld [vmem:[%s1008_s6 + $0x20] sm:$0xff] (%p31_p3) }
  0x14   : > { %258 = vst [vmem:[%s1013_s7 + $0x10] sm:$0xff] (%p31_p3), %v257_v2  ;;  %v263_v5 = vld [vmem:[%s1008_s6 + $0x50] sm:$0xff] (%p31_p3)  ;;  %260 = vst [vmem:[%s1013_s7 + $0x18] sm:$0xff] (%p31_p3), %v259_v3  ;;  %v265_v6 = vld [vmem:[%s1008_s6 + $0x58] sm:$0xff] (%p31_p3) }
  0x15   : > { %262 = vst [vmem:[%s1013_s7 + $0x20] sm:$0xff] %v261_v4  ;;  %264 = vst [vmem:[%s1013_s7 + $0x28] sm:$0xff] %v263_v5  ;;  %v267_v7 = vld [vmem:[%s1008_s6 + $0x60] sm:$0xff]  ;;  %v269_v8 = vld [vmem:[%s1008_s6 + $0x68] sm:$0xff] }
  0x16   : > { %266 = vst [vmem:[%s1013_s7 + $0x30] sm:$0xff] %v265_v6  ;;  %268 = vst [vmem:[%s1013_s7 + $0x38] sm:$0xff] %v267_v7  ;;  %v271_v9 = vld [vmem:[%s1008_s6 + $0x70] sm:$0xff]  ;;  %v273_v10 = vld [vmem:[%s1008_s6 + $0xa0] sm:$0xff] }
  0x17   : > { %270 = vst [vmem:[%s1013_s7 + $0x40] sm:$0xff] %v269_v8  ;;  %v275_v11 = vld [vmem:[%s1008_s6 + $0xa8] sm:$0xff]  ;;  %272 = vst [vmem:[%s1013_s7 + $0x48] sm:$0xff] %v271_v9  ;;  %v277_v12 = vld [vmem:[%s1008_s6 + $0xb0] sm:$0xff] }
  0x18   : > { %274 = vst [vmem:[%s1013_s7 + $0x50] sm:$0xff] %v273_v10  ;;  %276 = vst [vmem:[%s1013_s7 + $0x58] sm:$0xff] %v275_v11  ;;  %v279_v13 = vld [vmem:[%s1008_s6 + $0xb8] sm:$0xff]  ;;  %v281_v14 = vld [vmem:[%s1008_s6 + $0xc0] sm:$0xff] }
  0x19   : > { %278 = vst [vmem:[%s1013_s7 + $0x60] sm:$0xff] %v277_v12  ;;  %280 = vst [vmem:[%s1013_s7 + $0x68] sm:$0xff] %v279_v13  ;;  %v283_v15 = vld [vmem:[%s1008_s6 + $0xf0] sm:$0xff]  ;;  %v285_v16 = vld [vmem:[%s1008_s6 + $0xf8] sm:$0xff] }
  0x1a   : > { %282 = vst [vmem:[%s1013_s7 + $0x70] sm:$0xff] %v281_v14  ;;  %v287_v17 = vld [vmem:[%s1008_s6 + $0x100] sm:$0xff]  ;;  %284 = vst [vmem:[%s1013_s7 + $0x78] sm:$0xff] %v283_v15  ;;  %v289_v18 = vld [vmem:[%s1008_s6 + $0x108] sm:$0xff] }
  0x1b   : > { %286 = vst [vmem:[%s1013_s7 + $0x80] sm:$0xff] %v285_v16  ;;  %288 = vst [vmem:[%s1013_s7 + $0x88] sm:$0xff] %v287_v17  ;;  %v291_v19 = vld [vmem:[%s1008_s6 + $0x110] sm:$0xff] }
  0x1c   : > { %290 = vst [vmem:[%s1013_s7 + $0x90] sm:$0xff] %v289_v18  ;;  %292 = vst [vmem:[%s1013_s7 + $0x98] sm:$0xff] %v291_v19 }
  0x1d PF: > { %p804_p5 = scmp.ge.s32.totalorder %s940_s20, 1  ;;  %p297_p6 = scmp.lt.s32.totalorder %s940_s20, 3 }
  0x1f   : > { %p298_p7 = pnand %p804_p5, %p297_p6 }
  0x20   : > { %v1057_v20 = vld [vmem:[%s1224_s3] sm:$0xff] (!%p298_p7)   ;;  %v942_v21 = vmov (!%p298_p7), 0.0   ;;  %v1066_v22 = vld [vmem:[%s1224_s3 + $0x8] sm:$0xff] (!%p298_p7)   ;;  %s304_s12 = sand.u32 (!%p298_p7), 1, %s932_s18   ;;  %vm943_vm0 = vmmov (!%p298_p7), 0   ;;  %vm550_vm1 = vcmask (!%p298_p7), 261120  }
  0x21   : > { %301 = sbr.rel (%p298_p7) target bundleno = 289 (0x121), region = 74  ;;  %855 = vmatprep.subr.bf16.mxu0 (!%p298_p7), %v942_v21  ;;  %863 = vmatprep.subr.bf16.mxu1 (!%p298_p7), %v942_v21  ;;  %v1072_v23 = vld [vmem:[%s1222_s1] ss:$0 sm:$0xff] (!%p298_p7)  ;;  %v1079_v24 = vld [vmem:[%s1222_s1 + $0x1] ss:$0 sm:$0xff] (!%p298_p7)  ;;  %p331_p8 = scmp.lt.s32.totalorder (!%p298_p7), %s799_s21, 1 }
  0x22   : > { %856 = vmatpush3.bf16.msra.mxu0 (!%p298_p7), %v1057_v20  ;;  %864 = vmatpush3.bf16.msra.mxu1 (!%p298_p7), %v1057_v20  ;;  %s889_s15 = smul.u32 (!%p298_p7), 160, %s304_s12  ;;  %v1084_v25 = vld [vmem:[%s1222_s1 + $0x2] ss:$0 sm:$0xff] (!%p298_p7)  ;;  %v1093_v26 = vld [vmem:[%s1222_s1 + $0x3] ss:$0 sm:$0xff] (!%p298_p7)  ;;  %vm595_vm2 = vcmask (!%p298_p7), 519168  }
  0x23   : > { %857 = vmatprep.subr.bf16.mxu0 (!%p298_p7), %v942_v21  ;;  %865 = vmatprep.subr.bf16.mxu1 (!%p298_p7), %v942_v21  ;;  %v1098_v27 = vld [vmem:[%s1222_s1 + $0x4] ss:$0 sm:$0xff] (!%p298_p7)  ;;  %v1103_v28 = vld [vmem:[%s1222_s1 + $0x5] ss:$0 sm:$0xff] (!%p298_p7)  ;;  %v1108_v29 = vld [vmem:[%s1222_s1 + $0x6] ss:$0 sm:$0xff] (!%p298_p7) }
  0x24   : > { %859 = vmatprep.mubr.msk.bf16.mxu0 (!%p298_p7), %vm943_vm0, %v942_v21  ;;  %867 = vmatprep.mubr.msk.bf16.mxu1 (!%p298_p7), %vm943_vm0, %v942_v21  ;;  %v1113_v30 = vld [vmem:[%s1222_s1 + $0x7] ss:$0 sm:$0xff] (!%p298_p7)  ;;  %s1117_s10 = scalar_lea.vmem (!%p298_p7), [#allocation2], %s889_s15  ;;  %v1137_v44 = vld [vmem:[%s1222_s1 + $0x8] ss:$0 sm:$0xff] (!%p298_p7) }
  0x25   : > { %v337_v31 = vld [vmem:[%s1117_s10] sm:$0x1f] (!%p298_p7)  ;;  %v338_v32 = vld [vmem:[%s1117_s10 + $0x8] sm:$0x1f] (!%p298_p7)  ;;  %v808_v34 = vld [vmem:[%s1117_s10 + $0x30] sm:$0x1f] (!%p298_p7) }
  0x26   : > { %858 = vmatpush3.bf16.msra.mxu0 (!%p298_p7), %v1066_v22  ;;  %866 = vmatpush3.bf16.msra.mxu1 (!%p298_p7), %v1066_v22  ;;  %v807_v33 = vld [vmem:[%s1117_s10 + $0x28] sm:$0x1f] (!%p298_p7)  ;;  %v812_v35 = vld [vmem:[%s1117_s10 + $0x50] sm:$0x1f] (!%p298_p7)  ;;  %v816_v36 = vld [vmem:[%s1117_s10 + $0x78] sm:$0x1f] (!%p298_p7)  ;;  %v363_v37 = vmul.f32 (!%p298_p7), %v1072_v23, %v337_v31  ;;  %v364_v38 = vmul.f32 (!%p298_p7), %v1072_v23, %v338_v32  ;;  %v377_v40 = vmul.f32 (!%p298_p7), %v1079_v24, %v808_v34 }
  0x27   : > { %871 = vmatprep.subr.bf16.mxu0 (!%p298_p7), %v942_v21  ;;  %879 = vmatprep.subr.bf16.mxu1 (!%p298_p7), %v942_v21  ;;  %v376_v39 = vmul.f32 (!%p298_p7), %v1079_v24, %v807_v33  ;;  %v389_v41 = vmul.f32 (!%p298_p7), %v1084_v25, %v337_v31  ;;  %v390_v42 = vmul.f32 (!%p298_p7), %v1084_v25, %v338_v32  ;;  %v339_v45 = vld [vmem:[%s1117_s10 + $0x10] sm:$0x1f] (!%p298_p7)  ;;  %v809_v46 = vld [vmem:[%s1117_s10 + $0x38] sm:$0x1f] (!%p298_p7)  ;;  %v814_v56 = vld [vmem:[%s1117_s10 + $0x60] sm:$0x1f] (!%p298_p7) }
  0x28   : > { %v414_v43 = vmul.f32 %v1093_v26, %v812_v35  ;;  %v427_v48 = vmul.f32 %v1098_v27, %v816_v36  ;;  %v440_v49 = vmul.f32 %v1103_v28, %v812_v35  ;;  %v465_v50 = vmul.f32 %v1108_v29, %v338_v32  ;;  %v813_v51 = vld [vmem:[%s1117_s10 + $0x58] sm:$0x1f]  ;;  %v817_v57 = vld [vmem:[%s1117_s10 + $0x80] sm:$0x1f]  ;;  %v818_v12 = vld [vmem:[%s1117_s10 + $0x88] sm:$0x1f] }
  0x29   : > { %v380_v47 = vadd.f32 %v376_v39, %v363_v37  ;;  %v381_v52 = vadd.f32 %v377_v40, %v364_v38  ;;  %v397_v53 = vrot.slane %v389_v41, 1  ;;  %v398_v54 = vrot.slane %v390_v42, 1  ;;  %v340_v2 = vld [vmem:[%s1117_s10 + $0x18] sm:$0x1f]  ;;  %v810_v11 = vld [vmem:[%s1117_s10 + $0x40] sm:$0x1f] }
  0x2a   : > { %v478_v55 = vmul.f32 %v1113_v30, %v808_v34  ;;  %v448_v58 = vrot.slane %v440_v49, 1  ;;  %v491_v59 = vmul.f32 %v1137_v44, %v338_v32  ;;  %v365_v60 = vmul.f32 %v1072_v23, %v339_v45  ;;  %v815_v40 = vld [vmem:[%s1117_s10 + $0x68] sm:$0x1f]  ;;  %v819_v41 = vld [vmem:[%s1117_s10 + $0x90] sm:$0x1f]  ;;  %s1231_s21 = smov (!%p331_p8, %s799_s21), 1 }
  0x2b   : > { %v378_v61 = vmul.f32 %v1079_v24, %v809_v46  ;;  %v405_v62 = vadd.f32 %v397_v53, %v380_v47  ;;  %v406_v63 = vadd.f32 %v398_v54, %v381_v52  ;;  %v391_v0 = vmul.f32 %v1084_v25, %v339_v45  ;;  %s842_s17 = sshll.u32 %s1231_s21, 4 }
  0x2c   : > { %v415_v1 = vmul.f32 %v1093_v26, %v813_v51  ;;  %v499_v3 = vrot.slane %v491_v59, 1  ;;  %v416_v5 = vmul.f32 %v1093_v26, %v814_v56  ;;  %v428_v6 = vmul.f32 %v1098_v27, %v817_v57  ;;  %v341_v57 = vld [vmem:[%s1117_s10 + $0x20] sm:$0x1f]  ;;  %s335_s18 = scalar_lea.vmem %s1226_s5, %s842_s17 }
  0x2d   : > { %v382_v4 = vadd.f32 %v378_v61, %v365_v60  ;;  %v418_v7 = vadd.f32 %v414_v43, %v405_v62  ;;  %v399_v8 = vrot.slane %v391_v0, 1  ;;  %v441_v10 = vmul.f32 %v1103_v28, %v813_v51  ;;  %v811_v0 = vld [vmem:[%s1117_s10 + $0x48] sm:$0x1f] }
  0x2e   : > { %v419_v9 = vadd.f32 %v415_v1, %v406_v63  ;;  %v466_v13 = vmul.f32 %v1108_v29, %v339_v45  ;;  %v479_v14 = vmul.f32 %v1113_v30, %v809_v46  ;;  %v492_v15 = vmul.f32 %v1137_v44, %v339_v45 }
  0x2f   : > { %v366_v16 = vmul.f32 %v1072_v23, %v340_v2  ;;  %v431_v17 = vadd.f32 %v427_v48, %v418_v7  ;;  %v407_v18 = vadd.f32 %v399_v8, %v382_v4  ;;  %v449_v31 = vrot.slane %v441_v10, 1 }
  0x30   : > { %v432_v19 = vadd.f32 %v428_v6, %v419_v9  ;;  %v500_v32 = vrot.slane %v492_v15, 1  ;;  %v379_v33 = vmul.f32 %v1079_v24, %v810_v11  ;;  %v392_v34 = vmul.f32 %v1084_v25, %v340_v2 }
  0x31   : > { %v429_v35 = vmul.f32 %v1098_v27, %v818_v12  ;;  %v456_v36 = vadd.f32 %v448_v58, %v431_v17  ;;  %v420_v37 = vadd.f32 %v416_v5, %v407_v18  ;;  %v442_v39 = vmul.f32 %v1103_v28, %v814_v56 }
  0x32   : > { %v457_v38 = vadd.f32 %v449_v31, %v432_v19  ;;  %v383_v23 = vadd.f32 %v379_v33, %v366_v16  ;;  %v400_v42 = vrot.slane %v392_v34, 1  ;;  %v467_v43 = vmul.f32 %v1108_v29, %v340_v2 }
  0x33   : > { %v480_v45 = vmul.f32 %v1113_v30, %v810_v11  ;;  %v469_v46 = vadd.f32 %v465_v50, %v456_v36  ;;  %v433_v47 = vadd.f32 %v429_v35, %v420_v37  ;;  %v450_v25 = vrot.slane %v442_v39, 1  ;;  %v829_v50 = vld [vmem:[%s1223_s2] ss:$0 sm:$0xff] }
  0x34   : > { %v470_v24 = vadd.f32 %v466_v13, %v457_v38  ;;  %v408_v48 = vadd.f32 %v400_v42, %v383_v23  ;;  %v493_v49 = vmul.f32 %v1137_v44, %v340_v2  ;;  %v417_v51 = vmul.f32 %v1093_v26, %v815_v40 }
  0x35   : > { %v430_v52 = vmul.f32 %v1098_v27, %v819_v41  ;;  %v482_v53 = vadd.f32 %v478_v55, %v469_v46  ;;  %v458_v56 = vadd.f32 %v450_v25, %v433_v47  ;;  %v443_v58 = vmul.f32 %v1103_v28, %v815_v40 }
  0x36   : > { %v483_v54 = vadd.f32 %v479_v14, %v470_v24  ;;  %v501_v59 = vrot.slane %v493_v49, 1  ;;  %v421_v60 = vadd.f32 %v417_v51, %v408_v48  ;;  %v468_v27 = vmul.f32 %v1108_v29, %v341_v57 }
  0x37   : > { %v507_v61 = vadd.f32 %v499_v3, %v482_v53  ;;  %v471_v63 = vadd.f32 %v467_v43, %v458_v56  ;;  %v451_v1 = vrot.slane %v443_v58, 1  ;;  %v494_v55 = vmul.f32 %v1137_v44, %v341_v57 }
  0x38   : > { %v508_v62 = vadd.f32 %v500_v32, %v483_v54  ;;  %v434_v26 = vadd.f32 %v430_v52, %v421_v60  ;;  %v481_v6 = vmul.f32 %v1113_v30, %v811_v0 }
  0x39   : > { %v518_v2 = vadd.f32 %v829_v50, %v507_v61  ;;  %v484_v5 = vadd.f32 %v480_v45, %v471_v63  ;;  %v502_v10 = vrot.slane %v494_v55, 1 }
  0x3a   : > { %v519_v4 = vadd.f32 %v829_v50, %v508_v62  ;;  %v459_v28 = vadd.f32 %v451_v1, %v434_v26 }
  0x3b   : > { %v522_v7 = vmax.f32 %v518_v2, 0.0  ;;  %v509_v9 = vadd.f32 %v501_v59, %v484_v5 }
  0x3c   : > { %v523_v8 = vmax.f32 %v519_v4, 0.0  ;;  %v472_v3 = vadd.f32 %v468_v27, %v459_v28 }
  0x3d   : > { %v531_v11 = vpack.c.bf16 %v522_v7, %v522_v7  ;;  %v520_v13 = vadd.f32 %v829_v50, %v509_v9 }
  0x3e   : > { %v597_v12 = vpack.c.bf16 %v523_v8, %v523_v8  ;;  %v485_v14 = vadd.f32 %v481_v6, %v472_v3 }
  0x3f   : > { %860 = vmatmul.mubr.msk.bf16.vlgmr.msra.gmra.mrb[0].mxu0 %vm550_vm1, %v531_v11  ;;  %v524_v29 = vmax.f32 %v520_v13, 0.0 }
  0x40   : > { %868 = vmatmul.mubr.msk.bf16.vlgmr.msra.gmra.mrb[0].mxu1 %vm550_vm1, %v597_v12  ;;  %872 = vmatpush3.bf16.msra.mxu0 %v1057_v20  ;;  %v510_v30 = vadd.f32 %v502_v10, %v485_v14 }
  0x41   : > { %880 = vmatpush3.bf16.msra.mxu1 %v1057_v20  ;;  %873 = vmatprep.subr.bf16.mxu0 %v942_v21  ;;  %v644_v15 = vpack.c.bf16 %v524_v29, %v524_v29  ;;  %v830_v20 = vld [vmem:[%s1225_s4] ss:$0 sm:$0xff] }
  0x42   : > { %881 = vmatprep.subr.bf16.mxu1 %v942_v21  ;;  %875 = vmatprep.mubr.msk.bf16.mxu0 %vm943_vm0, %v942_v21  ;;  %v521_v44 = vadd.f32 %v829_v50, %v510_v30 }
  0x43   : > { %883 = vmatprep.mubr.msk.bf16.mxu1 %vm943_vm0, %v942_v21 }
  0x44   : > { %874 = vmatpush3.bf16.msra.mxu0 %v1066_v22  ;;  %v525_v16 = vmax.f32 %v521_v44, 0.0 }
  0x45   : > { %882 = vmatpush3.bf16.msra.mxu1 %v1066_v22 }
  0x46   : > { %v691_v17 = vpack.c.bf16 %v525_v16, %v525_v16 }
  0x47   : > { %876 = vmatmul.mubr.msk.bf16.vlgmr.msra.gmra.mrb[4].mxu0 %vm550_vm1, %v644_v15 }
  0x48   : > { %884 = vmatmul.mubr.msk.bf16.vlgmr.msra.gmra.mrb[4].mxu1 %vm550_vm1, %v691_v17 }
 0x112   : > { %v588_v21 = vpop.f32.mrb[0].mxu0 }
 0x113   : > { %v635_v18 = vpop.f32.mrb[0].mxu1  ;;  %v589_v19 = vadd.f32 %v830_v20, %v588_v21  ;;  %v861_v22 = vpop.f32.mrb[1].mxu0 }
 0x114   : > { %v636_v31 = vadd.f32 %v830_v20, %v635_v18  ;;  %v869_v32 = vpop.f32.mrb[1].mxu1  ;;  %v591_v33 = vpop.f32.mrb[2].mxu0 }
 0x115   : > { %v638_v34 = vpop.f32.mrb[2].mxu1  ;;  %v594_v35 = vmax.f32 %v589_v19, 0.0  ;;  %v862_v37 = vpop.f32.mrb[3].mxu0 }
 0x116   : > { %v641_v36 = vmax.f32 %v636_v31, 0.0  ;;  %v870_v38 = vpop.f32.mrb[3].mxu1 }
 0x117   : > { %596 = vst.msk [vmem:[%s335_s18] sm:$0xf] %vm595_vm2, %v594_v35 }
 0x118   : > { %835 = vst.msk [vmem:[%s335_s18 + $0x4] sm:$0xf] %vm595_vm2, %v641_v36 }
 0x11a   : > { %v682_v39 = vpop.f32.mrb[4].mxu0 }
 0x11b   : > { %v683_v40 = vadd.f32 %v830_v20, %v682_v39  ;;  %v729_v41 = vpop.f32.mrb[4].mxu1  ;;  %v877_v23 = vpop.f32.mrb[5].mxu0 }
 0x11c   : > { %v730_v42 = vadd.f32 %v830_v20, %v729_v41  ;;  %v885_v43 = vpop.f32.mrb[5].mxu1  ;;  %v685_v45 = vpop.f32.mrb[6].mxu0 }
 0x11d   : > { %v688_v46 = vmax.f32 %v683_v40, 0.0  ;;  %v732_v24 = vpop.f32.mrb[6].mxu1  ;;  %v878_v47 = vpop.f32.mrb[7].mxu0 }
 0x11e   : > { %v735_v25 = vmax.f32 %v730_v42, 0.0  ;;  %v886_v48 = vpop.f32.mrb[7].mxu1 }
 0x11f   : > { %837 = vst.msk [vmem:[%s335_s18 + $0x8] sm:$0xf] %vm595_vm2, %v688_v46 }
 0x120   : > { %839 = vst.msk [vmem:[%s335_s18 + $0xc] sm:$0xf] %vm595_vm2, %v735_v25 }
 0x121 PF: > { %p12_p9 = scmp.ge.s32.totalorder %s991_s22, 4   ;;  %s1227_s18 = smov %s936_s19 }
 0x122   : > { %s1228_s19 = smov %s1000_s25  ;;  %s1229_s20 = smov %s991_s22 }
 0x123   :  { %14 = sbr.rel (!%p12_p9) target bundleno = 2 (0x2), region = 119 }

// kernel: mobilenet_v1_forward.20
= control target key start
LH: loop header
LB: loop body
LE: loop exit
PB: predicated region body
PF: predicated region fallthrough
CT: control target
= control target key end

     0   :  { %s875_s18 = smov 0   ;;  %s1062_s0 = inlined_call_operand.vmem [shape: f32[1,2,6,6,64], index: 0, kind: input, shape index: {}]   ;;  %s1063_s1 = inlined_call_operand.vmem [shape: f32[9,64], index: 1, kind: input, shape index: {}]   ;;  %s1064_s2 = inlined_call_operand.vmem [shape: f32[1,64], index: 2, kind: input, shape index: {}]   ;;  %s1065_s3 = inlined_call_operand.vmem [shape: bf16[64,64], index: 3, kind: input, shape index: {}]   ;;  %s1066_s4 = inlined_call_operand.vmem [shape: f32[1,64], index: 4, kind: input, shape index: {}]   ;;  %s1067_s5 = inlined_call_operand.vmem [shape: f32[2,4,4,64], index: 5, kind: output, shape index: {}]  }
   0x1 LB: > { %s719_s19 = sadd.s32 4294967295, %s841_s18   ;;  %p723_p0 = scmp.ge.s32.totalorder %s841_s18, 1  ;;  %s841_s18 = sphi %s875_s18, %s15_s18  }
   0x2   : > { %p187_p1 = scmp.lt.s32.totalorder %s841_s18, 3 }
   0x4   : > { %p188_p2 = pnand %p723_p0, %p187_p1 }
   0x5   : > { %v886_v0 = vld [vmem:[%s1065_s3] sm:$0xff] (!%p188_p2)   ;;  %v843_v1 = vmov (!%p188_p2), 0.0   ;;  %v895_v2 = vld [vmem:[%s1065_s3 + $0x8] sm:$0xff] (!%p188_p2)   ;;  %p215_p3 = scmp.lt.s32.totalorder (!%p188_p2), %s719_s19, 1  ;;  %vm844_vm0 = vmmov (!%p188_p2), 0   ;;  %v910_v3 = vld [vmem:[%s1065_s3 + $0x10] sm:$0xff] (!%p188_p2)  }
   0x6   : > { %191 = sbr.rel (%p188_p2) target bundleno = 279 (0x117), region = 40  ;;  %772 = vmatprep.subr.bf16.mxu0 (!%p188_p2), %v843_v1  ;;  %784 = vmatprep.subr.bf16.mxu1 (!%p188_p2), %v843_v1  ;;  %v918_v4 = vld [vmem:[%s1063_s1] ss:$0 sm:$0xff] (!%p188_p2)  ;;  %v923_v5 = vld [vmem:[%s1063_s1 + $0x1] ss:$0 sm:$0xff] (!%p188_p2)  ;;  %v948_v9 = vld [vmem:[%s1065_s3 + $0x18] sm:$0xff] (!%p188_p2)  }
   0x7   : > { %773 = vmatpush3.bf16.msra.mxu0 (!%p188_p2), %v886_v0  ;;  %785 = vmatpush3.bf16.msra.mxu1 (!%p188_p2), %v886_v0  ;;  %v928_v6 = vld [vmem:[%s1063_s1 + $0x2] ss:$0 sm:$0xff] (!%p188_p2)  ;;  %v938_v7 = vld [vmem:[%s1063_s1 + $0x4] ss:$0 sm:$0xff] (!%p188_p2)  ;;  %v943_v8 = vld [vmem:[%s1063_s1 + $0x5] ss:$0 sm:$0xff] (!%p188_p2) }
   0x8   : > { %774 = vmatprep.subr.bf16.mxu0 (!%p188_p2), %v843_v1  ;;  %786 = vmatprep.subr.bf16.mxu1 (!%p188_p2), %v843_v1  ;;  %v954_v11 = vld [vmem:[%s1063_s1 + $0x7] ss:$0 sm:$0xff] (!%p188_p2)  ;;  %v965_v16 = vld [vmem:[%s1063_s1 + $0x3] ss:$0 sm:$0xff] (!%p188_p2)  ;;  %v970_v17 = vld [vmem:[%s1063_s1 + $0x8] ss:$0 sm:$0xff] (!%p188_p2) }
   0x9   : > { %780 = vmatprep.mubr.msk.bf16.mxu0 (!%p188_p2), %vm844_vm0, %v843_v1  ;;  %792 = vmatprep.mubr.msk.bf16.mxu1 (!%p188_p2), %vm844_vm0, %v843_v1  ;;  %v980_v23 = vld [vmem:[%s1063_s1 + $0x6] ss:$0 sm:$0xff] (!%p188_p2)  ;;  %vm476_vm1 = vcmask (!%p188_p2), 523264   ;;  %vm521_vm2 = vcmask (!%p188_p2), 519168  }
   0xb   : > { %775 = vmatpush3.bf16.msra.mxu0 (!%p188_p2), %v895_v2  ;;  %787 = vmatpush3.bf16.msra.mxu1 (!%p188_p2), %v895_v2 }
   0xc   : > { %776 = vmatprep.subr.bf16.mxu0 (!%p188_p2), %v843_v1  ;;  %788 = vmatprep.subr.bf16.mxu1 (!%p188_p2), %v843_v1 }
   0xd   : > { %s1069_s19 = smov (!%p215_p3, %s719_s19), 1 }
   0xe   : > { %s820_s26 = smul.u32 48, %s1069_s19  ;;  %s751_s6 = sshll.u32 %s1069_s19, 4 }
   0xf   : > { %777 = vmatpush3.bf16.msra.mxu0 %v910_v3  ;;  %789 = vmatpush3.bf16.msra.mxu1 %v910_v3  ;;  %s224_s9 = scalar_lea.vmem %s1067_s5, %s751_s6 }
  0x10   : > { %s933_s10 = scalar_lea.vmem %s1062_s0, %s820_s26  ;;  %778 = vmatprep.subr.bf16.mxu0 %v843_v1  ;;  %790 = vmatprep.subr.bf16.mxu1 %v843_v1 }
  0x11   : > { %v226_v10 = vld [vmem:[%s933_s10] sm:$0x3f]  ;;  %v227_v12 = vld [vmem:[%s933_s10 + $0x8] sm:$0x3f]  ;;  %v228_v18 = vld [vmem:[%s933_s10 + $0x10] sm:$0x3f] }
  0x12   : > { %v237_v13 = vmul.f32 %v918_v4, %v226_v10  ;;  %v250_v14 = vmul.f32 %v923_v5, %v226_v10  ;;  %v275_v15 = vmul.f32 %v928_v6, %v226_v10  ;;  %v313_v19 = vmul.f32 %v938_v7, %v227_v12  ;;  %v229_v29 = vld [vmem:[%s933_s10 + $0x18] sm:$0x3f]  ;;  %v230_v62 = vld [vmem:[%s933_s10 + $0x20] sm:$0x3f] }
  0x13   : > { %v338_v20 = vmul.f32 %v943_v8, %v227_v12  ;;  %v376_v24 = vmul.f32 %v954_v11, %v228_v18  ;;  %v300_v25 = vmul.f32 %v965_v16, %v227_v12  ;;  %v985_v26 = vmul.f32 %v970_v17, %v228_v18  ;;  %779 = vmatpush3.bf16.msra.mxu0 %v948_v9 }
  0x14   : > { %v258_v21 = vrot.slane %v250_v14, 1  ;;  %v283_v22 = vrot.slane %v275_v15, 2  ;;  %v238_v27 = vmul.f32 %v918_v4, %v227_v12  ;;  %791 = vmatpush3.bf16.msra.mxu1 %v948_v9  ;;  %v251_v30 = vmul.f32 %v923_v5, %v227_v12  ;;  %796 = vmatprep.subr.bf16.mxu0 %v843_v1 }
  0x15   : > { %v276_v31 = vmul.f32 %v928_v6, %v227_v12  ;;  %808 = vmatprep.subr.bf16.mxu1 %v843_v1  ;;  %v321_v32 = vrot.slane %v313_v19, 1  ;;  %v346_v33 = vrot.slane %v338_v20, 2  ;;  %v363_v34 = vmul.f32 %v980_v23, %v228_v18 }
  0x16   : > { %v266_v28 = vadd.f32 %v258_v21, %v237_v13  ;;  %v314_v35 = vmul.f32 %v938_v7, %v228_v18  ;;  %v384_v37 = vrot.slane %v376_v24, 1  ;;  %v259_v38 = vrot.slane %v251_v30, 1 }
  0x17   : > { %v284_v39 = vrot.slane %v276_v31, 2  ;;  %v409_v40 = vrot.slane %v985_v26, 2  ;;  %v301_v41 = vmul.f32 %v965_v16, %v228_v18  ;;  %v339_v42 = vmul.f32 %v943_v8, %v228_v18 }
  0x18   : > { %v291_v36 = vadd.f32 %v283_v22, %v266_v28  ;;  %v377_v43 = vmul.f32 %v954_v11, %v229_v29  ;;  %v267_v45 = vadd.f32 %v259_v38, %v238_v27  ;;  %v239_v46 = vmul.f32 %v918_v4, %v228_v18 }
  0x19   : > { %v252_v47 = vmul.f32 %v923_v5, %v228_v18  ;;  %v322_v48 = vrot.slane %v314_v35, 1  ;;  %v364_v49 = vmul.f32 %v980_v23, %v229_v29  ;;  %v402_v50 = vmul.f32 %v970_v17, %v229_v29 }
  0x1a   : > { %v304_v44 = vadd.f32 %v300_v25, %v291_v36  ;;  %v277_v51 = vmul.f32 %v928_v6, %v228_v18  ;;  %v292_v53 = vadd.f32 %v284_v39, %v267_v45  ;;  %v315_v55 = vmul.f32 %v938_v7, %v229_v29 }
  0x1b   : > { %v260_v54 = vrot.slane %v252_v47, 1  ;;  %v347_v56 = vrot.slane %v339_v42, 2  ;;  %v385_v57 = vrot.slane %v377_v43, 1  ;;  %v340_v59 = vmul.f32 %v943_v8, %v229_v29 }
  0x1c   : > { %v329_v52 = vadd.f32 %v321_v32, %v304_v44  ;;  %v285_v58 = vrot.slane %v277_v51, 2  ;;  %v305_v61 = vadd.f32 %v301_v41, %v292_v53  ;;  %v302_v10 = vmul.f32 %v965_v16, %v229_v29 }
  0x1d   : > { %v268_v63 = vadd.f32 %v260_v54, %v239_v46  ;;  %v410_v12 = vrot.slane %v402_v50, 2  ;;  %v323_v13 = vrot.slane %v315_v55, 1  ;;  %v365_v14 = vmul.f32 %v980_v23, %v230_v62 }
  0x1e   : > { %v354_v60 = vadd.f32 %v346_v33, %v329_v52  ;;  %v240_v15 = vmul.f32 %v918_v4, %v229_v29  ;;  %v330_v19 = vadd.f32 %v322_v48, %v305_v61  ;;  %v253_v21 = vmul.f32 %v923_v5, %v229_v29  ;;  %v736_v4 = vld [vmem:[%s1064_s2] ss:$0 sm:$0xff] }
  0x1f   : > { %v293_v20 = vadd.f32 %v285_v58, %v268_v63  ;;  %v348_v22 = vrot.slane %v340_v59, 2  ;;  %v378_v24 = vmul.f32 %v954_v11, %v230_v62  ;;  %v278_v25 = vmul.f32 %v928_v6, %v229_v29  ;;  %v231_v29 = vld [vmem:[%s933_s10 + $0x28] sm:$0x3f] }
  0x20   : > { %v367_v18 = vadd.f32 %v363_v34, %v354_v60  ;;  %v316_v26 = vmul.f32 %v938_v7, %v230_v62  ;;  %v355_v28 = vadd.f32 %v347_v56, %v330_v19  ;;  %v261_v31 = vrot.slane %v253_v21, 1 }
  0x21   : > { %v306_v30 = vadd.f32 %v302_v10, %v293_v20  ;;  %v403_v32 = vmul.f32 %v970_v17, %v230_v62  ;;  %v286_v33 = vrot.slane %v278_v25, 2  ;;  %v303_v5 = vmul.f32 %v965_v16, %v230_v62 }
  0x22   : > { %v392_v27 = vadd.f32 %v384_v37, %v367_v18  ;;  %v341_v34 = vmul.f32 %v943_v8, %v230_v62  ;;  %v368_v36 = vadd.f32 %v364_v49, %v355_v28  ;;  %v269_v7 = vadd.f32 %v261_v31, %v240_v15 }
  0x23   : > { %v331_v6 = vadd.f32 %v323_v13, %v306_v30  ;;  %v386_v37 = vrot.slane %v378_v24, 1  ;;  %v324_v38 = vrot.slane %v316_v26, 1  ;;  %v411_v44 = vrot.slane %v403_v32, 2 }
  0x24   : > { %v417_v35 = vadd.f32 %v409_v40, %v392_v27  ;;  %v393_v41 = vadd.f32 %v385_v57, %v368_v36  ;;  %v294_v43 = vadd.f32 %v286_v33, %v269_v7  ;;  %v349_v45 = vrot.slane %v341_v34, 2 }
  0x25   : > { %v356_v42 = vadd.f32 %v348_v22, %v331_v6  ;;  %v379_v46 = vmul.f32 %v954_v11, %v231_v29  ;;  %v366_v8 = vmul.f32 %v980_v23, %v231_v29  ;;  %v404_v40 = vmul.f32 %v970_v17, %v231_v29 }
  0x26   : > { %v428_v39 = vadd.f32 %v736_v4, %v417_v35  ;;  %v418_v48 = vadd.f32 %v410_v12, %v393_v41  ;;  %v307_v50 = vadd.f32 %v303_v5, %v294_v43 }
  0x27   : > { %v369_v16 = vadd.f32 %v365_v14, %v356_v42  ;;  %v387_v57 = vrot.slane %v379_v46, 1  ;;  %v412_v17 = vrot.slane %v404_v40, 2 }
  0x28   : > { %v432_v47 = vmax.f32 %v428_v39, 0.0  ;;  %v429_v51 = vadd.f32 %v736_v4, %v418_v48  ;;  %v332_v53 = vadd.f32 %v324_v38, %v307_v50 }
  0x29   : > { %v394_v52 = vadd.f32 %v386_v37, %v369_v16 }
  0x2a   : > { %v445_v49 = vpack.c.bf16 %v432_v47, %v432_v47  ;;  %v433_v54 = vmax.f32 %v429_v51, 0.0  ;;  %v357_v56 = vadd.f32 %v349_v45, %v332_v53 }
  0x2b   : > { %v419_v55 = vadd.f32 %v411_v44, %v394_v52 }
  0x2c   : > { %781 = vmatmul.mubr.msk.bf16.vlgmr.msra.gmra.mrb[0].mxu0 %vm476_vm1, %v445_v49  ;;  %v523_v11 = vpack.c.bf16 %v433_v54, %v433_v54  ;;  %v370_v23 = vadd.f32 %v366_v8, %v357_v56 }
  0x2d   : > { %797 = vmatpush3.bf16.msra.mxu0 %v886_v0  ;;  %804 = vmatprep.mubr.msk.bf16.mxu0 %vm844_vm0, %v843_v1  ;;  %v430_v58 = vadd.f32 %v736_v4, %v419_v55 }
  0x2e   : > { %798 = vmatprep.subr.bf16.mxu0 %v843_v1  ;;  %793 = vmatmul.mubr.msk.bf16.vlgmr.msra.gmra.mrb[0].mxu1 %vm476_vm1, %v523_v11  ;;  %v395_v59 = vadd.f32 %v387_v57, %v370_v23 }
  0x2f   : > { %809 = vmatpush3.bf16.msra.mxu1 %v886_v0  ;;  %816 = vmatprep.mubr.msk.bf16.mxu1 %vm844_vm0, %v843_v1  ;;  %v434_v61 = vmax.f32 %v430_v58, 0.0 }
  0x30   : > { %810 = vmatprep.subr.bf16.mxu1 %v843_v1  ;;  %v420_v60 = vadd.f32 %v412_v17, %v395_v59 }
  0x31   : > { %799 = vmatpush3.bf16.msra.mxu0 %v895_v2  ;;  %v570_v0 = vpack.c.bf16 %v434_v61, %v434_v61 }
  0x32   : > { %800 = vmatprep.subr.bf16.mxu0 %v843_v1  ;;  %v431_v62 = vadd.f32 %v736_v4, %v420_v60 }
  0x33   : > { %811 = vmatpush3.bf16.msra.mxu1 %v895_v2  ;;  %v737_v2 = vld [vmem:[%s1066_s4] ss:$0 sm:$0xff] }
  0x34   : > { %812 = vmatprep.subr.bf16.mxu1 %v843_v1  ;;  %v435_v63 = vmax.f32 %v431_v62, 0.0 }
  0x35   : > { %801 = vmatpush3.bf16.msra.mxu0 %v910_v3 }
  0x36   : > { %802 = vmatprep.subr.bf16.mxu0 %v843_v1  ;;  %v617_v10 = vpack.c.bf16 %v435_v63, %v435_v63 }
  0x37   : > { %813 = vmatpush3.bf16.msra.mxu1 %v910_v3 }
  0x38   : > { %814 = vmatprep.subr.bf16.mxu1 %v843_v1 }
  0x39   : > { %803 = vmatpush3.bf16.msra.mxu0 %v948_v9 }
  0x3b   : > { %815 = vmatpush3.bf16.msra.mxu1 %v948_v9 }
  0x3c   : > { %805 = vmatmul.mubr.msk.bf16.vlgmr.msra.gmra.mrb[4].mxu0 %vm476_vm1, %v570_v0 }
  0x3e   : > { %817 = vmatmul.mubr.msk.bf16.vlgmr.msra.gmra.mrb[4].mxu1 %vm476_vm1, %v617_v10 }
  0xff   : > { %v514_v12 = vpop.f32.mrb[0].mxu0 }
 0x100   : > { %v515_v13 = vadd.f32 %v737_v2, %v514_v12  ;;  %v782_v14 = vpop.f32.mrb[1].mxu0 }
 0x101   : > { %v517_v1 = vpop.f32.mrb[2].mxu0  ;;  %v561_v18 = vpop.f32.mrb[0].mxu1 }
 0x102   : > { %v520_v3 = vmax.f32 %v515_v13, 0.0  ;;  %v783_v15 = vpop.f32.mrb[3].mxu0  ;;  %v562_v9 = vadd.f32 %v737_v2, %v561_v18  ;;  %v794_v19 = vpop.f32.mrb[1].mxu1 }
 0x103   : > { %v564_v20 = vpop.f32.mrb[2].mxu1 }
 0x104   : > { %522 = vst.msk [vmem:[%s224_s9] sm:$0xf] %vm521_vm2, %v520_v3  ;;  %v567_v21 = vmax.f32 %v562_v9, 0.0  ;;  %v795_v22 = vpop.f32.mrb[3].mxu1 }
 0x106   : > { %744 = vst.msk [vmem:[%s224_s9 + $0x4] sm:$0xf] %vm521_vm2, %v567_v21 }
 0x10f   : > { %v608_v24 = vpop.f32.mrb[4].mxu0 }
 0x110   : > { %v609_v25 = vadd.f32 %v737_v2, %v608_v24  ;;  %v806_v26 = vpop.f32.mrb[5].mxu0 }
 0x111   : > { %v611_v27 = vpop.f32.mrb[6].mxu0  ;;  %v655_v31 = vpop.f32.mrb[4].mxu1 }
 0x112   : > { %v614_v28 = vmax.f32 %v609_v25, 0.0  ;;  %v807_v30 = vpop.f32.mrb[7].mxu0  ;;  %v656_v4 = vadd.f32 %v737_v2, %v655_v31  ;;  %v818_v32 = vpop.f32.mrb[5].mxu1 }
 0x113   : > { %v658_v33 = vpop.f32.mrb[6].mxu1 }
 0x114   : > { %746 = vst.msk [vmem:[%s224_s9 + $0x8] sm:$0xf] %vm521_vm2, %v614_v28  ;;  %v661_v5 = vmax.f32 %v656_v4, 0.0  ;;  %v819_v34 = vpop.f32.mrb[7].mxu1 }
 0x116   : > { %748 = vst.msk [vmem:[%s224_s9 + $0xc] sm:$0xf] %vm521_vm2, %v661_v5 }
 0x117 PF: > { %s15_s18 = sadd.s32 1, %s841_s18  }
 0x118   : > { %p12_p4 = scmp.ge.s32.totalorder %s15_s18, 4  }
 0x11a   :  { %14 = sbr.rel (!%p12_p4) target bundleno = 1 (0x1), region = 73 }

// kernel: mobilenet_v1_forward.21
= control target key start
LH: loop header
LB: loop body
LE: loop exit
PB: predicated region body
PF: predicated region fallthrough
CT: control target
= control target key end

     0   :  { %s788_s18 = smov 0   ;;  %s790_s19 = smov 0   ;;  %s899_s0 = inlined_call_operand.vmem [shape: f32[4,2,3,3,64], index: 0, kind: input, shape index: {}]   ;;  %s900_s1 = inlined_call_operand.vmem [shape: f32[9,64], index: 1, kind: input, shape index: {}]   ;;  %s901_s2 = inlined_call_operand.vmem [shape: f32[1,64], index: 2, kind: input, shape index: {}]   ;;  %s902_s3 = inlined_call_operand.vmem [shape: bf16[64,128], index: 3, kind: input, shape index: {}]   ;;  %s903_s4 = inlined_call_operand.vmem [shape: f32[1,128], index: 4, kind: input, shape index: {}]   ;;  %s904_s5 = inlined_call_operand.vmem [shape: f32[2,2,2,128], index: 5, kind: output, shape index: {}]  }
   0x1   :  { %s792_s20 = smov 0  }
   0x2 LB: > { %s629_s21 = sadd.s32 4294967295, %s754_s20   ;;  %s805_s22 = sadd.s32 1, %s754_s20   ;;  %s754_s20 = sphi %s792_s20, %s907_s20   ;;  %s750_s19 = sphi %s790_s19, %s906_s19   ;;  %s746_s18 = sphi %s788_s18, %s905_s18  }
   0x3   : > { %s19_s23 = ssub.s32 %s754_s20, %s805_s22  ;;  %s22_s24 = sadd.s32 1, %s750_s19 }
   0x4   : > { %p20_p0 = scmp.eq.s32.totalorder %s19_s23, 0  ;;  %p29_p1 = scmp.ne.s32.totalorder %s750_s19, %s746_s18 }
   0x5   : > { %p30_p2 = scmp.eq.s32.totalorder %s754_s20, 0  ;;  %p632_p4 = scmp.ge.s32.totalorder %s754_s20, 2 }
   0x6   : > { %s814_s25 = scalar_select %p20_p0, %s750_s19, %s22_s24  }
   0x7   : > { %p31_p3 = por %p30_p2, %p29_p1  ;;  %177 = sbr.rel (%p632_p4) target bundleno = 23 (0x17), region = 32 }
   0xe   : > { %180 = sbr.rel (!%p31_p3) target bundleno = 23 (0x17), region = 36  ;;  %s182_s26 = sand.u32 (%p31_p3), 1, %s750_s19  }
   0xf   : > { %s700_s27 = smul.u32 (%p31_p3), 12, %s754_s20 }
  0x10   : > { %s699_s28 = smul.u32 (%p31_p3), 48, %s182_s26 }
  0x11   : > { %s187_s6 = scalar_lea.vmem (%p31_p3), %s899_s0, %s700_s27 }
  0x12   : > { %v203_v0 = vld [vmem:[%s187_s6] sm:$0xff] (%p31_p3)   ;;  %v207_v1 = vld [vmem:[%s187_s6 + $0x8] sm:$0xf] (%p31_p3)  ;;  %v209_v2 = vld [vmem:[%s187_s6 + $0x18] sm:$0xff] (%p31_p3)   ;;  %s184_s7 = scalar_lea.vmem (%p31_p3), [#allocation2], %s699_s28 }
  0x13   : > { %204 = vst [vmem:[%s184_s7] sm:$0xff] (%p31_p3), %v203_v0   ;;  %208 = vst [vmem:[%s184_s7 + $0x8] sm:$0xf] (%p31_p3), %v207_v1  ;;  %v213_v3 = vld [vmem:[%s187_s6 + $0x20] sm:$0xf] (%p31_p3)  ;;  %v215_v4 = vld [vmem:[%s187_s6 + $0x30] sm:$0xff] (%p31_p3)  }
  0x14   : > { %210 = vst [vmem:[%s184_s7 + $0xc] sm:$0xff] (%p31_p3), %v209_v2   ;;  %v219_v5 = vld [vmem:[%s187_s6 + $0x38] sm:$0xf] (%p31_p3)  ;;  %214 = vst [vmem:[%s184_s7 + $0x14] sm:$0xf] (%p31_p3), %v213_v3  ;;  %v221_v6 = vld [vmem:[%s187_s6 + $0x48] sm:$0xff] (%p31_p3)  }
  0x15   : > { %216 = vst [vmem:[%s184_s7 + $0x18] sm:$0xff] %v215_v4   ;;  %220 = vst [vmem:[%s184_s7 + $0x20] sm:$0xf] %v219_v5  ;;  %v225_v7 = vld [vmem:[%s187_s6 + $0x50] sm:$0xf] }
  0x16   : > { %222 = vst [vmem:[%s184_s7 + $0x24] sm:$0xff] %v221_v6   ;;  %226 = vst [vmem:[%s184_s7 + $0x2c] sm:$0xf] %v225_v7 }
  0x17 PF: > { %p634_p5 = scmp.ge.s32.totalorder %s754_s20, 1  ;;  %p272_p6 = scmp.lt.s32.totalorder %s754_s20, 3 }
  0x19   : > { %p273_p7 = pnand %p634_p5, %p272_p6 }
  0x1a   : > { %v728_v8 = vld [vmem:[%s902_s3] sm:$0xff] (!%p273_p7)   ;;  %v756_v9 = vmov (!%p273_p7), 0.0   ;;  %v729_v10 = vld [vmem:[%s902_s3 + $0x8] sm:$0xff] (!%p273_p7)   ;;  %s279_s12 = sand.u32 (!%p273_p7), 1, %s746_s18   ;;  %vm757_vm0 = vmmov (!%p273_p7), 0   ;;  %v730_v13 = vld [vmem:[%s902_s3 + $0x10] sm:$0xff] (!%p273_p7)  }
  0x1b   : > { %276 = sbr.rel (%p273_p7) target bundleno = 274 (0x112), region = 77  ;;  %675 = vmatprep.subr.bf16.mxu0 (!%p273_p7), %v756_v9  ;;  %687 = vmatprep.subr.bf16.mxu1 (!%p273_p7), %v756_v9  ;;  %v644_v11 = vld [vmem:[%s900_s1] ss:$0 sm:$0xff] (!%p273_p7)  ;;  %v645_v12 = vld [vmem:[%s900_s1 + $0x1] ss:$0 sm:$0xff] (!%p273_p7)  ;;  %v731_v32 = vld [vmem:[%s902_s3 + $0x18] sm:$0xff] (!%p273_p7)  }
  0x1c   : > { %676 = vmatpush3.bf16.msra.mxu0 (!%p273_p7), %v728_v8  ;;  %688 = vmatpush3.bf16.msra.mxu1 (!%p273_p7), %v728_v8  ;;  %s701_s13 = smul.u32 (!%p273_p7), 48, %s279_s12  ;;  %v646_v14 = vld [vmem:[%s900_s1 + $0x2] ss:$0 sm:$0xff] (!%p273_p7)  ;;  %v647_v15 = vld [vmem:[%s900_s1 + $0x3] ss:$0 sm:$0xff] (!%p273_p7)  ;;  %vm475_vm1 = vcmask (!%p273_p7), 523264  }
  0x1d   : > { %677 = vmatprep.subr.bf16.mxu0 (!%p273_p7), %v756_v9  ;;  %689 = vmatprep.subr.bf16.mxu1 (!%p273_p7), %v756_v9  ;;  %v649_v27 = vld [vmem:[%s900_s1 + $0x5] ss:$0 sm:$0xff] (!%p273_p7)  ;;  %v648_v31 = vld [vmem:[%s900_s1 + $0x4] ss:$0 sm:$0xff] (!%p273_p7)  ;;  %v650_v44 = vld [vmem:[%s900_s1 + $0x6] ss:$0 sm:$0xff] (!%p273_p7) }
  0x1e   : > { %683 = vmatprep.mubr.msk.bf16.mxu0 (!%p273_p7), %vm757_vm0, %v756_v9  ;;  %695 = vmatprep.mubr.msk.bf16.mxu1 (!%p273_p7), %vm757_vm0, %v756_v9  ;;  %s846_s29 = scalar_lea.vmem (!%p273_p7), [#allocation2], %s701_s13  ;;  %v652_v45 = vld [vmem:[%s900_s1 + $0x8] ss:$0 sm:$0xff] (!%p273_p7)  ;;  %v651_v53 = vld [vmem:[%s900_s1 + $0x7] ss:$0 sm:$0xff] (!%p273_p7)  ;;  %p306_p8 = scmp.lt.s32.totalorder (!%p273_p7), %s629_s21, 1 }
  0x1f   : > { %v312_v16 = vld [vmem:[%s846_s29] sm:$0x7] (!%p273_p7)  ;;  %v313_v17 = vld [vmem:[%s846_s29 + $0x4] sm:$0x7] (!%p273_p7)  ;;  %v637_v18 = vld [vmem:[%s846_s29 + $0xc] sm:$0x7] (!%p273_p7) }
  0x20   : > { %678 = vmatpush3.bf16.msra.mxu0 (!%p273_p7), %v729_v10  ;;  %690 = vmatpush3.bf16.msra.mxu1 (!%p273_p7), %v729_v10  ;;  %v638_v19 = vld [vmem:[%s846_s29 + $0x10] sm:$0x7] (!%p273_p7)  ;;  %v640_v20 = vld [vmem:[%s846_s29 + $0x18] sm:$0x7] (!%p273_p7)  ;;  %v330_v21 = vmul.f32 (!%p273_p7), %v644_v11, %v312_v16  ;;  %v331_v22 = vmul.f32 (!%p273_p7), %v644_v11, %v313_v17  ;;  %v339_v23 = vmul.f32 (!%p273_p7), %v645_v12, %v637_v18  ;;  %v642_v28 = vld [vmem:[%s846_s29 + $0x24] sm:$0x7] (!%p273_p7) }
  0x21   : > { %679 = vmatprep.subr.bf16.mxu0 (!%p273_p7), %v756_v9  ;;  %691 = vmatprep.subr.bf16.mxu1 (!%p273_p7), %v756_v9  ;;  %v340_v24 = vmul.f32 (!%p273_p7), %v645_v12, %v638_v19  ;;  %v348_v25 = vmul.f32 (!%p273_p7), %v646_v14, %v312_v16  ;;  %v349_v26 = vmul.f32 (!%p273_p7), %v646_v14, %v313_v17  ;;  %v641_v37 = vld [vmem:[%s846_s29 + $0x1c] sm:$0x7] (!%p273_p7)  ;;  %v643_v38 = vld [vmem:[%s846_s29 + $0x28] sm:$0x7] (!%p273_p7)  ;;  %v639_v55 = vld [vmem:[%s846_s29 + $0x14] sm:$0x7] (!%p273_p7) }
  0x22   : > { %v341_v29 = vadd.f32 %v339_v23, %v330_v21  ;;  %v363_v30 = vmul.f32 %v647_v15, %v640_v20  ;;  %v381_v36 = vmul.f32 %v649_v27, %v640_v20  ;;  %v364_v39 = vmul.f32 %v647_v15, %v641_v37  ;;  %v314_v47 = vld [vmem:[%s846_s29 + $0x8] sm:$0x7]  ;;  %v653_v6 = vld [vmem:[%s901_s2] ss:$0 sm:$0xff]  ;;  %s909_s21 = smov (!%p306_p8, %s629_s21), 1 }
  0x23   : > { %v342_v33 = vadd.f32 %v340_v24, %v331_v22  ;;  %v352_v34 = vrot.slane %v348_v25, 1  ;;  %v353_v35 = vrot.slane %v349_v26, 1  ;;  %v382_v40 = vmul.f32 %v649_v27, %v641_v37  ;;  %v654_v15 = vld [vmem:[%s903_s4] ss:$0 sm:$0xff]  ;;  %s664_s18 = sshll.u32 %s909_s21, 2 }
  0x24   : > { %680 = vmatpush3.bf16.msra.mxu0 %v730_v13  ;;  %692 = vmatpush3.bf16.msra.mxu1 %v730_v13  ;;  %v372_v43 = vmul.f32 %v648_v31, %v642_v28  ;;  %v373_v46 = vmul.f32 %v648_v31, %v643_v38  ;;  %v385_v49 = vrot.slane %v381_v36, 1  ;;  %v396_v52 = vmul.f32 %v650_v44, %v313_v17  ;;  %s310_s29 = scalar_lea.vmem %s904_s5, %s664_s18 }
  0x25   : > { %681 = vmatprep.subr.bf16.mxu0 %v756_v9  ;;  %693 = vmatprep.subr.bf16.mxu1 %v756_v9  ;;  %v356_v41 = vadd.f32 %v352_v34, %v341_v29  ;;  %v357_v42 = vadd.f32 %v353_v35, %v342_v33  ;;  %v386_v51 = vrot.slane %v382_v40, 1  ;;  %v414_v54 = vmul.f32 %v652_v45, %v313_v17 }
  0x26   : > { %v397_v58 = vmul.f32 %v650_v44, %v314_v47  ;;  %v415_v59 = vmul.f32 %v652_v45, %v314_v47  ;;  %v405_v61 = vmul.f32 %v651_v53, %v638_v19  ;;  %v406_v63 = vmul.f32 %v651_v53, %v639_v55 }
  0x27   : > { %v365_v48 = vadd.f32 %v363_v30, %v356_v41  ;;  %v366_v50 = vadd.f32 %v364_v39, %v357_v42  ;;  %v418_v1 = vrot.slane %v414_v54, 1 }
  0x28   : > { %682 = vmatpush3.bf16.msra.mxu0 %v731_v32  ;;  %694 = vmatpush3.bf16.msra.mxu1 %v731_v32  ;;  %v419_v3 = vrot.slane %v415_v59, 1 }
  0x29   : > { %v374_v56 = vadd.f32 %v372_v43, %v365_v48  ;;  %v375_v57 = vadd.f32 %v373_v46, %v366_v50 }
  0x2b   : > { %v389_v60 = vadd.f32 %v385_v49, %v374_v56  ;;  %v390_v62 = vadd.f32 %v386_v51, %v375_v57 }
  0x2d   : > { %v398_v0 = vadd.f32 %v396_v52, %v389_v60  ;;  %v399_v2 = vadd.f32 %v397_v58, %v390_v62 }
  0x2f   : > { %v407_v4 = vadd.f32 %v405_v61, %v398_v0  ;;  %v408_v5 = vadd.f32 %v406_v63, %v399_v2 }
  0x31   : > { %v422_v7 = vadd.f32 %v418_v1, %v407_v4  ;;  %v423_v8 = vadd.f32 %v419_v3, %v408_v5 }
  0x33   : > { %v431_v9 = vadd.f32 %v653_v6, %v422_v7  ;;  %v432_v10 = vadd.f32 %v653_v6, %v423_v8 }
  0x35   : > { %v433_v11 = vmax.f32 %v431_v9, 0.0  ;;  %v434_v12 = vmax.f32 %v432_v10, 0.0 }
  0x37   : > { %v444_v13 = vpack.c.bf16 %v433_v11, %v433_v11  ;;  %v521_v14 = vpack.c.bf16 %v434_v12, %v434_v12 }
  0x39   : > { %684 = vmatmul.mubr.msk.bf16.vlgmr.msra.gmra.mrb[0].mxu0 %vm475_vm1, %v444_v13  ;;  %696 = vmatmul.mubr.msk.bf16.vlgmr.msra.gmra.mrb[0].mxu1 %vm475_vm1, %v521_v14 }
 0x10c   : > { %v513_v16 = vpop.f32.mrb[0].mxu0  ;;  %v559_v17 = vpop.f32.mrb[0].mxu1 }
 0x10d   : > { %v514_v18 = vadd.f32 %v654_v15, %v513_v16  ;;  %v560_v19 = vadd.f32 %v654_v15, %v559_v17  ;;  %v685_v20 = vpop.f32.mrb[1].mxu0  ;;  %v697_v21 = vpop.f32.mrb[1].mxu1 }
 0x10e   : > { %v516_v22 = vpop.f32.mrb[2].mxu0  ;;  %v562_v23 = vpop.f32.mrb[2].mxu1 }
 0x10f   : > { %v519_v24 = vmax.f32 %v514_v18, 0.0  ;;  %v565_v25 = vmax.f32 %v560_v19, 0.0  ;;  %v686_v26 = vpop.f32.mrb[3].mxu0  ;;  %v698_v27 = vpop.f32.mrb[3].mxu1 }
 0x111   : > { %520 = vst [vmem:[%s310_s29] sm:$0x3] %v519_v24  ;;  %661 = vst [vmem:[%s310_s29 + $0x2] sm:$0x3] %v565_v25 }
 0x112 PF: > { %p12_p9 = scmp.ge.s32.totalorder %s805_s22, 4   ;;  %s905_s18 = smov %s750_s19 }
 0x113   : > { %s906_s19 = smov %s814_s25  ;;  %s907_s20 = smov %s805_s22 }
 0x114   :  { %14 = sbr.rel (!%p12_p9) target bundleno = 2 (0x2), region = 120 }

// kernel: mobilenet_v1_forward.22
= control target key start
LH: loop header
LB: loop body
LE: loop exit
PB: predicated region body
PF: predicated region fallthrough
CT: control target
= control target key end

     0   :  { %s720_s18 = smov 0   ;;  %s822_s0 = inlined_call_operand.vmem [shape: f32[1,2,4,4,128], index: 0, kind: input, shape index: {}]   ;;  %s823_s1 = inlined_call_operand.vmem [shape: f32[9,128], index: 1, kind: input, shape index: {}]   ;;  %s824_s2 = inlined_call_operand.vmem [shape: f32[1,128], index: 2, kind: input, shape index: {}]   ;;  %s825_s3 = inlined_call_operand.vmem [shape: bf16[128,128], index: 3, kind: input, shape index: {}]   ;;  %s826_s4 = inlined_call_operand.vmem [shape: f32[1,128], index: 4, kind: input, shape index: {}]   ;;  %s827_s5 = inlined_call_operand.vmem [shape: f32[2,2,2,128], index: 5, kind: output, shape index: {}]  }
   0x1 LB: > { %s571_s19 = sadd.s32 4294967295, %s686_s18   ;;  %p575_p0 = scmp.ge.s32.totalorder %s686_s18, 1  ;;  %s686_s18 = sphi %s720_s18, %s15_s18  }
   0x2   : > { %p187_p1 = scmp.lt.s32.totalorder %s686_s18, 3 }
   0x4   : > { %p188_p2 = pnand %p575_p0, %p187_p1 }
   0x5   : > { %v672_v0 = vld [vmem:[%s825_s3] sm:$0xff] (!%p188_p2)   ;;  %v688_v1 = vmov (!%p188_p2), 0.0   ;;  %v673_v2 = vld [vmem:[%s825_s3 + $0x8] sm:$0xff] (!%p188_p2)   ;;  %p215_p3 = scmp.lt.s32.totalorder (!%p188_p2), %s571_s19, 1  ;;  %vm689_vm0 = vmmov (!%p188_p2), 0   ;;  %v674_v3 = vld [vmem:[%s825_s3 + $0x10] sm:$0xff] (!%p188_p2)  }
   0x6   : > { %191 = sbr.rel (%p188_p2) target bundleno = 261 (0x105), region = 40  ;;  %622 = vmatprep.subr.bf16.mxu0 (!%p188_p2), %v688_v1  ;;  %642 = vmatprep.subr.bf16.mxu1 (!%p188_p2), %v688_v1  ;;  %v675_v4 = vld [vmem:[%s825_s3 + $0x18] sm:$0xff] (!%p188_p2)   ;;  %v580_v7 = vld [vmem:[%s823_s1] ss:$0 sm:$0xff] (!%p188_p2)  ;;  %v581_v8 = vld [vmem:[%s823_s1 + $0x1] ss:$0 sm:$0xff] (!%p188_p2) }
   0x7   : > { %623 = vmatpush3.bf16.msra.mxu0 (!%p188_p2), %v672_v0  ;;  %643 = vmatpush3.bf16.msra.mxu1 (!%p188_p2), %v672_v0  ;;  %v582_v9 = vld [vmem:[%s823_s1 + $0x2] ss:$0 sm:$0xff] (!%p188_p2)  ;;  %v583_v13 = vld [vmem:[%s823_s1 + $0x3] ss:$0 sm:$0xff] (!%p188_p2)  ;;  %v584_v14 = vld [vmem:[%s823_s1 + $0x4] ss:$0 sm:$0xff] (!%p188_p2) }
   0x8   : > { %624 = vmatprep.subr.bf16.mxu0 (!%p188_p2), %v688_v1  ;;  %644 = vmatprep.subr.bf16.mxu1 (!%p188_p2), %v688_v1  ;;  %v585_v15 = vld [vmem:[%s823_s1 + $0x5] ss:$0 sm:$0xff] (!%p188_p2)  ;;  %v587_v25 = vld [vmem:[%s823_s1 + $0x7] ss:$0 sm:$0xff] (!%p188_p2)  ;;  %v588_v30 = vld [vmem:[%s823_s1 + $0x8] ss:$0 sm:$0xff] (!%p188_p2) }
   0x9   : > { %638 = vmatprep.mubr.msk.bf16.mxu0 (!%p188_p2), %vm689_vm0, %v688_v1  ;;  %658 = vmatprep.mubr.msk.bf16.mxu1 (!%p188_p2), %vm689_vm0, %v688_v1  ;;  %v676_v23 = vld [vmem:[%s825_s3 + $0x20] sm:$0xff] (!%p188_p2)   ;;  %v677_v37 = vld [vmem:[%s825_s3 + $0x28] sm:$0xff] (!%p188_p2)   ;;  %v678_v49 = vld [vmem:[%s825_s3 + $0x30] sm:$0xff] (!%p188_p2)  }
   0xa   : > { %v586_v34 = vld [vmem:[%s823_s1 + $0x6] ss:$0 sm:$0xff] (!%p188_p2)  ;;  %v679_v59 = vld [vmem:[%s825_s3 + $0x38] sm:$0xff] (!%p188_p2)   ;;  %v589_v63 = vld [vmem:[%s824_s2] ss:$0 sm:$0xff] (!%p188_p2) }
   0xb   : > { %625 = vmatpush3.bf16.msra.mxu0 (!%p188_p2), %v673_v2  ;;  %645 = vmatpush3.bf16.msra.mxu1 (!%p188_p2), %v673_v2 }
   0xc   : > { %626 = vmatprep.subr.bf16.mxu0 (!%p188_p2), %v688_v1  ;;  %646 = vmatprep.subr.bf16.mxu1 (!%p188_p2), %v688_v1 }
   0xd   : > { %s829_s19 = smov (!%p215_p3, %s571_s19), 1 }
   0xe   : > { %s602_s26 = sshll.u32 %s829_s19, 4  ;;  %s603_s14 = sshll.u32 %s829_s19, 2 }
   0xf   : > { %s751_s29 = scalar_lea.vmem %s822_s0, %s602_s26  ;;  %627 = vmatpush3.bf16.msra.mxu0 %v674_v3  ;;  %647 = vmatpush3.bf16.msra.mxu1 %v674_v3  ;;  %s224_s17 = scalar_lea.vmem %s827_s5, %s603_s14 }
  0x10   : > { %v226_v5 = vld [vmem:[%s751_s29] sm:$0xf]  ;;  %v227_v6 = vld [vmem:[%s751_s29 + $0x4] sm:$0xf]  ;;  %628 = vmatprep.subr.bf16.mxu0 %v688_v1  ;;  %648 = vmatprep.subr.bf16.mxu1 %v688_v1  ;;  %v228_v19 = vld [vmem:[%s751_s29 + $0x8] sm:$0xf] }
  0x11   : > { %v235_v10 = vmul.f32 %v580_v7, %v226_v5  ;;  %v244_v11 = vmul.f32 %v581_v8, %v226_v5  ;;  %v259_v12 = vmul.f32 %v582_v9, %v226_v5  ;;  %v283_v16 = vmul.f32 %v584_v14, %v227_v6  ;;  %v229_v43 = vld [vmem:[%s751_s29 + $0xc] sm:$0xf] }
  0x12   : > { %v274_v20 = vmul.f32 %v583_v13, %v227_v6  ;;  %v298_v21 = vmul.f32 %v585_v15, %v227_v6  ;;  %v236_v22 = vmul.f32 %v580_v7, %v227_v6  ;;  %v245_v26 = vmul.f32 %v581_v8, %v227_v6 }
  0x13   : > { %v248_v17 = vrot.slane %v244_v11, 1  ;;  %v263_v18 = vrot.slane %v259_v12, 2  ;;  %629 = vmatpush3.bf16.msra.mxu0 %v675_v4  ;;  %649 = vmatpush3.bf16.msra.mxu1 %v675_v4  ;;  %v260_v27 = vmul.f32 %v582_v9, %v227_v6  ;;  %v287_v28 = vrot.slane %v283_v16, 1 }
  0x14   : > { %630 = vmatprep.subr.bf16.mxu0 %v688_v1  ;;  %650 = vmatprep.subr.bf16.mxu1 %v688_v1  ;;  %v249_v31 = vrot.slane %v245_v26, 1  ;;  %v284_v33 = vmul.f32 %v584_v14, %v228_v19  ;;  %v322_v35 = vmul.f32 %v587_v25, %v228_v19  ;;  %v275_v36 = vmul.f32 %v583_v13, %v228_v19 }
  0x15   : > { %v252_v24 = vadd.f32 %v248_v17, %v235_v10  ;;  %v264_v32 = vrot.slane %v260_v27, 2  ;;  %v302_v39 = vrot.slane %v298_v21, 2  ;;  %v299_v41 = vmul.f32 %v585_v15, %v228_v19 }
  0x16   : > { %v253_v40 = vadd.f32 %v249_v31, %v236_v22  ;;  %v337_v42 = vmul.f32 %v588_v30, %v228_v19  ;;  %v313_v45 = vmul.f32 %v586_v34, %v228_v19  ;;  %v288_v47 = vrot.slane %v284_v33, 1 }
  0x17   : > { %v267_v29 = vadd.f32 %v263_v18, %v252_v24  ;;  %631 = vmatpush3.bf16.msra.mxu0 %v676_v23  ;;  %651 = vmatpush3.bf16.msra.mxu1 %v676_v23  ;;  %v326_v48 = vrot.slane %v322_v35, 1  ;;  %v303_v52 = vrot.slane %v299_v41, 2  ;;  %v323_v53 = vmul.f32 %v587_v25, %v229_v43 }
  0x18   : > { %632 = vmatprep.subr.bf16.mxu0 %v688_v1  ;;  %652 = vmatprep.subr.bf16.mxu1 %v688_v1  ;;  %v268_v46 = vadd.f32 %v264_v32, %v253_v40  ;;  %v341_v54 = vrot.slane %v337_v42, 2  ;;  %v314_v57 = vmul.f32 %v586_v34, %v229_v43  ;;  %v338_v58 = vmul.f32 %v588_v30, %v229_v43 }
  0x19   : > { %v276_v38 = vadd.f32 %v274_v20, %v267_v29  ;;  %v327_v62 = vrot.slane %v323_v53, 1 }
  0x1a   : > { %v277_v51 = vadd.f32 %v275_v36, %v268_v46  ;;  %v342_v3 = vrot.slane %v338_v58, 2 }
  0x1b   : > { %v291_v44 = vadd.f32 %v287_v28, %v276_v38  ;;  %633 = vmatpush3.bf16.msra.mxu0 %v677_v37  ;;  %653 = vmatpush3.bf16.msra.mxu1 %v677_v37 }
  0x1c   : > { %634 = vmatprep.subr.bf16.mxu0 %v688_v1  ;;  %654 = vmatprep.subr.bf16.mxu1 %v688_v1  ;;  %v292_v56 = vadd.f32 %v288_v47, %v277_v51 }
  0x1d   : > { %v306_v50 = vadd.f32 %v302_v39, %v291_v44 }
  0x1e   : > { %v307_v61 = vadd.f32 %v303_v52, %v292_v56 }
  0x1f   : > { %v315_v55 = vadd.f32 %v313_v45, %v306_v50  ;;  %635 = vmatpush3.bf16.msra.mxu0 %v678_v49  ;;  %655 = vmatpush3.bf16.msra.mxu1 %v678_v49 }
  0x20   : > { %636 = vmatprep.subr.bf16.mxu0 %v688_v1  ;;  %656 = vmatprep.subr.bf16.mxu1 %v688_v1  ;;  %v316_v2 = vadd.f32 %v314_v57, %v307_v61  ;;  %v590_v1 = vld [vmem:[%s826_s4] ss:$0 sm:$0xff] }
  0x21   : > { %v330_v60 = vadd.f32 %v326_v48, %v315_v55 }
  0x22   : > { %v331_v5 = vadd.f32 %v327_v62, %v316_v2 }
  0x23   : > { %v345_v0 = vadd.f32 %v341_v54, %v330_v60  ;;  %637 = vmatpush3.bf16.msra.mxu0 %v679_v59  ;;  %657 = vmatpush3.bf16.msra.mxu1 %v679_v59 }
  0x24   : > { %v346_v7 = vadd.f32 %v342_v3, %v331_v5 }
  0x25   : > { %v354_v4 = vadd.f32 %v589_v63, %v345_v0 }
  0x26   : > { %v355_v9 = vadd.f32 %v589_v63, %v346_v7 }
  0x27   : > { %v356_v6 = vmax.f32 %v354_v4, 0.0 }
  0x28   : > { %v357_v10 = vmax.f32 %v355_v9, 0.0 }
  0x29   : > { %v375_v8 = vpack.c.bf16 %v356_v6, %v356_v6 }
  0x2a   : > { %v472_v11 = vpack.c.bf16 %v357_v10, %v357_v10 }
  0x2b   : > { %639 = vmatmul.mubr.bf16.vlgmr.msra.gmra.mrb[0].mxu0 %v375_v8 }
  0x2c   : > { %659 = vmatmul.mubr.bf16.vlgmr.msra.gmra.mrb[0].mxu1 %v472_v11 }
  0xfe   : > { %v464_v12 = vpop.f32.mrb[0].mxu0 }
  0xff   : > { %v465_v13 = vadd.f32 %v590_v1, %v464_v12  ;;  %v640_v14 = vpop.f32.mrb[1].mxu0  ;;  %v507_v18 = vpop.f32.mrb[0].mxu1 }
 0x100   : > { %v467_v15 = vpop.f32.mrb[2].mxu0  ;;  %v508_v19 = vadd.f32 %v590_v1, %v507_v18  ;;  %v660_v20 = vpop.f32.mrb[1].mxu1 }
 0x101   : > { %v470_v16 = vmax.f32 %v465_v13, 0.0  ;;  %v641_v17 = vpop.f32.mrb[3].mxu0  ;;  %v510_v21 = vpop.f32.mrb[2].mxu1 }
 0x102   : > { %v513_v22 = vmax.f32 %v508_v19, 0.0  ;;  %v661_v23 = vpop.f32.mrb[3].mxu1 }
 0x103   : > { %471 = vst [vmem:[%s224_s17] sm:$0x3] %v470_v16 }
 0x104   : > { %599 = vst [vmem:[%s224_s17 + $0x2] sm:$0x3] %v513_v22 }
 0x105 PF: > { %s15_s18 = sadd.s32 1, %s686_s18  }
 0x106   : > { %p12_p4 = scmp.ge.s32.totalorder %s15_s18, 4  }
 0x108   :  { %14 = sbr.rel (!%p12_p4) target bundleno = 1 (0x1), region = 71 }

// kernel: mobilenet_v1_forward.27
= control target key start
LH: loop header
LB: loop body
LE: loop exit
PB: predicated region body
PF: predicated region fallthrough
CT: control target
= control target key end

     0   :  { %s724_s18 = smov 0   ;;  %s726_s19 = smov 0   ;;  %s867_s0 = inlined_call_operand.vmem [shape: f32[4,2,2,2,128], index: 0, kind: input, shape index: {}]   ;;  %s868_s1 = inlined_call_operand.vmem [shape: f32[9,128], index: 1, kind: input, shape index: {}]   ;;  %s869_s2 = inlined_call_operand.vmem [shape: f32[1,128], index: 2, kind: input, shape index: {}]   ;;  %s870_s3 = inlined_call_operand.vmem [shape: bf16[128,256], index: 3, kind: input, shape index: {}]   ;;  %s871_s4 = inlined_call_operand.vmem [shape: f32[1,256], index: 4, kind: input, shape index: {}]   ;;  %s872_s5 = inlined_call_operand.vmem [shape: f32[2,1,1,256], index: 5, kind: output, shape index: {}]  }
   0x1   :  { %s728_s20 = smov 0  }
   0x2 LB: > { %s585_s21 = sadd.s32 4294967295, %s690_s20   ;;  %s741_s22 = sadd.s32 1, %s690_s20   ;;  %s690_s20 = sphi %s728_s20, %s875_s20   ;;  %s686_s19 = sphi %s726_s19, %s874_s19   ;;  %s682_s18 = sphi %s724_s18, %s873_s18  }
   0x3   : > { %s19_s23 = ssub.s32 %s690_s20, %s741_s22  ;;  %s22_s24 = sadd.s32 1, %s686_s19 }
   0x4   : > { %p20_p0 = scmp.eq.s32.totalorder %s19_s23, 0  ;;  %p29_p1 = scmp.ne.s32.totalorder %s686_s19, %s682_s18 }
   0x5   : > { %p30_p2 = scmp.eq.s32.totalorder %s690_s20, 0  ;;  %p588_p4 = scmp.ge.s32.totalorder %s690_s20, 2 }
   0x6   : > { %s750_s25 = scalar_select %p20_p0, %s686_s19, %s22_s24  }
   0x7   : > { %p31_p3 = por %p30_p2, %p29_p1  ;;  %177 = sbr.rel (%p588_p4) target bundleno = 21 (0x15), region = 32 }
   0xe   : > { %180 = sbr.rel (!%p31_p3) target bundleno = 21 (0x15), region = 36  ;;  %s182_s26 = sand.u32 (%p31_p3), 1, %s686_s19  }
   0xf   : > { %s617_s27 = sshll.u32 (%p31_p3), %s690_s20, 2  ;;  %s589_s28 = sshll.u32 (%p31_p3), %s182_s26, 4 }
  0x10   : > { %s187_s6 = scalar_lea.vmem (%p31_p3), %s867_s0, %s617_s27  ;;  %s184_s7 = scalar_lea.vmem (%p31_p3), [#allocation2], %s589_s28 }
  0x11   : > { %v203_v0 = vld [vmem:[%s187_s6] sm:$0xf] (%p31_p3)   ;;  %v207_v1 = vld [vmem:[%s187_s6 + $0x8] sm:$0xf] (%p31_p3)   ;;  %v211_v2 = vld [vmem:[%s187_s6 + $0x10] sm:$0xf] (%p31_p3)  }
  0x12   : > { %204 = vst [vmem:[%s184_s7] sm:$0xf] (%p31_p3), %v203_v0   ;;  %208 = vst [vmem:[%s184_s7 + $0x4] sm:$0xf] (%p31_p3), %v207_v1   ;;  %v215_v3 = vld [vmem:[%s187_s6 + $0x18] sm:$0xf] (%p31_p3)  }
  0x13   : > { %212 = vst [vmem:[%s184_s7 + $0x8] sm:$0xf] (%p31_p3), %v211_v2   ;;  %216 = vst [vmem:[%s184_s7 + $0xc] sm:$0xf] (%p31_p3), %v215_v3  }
  0x15 PF: > { %p592_p5 = scmp.ge.s32.totalorder %s690_s20, 1  ;;  %p256_p6 = scmp.lt.s32.totalorder %s690_s20, 3 }
  0x17   : > { %p257_p7 = pnand %p592_p5, %p256_p6 }
  0x18   : > { %v644_v4 = vld [vmem:[%s870_s3 + $0x4] ss:$8 sps:$4 sm:$0xff] (!%p257_p7)   ;;  %v646_v5 = vld [vmem:[%s870_s3] ss:$8 sps:$4 sm:$0xff] (!%p257_p7)   ;;  %v692_v6 = vmov (!%p257_p7), 0   ;;  %s263_s12 = sand.u32 (!%p257_p7), 1, %s682_s18   ;;  %v450_v63 = vlaneseq (!%p257_p7) }
  0x19   : > { %260 = sbr.rel (%p257_p7) target bundleno = 281 (0x119), region = 77  ;;  %492 = vmatprep.mubr.bf16.mxu0 (!%p257_p7), %v692_v6  ;;  %460 = vmatprep.subr.bf16.mxu0 (!%p257_p7), %v644_v4  ;;  %v647_v7 = vld [vmem:[%s870_s3 + $0x14] ss:$8 sps:$4 sm:$0xff] (!%p257_p7)   ;;  %v649_v8 = vld [vmem:[%s870_s3 + $0x10] ss:$8 sps:$4 sm:$0xff] (!%p257_p7)   ;;  %s593_s24 = sshll.u32 (!%p257_p7), %s263_s12, 4 }
  0x1a   : > { %461 = vmatpush1.bf16.msra.mxu0 (!%p257_p7), %v646_v5  ;;  %v650_v9 = vld [vmem:[%s870_s3 + $0x24] ss:$8 sps:$4 sm:$0xff] (!%p257_p7)   ;;  %v652_v10 = vld [vmem:[%s870_s3 + $0x20] ss:$8 sps:$4 sm:$0xff] (!%p257_p7)   ;;  %v653_v11 = vld [vmem:[%s870_s3 + $0x34] ss:$8 sps:$4 sm:$0xff] (!%p257_p7)  }
  0x1b   : > { %462 = vmatprep.subr.bf16.mxu0 (!%p257_p7), %v647_v7  ;;  %s782_s29 = scalar_lea.vmem (!%p257_p7), [#allocation2], %s593_s24  ;;  %v655_v13 = vld [vmem:[%s870_s3 + $0x30] ss:$8 sps:$4 sm:$0xff] (!%p257_p7)   ;;  %v656_v15 = vld [vmem:[%s870_s3 + $0x44] ss:$8 sps:$4 sm:$0xff] (!%p257_p7)   ;;  %v451_v0 = vshrl.u32 (!%p257_p7), %v450_v63, 7 }
  0x1c   : > { %v294_v12 = vld [vmem:[%s782_s29] sm:$0x3] (!%p257_p7)  ;;  %v595_v14 = vld [vmem:[%s782_s29 + $0x4] sm:$0x3] (!%p257_p7)  ;;  %v309_v19 = vld [vmem:[%s868_s1 + $0x2] sm:$0x1] (!%p257_p7) }
  0x1d   : > { %v303_v16 = vld [vmem:[%s868_s1] sm:$0x1] (!%p257_p7)  ;;  %v306_v18 = vld [vmem:[%s868_s1 + $0x1] sm:$0x1] (!%p257_p7)  ;;  %v311_v22 = vrot.slane (!%p257_p7), %v309_v19, 7  ;;  %v452_v1 = vsub.s32 (!%p257_p7), 0, %v451_v0 }
  0x1e   : > { %463 = vmatpush1.bf16.msra.mxu0 (!%p257_p7), %v649_v8  ;;  %v304_v17 = vmul.f32 (!%p257_p7), %v303_v16, %v294_v12  ;;  %v658_v20 = vld [vmem:[%s870_s3 + $0x40] ss:$8 sps:$4 sm:$0xff] (!%p257_p7)   ;;  %v307_v21 = vmul.f32 (!%p257_p7), %v595_v14, %v306_v18  ;;  %v324_v23 = vld [vmem:[%s868_s1 + $0x5] sm:$0x1] (!%p257_p7)  ;;  %v659_v27 = vld [vmem:[%s870_s3 + $0x54] ss:$8 sps:$4 sm:$0xff] (!%p257_p7)  }
  0x1f   : > { %464 = vmatprep.subr.bf16.mxu0 (!%p257_p7), %v650_v9  ;;  %v597_v24 = vld [vmem:[%s782_s29 + $0x8] sm:$0x3] (!%p257_p7)  ;;  %v318_v25 = vld [vmem:[%s868_s1 + $0x3] sm:$0x1] (!%p257_p7)  ;;  %v326_v26 = vrot.slane (!%p257_p7), %v324_v23, 7  ;;  %v313_v29 = vmul.f32 (!%p257_p7), %v311_v22, %v294_v12  ;;  %v456_v3 = vsub.s32 (!%p257_p7), 1, %v451_v0 }
  0x20   : > { %v308_v28 = vadd.f32 %v307_v21, %v304_v17  ;;  %v598_v30 = vld [vmem:[%s782_s29 + $0xc] sm:$0x3]  ;;  %v321_v31 = vld [vmem:[%s868_s1 + $0x4] sm:$0x1]  ;;  %v339_v32 = vld [vmem:[%s868_s1 + $0x8] sm:$0x1]  ;;  %v319_v34 = vmul.f32 %v597_v24, %v318_v25 }
  0x21   : > { %v315_v33 = vrot.slane %v313_v29, 1  ;;  %v328_v35 = vmul.f32 %v597_v24, %v326_v26  ;;  %v661_v36 = vld [vmem:[%s870_s3 + $0x50] ss:$8 sps:$4 sm:$0xff]   ;;  %v662_v37 = vld [vmem:[%s870_s3 + $0x64] ss:$8 sps:$4 sm:$0xff]   ;;  %v322_v39 = vmul.f32 %v598_v30, %v321_v31  ;;  %v341_v40 = vrot.slane %v339_v32, 7 }
  0x22   : > { %465 = vmatpush1.bf16.msra.mxu0 %v652_v10  ;;  %v295_v41 = vld [vmem:[%s782_s29 + $0x2] sm:$0x3]  ;;  %v333_v42 = vld [vmem:[%s868_s1 + $0x6] sm:$0x1]  ;;  %v336_v47 = vld [vmem:[%s868_s1 + $0x7] sm:$0x1] }
  0x23   : > { %466 = vmatprep.subr.bf16.mxu0 %v653_v11  ;;  %v317_v38 = vadd.f32 %v315_v33, %v308_v28  ;;  %v330_v44 = vrot.slane %v328_v35, 1  ;;  %v664_v45 = vld [vmem:[%s870_s3 + $0x60] ss:$8 sps:$4 sm:$0xff]   ;;  %v596_v46 = vld [vmem:[%s782_s29 + $0x6] sm:$0x3]  ;;  %v334_v50 = vmul.f32 %v333_v42, %v295_v41  ;;  %v343_v51 = vmul.f32 %v341_v40, %v295_v41  ;;  %p289_p8 = scmp.lt.s32.totalorder %s585_s21, 1 }
  0x24   : > { %v665_v48 = vld [vmem:[%s870_s3 + $0x74] ss:$8 sps:$4 sm:$0xff]   ;;  %v337_v53 = vmul.f32 %v596_v46, %v336_v47  ;;  %v667_v54 = vld [vmem:[%s870_s3 + $0x70] ss:$8 sps:$4 sm:$0xff]   ;;  %v348_v58 = vld [vmem:[%s869_s2] sm:$0x1] }
  0x25   : > { %v320_v43 = vadd.f32 %v319_v34, %v317_v38  ;;  %v345_v56 = vrot.slane %v343_v51, 1  ;;  %v367_v2 = vld [vmem:[%s871_s4] sm:$0x3]  ;;  %v693_v4 = vmov 1966171168   ;;  %s877_s21 = smov (!%p289_p8, %s585_s21), 1 }
  0x26   : > { %467 = vmatpush1.bf16.msra.mxu0 %v655_v13  ;;  %v507_v5 = vunpack.c.l.s4 %v693_v4  ;;  %v453_v6 = vrot.slane %v367_v2, %v452_v1  ;;  %v457_v7 = vrot.slane %v367_v2, %v456_v3  ;;  %s594_s6 = sshll.u32 %s877_s21, 1  ;;  %vm523_vm0 = vcmp.lt.s32.totalorder %v450_v63, 256 }
  0x27   : > { %468 = vmatprep.subr.bf16.mxu0 %v656_v15  ;;  %v323_v49 = vadd.f32 %v322_v39, %v320_v43  ;;  %s292_s9 = scalar_lea.vmem %s872_s5, %s594_s6 }
  0x28   : > { %v508_v9 = vunpack.c.0.s8 %v507_v5 }
  0x29   : > { %v332_v52 = vadd.f32 %v330_v44, %v323_v49 }
  0x2a   : > { %469 = vmatpush1.bf16.msra.mxu0 %v658_v20  ;;  %v511_v17 = vsub.s32 %v508_v9, %v451_v0 }
  0x2b   : > { %470 = vmatprep.subr.bf16.mxu0 %v659_v27  ;;  %v335_v55 = vadd.f32 %v334_v50, %v332_v52 }
  0x2d   : > { %v338_v57 = vadd.f32 %v337_v53, %v335_v55 }
  0x2e   : > { %471 = vmatpush1.bf16.msra.mxu0 %v661_v36 }
  0x2f   : > { %472 = vmatprep.subr.bf16.mxu0 %v662_v37  ;;  %v347_v59 = vadd.f32 %v345_v56, %v338_v57 }
  0x31   : > { %v349_v60 = vadd.f32 %v348_v58, %v347_v59 }
  0x32   : > { %473 = vmatpush1.bf16.msra.mxu0 %v664_v45 }
  0x33   : > { %474 = vmatprep.subr.bf16.mxu0 %v665_v48  ;;  %v350_v61 = vmax.f32 %v349_v60, 0.0 }
  0x35   : > { %v368_v62 = vpack.c.bf16 %v350_v61, %v350_v61 }
  0x36   : > { %475 = vmatpush1.bf16.msra.mxu0 %v667_v54 }
  0x39   : > { %493 = vmatmul.mubr.bf16.vlgmr.msra.gmra.mrb[0].mxu0 %v368_v62 }
 0x10c   : > { %v494_v8 = vpop.f32.mrb[0].mxu0 }
 0x10d   : > { %v495_v10 = vadd.f32 %v494_v8, %v453_v6  ;;  %v496_v11 = vpop.f32.mrb[1].mxu0 }
 0x10e   : > { %v497_v12 = vadd.f32 %v496_v11, %v457_v7  ;;  %v498_v13 = vpop.f32.mrb[2].mxu0 }
 0x10f   : > { %v501_v14 = vmax.f32 %v495_v10, 0.0  ;;  %v499_v15 = vpop.f32.mrb[3].mxu0 }
 0x110   : > { %v502_v16 = vmax.f32 %v497_v12, 0.0 }
 0x112   : > { %v505_v18 = vcombine.low %v501_v14, %v502_v16 }
 0x114   : > { %v512_v19 = vrot.slane %v505_v18, %v511_v17 }
 0x116   : > { %v519_v20 = vrot.slane %v512_v19, %v511_v17 }
 0x118   : > { %525 = vst.msk [vmem:[%s292_s9] sm:$0x3] %vm523_vm0, %v519_v20 }
 0x119 PF: > { %p12_p9 = scmp.ge.s32.totalorder %s741_s22, 4   ;;  %s873_s18 = smov %s686_s19 }
 0x11a   : > { %s874_s19 = smov %s750_s25  ;;  %s875_s20 = smov %s741_s22 }
 0x11b   :  { %14 = sbr.rel (!%p12_p9) target bundleno = 2 (0x2), region = 119 }

// kernel: mobilenet_v1_forward.29
= control target key start
LH: loop header
LB: loop body
LE: loop exit
PB: predicated region body
PF: predicated region fallthrough
CT: control target
= control target key end

     0   :  { %v68_v9 = vlaneseq  ;;  %v314_v13 = vmov 1966171168   ;;  %s402_s0 = inlined_call_operand.vmem [shape: bf16[2,256], index: 0, kind: input, shape index: {}]   ;;  %s403_s1 = inlined_call_operand.vmem [shape: bf16[256,128], index: 1, kind: input, shape index: {}]   ;;  %s404_s2 = inlined_call_operand.vmem [shape: f32[1,128], index: 2, kind: input, shape index: {}]   ;;  %s405_s3 = inlined_call_operand.hbm [shape: f32[2,128], index: 3, kind: output, shape index: {}]  }
   0x1   :  { %v274_v0 = vld [vmem:[%s403_s1 + $0x40] sm:$0xff]   ;;  %v276_v2 = vld [vmem:[%s403_s1 + $0x48] sm:$0xff]   ;;  %v278_v4 = vld [vmem:[%s403_s1 + $0x50] sm:$0xff]   ;;  %v66_v14 = vunpack.c.l.s4 %v314_v13 }
   0x2   :  { %v275_v1 = vld [vmem:[%s403_s1] sm:$0xff]   ;;  %250 = vmatprep.subr.bf16.mxu0 %v274_v0  ;;  %v277_v3 = vld [vmem:[%s403_s1 + $0x8] sm:$0xff]   ;;  %v279_v5 = vld [vmem:[%s403_s1 + $0x10] sm:$0xff]   ;;  %v69_v15 = vshrl.u32 %v68_v9, 7 }
   0x3   :  { %251 = vmatpush3.bf16.msra.mxu0 %v275_v1  ;;  %v280_v6 = vld [vmem:[%s403_s1 + $0x58] sm:$0xff]   ;;  %v282_v8 = vld [vmem:[%s403_s1 + $0x60] sm:$0xff]   ;;  %v284_v11 = vld [vmem:[%s403_s1 + $0x68] sm:$0xff]  }
   0x4   :  { %252 = vmatprep.subr.bf16.mxu0 %v276_v2  ;;  %v281_v7 = vld [vmem:[%s403_s1 + $0x18] sm:$0xff]   ;;  %v283_v10 = vld [vmem:[%s403_s1 + $0x20] sm:$0xff]  }
   0x5   :  { %v233_v12 = vld.sshfl [vmem:[%s402_s0] sm:$0x11 pattern:$0x75316420] }
   0x7   :  { %253 = vmatpush3.bf16.msra.mxu0 %v277_v3 }
   0x8   :  { %254 = vmatprep.subr.bf16.mxu0 %v278_v4 }
   0xb   :  { %255 = vmatpush3.bf16.msra.mxu0 %v279_v5 }
   0xc   :  { %256 = vmatprep.subr.bf16.mxu0 %v280_v6 }
   0xf   :  { %257 = vmatpush3.bf16.msra.mxu0 %v281_v7 }
  0x10   :  { %258 = vmatprep.subr.bf16.mxu0 %v282_v8 }
  0x11   :  { %8 = vsyncpa [#allocation3], 0  ;;  %v285_v16 = vld [vmem:[%s403_s1 + $0x28] sm:$0xff]   ;;  %v64_v17 = vcombine.high %v233_v12, %v233_v12  ;;  %v67_v18 = vunpack.c.0.s8 %v66_v14  ;;  %v286_v19 = vld [vmem:[%s403_s1 + $0x70] sm:$0xff]   ;;  %s315_s20 = smov [#allocation2]  }
  0x12   :  { %v287_v21 = vld [vmem:[%s403_s1 + $0x30] sm:$0xff]   ;;  %v288_v23 = vld [vmem:[%s403_s1 + $0x78] sm:$0xff]   ;;  %v232_v28 = vld [vmem:[%s404_s2] ss:$0 sm:$0xff]  ;;  %s224_s21 = sshll.u32 %s315_s20, 4  ;;  %s225_s21 = int_to_ptr.vmem [resolvable:$true] %s224_s21 }
  0x13   :  { %259 = vmatpush3.bf16.msra.mxu0 %v283_v10  ;;  %v70_v20 = vsub.s32 %v67_v18, %v69_v15  ;;  %v289_v24 = vld [vmem:[%s403_s1 + $0x38] sm:$0xff]   ;;  %s290_s22 = scalar_lea.vmem %s225_s21, 32  ;;  %p295_p1 = scmp.lt.s32.totalorder %s225_s21, %s225_s21 }
  0x14   :  { %260 = vmatprep.subr.bf16.mxu0 %v284_v11  ;;  %p291_p0 = scmp.ne.s32.totalorder %s225_s21, %s290_s22  ;;  %p296_p2 = scmp.lt.s32.totalorder %s290_s22, %s290_s22 }
  0x15   :  { %v78_v22 = vrot.slane %v64_v17, %v70_v20  ;;  %v71_v25 = vrot.slane %v233_v12, %v70_v20 }
  0x16   :  { %p297_p3 = por %p296_p2, %p295_p1 }
  0x17   :  { %261 = vmatpush3.bf16.msra.mxu0 %v285_v16  ;;  %209 = vmatprep.mubr.bf16.mxu0 %v78_v22 }
  0x18   :  { %262 = vmatprep.subr.bf16.mxu0 %v286_v19  ;;  %p298_p4 = pnand %p297_p3, %p291_p0 }
  0x1b   :  { %263 = vmatpush3.bf16.msra.mxu0 %v287_v21 }
  0x1c   :  { %264 = vmatprep.subr.bf16.mxu0 %v288_v23 }
  0x1f   :  { %265 = vmatpush3.bf16.msra.mxu0 %v289_v24 }
  0x22   :  { %210 = vmatmul.mubr.bf16.vlgmr.msra.gmra.mrb[0].mxu0 %v71_v25 }
  0xf5   :  { %v266_v26 = vpop.f32.mrb[0].mxu0 }
  0xf6   :  { %v267_v27 = vpop.f32.mrb[1].mxu0 }
  0xf7   :  { %v268_v29 = vadd.f32 %v267_v27, %v266_v26  ;;  %v269_v30 = vpop.f32.mrb[2].mxu0 }
  0xf8   :  { %v270_v31 = vpop.f32.mrb[3].mxu0 }
  0xf9   :  { %v212_v32 = vadd.f32 %v268_v29, %v232_v28 }
  0xfb   :  { %217 = vst [vmem:[#allocation2] sm:$0x3] %v212_v32 }
  0xfc   :  { %301 = shalt.err (!%p298_p4)
}
  0xfd   :  { %s302_s24 = scalar_lea.hbm %s405_s3, 32 }
  0xfe   :  { %p303_p5 = scmp.ne.s32.totalorder %s405_s3, %s302_s24  ;;  %p306_p6 = scmp.lt.u32.totalorder %s302_s24, %s405_s3 }
 0x100   :  { %p308_p7 = pnand %p306_p6, %p303_p5 }
 0x102   :  { %311 = shalt.err (!%p308_p7)
}
 0x103   :  { %227 = dma.vmem_to_hbm [thread:$0]  %s225_s21, 32, %s405_s3, [#allocation3]  }
 0x104   :  { %312 = dma.done.wait [#allocation3], 32  }
 0x105   :  { %313 = vsyncadd [#allocation3], 4294967264 }
 0x106   :  { %231 = vsyncpa [#allocation3], 1 }

// kernel: mobilenet_v1_forward.28
= control target key start
LH: loop header
LB: loop body
LE: loop exit
PB: predicated region body
PF: predicated region fallthrough
CT: control target
= control target key end

     0   :  { %s974_s18 = smov 0   ;;  %s976_s19 = smov 0   ;;  %s1186_s0 = inlined_call_operand.vmem [shape: f32[4,2,2,2,256], index: 0, kind: input, shape index: {}]   ;;  %s1187_s1 = inlined_call_operand.vmem [shape: f32[9,256], index: 1, kind: input, shape index: {}]   ;;  %s1188_s2 = inlined_call_operand.vmem [shape: f32[1,256], index: 2, kind: input, shape index: {}]   ;;  %s1189_s3 = inlined_call_operand.vmem [shape: bf16[256,256], index: 3, kind: input, shape index: {}]   ;;  %s1190_s4 = inlined_call_operand.vmem [shape: f32[1,256], index: 4, kind: input, shape index: {}]   ;;  %s1191_s5 = inlined_call_operand.vmem [shape: f32[2,1,1,256], index: 5, kind: output, shape index: {}]  }
   0x1   :  { %s978_s20 = smov 0  }
   0x2 LB: > { %s784_s21 = sadd.s32 4294967295, %s940_s20   ;;  %s991_s22 = sadd.s32 1, %s940_s20   ;;  %s940_s20 = sphi %s978_s20, %s1194_s20   ;;  %s936_s19 = sphi %s976_s19, %s1193_s19   ;;  %s932_s18 = sphi %s974_s18, %s1192_s18  }
   0x3   : > { %s19_s23 = ssub.s32 %s940_s20, %s991_s22  ;;  %s22_s24 = sadd.s32 1, %s936_s19 }
   0x4   : > { %p20_p0 = scmp.eq.s32.totalorder %s19_s23, 0  ;;  %p29_p1 = scmp.ne.s32.totalorder %s936_s19, %s932_s18 }
   0x5   : > { %p30_p2 = scmp.eq.s32.totalorder %s940_s20, 0  ;;  %p787_p4 = scmp.ge.s32.totalorder %s940_s20, 2 }
   0x6   : > { %s1000_s25 = scalar_select %p20_p0, %s936_s19, %s22_s24  }
   0x7   : > { %p31_p3 = por %p30_p2, %p29_p1  ;;  %177 = sbr.rel (%p787_p4) target bundleno = 21 (0x15), region = 32 }
   0xe   : > { %180 = sbr.rel (!%p31_p3) target bundleno = 21 (0x15), region = 36  ;;  %s182_s26 = sand.u32 (%p31_p3), 1, %s936_s19  }
   0xf   : > { %s843_s27 = sshll.u32 (%p31_p3), %s940_s20, 3  ;;  %s788_s28 = sshll.u32 (%p31_p3), %s182_s26, 5 }
  0x10   : > { %s187_s6 = scalar_lea.vmem (%p31_p3), %s1186_s0, %s843_s27  ;;  %s184_s7 = scalar_lea.vmem (%p31_p3), [#allocation2], %s788_s28 }
  0x11   : > { %v203_v0 = vld [vmem:[%s187_s6] sm:$0xff] (%p31_p3)   ;;  %v207_v1 = vld [vmem:[%s187_s6 + $0x10] sm:$0xff] (%p31_p3)  }
  0x12   : > { %v211_v2 = vld [vmem:[%s187_s6 + $0x20] sm:$0xff] (%p31_p3)   ;;  %204 = vst [vmem:[%s184_s7] sm:$0xff] (%p31_p3), %v203_v0   ;;  %208 = vst [vmem:[%s184_s7 + $0x8] sm:$0xff] (%p31_p3), %v207_v1   ;;  %v215_v3 = vld [vmem:[%s187_s6 + $0x30] sm:$0xff] (%p31_p3)  }
  0x13   : > { %212 = vst [vmem:[%s184_s7 + $0x10] sm:$0xff] (%p31_p3), %v211_v2   ;;  %216 = vst [vmem:[%s184_s7 + $0x18] sm:$0xff] (%p31_p3), %v215_v3  }
  0x15 PF: > { %p791_p5 = scmp.ge.s32.totalorder %s940_s20, 1  ;;  %p256_p6 = scmp.lt.s32.totalorder %s940_s20, 3 }
  0x17   : > { %p257_p7 = pnand %p791_p5, %p256_p6 }
  0x18   : > { %v870_v4 = vld [vmem:[%s1189_s3 + $0x4] ss:$8 sps:$4 sm:$0xff] (!%p257_p7)   ;;  %v872_v5 = vld [vmem:[%s1189_s3] ss:$8 sps:$4 sm:$0xff] (!%p257_p7)   ;;  %v873_v6 = vld [vmem:[%s1189_s3 + $0x14] ss:$8 sps:$4 sm:$0xff] (!%p257_p7)   ;;  %v307_v15 = vlaneseq (!%p257_p7) }
  0x19   : > { %260 = sbr.rel (%p257_p7) target bundleno = 313 (0x139), region = 77  ;;  %659 = vmatprep.subr.bf16.mxu0 (!%p257_p7), %v870_v4  ;;  %v875_v7 = vld [vmem:[%s1189_s3 + $0x10] ss:$8 sps:$4 sm:$0xff] (!%p257_p7)   ;;  %v876_v8 = vld [vmem:[%s1189_s3 + $0x24] ss:$8 sps:$4 sm:$0xff] (!%p257_p7)   ;;  %s263_s7 = sand.u32 (!%p257_p7), 1, %s932_s18  }
  0x1a   : > { %660 = vmatpush1.bf16.msra.mxu0 (!%p257_p7), %v872_v5  ;;  %v878_v9 = vld [vmem:[%s1189_s3 + $0x20] ss:$8 sps:$4 sm:$0xff] (!%p257_p7)   ;;  %v879_v10 = vld [vmem:[%s1189_s3 + $0x34] ss:$8 sps:$4 sm:$0xff] (!%p257_p7)   ;;  %v881_v11 = vld [vmem:[%s1189_s3 + $0x30] ss:$8 sps:$4 sm:$0xff] (!%p257_p7)  }
  0x1b   : > { %661 = vmatprep.subr.bf16.mxu0 (!%p257_p7), %v873_v6  ;;  %v882_v12 = vld [vmem:[%s1189_s3 + $0x44] ss:$8 sps:$4 sm:$0xff] (!%p257_p7)   ;;  %v942_v13 = vmov (!%p257_p7), 857870592   ;;  %v884_v16 = vld [vmem:[%s1189_s3 + $0x40] ss:$8 sps:$4 sm:$0xff] (!%p257_p7)  }
  0x1c   : > { %v305_v14 = vunpack.c.l.s4 (!%p257_p7), %v942_v13  ;;  %v885_v17 = vld [vmem:[%s1189_s3 + $0x54] ss:$8 sps:$4 sm:$0xff] (!%p257_p7)   ;;  %s792_s12 = sshll.u32 (!%p257_p7), %s263_s7, 5  ;;  %v1045_v19 = vshrl.u32 (!%p257_p7), %v307_v15, 7  ;;  %v887_v20 = vld [vmem:[%s1189_s3 + $0x50] ss:$8 sps:$4 sm:$0xff] (!%p257_p7)  }
  0x1d   : > { %v888_v21 = vld [vmem:[%s1189_s3 + $0x64] ss:$8 sps:$4 sm:$0xff] (!%p257_p7)   ;;  %v890_v23 = vld [vmem:[%s1189_s3 + $0x60] ss:$8 sps:$4 sm:$0xff] (!%p257_p7)   ;;  %v891_v24 = vld [vmem:[%s1189_s3 + $0x74] ss:$8 sps:$4 sm:$0xff] (!%p257_p7)  }
  0x1e   : > { %662 = vmatpush1.bf16.msra.mxu0 (!%p257_p7), %v875_v7  ;;  %v306_v18 = vunpack.c.0.s8 (!%p257_p7), %v305_v14  ;;  %s1062_s26 = scalar_lea.vmem (!%p257_p7), [#allocation2], %s792_s12  ;;  %v302_v27 = vld [vmem:[%s1187_s1] ss:$8 sm:$0x3] (!%p257_p7)  ;;  %v893_v39 = vld [vmem:[%s1189_s3 + $0x70] ss:$8 sps:$4 sm:$0xff] (!%p257_p7)  }
  0x1f   : > { %663 = vmatprep.subr.bf16.mxu0 (!%p257_p7), %v876_v8  ;;  %v293_v25 = vld [vmem:[%s1062_s26] sm:$0xf] (!%p257_p7)  ;;  %v794_v26 = vld [vmem:[%s1062_s26 + $0x8] sm:$0xf] (!%p257_p7)  ;;  %v796_v35 = vld [vmem:[%s1062_s26 + $0x10] sm:$0xf] (!%p257_p7) }
  0x20   : > { %v1054_v22 = vsub.s32 %v306_v18, %v1045_v19  ;;  %v798_v29 = vld [vmem:[%s1187_s1 + $0x1] ss:$8 sm:$0x3]  ;;  %v799_v30 = vld [vmem:[%s1187_s1 + $0x2] ss:$8 sm:$0x3] }
  0x21   : > { %v801_v33 = vld [vmem:[%s1187_s1 + $0x3] ss:$8 sm:$0x3]  ;;  %v802_v34 = vld [vmem:[%s1187_s1 + $0x4] ss:$8 sm:$0x3] }
  0x22   : > { %664 = vmatpush1.bf16.msra.mxu0 %v878_v9  ;;  %v310_v28 = vrot.slane %v302_v27, %v1054_v22  ;;  %v323_v31 = vrot.slane %v798_v29, %v1054_v22  ;;  %v336_v32 = vrot.slane %v799_v30, %v1054_v22  ;;  %v353_v37 = vrot.slane %v801_v33, %v1054_v22  ;;  %v803_v38 = vld [vmem:[%s1187_s1 + $0x5] ss:$8 sm:$0x3]  ;;  %v797_v41 = vld [vmem:[%s1062_s26 + $0x18] sm:$0xf]  ;;  %p289_p8 = scmp.lt.s32.totalorder %s784_s21, 1 }
  0x23   : > { %665 = vmatprep.subr.bf16.mxu0 %v879_v10  ;;  %v894_v40 = vld [vmem:[%s1189_s3 + $0x84] ss:$8 sps:$4 sm:$0xff]   ;;  %v366_v44 = vrot.slane %v802_v34, %v1054_v22  ;;  %v379_v45 = vrot.slane %v803_v38, %v1054_v22  ;;  %v807_v47 = vld [vmem:[%s1187_s1 + $0x10] ss:$8 sm:$0x3]  ;;  %vm722_vm0 = vcmp.lt.s32.totalorder %v307_v15, 256 }
  0x24   : > { %v312_v36 = vmul.f32 %v310_v28, %v293_v25  ;;  %v325_v42 = vmul.f32 %v794_v26, %v323_v31  ;;  %v338_v43 = vmul.f32 %v336_v32, %v293_v25  ;;  %v805_v46 = vld [vmem:[%s1187_s1 + $0x6] ss:$8 sm:$0x3]  ;;  %v355_v50 = vmul.f32 %v796_v35, %v353_v37  ;;  %v806_v52 = vld [vmem:[%s1187_s1 + $0x7] ss:$8 sm:$0x3] }
  0x25   : > { %v381_v51 = vmul.f32 %v796_v35, %v379_v45  ;;  %v896_v53 = vld [vmem:[%s1189_s3 + $0x80] ss:$8 sps:$4 sm:$0xff]   ;;  %v368_v55 = vmul.f32 %v797_v41, %v366_v44  ;;  %v396_v56 = vrot.slane %v805_v46, %v1054_v22  ;;  %v422_v57 = vrot.slane %v807_v47, %v1054_v22  ;;  %v897_v58 = vld [vmem:[%s1189_s3 + $0x94] ss:$8 sps:$4 sm:$0xff]   ;;  %v294_v59 = vld [vmem:[%s1062_s26 + $0x4] sm:$0xf] }
  0x26   : > { %666 = vmatpush1.bf16.msra.mxu0 %v881_v11  ;;  %v326_v48 = vadd.f32 %v325_v42, %v312_v36  ;;  %v800_v49 = vrot.slane %v338_v43, 9  ;;  %v409_v62 = vrot.slane %v806_v52, %v1054_v22  ;;  %v795_v63 = vld [vmem:[%s1062_s26 + $0xc] sm:$0xf]  ;;  %v899_v0 = vld [vmem:[%s1189_s3 + $0x90] ss:$8 sps:$4 sm:$0xff]   ;;  %v478_v28 = vsub.s32 0, %v1045_v19 }
  0x27   : > { %667 = vmatprep.subr.bf16.mxu0 %v882_v12  ;;  %v804_v61 = vrot.slane %v381_v51, 9  ;;  %v398_v2 = vmul.f32 %v396_v56, %v294_v59  ;;  %v424_v3 = vmul.f32 %v422_v57, %v294_v59  ;;  %v900_v4 = vld [vmem:[%s1189_s3 + $0xa4] ss:$8 sps:$4 sm:$0xff]   ;;  %v430_v7 = vld [vmem:[%s1188_s2] sm:$0x3]  ;;  %v655_v35 = vsub.s32 1, %v1045_v19 }
  0x28   : > { %v343_v54 = vadd.f32 %v800_v49, %v326_v48  ;;  %v411_v6 = vmul.f32 %v795_v63, %v409_v62  ;;  %v902_v8 = vld [vmem:[%s1189_s3 + $0xa0] ss:$8 sps:$4 sm:$0xff]   ;;  %v903_v11 = vld [vmem:[%s1189_s3 + $0xb4] ss:$8 sps:$4 sm:$0xff]   ;;  %v438_v13 = vrot.slane %v430_v7, %v1054_v22  ;;  %v905_v14 = vld [vmem:[%s1189_s3 + $0xb0] ss:$8 sps:$4 sm:$0xff]  }
  0x29   : > { %v808_v10 = vrot.slane %v424_v3, 9  ;;  %v911_v25 = vld [vmem:[%s1189_s3 + $0xd0] ss:$8 sps:$4 sm:$0xff]   ;;  %v912_v27 = vld [vmem:[%s1189_s3 + $0xe4] ss:$8 sps:$4 sm:$0xff]   ;;  %s1196_s21 = smov (!%p289_p8, %s784_s21), 1 }
  0x2a   : > { %668 = vmatpush1.bf16.msra.mxu0 %v884_v16  ;;  %v356_v60 = vadd.f32 %v355_v50, %v343_v54  ;;  %v914_v29 = vld [vmem:[%s1189_s3 + $0xe0] ss:$8 sps:$4 sm:$0xff]   ;;  %v915_v30 = vld [vmem:[%s1189_s3 + $0xf4] ss:$8 sps:$4 sm:$0xff]   ;;  %v917_v32 = vld [vmem:[%s1189_s3 + $0xf0] ss:$8 sps:$4 sm:$0xff]  }
  0x2b   : > { %669 = vmatprep.subr.bf16.mxu0 %v885_v17  ;;  %v906_v17 = vld [vmem:[%s1189_s3 + $0xc4] ss:$8 sps:$4 sm:$0xff]   ;;  %v474_v34 = vld [vmem:[%s1190_s4] sm:$0x3]  ;;  %v943_v36 = vmov 1966171168  }
  0x2c   : > { %v369_v1 = vadd.f32 %v368_v55, %v356_v60  ;;  %v706_v37 = vunpack.c.l.s4 %v943_v36  ;;  %v652_v38 = vrot.slane %v474_v34, %v478_v28  ;;  %s793_s17 = sshll.u32 %s1196_s21, 1 }
  0x2d   : > { %s292_s27 = scalar_lea.vmem %s1191_s5, %s793_s17 }
  0x2e   : > { %670 = vmatpush1.bf16.msra.mxu0 %v887_v20  ;;  %v386_v5 = vadd.f32 %v804_v61, %v369_v1  ;;  %v482_v20 = vsub.s32 2, %v1045_v19  ;;  %v707_v41 = vunpack.c.0.s8 %v706_v37 }
  0x2f   : > { %671 = vmatprep.subr.bf16.mxu0 %v888_v21  ;;  %v908_v21 = vld [vmem:[%s1189_s3 + $0xc0] ss:$8 sps:$4 sm:$0xff]  }
  0x30   : > { %v399_v9 = vadd.f32 %v398_v2, %v386_v5  ;;  %v710_v49 = vsub.s32 %v707_v41, %v1045_v19 }
  0x32   : > { %672 = vmatpush1.bf16.msra.mxu0 %v890_v23  ;;  %v412_v12 = vadd.f32 %v411_v6, %v399_v9  ;;  %v909_v23 = vld [vmem:[%s1189_s3 + $0xd4] ss:$8 sps:$4 sm:$0xff]  }
  0x33   : > { %673 = vmatprep.subr.bf16.mxu0 %v891_v24 }
  0x34   : > { %v429_v16 = vadd.f32 %v808_v10, %v412_v12 }
  0x36   : > { %674 = vmatpush1.bf16.msra.mxu0 %v893_v39  ;;  %v440_v18 = vadd.f32 %v438_v13, %v429_v16  ;;  %v656_v39 = vrot.slane %v474_v34, %v655_v35 }
  0x37   : > { %675 = vmatprep.subr.bf16.mxu0 %v894_v40 }
  0x38   : > { %v441_v22 = vmax.f32 %v440_v18, 0.0 }
  0x3a   : > { %676 = vmatpush1.bf16.msra.mxu0 %v896_v53  ;;  %v483_v24 = vrot.slane %v441_v22, %v482_v20  ;;  %v479_v31 = vrot.slane %v441_v22, %v478_v28 }
  0x3b   : > { %677 = vmatprep.subr.bf16.mxu0 %v897_v58 }
  0x3c   : > { %v487_v26 = vpack.c.bf16 %v483_v24, %v483_v24  ;;  %v486_v33 = vpack.c.bf16 %v479_v31, %v479_v31 }
  0x3e   : > { %678 = vmatpush1.bf16.msra.mxu0 %v899_v0  ;;  %691 = vmatprep.mubr.bf16.mxu0 %v487_v26 }
  0x3f   : > { %679 = vmatprep.subr.bf16.mxu0 %v900_v4 }
  0x42   : > { %680 = vmatpush1.bf16.msra.mxu0 %v902_v8 }
  0x43   : > { %681 = vmatprep.subr.bf16.mxu0 %v903_v11 }
  0x46   : > { %682 = vmatpush1.bf16.msra.mxu0 %v905_v14 }
  0x47   : > { %683 = vmatprep.subr.bf16.mxu0 %v906_v17 }
  0x4a   : > { %684 = vmatpush1.bf16.msra.mxu0 %v908_v21 }
  0x4b   : > { %685 = vmatprep.subr.bf16.mxu0 %v909_v23 }
  0x4e   : > { %686 = vmatpush1.bf16.msra.mxu0 %v911_v25 }
  0x4f   : > { %687 = vmatprep.subr.bf16.mxu0 %v912_v27 }
  0x52   : > { %688 = vmatpush1.bf16.msra.mxu0 %v914_v29 }
  0x53   : > { %689 = vmatprep.subr.bf16.mxu0 %v915_v30 }
  0x56   : > { %690 = vmatpush1.bf16.msra.mxu0 %v917_v32 }
  0x59   : > { %692 = vmatmul.mubr.bf16.vlgmr.msra.gmra.mrb[0].mxu0 %v486_v33 }
 0x12c   : > { %v693_v40 = vpop.f32.mrb[0].mxu0 }
 0x12d   : > { %v694_v42 = vadd.f32 %v693_v40, %v652_v38  ;;  %v695_v43 = vpop.f32.mrb[1].mxu0 }
 0x12e   : > { %v696_v44 = vadd.f32 %v695_v43, %v656_v39  ;;  %v697_v45 = vpop.f32.mrb[2].mxu0 }
 0x12f   : > { %v700_v46 = vmax.f32 %v694_v42, 0.0  ;;  %v698_v47 = vpop.f32.mrb[3].mxu0 }
 0x130   : > { %v701_v48 = vmax.f32 %v696_v44, 0.0 }
 0x132   : > { %v704_v50 = vcombine.low %v700_v46, %v701_v48 }
 0x134   : > { %v711_v51 = vrot.slane %v704_v50, %v710_v49 }
 0x136   : > { %v718_v52 = vrot.slane %v711_v51, %v710_v49 }
 0x138   : > { %724 = vst.msk [vmem:[%s292_s27] sm:$0x3] %vm722_vm0, %v718_v52 }
 0x139 PF: > { %p12_p9 = scmp.ge.s32.totalorder %s991_s22, 4   ;;  %s1192_s18 = smov %s936_s19 }
 0x13a   : > { %s1193_s19 = smov %s1000_s25  ;;  %s1194_s20 = smov %s991_s22 }
 0x13b   :  { %14 = sbr.rel (!%p12_p9) target bundleno = 2 (0x2), region = 127 }

</bundles_post_ra>
